<compile_context>
chip_gen: v5e
topology: v5e:2x2
jax: 0.10.0
libtpu: 0.0.40
codegen_flags: <defaults>
</compile_context>

<pallas_src>
import functools

import jax
import jax.numpy as jnp
from jax.experimental import pallas as pl


# ----------------------------- fused Pallas kernel ---------------------------

def _lstm_layer(x_parts, part_dims, wih_ref, whh_ref, b_ref, *,
                T, B, H, D, need_seq):
    """One (bi)directional LSTM layer, fully unrolled over time.

    x_parts: list of (T*B, dim_k) f32 arrays whose lane-concatenation is the
      time-major layer input; instead of concatenating, W_ih is split by rows.
    Returns (seq_parts, finals):
      seq_parts: [fwd (T*B,H), bwd (T*B,H)] in forward time order (or None)
      finals:    [h_final_fwd, h_final_bwd], each (B, H)
    """
    G = 4 * H

    # Hoisted input projection: all timesteps in one MXU matmul per part.
    xg = b_ref[...]                                            # (1, D*G)
    off = 0
    for xp, dsz in zip(x_parts, part_dims):
        xg = xg + jnp.dot(xp, wih_ref[off:off + dsz, :],
                          preferred_element_type=jnp.float32)
        off += dsz                                             # (T*B, D*G)

    whh = whh_ref[...]               # (D*H, D*G); block-diagonal when D == 2
    h = jnp.zeros((B, D * H), jnp.float32)
    c_state = [jnp.zeros((B, H), jnp.float32) for _ in range(D)]
    hs = [[] for _ in range(D)]
    h_parts = None

    for t in range(T):               # static, fully unrolled recurrence
        if D == 2:
            g_in = jnp.concatenate(
                [xg[t * B:(t + 1) * B, 0:G],                   # fwd reads x[t]
                 xg[(T - 1 - t) * B:(T - t) * B, G:2 * G]],    # bwd reads x[T-1-t]
                axis=-1)                                       # (B, 2G)
        else:
            g_in = xg[t * B:(t + 1) * B, :]                    # (B, G)
        gates = g_in + jnp.dot(h, whh, preferred_element_type=jnp.float32)

        h_parts, c_parts = [], []
        for d in range(D):
            gd = gates[:, d * G:(d + 1) * G]
            i = jax.nn.sigmoid(gd[:, 0 * H:1 * H])
            f = jax.nn.sigmoid(gd[:, 1 * H:2 * H])
            g = jnp.tanh(gd[:, 2 * H:3 * H])
            o = jax.nn.sigmoid(gd[:, 3 * H:4 * H])
            cd = f * c_state[d] + i * g
            hd = o * jnp.tanh(cd)
            h_parts.append(hd)
            c_parts.append(cd)
            if need_seq:
                hs[d].append(hd)
        c_state = c_parts
        h = h_parts[0] if D == 1 else jnp.concatenate(h_parts, axis=-1)

    finals = h_parts                 # both directions finish on the last step
    if not need_seq:
        return None, finals
    seq_parts = [jnp.concatenate(hs[0], axis=0)]               # (T*B, H)
    if D == 2:
        # backward outputs back into forward time order (index-based, no flip)
        seq_parts.append(jnp.concatenate(hs[1][::-1], axis=0))
    return seq_parts, finals


def _run_stack(x_flat, in_dim, layer_refs, *, T, B, H, D, L):
    parts, dims = [x_flat], [in_dim]
    finals_all = []
    for layer in range(L):
        wih_ref, whh_ref, b_ref = layer_refs[layer]
        seq_parts, finals = _lstm_layer(parts, dims, wih_ref, whh_ref, b_ref,
                                        T=T, B=B, H=H, D=D,
                                        need_seq=(layer < L - 1))
        finals_all.extend(finals)
        if layer < L - 1:
            parts, dims = seq_parts, [H] * D
    # PyTorch h_n.swapaxes(0, 1).reshape(B, -1): [l0_f | l0_b | l1_f | l1_b ...]
    return jnp.concatenate(finals_all, axis=-1)                # (B, L*D*H)


def _fuser_kernel(*refs, T, B, H, D, L, f1_dim, f2_dim, f1_only, n_mlp):
    idx = 0
    x1_ref = refs[idx]; idx += 1
    lstm1 = [tuple(refs[idx + 3 * l: idx + 3 * l + 3]) for l in range(L)]
    idx += 3 * L
    if not f1_only:
        x2_ref = refs[idx]; idx += 1
        lstm2 = [tuple(refs[idx + 3 * l: idx + 3 * l + 3]) for l in range(L)]
        idx += 3 * L
    mlp = [tuple(refs[idx + 2 * m: idx + 2 * m + 2]) for m in range(n_mlp)]
    idx += 2 * n_mlp
    fc_w_ref, fc_b_ref = refs[idx], refs[idx + 1]; idx += 2
    enc_ref, out_ref = refs[idx], refs[idx + 1]

    xc = _run_stack(x1_ref[...], f1_dim, lstm1, T=T, B=B, H=H, D=D, L=L)
    if not f1_only:
        f2 = _run_stack(x2_ref[...], f2_dim, lstm2, T=T, B=B, H=H, D=D, L=L)
        xc = jnp.concatenate([xc, f2], axis=-1)
    for w_ref, bm_ref in mlp:                                  # Linear + ReLU
        xc = jnp.maximum(
            jnp.dot(xc, w_ref[...], preferred_element_type=jnp.float32)
            + bm_ref[...], 0.0)
    enc_ref[...] = xc
    out_ref[...] = (jnp.dot(xc, fc_w_ref[...],
                            preferred_element_type=jnp.float32)
                    + fc_b_ref[...])


# ------------------------------ wrapper ---------------------------------------

def _pack_dir_weights(dir_params, D, H):
    """Pack both directions so one matmul produces fwd+bwd gates together."""
    if D == 1:
        return list(dir_params[0])
    (wih_f, whh_f, b_f), (wih_b, whh_b, b_b) = dir_params
    G = 4 * H
    wih = jnp.concatenate([wih_f, wih_b], axis=1)              # (in, 2G)
    whh = jnp.zeros((2 * H, 2 * G), jnp.float32)
    whh = whh.at[:H, :G].set(whh_f).at[H:, G:].set(whh_b)      # block-diagonal
    b = jnp.concatenate([b_f, b_b], axis=1)                    # (1, 2G)
    return [wih, whh, b]


def lstm_fuser_forward_pallas(params, x1, x2, cfg, get_encode=False,
                              return_both=False):
    D = 2 if cfg["bidirectional"] else 1
    L, H = cfg["num_layers"], cfg["hidden_size"]
    B, T, F1 = x1.shape
    f1_only = cfg["f1_only"]

    inputs = [jnp.transpose(x1, (1, 0, 2)).reshape(T * B, F1)]  # time-major flat
    for layer in range(L):
        inputs += _pack_dir_weights(
            [params["lstm1"][(layer, d)] for d in range(D)], D, H)
    F2 = 0
    if not f1_only:
        F2 = x2.shape[2]
        inputs.append(jnp.transpose(x2, (1, 0, 2)).reshape(T * B, F2))
        for layer in range(L):
            inputs += _pack_dir_weights(
                [params["lstm2"][(layer, d)] for d in range(D)], D, H)
    for w, b in params["mlp"]:
        inputs += [w, b.reshape(1, -1)]
    fc_w, fc_b = params["fc"]
    inputs += [fc_w, fc_b.reshape(1, -1)]

    enc_dim, out_dim = fc_w.shape
    kern = functools.partial(_fuser_kernel, T=T, B=B, H=H, D=D, L=L,
                             f1_dim=F1, f2_dim=F2, f1_only=f1_only,
                             n_mlp=len(params["mlp"]))
    enc, out = pl.pallas_call(
        kern,
        out_shape=(jax.ShapeDtypeStruct((B, enc_dim), jnp.float32),
                   jax.ShapeDtypeStruct((B, out_dim), jnp.float32)),
    )(*inputs)
    if get_encode:
        return (enc, out) if return_both else enc
    return out


# ------------------------ pure-JAX reference (check) --------------------------

def _lstm_layer_ref(x_tbf, wih, whh, b):
    B, H = x_tbf.shape[1], whh.shape[0]

    def step(carry, x_t):
        h, c = carry
        gates = x_t @ wih + h @ whh + b
        i, f, g, o = jnp.split(gates, 4, axis=-1)
        i, f, o = jax.nn.sigmoid(i), jax.nn.sigmoid(f), jax.nn.sigmoid(o)
        g = jnp.tanh(g)
        c = f * c + i * g
        h = o * jnp.tanh(c)
        return (h, c), h

    (h, _), hseq = jax.lax.scan(
        step, (jnp.zeros((B, H), jnp.float32), jnp.zeros((B, H), jnp.float32)),
        x_tbf)
    return hseq, h


def _lstm_stack_ref(x_btf, layer_params, num_layers, num_dirs):
    x = jnp.transpose(x_btf, (1, 0, 2))
    h_finals, layer_in = [], x
    for layer in range(num_layers):
        dir_seqs = []
        for d in range(num_dirs):
            wih, whh, b = layer_params[(layer, d)]
            xin = layer_in if d == 0 else jnp.flip(layer_in, axis=0)
            hseq, hfin = _lstm_layer_ref(xin, wih, whh, b)
            if d == 1:
                hseq = jnp.flip(hseq, axis=0)
            dir_seqs.append(hseq)
            h_finals.append(hfin)
        layer_in = (dir_seqs[0] if num_dirs == 1
                    else jnp.concatenate(dir_seqs, axis=-1))
    h_n = jnp.stack(h_finals, axis=0)                          # [L*D, B, H]
    B = x_btf.shape[0]
    return jnp.transpose(h_n, (1, 0, 2)).reshape(B, -1)


def lstm_fuser_forward_ref(params, x1, x2, cfg, get_encode=False,
                           return_both=False):
    D = 2 if cfg["bidirectional"] else 1
    xc = _lstm_stack_ref(x1, params["lstm1"], cfg["num_layers"], D)
    if not cfg["f1_only"]:
        f2 = _lstm_stack_ref(x2, params["lstm2"], cfg["num_layers"], D)
        xc = jnp.concatenate([xc, f2], axis=-1)
    for w, b in params["mlp"]:
        xc = jnp.maximum(xc @ w + b.reshape(1, -1), 0.0)
    out = xc @ params["fc"][0] + params["fc"][1].reshape(1, -1)
    if get_encode:
        return (xc, out) if return_both else xc
    return out


# ------------------------------ parameter init ---------------------------------

def _uniform(key, shape, scale):
    return jax.random.uniform(key, shape, jnp.float32, -scale, scale)


def init_lstm_params(key, input_dim, hidden, num_layers, num_dirs):
    params = {}
    k = 1.0 / jnp.sqrt(hidden)
    for layer in range(num_layers):
        in_dim = input_dim if layer == 0 else hidden * num_dirs
        for d in range(num_dirs):
            key, k1, k2, k3, k4 = jax.random.split(key, 5)
            wih = _uniform(k1, (in_dim, 4 * hidden), k)
            whh = _uniform(k2, (hidden, 4 * hidden), k)
            b = (_uniform(k3, (1, 4 * hidden), k)
                 + _uniform(k4, (1, 4 * hidden), k))           # b_ih + b_hh
            params[(layer, d)] = (wih, whh, b)
    return params, key


def init_params(key, cfg):
    num_dirs = 2 if cfg["bidirectional"] else 1
    H, L = cfg["hidden_size"], cfg["num_layers"]
    params = {}
    params["lstm1"], key = init_lstm_params(key, cfg["f1_dim"], H, L, num_dirs)
    if not cfg["f1_only"]:
        params["lstm2"], key = init_lstm_params(key, cfg["f2_dim"], H, L,
                                                num_dirs)
        prev = 2 * H * L * num_dirs
    else:
        prev = H * L * num_dirs
    mlp = []
    for n in cfg["mlp_neurons"]:
        key, k1, k2 = jax.random.split(key, 3)
        s = 1.0 / jnp.sqrt(prev)
        mlp.append((_uniform(k1, (prev, n), s), _uniform(k2, (n,), s)))
        prev = n
    params["mlp"] = mlp
    key, k1, k2 = jax.random.split(key, 3)
    s = 1.0 / jnp.sqrt(prev)
    params["fc"] = (_uniform(k1, (prev, cfg["output_dim"]), s),
                    _uniform(k2, (cfg["output_dim"],), s))
    return params


# ----------------------------------- main --------------------------------------

if __name__ == "__main__":
    cfg = dict(length=8, f1_dim=16, f2_dim=12, hidden_size=32, num_layers=2,
               mlp_neurons=(64, 32), output_dim=8, dropout=0.0,
               bidirectional=True, f1_only=False)
    B = 2

    key = jax.random.PRNGKey(0)
    kp, kx1, kx2 = jax.random.split(key, 3)
    params = init_params(kp, cfg)
    x1 = jax.random.normal(kx1, (B, cfg["length"], cfg["f1_dim"]), jnp.float32)
    x2 = jax.random.normal(kx2, (B, cfg["length"], cfg["f2_dim"]), jnp.float32)

    out = lstm_fuser_forward_pallas(params, x1, x2, cfg)
    out = jax.block_until_ready(out)
    assert out.shape == (B, cfg["output_dim"])

    ref = lstm_fuser_forward_ref(params, x1, x2, cfg)
    assert jnp.allclose(out, ref, atol=2e-2, rtol=2e-2), "mismatch vs reference"

    print("KERNEL_OK")
</pallas_src>

<mosaic_0001>
module attributes {stable_mosaic.version = 11 : i64} {
  func.func @_fuser_kernel(%arg0: memref<16x16xf32, #tpu.memory_space<vmem>>, %arg1: memref<16x256xf32, #tpu.memory_space<vmem>>, %arg2: memref<64x256xf32, #tpu.memory_space<vmem>>, %arg3: memref<1x256xf32, #tpu.memory_space<vmem>>, %arg4: memref<64x256xf32, #tpu.memory_space<vmem>>, %arg5: memref<64x256xf32, #tpu.memory_space<vmem>>, %arg6: memref<1x256xf32, #tpu.memory_space<vmem>>, %arg7: memref<16x12xf32, #tpu.memory_space<vmem>>, %arg8: memref<12x256xf32, #tpu.memory_space<vmem>>, %arg9: memref<64x256xf32, #tpu.memory_space<vmem>>, %arg10: memref<1x256xf32, #tpu.memory_space<vmem>>, %arg11: memref<64x256xf32, #tpu.memory_space<vmem>>, %arg12: memref<64x256xf32, #tpu.memory_space<vmem>>, %arg13: memref<1x256xf32, #tpu.memory_space<vmem>>, %arg14: memref<256x64xf32, #tpu.memory_space<vmem>>, %arg15: memref<1x64xf32, #tpu.memory_space<vmem>>, %arg16: memref<64x32xf32, #tpu.memory_space<vmem>>, %arg17: memref<1x32xf32, #tpu.memory_space<vmem>>, %arg18: memref<32x8xf32, #tpu.memory_space<vmem>>, %arg19: memref<1x8xf32, #tpu.memory_space<vmem>>, %arg20: memref<2x32xf32, #tpu.memory_space<vmem>>, %arg21: memref<2x8xf32, #tpu.memory_space<vmem>>) attributes {dimension_semantics = [], scalar_prefetch = 0 : i64, scratch_operands = 0 : i64, tpu.core_type = #tpu.core_type<tc>} {
    %c0 = arith.constant 0 : index
    %c0_0 = arith.constant 0 : index
    %0 = vector.load %arg0[%c0, %c0_0] : memref<16x16xf32, #tpu.memory_space<vmem>>, vector<16x16xf32>
    %c0_1 = arith.constant 0 : index
    %c0_2 = arith.constant 0 : index
    %1 = vector.load %arg3[%c0_1, %c0_2] : memref<1x256xf32, #tpu.memory_space<vmem>>, vector<1x256xf32>
    %c0_3 = arith.constant 0 : index
    %c0_4 = arith.constant 0 : index
    %2 = vector.load %arg1[%c0_3, %c0_4] : memref<16x256xf32, #tpu.memory_space<vmem>>, vector<16x256xf32>
    %cst = arith.constant dense<0.000000e+00> : vector<16x256xf32>
    %3 = tpu.matmul %0, %2, %cst {dimension_numbers = #tpu.dot_dimension_numbers<[1], [0], [0], [1], [0, 0, 1, 1], [], []>} : vector<16x16xf32>, vector<16x256xf32>, vector<16x256xf32> -> vector<16x256xf32>
    %4 = vector.broadcast %1 : vector<1x256xf32> to vector<16x256xf32>
    %5 = arith.addf %4, %3 : vector<16x256xf32>
    %c0_5 = arith.constant 0 : index
    %c0_6 = arith.constant 0 : index
    %6 = vector.load %arg2[%c0_5, %c0_6] : memref<64x256xf32, #tpu.memory_space<vmem>>, vector<64x256xf32>
    %cst_7 = arith.constant 0.000000e+00 : f32
    %7 = vector.broadcast %cst_7 : f32 to vector<2x64xf32>
    %cst_8 = arith.constant 0.000000e+00 : f32
    %8 = vector.broadcast %cst_8 : f32 to vector<2x32xf32>
    %cst_9 = arith.constant 0.000000e+00 : f32
    %9 = vector.broadcast %cst_9 : f32 to vector<2x32xf32>
    %10 = vector.extract_strided_slice %5 {offsets = [0, 0], sizes = [2, 128], strides = [1, 1]} : vector<16x256xf32> to vector<2x128xf32>
    %11 = vector.extract_strided_slice %5 {offsets = [14, 128], sizes = [2, 128], strides = [1, 1]} : vector<16x256xf32> to vector<2x128xf32>
    %12 = tpu.concatenate %10, %11 in 1 : vector<2x128xf32>, vector<2x128xf32> -> vector<2x256xf32>
    %cst_10 = arith.constant dense<0.000000e+00> : vector<2x256xf32>
    %13 = tpu.matmul %7, %6, %cst_10 {dimension_numbers = #tpu.dot_dimension_numbers<[1], [0], [0], [1], [0, 0, 1, 1], [], []>} : vector<2x64xf32>, vector<64x256xf32>, vector<2x256xf32> -> vector<2x256xf32>
    %14 = arith.addf %12, %13 : vector<2x256xf32>
    %15 = vector.extract_strided_slice %14 {offsets = [0, 0], sizes = [2, 128], strides = [1, 1]} : vector<2x256xf32> to vector<2x128xf32>
    %16 = vector.extract_strided_slice %15 {offsets = [0, 0], sizes = [2, 32], strides = [1, 1]} : vector<2x128xf32> to vector<2x32xf32>
    %17 = arith.negf %16 : vector<2x32xf32>
    %18 = math.exp %17 : vector<2x32xf32>
    %cst_11 = arith.constant 1.000000e+00 : f32
    %19 = vector.broadcast %cst_11 : f32 to vector<2x32xf32>
    %20 = arith.addf %19, %18 : vector<2x32xf32>
    %21 = arith.divf %19, %20 : vector<2x32xf32>
    %22 = vector.extract_strided_slice %15 {offsets = [0, 32], sizes = [2, 32], strides = [1, 1]} : vector<2x128xf32> to vector<2x32xf32>
    %23 = arith.negf %22 : vector<2x32xf32>
    %24 = math.exp %23 : vector<2x32xf32>
    %cst_12 = arith.constant 1.000000e+00 : f32
    %25 = vector.broadcast %cst_12 : f32 to vector<2x32xf32>
    %26 = arith.addf %25, %24 : vector<2x32xf32>
    %27 = arith.divf %25, %26 : vector<2x32xf32>
    %28 = vector.extract_strided_slice %15 {offsets = [0, 64], sizes = [2, 32], strides = [1, 1]} : vector<2x128xf32> to vector<2x32xf32>
    %29 = math.tanh %28 : vector<2x32xf32>
    %30 = vector.extract_strided_slice %15 {offsets = [0, 96], sizes = [2, 32], strides = [1, 1]} : vector<2x128xf32> to vector<2x32xf32>
    %31 = arith.negf %30 : vector<2x32xf32>
    %32 = math.exp %31 : vector<2x32xf32>
    %cst_13 = arith.constant 1.000000e+00 : f32
    %33 = vector.broadcast %cst_13 : f32 to vector<2x32xf32>
    %34 = arith.addf %33, %32 : vector<2x32xf32>
    %35 = arith.divf %33, %34 : vector<2x32xf32>
    %36 = arith.mulf %27, %8 : vector<2x32xf32>
    %37 = arith.mulf %21, %29 : vector<2x32xf32>
    %38 = arith.addf %36, %37 : vector<2x32xf32>
    %39 = math.tanh %38 : vector<2x32xf32>
    %40 = arith.mulf %35, %39 : vector<2x32xf32>
    %41 = vector.extract_strided_slice %14 {offsets = [0, 128], sizes = [2, 128], strides = [1, 1]} : vector<2x256xf32> to vector<2x128xf32>
    %42 = vector.extract_strided_slice %41 {offsets = [0, 0], sizes = [2, 32], strides = [1, 1]} : vector<2x128xf32> to vector<2x32xf32>
    %43 = arith.negf %42 : vector<2x32xf32>
    %44 = math.exp %43 : vector<2x32xf32>
    %cst_14 = arith.constant 1.000000e+00 : f32
    %45 = vector.broadcast %cst_14 : f32 to vector<2x32xf32>
    %46 = arith.addf %45, %44 : vector<2x32xf32>
    %47 = arith.divf %45, %46 : vector<2x32xf32>
    %48 = vector.extract_strided_slice %41 {offsets = [0, 32], sizes = [2, 32], strides = [1, 1]} : vector<2x128xf32> to vector<2x32xf32>
    %49 = arith.negf %48 : vector<2x32xf32>
    %50 = math.exp %49 : vector<2x32xf32>
    %cst_15 = arith.constant 1.000000e+00 : f32
    %51 = vector.broadcast %cst_15 : f32 to vector<2x32xf32>
    %52 = arith.addf %51, %50 : vector<2x32xf32>
    %53 = arith.divf %51, %52 : vector<2x32xf32>
    %54 = vector.extract_strided_slice %41 {offsets = [0, 64], sizes = [2, 32], strides = [1, 1]} : vector<2x128xf32> to vector<2x32xf32>
    %55 = math.tanh %54 : vector<2x32xf32>
    %56 = vector.extract_strided_slice %41 {offsets = [0, 96], sizes = [2, 32], strides = [1, 1]} : vector<2x128xf32> to vector<2x32xf32>
    %57 = arith.negf %56 : vector<2x32xf32>
    %58 = math.exp %57 : vector<2x32xf32>
    %cst_16 = arith.constant 1.000000e+00 : f32
    %59 = vector.broadcast %cst_16 : f32 to vector<2x32xf32>
    %60 = arith.addf %59, %58 : vector<2x32xf32>
    %61 = arith.divf %59, %60 : vector<2x32xf32>
    %62 = arith.mulf %53, %9 : vector<2x32xf32>
    %63 = arith.mulf %47, %55 : vector<2x32xf32>
    %64 = arith.addf %62, %63 : vector<2x32xf32>
    %65 = math.tanh %64 : vector<2x32xf32>
    %66 = arith.mulf %61, %65 : vector<2x32xf32>
    %67 = tpu.concatenate %40, %66 in 1 : vector<2x32xf32>, vector<2x32xf32> -> vector<2x64xf32>
    %68 = vector.extract_strided_slice %5 {offsets = [2, 0], sizes = [2, 128], strides = [1, 1]} : vector<16x256xf32> to vector<2x128xf32>
    %69 = vector.extract_strided_slice %5 {offsets = [12, 128], sizes = [2, 128], strides = [1, 1]} : vector<16x256xf32> to vector<2x128xf32>
    %70 = tpu.concatenate %68, %69 in 1 : vector<2x128xf32>, vector<2x128xf32> -> vector<2x256xf32>
    %cst_17 = arith.constant dense<0.000000e+00> : vector<2x256xf32>
    %71 = tpu.matmul %67, %6, %cst_17 {dimension_numbers = #tpu.dot_dimension_numbers<[1], [0], [0], [1], [0, 0, 1, 1], [], []>} : vector<2x64xf32>, vector<64x256xf32>, vector<2x256xf32> -> vector<2x256xf32>
    %72 = arith.addf %70, %71 : vector<2x256xf32>
    %73 = vector.extract_strided_slice %72 {offsets = [0, 0], sizes = [2, 128], strides = [1, 1]} : vector<2x256xf32> to vector<2x128xf32>
    %74 = vector.extract_strided_slice %73 {offsets = [0, 0], sizes = [2, 32], strides = [1, 1]} : vector<2x128xf32> to vector<2x32xf32>
    %75 = arith.negf %74 : vector<2x32xf32>
    %76 = math.exp %75 : vector<2x32xf32>
    %cst_18 = arith.constant 1.000000e+00 : f32
    %77 = vector.broadcast %cst_18 : f32 to vector<2x32xf32>
    %78 = arith.addf %77, %76 : vector<2x32xf32>
    %79 = arith.divf %77, %78 : vector<2x32xf32>
    %80 = vector.extract_strided_slice %73 {offsets = [0, 32], sizes = [2, 32], strides = [1, 1]} : vector<2x128xf32> to vector<2x32xf32>
    %81 = arith.negf %80 : vector<2x32xf32>
    %82 = math.exp %81 : vector<2x32xf32>
    %cst_19 = arith.constant 1.000000e+00 : f32
    %83 = vector.broadcast %cst_19 : f32 to vector<2x32xf32>
    %84 = arith.addf %83, %82 : vector<2x32xf32>
    %85 = arith.divf %83, %84 : vector<2x32xf32>
    %86 = vector.extract_strided_slice %73 {offsets = [0, 64], sizes = [2, 32], strides = [1, 1]} : vector<2x128xf32> to vector<2x32xf32>
    %87 = math.tanh %86 : vector<2x32xf32>
    %88 = vector.extract_strided_slice %73 {offsets = [0, 96], sizes = [2, 32], strides = [1, 1]} : vector<2x128xf32> to vector<2x32xf32>
    %89 = arith.negf %88 : vector<2x32xf32>
    %90 = math.exp %89 : vector<2x32xf32>
    %cst_20 = arith.constant 1.000000e+00 : f32
    %91 = vector.broadcast %cst_20 : f32 to vector<2x32xf32>
    %92 = arith.addf %91, %90 : vector<2x32xf32>
    %93 = arith.divf %91, %92 : vector<2x32xf32>
    %94 = arith.mulf %85, %38 : vector<2x32xf32>
    %95 = arith.mulf %79, %87 : vector<2x32xf32>
    %96 = arith.addf %94, %95 : vector<2x32xf32>
    %97 = math.tanh %96 : vector<2x32xf32>
    %98 = arith.mulf %93, %97 : vector<2x32xf32>
    %99 = vector.extract_strided_slice %72 {offsets = [0, 128], sizes = [2, 128], strides = [1, 1]} : vector<2x256xf32> to vector<2x128xf32>
    %100 = vector.extract_strided_slice %99 {offsets = [0, 0], sizes = [2, 32], strides = [1, 1]} : vector<2x128xf32> to vector<2x32xf32>
    %101 = arith.negf %100 : vector<2x32xf32>
    %102 = math.exp %101 : vector<2x32xf32>
    %cst_21 = arith.constant 1.000000e+00 : f32
    %103 = vector.broadcast %cst_21 : f32 to vector<2x32xf32>
    %104 = arith.addf %103, %102 : vector<2x32xf32>
    %105 = arith.divf %103, %104 : vector<2x32xf32>
    %106 = vector.extract_strided_slice %99 {offsets = [0, 32], sizes = [2, 32], strides = [1, 1]} : vector<2x128xf32> to vector<2x32xf32>
    %107 = arith.negf %106 : vector<2x32xf32>
    %108 = math.exp %107 : vector<2x32xf32>
    %cst_22 = arith.constant 1.000000e+00 : f32
    %109 = vector.broadcast %cst_22 : f32 to vector<2x32xf32>
    %110 = arith.addf %109, %108 : vector<2x32xf32>
    %111 = arith.divf %109, %110 : vector<2x32xf32>
    %112 = vector.extract_strided_slice %99 {offsets = [0, 64], sizes = [2, 32], strides = [1, 1]} : vector<2x128xf32> to vector<2x32xf32>
    %113 = math.tanh %112 : vector<2x32xf32>
    %114 = vector.extract_strided_slice %99 {offsets = [0, 96], sizes = [2, 32], strides = [1, 1]} : vector<2x128xf32> to vector<2x32xf32>
    %115 = arith.negf %114 : vector<2x32xf32>
    %116 = math.exp %115 : vector<2x32xf32>
    %cst_23 = arith.constant 1.000000e+00 : f32
    %117 = vector.broadcast %cst_23 : f32 to vector<2x32xf32>
    %118 = arith.addf %117, %116 : vector<2x32xf32>
    %119 = arith.divf %117, %118 : vector<2x32xf32>
    %120 = arith.mulf %111, %64 : vector<2x32xf32>
    %121 = arith.mulf %105, %113 : vector<2x32xf32>
    %122 = arith.addf %120, %121 : vector<2x32xf32>
    %123 = math.tanh %122 : vector<2x32xf32>
    %124 = arith.mulf %119, %123 : vector<2x32xf32>
    %125 = tpu.concatenate %98, %124 in 1 : vector<2x32xf32>, vector<2x32xf32> -> vector<2x64xf32>
    %126 = vector.extract_strided_slice %5 {offsets = [4, 0], sizes = [2, 128], strides = [1, 1]} : vector<16x256xf32> to vector<2x128xf32>
    %127 = vector.extract_strided_slice %5 {offsets = [10, 128], sizes = [2, 128], strides = [1, 1]} : vector<16x256xf32> to vector<2x128xf32>
    %128 = tpu.concatenate %126, %127 in 1 : vector<2x128xf32>, vector<2x128xf32> -> vector<2x256xf32>
    %cst_24 = arith.constant dense<0.000000e+00> : vector<2x256xf32>
    %129 = tpu.matmul %125, %6, %cst_24 {dimension_numbers = #tpu.dot_dimension_numbers<[1], [0], [0], [1], [0, 0, 1, 1], [], []>} : vector<2x64xf32>, vector<64x256xf32>, vector<2x256xf32> -> vector<2x256xf32>
    %130 = arith.addf %128, %129 : vector<2x256xf32>
    %131 = vector.extract_strided_slice %130 {offsets = [0, 0], sizes = [2, 128], strides = [1, 1]} : vector<2x256xf32> to vector<2x128xf32>
    %132 = vector.extract_strided_slice %131 {offsets = [0, 0], sizes = [2, 32], strides = [1, 1]} : vector<2x128xf32> to vector<2x32xf32>
    %133 = arith.negf %132 : vector<2x32xf32>
    %134 = math.exp %133 : vector<2x32xf32>
    %cst_25 = arith.constant 1.000000e+00 : f32
    %135 = vector.broadcast %cst_25 : f32 to vector<2x32xf32>
    %136 = arith.addf %135, %134 : vector<2x32xf32>
    %137 = arith.divf %135, %136 : vector<2x32xf32>
    %138 = vector.extract_strided_slice %131 {offsets = [0, 32], sizes = [2, 32], strides = [1, 1]} : vector<2x128xf32> to vector<2x32xf32>
    %139 = arith.negf %138 : vector<2x32xf32>
    %140 = math.exp %139 : vector<2x32xf32>
    %cst_26 = arith.constant 1.000000e+00 : f32
    %141 = vector.broadcast %cst_26 : f32 to vector<2x32xf32>
    %142 = arith.addf %141, %140 : vector<2x32xf32>
    %143 = arith.divf %141, %142 : vector<2x32xf32>
    %144 = vector.extract_strided_slice %131 {offsets = [0, 64], sizes = [2, 32], strides = [1, 1]} : vector<2x128xf32> to vector<2x32xf32>
    %145 = math.tanh %144 : vector<2x32xf32>
    %146 = vector.extract_strided_slice %131 {offsets = [0, 96], sizes = [2, 32], strides = [1, 1]} : vector<2x128xf32> to vector<2x32xf32>
    %147 = arith.negf %146 : vector<2x32xf32>
    %148 = math.exp %147 : vector<2x32xf32>
    %cst_27 = arith.constant 1.000000e+00 : f32
    %149 = vector.broadcast %cst_27 : f32 to vector<2x32xf32>
    %150 = arith.addf %149, %148 : vector<2x32xf32>
    %151 = arith.divf %149, %150 : vector<2x32xf32>
    %152 = arith.mulf %143, %96 : vector<2x32xf32>
    %153 = arith.mulf %137, %145 : vector<2x32xf32>
    %154 = arith.addf %152, %153 : vector<2x32xf32>
    %155 = math.tanh %154 : vector<2x32xf32>
    %156 = arith.mulf %151, %155 : vector<2x32xf32>
    %157 = vector.extract_strided_slice %130 {offsets = [0, 128], sizes = [2, 128], strides = [1, 1]} : vector<2x256xf32> to vector<2x128xf32>
    %158 = vector.extract_strided_slice %157 {offsets = [0, 0], sizes = [2, 32], strides = [1, 1]} : vector<2x128xf32> to vector<2x32xf32>
    %159 = arith.negf %158 : vector<2x32xf32>
    %160 = math.exp %159 : vector<2x32xf32>
    %cst_28 = arith.constant 1.000000e+00 : f32
    %161 = vector.broadcast %cst_28 : f32 to vector<2x32xf32>
    %162 = arith.addf %161, %160 : vector<2x32xf32>
    %163 = arith.divf %161, %162 : vector<2x32xf32>
    %164 = vector.extract_strided_slice %157 {offsets = [0, 32], sizes = [2, 32], strides = [1, 1]} : vector<2x128xf32> to vector<2x32xf32>
    %165 = arith.negf %164 : vector<2x32xf32>
    %166 = math.exp %165 : vector<2x32xf32>
    %cst_29 = arith.constant 1.000000e+00 : f32
    %167 = vector.broadcast %cst_29 : f32 to vector<2x32xf32>
    %168 = arith.addf %167, %166 : vector<2x32xf32>
    %169 = arith.divf %167, %168 : vector<2x32xf32>
    %170 = vector.extract_strided_slice %157 {offsets = [0, 64], sizes = [2, 32], strides = [1, 1]} : vector<2x128xf32> to vector<2x32xf32>
    %171 = math.tanh %170 : vector<2x32xf32>
    %172 = vector.extract_strided_slice %157 {offsets = [0, 96], sizes = [2, 32], strides = [1, 1]} : vector<2x128xf32> to vector<2x32xf32>
    %173 = arith.negf %172 : vector<2x32xf32>
    %174 = math.exp %173 : vector<2x32xf32>
    %cst_30 = arith.constant 1.000000e+00 : f32
    %175 = vector.broadcast %cst_30 : f32 to vector<2x32xf32>
    %176 = arith.addf %175, %174 : vector<2x32xf32>
    %177 = arith.divf %175, %176 : vector<2x32xf32>
    %178 = arith.mulf %169, %122 : vector<2x32xf32>
    %179 = arith.mulf %163, %171 : vector<2x32xf32>
    %180 = arith.addf %178, %179 : vector<2x32xf32>
    %181 = math.tanh %180 : vector<2x32xf32>
    %182 = arith.mulf %177, %181 : vector<2x32xf32>
    %183 = tpu.concatenate %156, %182 in 1 : vector<2x32xf32>, vector<2x32xf32> -> vector<2x64xf32>
    %184 = vector.extract_strided_slice %5 {offsets = [6, 0], sizes = [2, 128], strides = [1, 1]} : vector<16x256xf32> to vector<2x128xf32>
    %185 = vector.extract_strided_slice %5 {offsets = [8, 128], sizes = [2, 128], strides = [1, 1]} : vector<16x256xf32> to vector<2x128xf32>
    %186 = tpu.concatenate %184, %185 in 1 : vector<2x128xf32>, vector<2x128xf32> -> vector<2x256xf32>
    %cst_31 = arith.constant dense<0.000000e+00> : vector<2x256xf32>
    %187 = tpu.matmul %183, %6, %cst_31 {dimension_numbers = #tpu.dot_dimension_numbers<[1], [0], [0], [1], [0, 0, 1, 1], [], []>} : vector<2x64xf32>, vector<64x256xf32>, vector<2x256xf32> -> vector<2x256xf32>
    %188 = arith.addf %186, %187 : vector<2x256xf32>
    %189 = vector.extract_strided_slice %188 {offsets = [0, 0], sizes = [2, 128], strides = [1, 1]} : vector<2x256xf32> to vector<2x128xf32>
    %190 = vector.extract_strided_slice %189 {offsets = [0, 0], sizes = [2, 32], strides = [1, 1]} : vector<2x128xf32> to vector<2x32xf32>
    %191 = arith.negf %190 : vector<2x32xf32>
    %192 = math.exp %191 : vector<2x32xf32>
    %cst_32 = arith.constant 1.000000e+00 : f32
    %193 = vector.broadcast %cst_32 : f32 to vector<2x32xf32>
    %194 = arith.addf %193, %192 : vector<2x32xf32>
    %195 = arith.divf %193, %194 : vector<2x32xf32>
    %196 = vector.extract_strided_slice %189 {offsets = [0, 32], sizes = [2, 32], strides = [1, 1]} : vector<2x128xf32> to vector<2x32xf32>
    %197 = arith.negf %196 : vector<2x32xf32>
    %198 = math.exp %197 : vector<2x32xf32>
    %cst_33 = arith.constant 1.000000e+00 : f32
    %199 = vector.broadcast %cst_33 : f32 to vector<2x32xf32>
    %200 = arith.addf %199, %198 : vector<2x32xf32>
    %201 = arith.divf %199, %200 : vector<2x32xf32>
    %202 = vector.extract_strided_slice %189 {offsets = [0, 64], sizes = [2, 32], strides = [1, 1]} : vector<2x128xf32> to vector<2x32xf32>
    %203 = math.tanh %202 : vector<2x32xf32>
    %204 = vector.extract_strided_slice %189 {offsets = [0, 96], sizes = [2, 32], strides = [1, 1]} : vector<2x128xf32> to vector<2x32xf32>
    %205 = arith.negf %204 : vector<2x32xf32>
    %206 = math.exp %205 : vector<2x32xf32>
    %cst_34 = arith.constant 1.000000e+00 : f32
    %207 = vector.broadcast %cst_34 : f32 to vector<2x32xf32>
    %208 = arith.addf %207, %206 : vector<2x32xf32>
    %209 = arith.divf %207, %208 : vector<2x32xf32>
    %210 = arith.mulf %201, %154 : vector<2x32xf32>
    %211 = arith.mulf %195, %203 : vector<2x32xf32>
    %212 = arith.addf %210, %211 : vector<2x32xf32>
    %213 = math.tanh %212 : vector<2x32xf32>
    %214 = arith.mulf %209, %213 : vector<2x32xf32>
    %215 = vector.extract_strided_slice %188 {offsets = [0, 128], sizes = [2, 128], strides = [1, 1]} : vector<2x256xf32> to vector<2x128xf32>
    %216 = vector.extract_strided_slice %215 {offsets = [0, 0], sizes = [2, 32], strides = [1, 1]} : vector<2x128xf32> to vector<2x32xf32>
    %217 = arith.negf %216 : vector<2x32xf32>
    %218 = math.exp %217 : vector<2x32xf32>
    %cst_35 = arith.constant 1.000000e+00 : f32
    %219 = vector.broadcast %cst_35 : f32 to vector<2x32xf32>
    %220 = arith.addf %219, %218 : vector<2x32xf32>
    %221 = arith.divf %219, %220 : vector<2x32xf32>
    %222 = vector.extract_strided_slice %215 {offsets = [0, 32], sizes = [2, 32], strides = [1, 1]} : vector<2x128xf32> to vector<2x32xf32>
    %223 = arith.negf %222 : vector<2x32xf32>
    %224 = math.exp %223 : vector<2x32xf32>
    %cst_36 = arith.constant 1.000000e+00 : f32
    %225 = vector.broadcast %cst_36 : f32 to vector<2x32xf32>
    %226 = arith.addf %225, %224 : vector<2x32xf32>
    %227 = arith.divf %225, %226 : vector<2x32xf32>
    %228 = vector.extract_strided_slice %215 {offsets = [0, 64], sizes = [2, 32], strides = [1, 1]} : vector<2x128xf32> to vector<2x32xf32>
    %229 = math.tanh %228 : vector<2x32xf32>
    %230 = vector.extract_strided_slice %215 {offsets = [0, 96], sizes = [2, 32], strides = [1, 1]} : vector<2x128xf32> to vector<2x32xf32>
    %231 = arith.negf %230 : vector<2x32xf32>
    %232 = math.exp %231 : vector<2x32xf32>
    %cst_37 = arith.constant 1.000000e+00 : f32
    %233 = vector.broadcast %cst_37 : f32 to vector<2x32xf32>
    %234 = arith.addf %233, %232 : vector<2x32xf32>
    %235 = arith.divf %233, %234 : vector<2x32xf32>
    %236 = arith.mulf %227, %180 : vector<2x32xf32>
    %237 = arith.mulf %221, %229 : vector<2x32xf32>
    %238 = arith.addf %236, %237 : vector<2x32xf32>
    %239 = math.tanh %238 : vector<2x32xf32>
    %240 = arith.mulf %235, %239 : vector<2x32xf32>
    %241 = tpu.concatenate %214, %240 in 1 : vector<2x32xf32>, vector<2x32xf32> -> vector<2x64xf32>
    %242 = vector.extract_strided_slice %5 {offsets = [8, 0], sizes = [2, 128], strides = [1, 1]} : vector<16x256xf32> to vector<2x128xf32>
    %243 = vector.extract_strided_slice %5 {offsets = [6, 128], sizes = [2, 128], strides = [1, 1]} : vector<16x256xf32> to vector<2x128xf32>
    %244 = tpu.concatenate %242, %243 in 1 : vector<2x128xf32>, vector<2x128xf32> -> vector<2x256xf32>
    %cst_38 = arith.constant dense<0.000000e+00> : vector<2x256xf32>
    %245 = tpu.matmul %241, %6, %cst_38 {dimension_numbers = #tpu.dot_dimension_numbers<[1], [0], [0], [1], [0, 0, 1, 1], [], []>} : vector<2x64xf32>, vector<64x256xf32>, vector<2x256xf32> -> vector<2x256xf32>
    %246 = arith.addf %244, %245 : vector<2x256xf32>
    %247 = vector.extract_strided_slice %246 {offsets = [0, 0], sizes = [2, 128], strides = [1, 1]} : vector<2x256xf32> to vector<2x128xf32>
    %248 = vector.extract_strided_slice %247 {offsets = [0, 0], sizes = [2, 32], strides = [1, 1]} : vector<2x128xf32> to vector<2x32xf32>
    %249 = arith.negf %248 : vector<2x32xf32>
    %250 = math.exp %249 : vector<2x32xf32>
    %cst_39 = arith.constant 1.000000e+00 : f32
    %251 = vector.broadcast %cst_39 : f32 to vector<2x32xf32>
    %252 = arith.addf %251, %250 : vector<2x32xf32>
    %253 = arith.divf %251, %252 : vector<2x32xf32>
    %254 = vector.extract_strided_slice %247 {offsets = [0, 32], sizes = [2, 32], strides = [1, 1]} : vector<2x128xf32> to vector<2x32xf32>
    %255 = arith.negf %254 : vector<2x32xf32>
    %256 = math.exp %255 : vector<2x32xf32>
    %cst_40 = arith.constant 1.000000e+00 : f32
    %257 = vector.broadcast %cst_40 : f32 to vector<2x32xf32>
    %258 = arith.addf %257, %256 : vector<2x32xf32>
    %259 = arith.divf %257, %258 : vector<2x32xf32>
    %260 = vector.extract_strided_slice %247 {offsets = [0, 64], sizes = [2, 32], strides = [1, 1]} : vector<2x128xf32> to vector<2x32xf32>
    %261 = math.tanh %260 : vector<2x32xf32>
    %262 = vector.extract_strided_slice %247 {offsets = [0, 96], sizes = [2, 32], strides = [1, 1]} : vector<2x128xf32> to vector<2x32xf32>
    %263 = arith.negf %262 : vector<2x32xf32>
    %264 = math.exp %263 : vector<2x32xf32>
    %cst_41 = arith.constant 1.000000e+00 : f32
    %265 = vector.broadcast %cst_41 : f32 to vector<2x32xf32>
    %266 = arith.addf %265, %264 : vector<2x32xf32>
    %267 = arith.divf %265, %266 : vector<2x32xf32>
    %268 = arith.mulf %259, %212 : vector<2x32xf32>
    %269 = arith.mulf %253, %261 : vector<2x32xf32>
    %270 = arith.addf %268, %269 : vector<2x32xf32>
    %271 = math.tanh %270 : vector<2x32xf32>
    %272 = arith.mulf %267, %271 : vector<2x32xf32>
    %273 = vector.extract_strided_slice %246 {offsets = [0, 128], sizes = [2, 128], strides = [1, 1]} : vector<2x256xf32> to vector<2x128xf32>
    %274 = vector.extract_strided_slice %273 {offsets = [0, 0], sizes = [2, 32], strides = [1, 1]} : vector<2x128xf32> to vector<2x32xf32>
    %275 = arith.negf %274 : vector<2x32xf32>
    %276 = math.exp %275 : vector<2x32xf32>
    %cst_42 = arith.constant 1.000000e+00 : f32
    %277 = vector.broadcast %cst_42 : f32 to vector<2x32xf32>
    %278 = arith.addf %277, %276 : vector<2x32xf32>
    %279 = arith.divf %277, %278 : vector<2x32xf32>
    %280 = vector.extract_strided_slice %273 {offsets = [0, 32], sizes = [2, 32], strides = [1, 1]} : vector<2x128xf32> to vector<2x32xf32>
    %281 = arith.negf %280 : vector<2x32xf32>
    %282 = math.exp %281 : vector<2x32xf32>
    %cst_43 = arith.constant 1.000000e+00 : f32
    %283 = vector.broadcast %cst_43 : f32 to vector<2x32xf32>
    %284 = arith.addf %283, %282 : vector<2x32xf32>
    %285 = arith.divf %283, %284 : vector<2x32xf32>
    %286 = vector.extract_strided_slice %273 {offsets = [0, 64], sizes = [2, 32], strides = [1, 1]} : vector<2x128xf32> to vector<2x32xf32>
    %287 = math.tanh %286 : vector<2x32xf32>
    %288 = vector.extract_strided_slice %273 {offsets = [0, 96], sizes = [2, 32], strides = [1, 1]} : vector<2x128xf32> to vector<2x32xf32>
    %289 = arith.negf %288 : vector<2x32xf32>
    %290 = math.exp %289 : vector<2x32xf32>
    %cst_44 = arith.constant 1.000000e+00 : f32
    %291 = vector.broadcast %cst_44 : f32 to vector<2x32xf32>
    %292 = arith.addf %291, %290 : vector<2x32xf32>
    %293 = arith.divf %291, %292 : vector<2x32xf32>
    %294 = arith.mulf %285, %238 : vector<2x32xf32>
    %295 = arith.mulf %279, %287 : vector<2x32xf32>
    %296 = arith.addf %294, %295 : vector<2x32xf32>
    %297 = math.tanh %296 : vector<2x32xf32>
    %298 = arith.mulf %293, %297 : vector<2x32xf32>
    %299 = tpu.concatenate %272, %298 in 1 : vector<2x32xf32>, vector<2x32xf32> -> vector<2x64xf32>
    %300 = vector.extract_strided_slice %5 {offsets = [10, 0], sizes = [2, 128], strides = [1, 1]} : vector<16x256xf32> to vector<2x128xf32>
    %301 = vector.extract_strided_slice %5 {offsets = [4, 128], sizes = [2, 128], strides = [1, 1]} : vector<16x256xf32> to vector<2x128xf32>
    %302 = tpu.concatenate %300, %301 in 1 : vector<2x128xf32>, vector<2x128xf32> -> vector<2x256xf32>
    %cst_45 = arith.constant dense<0.000000e+00> : vector<2x256xf32>
    %303 = tpu.matmul %299, %6, %cst_45 {dimension_numbers = #tpu.dot_dimension_numbers<[1], [0], [0], [1], [0, 0, 1, 1], [], []>} : vector<2x64xf32>, vector<64x256xf32>, vector<2x256xf32> -> vector<2x256xf32>
    %304 = arith.addf %302, %303 : vector<2x256xf32>
    %305 = vector.extract_strided_slice %304 {offsets = [0, 0], sizes = [2, 128], strides = [1, 1]} : vector<2x256xf32> to vector<2x128xf32>
    %306 = vector.extract_strided_slice %305 {offsets = [0, 0], sizes = [2, 32], strides = [1, 1]} : vector<2x128xf32> to vector<2x32xf32>
    %307 = arith.negf %306 : vector<2x32xf32>
    %308 = math.exp %307 : vector<2x32xf32>
    %cst_46 = arith.constant 1.000000e+00 : f32
    %309 = vector.broadcast %cst_46 : f32 to vector<2x32xf32>
    %310 = arith.addf %309, %308 : vector<2x32xf32>
    %311 = arith.divf %309, %310 : vector<2x32xf32>
    %312 = vector.extract_strided_slice %305 {offsets = [0, 32], sizes = [2, 32], strides = [1, 1]} : vector<2x128xf32> to vector<2x32xf32>
    %313 = arith.negf %312 : vector<2x32xf32>
    %314 = math.exp %313 : vector<2x32xf32>
    %cst_47 = arith.constant 1.000000e+00 : f32
    %315 = vector.broadcast %cst_47 : f32 to vector<2x32xf32>
    %316 = arith.addf %315, %314 : vector<2x32xf32>
    %317 = arith.divf %315, %316 : vector<2x32xf32>
    %318 = vector.extract_strided_slice %305 {offsets = [0, 64], sizes = [2, 32], strides = [1, 1]} : vector<2x128xf32> to vector<2x32xf32>
    %319 = math.tanh %318 : vector<2x32xf32>
    %320 = vector.extract_strided_slice %305 {offsets = [0, 96], sizes = [2, 32], strides = [1, 1]} : vector<2x128xf32> to vector<2x32xf32>
    %321 = arith.negf %320 : vector<2x32xf32>
    %322 = math.exp %321 : vector<2x32xf32>
    %cst_48 = arith.constant 1.000000e+00 : f32
    %323 = vector.broadcast %cst_48 : f32 to vector<2x32xf32>
    %324 = arith.addf %323, %322 : vector<2x32xf32>
    %325 = arith.divf %323, %324 : vector<2x32xf32>
    %326 = arith.mulf %317, %270 : vector<2x32xf32>
    %327 = arith.mulf %311, %319 : vector<2x32xf32>
    %328 = arith.addf %326, %327 : vector<2x32xf32>
    %329 = math.tanh %328 : vector<2x32xf32>
    %330 = arith.mulf %325, %329 : vector<2x32xf32>
    %331 = vector.extract_strided_slice %304 {offsets = [0, 128], sizes = [2, 128], strides = [1, 1]} : vector<2x256xf32> to vector<2x128xf32>
    %332 = vector.extract_strided_slice %331 {offsets = [0, 0], sizes = [2, 32], strides = [1, 1]} : vector<2x128xf32> to vector<2x32xf32>
    %333 = arith.negf %332 : vector<2x32xf32>
    %334 = math.exp %333 : vector<2x32xf32>
    %cst_49 = arith.constant 1.000000e+00 : f32
    %335 = vector.broadcast %cst_49 : f32 to vector<2x32xf32>
    %336 = arith.addf %335, %334 : vector<2x32xf32>
    %337 = arith.divf %335, %336 : vector<2x32xf32>
    %338 = vector.extract_strided_slice %331 {offsets = [0, 32], sizes = [2, 32], strides = [1, 1]} : vector<2x128xf32> to vector<2x32xf32>
    %339 = arith.negf %338 : vector<2x32xf32>
    %340 = math.exp %339 : vector<2x32xf32>
    %cst_50 = arith.constant 1.000000e+00 : f32
    %341 = vector.broadcast %cst_50 : f32 to vector<2x32xf32>
    %342 = arith.addf %341, %340 : vector<2x32xf32>
    %343 = arith.divf %341, %342 : vector<2x32xf32>
    %344 = vector.extract_strided_slice %331 {offsets = [0, 64], sizes = [2, 32], strides = [1, 1]} : vector<2x128xf32> to vector<2x32xf32>
    %345 = math.tanh %344 : vector<2x32xf32>
    %346 = vector.extract_strided_slice %331 {offsets = [0, 96], sizes = [2, 32], strides = [1, 1]} : vector<2x128xf32> to vector<2x32xf32>
    %347 = arith.negf %346 : vector<2x32xf32>
    %348 = math.exp %347 : vector<2x32xf32>
    %cst_51 = arith.constant 1.000000e+00 : f32
    %349 = vector.broadcast %cst_51 : f32 to vector<2x32xf32>
    %350 = arith.addf %349, %348 : vector<2x32xf32>
    %351 = arith.divf %349, %350 : vector<2x32xf32>
    %352 = arith.mulf %343, %296 : vector<2x32xf32>
    %353 = arith.mulf %337, %345 : vector<2x32xf32>
    %354 = arith.addf %352, %353 : vector<2x32xf32>
    %355 = math.tanh %354 : vector<2x32xf32>
    %356 = arith.mulf %351, %355 : vector<2x32xf32>
    %357 = tpu.concatenate %330, %356 in 1 : vector<2x32xf32>, vector<2x32xf32> -> vector<2x64xf32>
    %358 = vector.extract_strided_slice %5 {offsets = [12, 0], sizes = [2, 128], strides = [1, 1]} : vector<16x256xf32> to vector<2x128xf32>
    %359 = vector.extract_strided_slice %5 {offsets = [2, 128], sizes = [2, 128], strides = [1, 1]} : vector<16x256xf32> to vector<2x128xf32>
    %360 = tpu.concatenate %358, %359 in 1 : vector<2x128xf32>, vector<2x128xf32> -> vector<2x256xf32>
    %cst_52 = arith.constant dense<0.000000e+00> : vector<2x256xf32>
    %361 = tpu.matmul %357, %6, %cst_52 {dimension_numbers = #tpu.dot_dimension_numbers<[1], [0], [0], [1], [0, 0, 1, 1], [], []>} : vector<2x64xf32>, vector<64x256xf32>, vector<2x256xf32> -> vector<2x256xf32>
    %362 = arith.addf %360, %361 : vector<2x256xf32>
    %363 = vector.extract_strided_slice %362 {offsets = [0, 0], sizes = [2, 128], strides = [1, 1]} : vector<2x256xf32> to vector<2x128xf32>
    %364 = vector.extract_strided_slice %363 {offsets = [0, 0], sizes = [2, 32], strides = [1, 1]} : vector<2x128xf32> to vector<2x32xf32>
    %365 = arith.negf %364 : vector<2x32xf32>
    %366 = math.exp %365 : vector<2x32xf32>
    %cst_53 = arith.constant 1.000000e+00 : f32
    %367 = vector.broadcast %cst_53 : f32 to vector<2x32xf32>
    %368 = arith.addf %367, %366 : vector<2x32xf32>
    %369 = arith.divf %367, %368 : vector<2x32xf32>
    %370 = vector.extract_strided_slice %363 {offsets = [0, 32], sizes = [2, 32], strides = [1, 1]} : vector<2x128xf32> to vector<2x32xf32>
    %371 = arith.negf %370 : vector<2x32xf32>
    %372 = math.exp %371 : vector<2x32xf32>
    %cst_54 = arith.constant 1.000000e+00 : f32
    %373 = vector.broadcast %cst_54 : f32 to vector<2x32xf32>
    %374 = arith.addf %373, %372 : vector<2x32xf32>
    %375 = arith.divf %373, %374 : vector<2x32xf32>
    %376 = vector.extract_strided_slice %363 {offsets = [0, 64], sizes = [2, 32], strides = [1, 1]} : vector<2x128xf32> to vector<2x32xf32>
    %377 = math.tanh %376 : vector<2x32xf32>
    %378 = vector.extract_strided_slice %363 {offsets = [0, 96], sizes = [2, 32], strides = [1, 1]} : vector<2x128xf32> to vector<2x32xf32>
    %379 = arith.negf %378 : vector<2x32xf32>
    %380 = math.exp %379 : vector<2x32xf32>
    %cst_55 = arith.constant 1.000000e+00 : f32
    %381 = vector.broadcast %cst_55 : f32 to vector<2x32xf32>
    %382 = arith.addf %381, %380 : vector<2x32xf32>
    %383 = arith.divf %381, %382 : vector<2x32xf32>
    %384 = arith.mulf %375, %328 : vector<2x32xf32>
    %385 = arith.mulf %369, %377 : vector<2x32xf32>
    %386 = arith.addf %384, %385 : vector<2x32xf32>
    %387 = math.tanh %386 : vector<2x32xf32>
    %388 = arith.mulf %383, %387 : vector<2x32xf32>
    %389 = vector.extract_strided_slice %362 {offsets = [0, 128], sizes = [2, 128], strides = [1, 1]} : vector<2x256xf32> to vector<2x128xf32>
    %390 = vector.extract_strided_slice %389 {offsets = [0, 0], sizes = [2, 32], strides = [1, 1]} : vector<2x128xf32> to vector<2x32xf32>
    %391 = arith.negf %390 : vector<2x32xf32>
    %392 = math.exp %391 : vector<2x32xf32>
    %cst_56 = arith.constant 1.000000e+00 : f32
    %393 = vector.broadcast %cst_56 : f32 to vector<2x32xf32>
    %394 = arith.addf %393, %392 : vector<2x32xf32>
    %395 = arith.divf %393, %394 : vector<2x32xf32>
    %396 = vector.extract_strided_slice %389 {offsets = [0, 32], sizes = [2, 32], strides = [1, 1]} : vector<2x128xf32> to vector<2x32xf32>
    %397 = arith.negf %396 : vector<2x32xf32>
    %398 = math.exp %397 : vector<2x32xf32>
    %cst_57 = arith.constant 1.000000e+00 : f32
    %399 = vector.broadcast %cst_57 : f32 to vector<2x32xf32>
    %400 = arith.addf %399, %398 : vector<2x32xf32>
    %401 = arith.divf %399, %400 : vector<2x32xf32>
    %402 = vector.extract_strided_slice %389 {offsets = [0, 64], sizes = [2, 32], strides = [1, 1]} : vector<2x128xf32> to vector<2x32xf32>
    %403 = math.tanh %402 : vector<2x32xf32>
    %404 = vector.extract_strided_slice %389 {offsets = [0, 96], sizes = [2, 32], strides = [1, 1]} : vector<2x128xf32> to vector<2x32xf32>
    %405 = arith.negf %404 : vector<2x32xf32>
    %406 = math.exp %405 : vector<2x32xf32>
    %cst_58 = arith.constant 1.000000e+00 : f32
    %407 = vector.broadcast %cst_58 : f32 to vector<2x32xf32>
    %408 = arith.addf %407, %406 : vector<2x32xf32>
    %409 = arith.divf %407, %408 : vector<2x32xf32>
    %410 = arith.mulf %401, %354 : vector<2x32xf32>
    %411 = arith.mulf %395, %403 : vector<2x32xf32>
    %412 = arith.addf %410, %411 : vector<2x32xf32>
    %413 = math.tanh %412 : vector<2x32xf32>
    %414 = arith.mulf %409, %413 : vector<2x32xf32>
    %415 = tpu.concatenate %388, %414 in 1 : vector<2x32xf32>, vector<2x32xf32> -> vector<2x64xf32>
    %416 = vector.extract_strided_slice %5 {offsets = [14, 0], sizes = [2, 128], strides = [1, 1]} : vector<16x256xf32> to vector<2x128xf32>
    %417 = vector.extract_strided_slice %5 {offsets = [0, 128], sizes = [2, 128], strides = [1, 1]} : vector<16x256xf32> to vector<2x128xf32>
    %418 = tpu.concatenate %416, %417 in 1 : vector<2x128xf32>, vector<2x128xf32> -> vector<2x256xf32>
    %cst_59 = arith.constant dense<0.000000e+00> : vector<2x256xf32>
    %419 = tpu.matmul %415, %6, %cst_59 {dimension_numbers = #tpu.dot_dimension_numbers<[1], [0], [0], [1], [0, 0, 1, 1], [], []>} : vector<2x64xf32>, vector<64x256xf32>, vector<2x256xf32> -> vector<2x256xf32>
    %420 = arith.addf %418, %419 : vector<2x256xf32>
    %421 = vector.extract_strided_slice %420 {offsets = [0, 0], sizes = [2, 128], strides = [1, 1]} : vector<2x256xf32> to vector<2x128xf32>
    %422 = vector.extract_strided_slice %421 {offsets = [0, 0], sizes = [2, 32], strides = [1, 1]} : vector<2x128xf32> to vector<2x32xf32>
    %423 = arith.negf %422 : vector<2x32xf32>
    %424 = math.exp %423 : vector<2x32xf32>
    %cst_60 = arith.constant 1.000000e+00 : f32
    %425 = vector.broadcast %cst_60 : f32 to vector<2x32xf32>
    %426 = arith.addf %425, %424 : vector<2x32xf32>
    %427 = arith.divf %425, %426 : vector<2x32xf32>
    %428 = vector.extract_strided_slice %421 {offsets = [0, 32], sizes = [2, 32], strides = [1, 1]} : vector<2x128xf32> to vector<2x32xf32>
    %429 = arith.negf %428 : vector<2x32xf32>
    %430 = math.exp %429 : vector<2x32xf32>
    %cst_61 = arith.constant 1.000000e+00 : f32
    %431 = vector.broadcast %cst_61 : f32 to vector<2x32xf32>
    %432 = arith.addf %431, %430 : vector<2x32xf32>
    %433 = arith.divf %431, %432 : vector<2x32xf32>
    %434 = vector.extract_strided_slice %421 {offsets = [0, 64], sizes = [2, 32], strides = [1, 1]} : vector<2x128xf32> to vector<2x32xf32>
    %435 = math.tanh %434 : vector<2x32xf32>
    %436 = vector.extract_strided_slice %421 {offsets = [0, 96], sizes = [2, 32], strides = [1, 1]} : vector<2x128xf32> to vector<2x32xf32>
    %437 = arith.negf %436 : vector<2x32xf32>
    %438 = math.exp %437 : vector<2x32xf32>
    %cst_62 = arith.constant 1.000000e+00 : f32
    %439 = vector.broadcast %cst_62 : f32 to vector<2x32xf32>
    %440 = arith.addf %439, %438 : vector<2x32xf32>
    %441 = arith.divf %439, %440 : vector<2x32xf32>
    %442 = arith.mulf %433, %386 : vector<2x32xf32>
    %443 = arith.mulf %427, %435 : vector<2x32xf32>
    %444 = arith.addf %442, %443 : vector<2x32xf32>
    %445 = math.tanh %444 : vector<2x32xf32>
    %446 = arith.mulf %441, %445 : vector<2x32xf32>
    %447 = vector.extract_strided_slice %420 {offsets = [0, 128], sizes = [2, 128], strides = [1, 1]} : vector<2x256xf32> to vector<2x128xf32>
    %448 = vector.extract_strided_slice %447 {offsets = [0, 0], sizes = [2, 32], strides = [1, 1]} : vector<2x128xf32> to vector<2x32xf32>
    %449 = arith.negf %448 : vector<2x32xf32>
    %450 = math.exp %449 : vector<2x32xf32>
    %cst_63 = arith.constant 1.000000e+00 : f32
    %451 = vector.broadcast %cst_63 : f32 to vector<2x32xf32>
    %452 = arith.addf %451, %450 : vector<2x32xf32>
    %453 = arith.divf %451, %452 : vector<2x32xf32>
    %454 = vector.extract_strided_slice %447 {offsets = [0, 32], sizes = [2, 32], strides = [1, 1]} : vector<2x128xf32> to vector<2x32xf32>
    %455 = arith.negf %454 : vector<2x32xf32>
    %456 = math.exp %455 : vector<2x32xf32>
    %cst_64 = arith.constant 1.000000e+00 : f32
    %457 = vector.broadcast %cst_64 : f32 to vector<2x32xf32>
    %458 = arith.addf %457, %456 : vector<2x32xf32>
    %459 = arith.divf %457, %458 : vector<2x32xf32>
    %460 = vector.extract_strided_slice %447 {offsets = [0, 64], sizes = [2, 32], strides = [1, 1]} : vector<2x128xf32> to vector<2x32xf32>
    %461 = math.tanh %460 : vector<2x32xf32>
    %462 = vector.extract_strided_slice %447 {offsets = [0, 96], sizes = [2, 32], strides = [1, 1]} : vector<2x128xf32> to vector<2x32xf32>
    %463 = arith.negf %462 : vector<2x32xf32>
    %464 = math.exp %463 : vector<2x32xf32>
    %cst_65 = arith.constant 1.000000e+00 : f32
    %465 = vector.broadcast %cst_65 : f32 to vector<2x32xf32>
    %466 = arith.addf %465, %464 : vector<2x32xf32>
    %467 = arith.divf %465, %466 : vector<2x32xf32>
    %468 = arith.mulf %459, %412 : vector<2x32xf32>
    %469 = arith.mulf %453, %461 : vector<2x32xf32>
    %470 = arith.addf %468, %469 : vector<2x32xf32>
    %471 = math.tanh %470 : vector<2x32xf32>
    %472 = arith.mulf %467, %471 : vector<2x32xf32>
    %473 = tpu.concatenate %40, %98, %156, %214, %272, %330, %388, %446 in 0 : vector<2x32xf32>, vector<2x32xf32>, vector<2x32xf32>, vector<2x32xf32>, vector<2x32xf32>, vector<2x32xf32>, vector<2x32xf32>, vector<2x32xf32> -> vector<16x32xf32>
    %474 = tpu.concatenate %472, %414, %356, %298, %240, %182, %124, %66 in 0 : vector<2x32xf32>, vector<2x32xf32>, vector<2x32xf32>, vector<2x32xf32>, vector<2x32xf32>, vector<2x32xf32>, vector<2x32xf32>, vector<2x32xf32> -> vector<16x32xf32>
    %c0_66 = arith.constant 0 : index
    %c0_67 = arith.constant 0 : index
    %475 = vector.load %arg6[%c0_66, %c0_67] : memref<1x256xf32, #tpu.memory_space<vmem>>, vector<1x256xf32>
    %c0_68 = arith.constant 0 : index
    %c0_69 = arith.constant 0 : index
    %476 = vector.load %arg4[%c0_68, %c0_69] : memref<64x256xf32, #tpu.memory_space<vmem>>, vector<32x256xf32>
    %cst_70 = arith.constant dense<0.000000e+00> : vector<16x256xf32>
    %477 = tpu.matmul %473, %476, %cst_70 {dimension_numbers = #tpu.dot_dimension_numbers<[1], [0], [0], [1], [0, 0, 1, 1], [], []>} : vector<16x32xf32>, vector<32x256xf32>, vector<16x256xf32> -> vector<16x256xf32>
    %478 = vector.broadcast %475 : vector<1x256xf32> to vector<16x256xf32>
    %479 = arith.addf %478, %477 : vector<16x256xf32>
    %c32 = arith.constant 32 : index
    %c0_71 = arith.constant 0 : index
    %480 = vector.load %arg4[%c32, %c0_71] : memref<64x256xf32, #tpu.memory_space<vmem>>, vector<32x256xf32>
    %cst_72 = arith.constant dense<0.000000e+00> : vector<16x256xf32>
    %481 = tpu.matmul %474, %480, %cst_72 {dimension_numbers = #tpu.dot_dimension_numbers<[1], [0], [0], [1], [0, 0, 1, 1], [], []>} : vector<16x32xf32>, vector<32x256xf32>, vector<16x256xf32> -> vector<16x256xf32>
    %482 = arith.addf %479, %481 : vector<16x256xf32>
    %c0_73 = arith.constant 0 : index
    %c0_74 = arith.constant 0 : index
    %483 = vector.load %arg5[%c0_73, %c0_74] : memref<64x256xf32, #tpu.memory_space<vmem>>, vector<64x256xf32>
    %cst_75 = arith.constant 0.000000e+00 : f32
    %484 = vector.broadcast %cst_75 : f32 to vector<2x64xf32>
    %cst_76 = arith.constant 0.000000e+00 : f32
    %485 = vector.broadcast %cst_76 : f32 to vector<2x32xf32>
    %cst_77 = arith.constant 0.000000e+00 : f32
    %486 = vector.broadcast %cst_77 : f32 to vector<2x32xf32>
    %487 = vector.extract_strided_slice %482 {offsets = [0, 0], sizes = [2, 128], strides = [1, 1]} : vector<16x256xf32> to vector<2x128xf32>
    %488 = vector.extract_strided_slice %482 {offsets = [14, 128], sizes = [2, 128], strides = [1, 1]} : vector<16x256xf32> to vector<2x128xf32>
    %489 = tpu.concatenate %487, %488 in 1 : vector<2x128xf32>, vector<2x128xf32> -> vector<2x256xf32>
    %cst_78 = arith.constant dense<0.000000e+00> : vector<2x256xf32>
    %490 = tpu.matmul %484, %483, %cst_78 {dimension_numbers = #tpu.dot_dimension_numbers<[1], [0], [0], [1], [0, 0, 1, 1], [], []>} : vector<2x64xf32>, vector<64x256xf32>, vector<2x256xf32> -> vector<2x256xf32>
    %491 = arith.addf %489, %490 : vector<2x256xf32>
    %492 = vector.extract_strided_slice %491 {offsets = [0, 0], sizes = [2, 128], strides = [1, 1]} : vector<2x256xf32> to vector<2x128xf32>
    %493 = vector.extract_strided_slice %492 {offsets = [0, 0], sizes = [2, 32], strides = [1, 1]} : vector<2x128xf32> to vector<2x32xf32>
    %494 = arith.negf %493 : vector<2x32xf32>
    %495 = math.exp %494 : vector<2x32xf32>
    %cst_79 = arith.constant 1.000000e+00 : f32
    %496 = vector.broadcast %cst_79 : f32 to vector<2x32xf32>
    %497 = arith.addf %496, %495 : vector<2x32xf32>
    %498 = arith.divf %496, %497 : vector<2x32xf32>
    %499 = vector.extract_strided_slice %492 {offsets = [0, 32], sizes = [2, 32], strides = [1, 1]} : vector<2x128xf32> to vector<2x32xf32>
    %500 = arith.negf %499 : vector<2x32xf32>
    %501 = math.exp %500 : vector<2x32xf32>
    %cst_80 = arith.constant 1.000000e+00 : f32
    %502 = vector.broadcast %cst_80 : f32 to vector<2x32xf32>
    %503 = arith.addf %502, %501 : vector<2x32xf32>
    %504 = arith.divf %502, %503 : vector<2x32xf32>
    %505 = vector.extract_strided_slice %492 {offsets = [0, 64], sizes = [2, 32], strides = [1, 1]} : vector<2x128xf32> to vector<2x32xf32>
    %506 = math.tanh %505 : vector<2x32xf32>
    %507 = vector.extract_strided_slice %492 {offsets = [0, 96], sizes = [2, 32], strides = [1, 1]} : vector<2x128xf32> to vector<2x32xf32>
    %508 = arith.negf %507 : vector<2x32xf32>
    %509 = math.exp %508 : vector<2x32xf32>
    %cst_81 = arith.constant 1.000000e+00 : f32
    %510 = vector.broadcast %cst_81 : f32 to vector<2x32xf32>
    %511 = arith.addf %510, %509 : vector<2x32xf32>
    %512 = arith.divf %510, %511 : vector<2x32xf32>
    %513 = arith.mulf %504, %485 : vector<2x32xf32>
    %514 = arith.mulf %498, %506 : vector<2x32xf32>
    %515 = arith.addf %513, %514 : vector<2x32xf32>
    %516 = math.tanh %515 : vector<2x32xf32>
    %517 = arith.mulf %512, %516 : vector<2x32xf32>
    %518 = vector.extract_strided_slice %491 {offsets = [0, 128], sizes = [2, 128], strides = [1, 1]} : vector<2x256xf32> to vector<2x128xf32>
    %519 = vector.extract_strided_slice %518 {offsets = [0, 0], sizes = [2, 32], strides = [1, 1]} : vector<2x128xf32> to vector<2x32xf32>
    %520 = arith.negf %519 : vector<2x32xf32>
    %521 = math.exp %520 : vector<2x32xf32>
    %cst_82 = arith.constant 1.000000e+00 : f32
    %522 = vector.broadcast %cst_82 : f32 to vector<2x32xf32>
    %523 = arith.addf %522, %521 : vector<2x32xf32>
    %524 = arith.divf %522, %523 : vector<2x32xf32>
    %525 = vector.extract_strided_slice %518 {offsets = [0, 32], sizes = [2, 32], strides = [1, 1]} : vector<2x128xf32> to vector<2x32xf32>
    %526 = arith.negf %525 : vector<2x32xf32>
    %527 = math.exp %526 : vector<2x32xf32>
    %cst_83 = arith.constant 1.000000e+00 : f32
    %528 = vector.broadcast %cst_83 : f32 to vector<2x32xf32>
    %529 = arith.addf %528, %527 : vector<2x32xf32>
    %530 = arith.divf %528, %529 : vector<2x32xf32>
    %531 = vector.extract_strided_slice %518 {offsets = [0, 64], sizes = [2, 32], strides = [1, 1]} : vector<2x128xf32> to vector<2x32xf32>
    %532 = math.tanh %531 : vector<2x32xf32>
    %533 = vector.extract_strided_slice %518 {offsets = [0, 96], sizes = [2, 32], strides = [1, 1]} : vector<2x128xf32> to vector<2x32xf32>
    %534 = arith.negf %533 : vector<2x32xf32>
    %535 = math.exp %534 : vector<2x32xf32>
    %cst_84 = arith.constant 1.000000e+00 : f32
    %536 = vector.broadcast %cst_84 : f32 to vector<2x32xf32>
    %537 = arith.addf %536, %535 : vector<2x32xf32>
    %538 = arith.divf %536, %537 : vector<2x32xf32>
    %539 = arith.mulf %530, %486 : vector<2x32xf32>
    %540 = arith.mulf %524, %532 : vector<2x32xf32>
    %541 = arith.addf %539, %540 : vector<2x32xf32>
    %542 = math.tanh %541 : vector<2x32xf32>
    %543 = arith.mulf %538, %542 : vector<2x32xf32>
    %544 = tpu.concatenate %517, %543 in 1 : vector<2x32xf32>, vector<2x32xf32> -> vector<2x64xf32>
    %545 = vector.extract_strided_slice %482 {offsets = [2, 0], sizes = [2, 128], strides = [1, 1]} : vector<16x256xf32> to vector<2x128xf32>
    %546 = vector.extract_strided_slice %482 {offsets = [12, 128], sizes = [2, 128], strides = [1, 1]} : vector<16x256xf32> to vector<2x128xf32>
    %547 = tpu.concatenate %545, %546 in 1 : vector<2x128xf32>, vector<2x128xf32> -> vector<2x256xf32>
    %cst_85 = arith.constant dense<0.000000e+00> : vector<2x256xf32>
    %548 = tpu.matmul %544, %483, %cst_85 {dimension_numbers = #tpu.dot_dimension_numbers<[1], [0], [0], [1], [0, 0, 1, 1], [], []>} : vector<2x64xf32>, vector<64x256xf32>, vector<2x256xf32> -> vector<2x256xf32>
    %549 = arith.addf %547, %548 : vector<2x256xf32>
    %550 = vector.extract_strided_slice %549 {offsets = [0, 0], sizes = [2, 128], strides = [1, 1]} : vector<2x256xf32> to vector<2x128xf32>
    %551 = vector.extract_strided_slice %550 {offsets = [0, 0], sizes = [2, 32], strides = [1, 1]} : vector<2x128xf32> to vector<2x32xf32>
    %552 = arith.negf %551 : vector<2x32xf32>
    %553 = math.exp %552 : vector<2x32xf32>
    %cst_86 = arith.constant 1.000000e+00 : f32
    %554 = vector.broadcast %cst_86 : f32 to vector<2x32xf32>
    %555 = arith.addf %554, %553 : vector<2x32xf32>
    %556 = arith.divf %554, %555 : vector<2x32xf32>
    %557 = vector.extract_strided_slice %550 {offsets = [0, 32], sizes = [2, 32], strides = [1, 1]} : vector<2x128xf32> to vector<2x32xf32>
    %558 = arith.negf %557 : vector<2x32xf32>
    %559 = math.exp %558 : vector<2x32xf32>
    %cst_87 = arith.constant 1.000000e+00 : f32
    %560 = vector.broadcast %cst_87 : f32 to vector<2x32xf32>
    %561 = arith.addf %560, %559 : vector<2x32xf32>
    %562 = arith.divf %560, %561 : vector<2x32xf32>
    %563 = vector.extract_strided_slice %550 {offsets = [0, 64], sizes = [2, 32], strides = [1, 1]} : vector<2x128xf32> to vector<2x32xf32>
    %564 = math.tanh %563 : vector<2x32xf32>
    %565 = vector.extract_strided_slice %550 {offsets = [0, 96], sizes = [2, 32], strides = [1, 1]} : vector<2x128xf32> to vector<2x32xf32>
    %566 = arith.negf %565 : vector<2x32xf32>
    %567 = math.exp %566 : vector<2x32xf32>
    %cst_88 = arith.constant 1.000000e+00 : f32
    %568 = vector.broadcast %cst_88 : f32 to vector<2x32xf32>
    %569 = arith.addf %568, %567 : vector<2x32xf32>
    %570 = arith.divf %568, %569 : vector<2x32xf32>
    %571 = arith.mulf %562, %515 : vector<2x32xf32>
    %572 = arith.mulf %556, %564 : vector<2x32xf32>
    %573 = arith.addf %571, %572 : vector<2x32xf32>
    %574 = math.tanh %573 : vector<2x32xf32>
    %575 = arith.mulf %570, %574 : vector<2x32xf32>
    %576 = vector.extract_strided_slice %549 {offsets = [0, 128], sizes = [2, 128], strides = [1, 1]} : vector<2x256xf32> to vector<2x128xf32>
    %577 = vector.extract_strided_slice %576 {offsets = [0, 0], sizes = [2, 32], strides = [1, 1]} : vector<2x128xf32> to vector<2x32xf32>
    %578 = arith.negf %577 : vector<2x32xf32>
    %579 = math.exp %578 : vector<2x32xf32>
    %cst_89 = arith.constant 1.000000e+00 : f32
    %580 = vector.broadcast %cst_89 : f32 to vector<2x32xf32>
    %581 = arith.addf %580, %579 : vector<2x32xf32>
    %582 = arith.divf %580, %581 : vector<2x32xf32>
    %583 = vector.extract_strided_slice %576 {offsets = [0, 32], sizes = [2, 32], strides = [1, 1]} : vector<2x128xf32> to vector<2x32xf32>
    %584 = arith.negf %583 : vector<2x32xf32>
    %585 = math.exp %584 : vector<2x32xf32>
    %cst_90 = arith.constant 1.000000e+00 : f32
    %586 = vector.broadcast %cst_90 : f32 to vector<2x32xf32>
    %587 = arith.addf %586, %585 : vector<2x32xf32>
    %588 = arith.divf %586, %587 : vector<2x32xf32>
    %589 = vector.extract_strided_slice %576 {offsets = [0, 64], sizes = [2, 32], strides = [1, 1]} : vector<2x128xf32> to vector<2x32xf32>
    %590 = math.tanh %589 : vector<2x32xf32>
    %591 = vector.extract_strided_slice %576 {offsets = [0, 96], sizes = [2, 32], strides = [1, 1]} : vector<2x128xf32> to vector<2x32xf32>
    %592 = arith.negf %591 : vector<2x32xf32>
    %593 = math.exp %592 : vector<2x32xf32>
    %cst_91 = arith.constant 1.000000e+00 : f32
    %594 = vector.broadcast %cst_91 : f32 to vector<2x32xf32>
    %595 = arith.addf %594, %593 : vector<2x32xf32>
    %596 = arith.divf %594, %595 : vector<2x32xf32>
    %597 = arith.mulf %588, %541 : vector<2x32xf32>
    %598 = arith.mulf %582, %590 : vector<2x32xf32>
    %599 = arith.addf %597, %598 : vector<2x32xf32>
    %600 = math.tanh %599 : vector<2x32xf32>
    %601 = arith.mulf %596, %600 : vector<2x32xf32>
    %602 = tpu.concatenate %575, %601 in 1 : vector<2x32xf32>, vector<2x32xf32> -> vector<2x64xf32>
    %603 = vector.extract_strided_slice %482 {offsets = [4, 0], sizes = [2, 128], strides = [1, 1]} : vector<16x256xf32> to vector<2x128xf32>
    %604 = vector.extract_strided_slice %482 {offsets = [10, 128], sizes = [2, 128], strides = [1, 1]} : vector<16x256xf32> to vector<2x128xf32>
    %605 = tpu.concatenate %603, %604 in 1 : vector<2x128xf32>, vector<2x128xf32> -> vector<2x256xf32>
    %cst_92 = arith.constant dense<0.000000e+00> : vector<2x256xf32>
    %606 = tpu.matmul %602, %483, %cst_92 {dimension_numbers = #tpu.dot_dimension_numbers<[1], [0], [0], [1], [0, 0, 1, 1], [], []>} : vector<2x64xf32>, vector<64x256xf32>, vector<2x256xf32> -> vector<2x256xf32>
    %607 = arith.addf %605, %606 : vector<2x256xf32>
    %608 = vector.extract_strided_slice %607 {offsets = [0, 0], sizes = [2, 128], strides = [1, 1]} : vector<2x256xf32> to vector<2x128xf32>
    %609 = vector.extract_strided_slice %608 {offsets = [0, 0], sizes = [2, 32], strides = [1, 1]} : vector<2x128xf32> to vector<2x32xf32>
    %610 = arith.negf %609 : vector<2x32xf32>
    %611 = math.exp %610 : vector<2x32xf32>
    %cst_93 = arith.constant 1.000000e+00 : f32
    %612 = vector.broadcast %cst_93 : f32 to vector<2x32xf32>
    %613 = arith.addf %612, %611 : vector<2x32xf32>
    %614 = arith.divf %612, %613 : vector<2x32xf32>
    %615 = vector.extract_strided_slice %608 {offsets = [0, 32], sizes = [2, 32], strides = [1, 1]} : vector<2x128xf32> to vector<2x32xf32>
    %616 = arith.negf %615 : vector<2x32xf32>
    %617 = math.exp %616 : vector<2x32xf32>
    %cst_94 = arith.constant 1.000000e+00 : f32
    %618 = vector.broadcast %cst_94 : f32 to vector<2x32xf32>
    %619 = arith.addf %618, %617 : vector<2x32xf32>
    %620 = arith.divf %618, %619 : vector<2x32xf32>
    %621 = vector.extract_strided_slice %608 {offsets = [0, 64], sizes = [2, 32], strides = [1, 1]} : vector<2x128xf32> to vector<2x32xf32>
    %622 = math.tanh %621 : vector<2x32xf32>
    %623 = vector.extract_strided_slice %608 {offsets = [0, 96], sizes = [2, 32], strides = [1, 1]} : vector<2x128xf32> to vector<2x32xf32>
    %624 = arith.negf %623 : vector<2x32xf32>
    %625 = math.exp %624 : vector<2x32xf32>
    %cst_95 = arith.constant 1.000000e+00 : f32
    %626 = vector.broadcast %cst_95 : f32 to vector<2x32xf32>
    %627 = arith.addf %626, %625 : vector<2x32xf32>
    %628 = arith.divf %626, %627 : vector<2x32xf32>
    %629 = arith.mulf %620, %573 : vector<2x32xf32>
    %630 = arith.mulf %614, %622 : vector<2x32xf32>
    %631 = arith.addf %629, %630 : vector<2x32xf32>
    %632 = math.tanh %631 : vector<2x32xf32>
    %633 = arith.mulf %628, %632 : vector<2x32xf32>
    %634 = vector.extract_strided_slice %607 {offsets = [0, 128], sizes = [2, 128], strides = [1, 1]} : vector<2x256xf32> to vector<2x128xf32>
    %635 = vector.extract_strided_slice %634 {offsets = [0, 0], sizes = [2, 32], strides = [1, 1]} : vector<2x128xf32> to vector<2x32xf32>
    %636 = arith.negf %635 : vector<2x32xf32>
    %637 = math.exp %636 : vector<2x32xf32>
    %cst_96 = arith.constant 1.000000e+00 : f32
    %638 = vector.broadcast %cst_96 : f32 to vector<2x32xf32>
    %639 = arith.addf %638, %637 : vector<2x32xf32>
    %640 = arith.divf %638, %639 : vector<2x32xf32>
    %641 = vector.extract_strided_slice %634 {offsets = [0, 32], sizes = [2, 32], strides = [1, 1]} : vector<2x128xf32> to vector<2x32xf32>
    %642 = arith.negf %641 : vector<2x32xf32>
    %643 = math.exp %642 : vector<2x32xf32>
    %cst_97 = arith.constant 1.000000e+00 : f32
    %644 = vector.broadcast %cst_97 : f32 to vector<2x32xf32>
    %645 = arith.addf %644, %643 : vector<2x32xf32>
    %646 = arith.divf %644, %645 : vector<2x32xf32>
    %647 = vector.extract_strided_slice %634 {offsets = [0, 64], sizes = [2, 32], strides = [1, 1]} : vector<2x128xf32> to vector<2x32xf32>
    %648 = math.tanh %647 : vector<2x32xf32>
    %649 = vector.extract_strided_slice %634 {offsets = [0, 96], sizes = [2, 32], strides = [1, 1]} : vector<2x128xf32> to vector<2x32xf32>
    %650 = arith.negf %649 : vector<2x32xf32>
    %651 = math.exp %650 : vector<2x32xf32>
    %cst_98 = arith.constant 1.000000e+00 : f32
    %652 = vector.broadcast %cst_98 : f32 to vector<2x32xf32>
    %653 = arith.addf %652, %651 : vector<2x32xf32>
    %654 = arith.divf %652, %653 : vector<2x32xf32>
    %655 = arith.mulf %646, %599 : vector<2x32xf32>
    %656 = arith.mulf %640, %648 : vector<2x32xf32>
    %657 = arith.addf %655, %656 : vector<2x32xf32>
    %658 = math.tanh %657 : vector<2x32xf32>
    %659 = arith.mulf %654, %658 : vector<2x32xf32>
    %660 = tpu.concatenate %633, %659 in 1 : vector<2x32xf32>, vector<2x32xf32> -> vector<2x64xf32>
    %661 = vector.extract_strided_slice %482 {offsets = [6, 0], sizes = [2, 128], strides = [1, 1]} : vector<16x256xf32> to vector<2x128xf32>
    %662 = vector.extract_strided_slice %482 {offsets = [8, 128], sizes = [2, 128], strides = [1, 1]} : vector<16x256xf32> to vector<2x128xf32>
    %663 = tpu.concatenate %661, %662 in 1 : vector<2x128xf32>, vector<2x128xf32> -> vector<2x256xf32>
    %cst_99 = arith.constant dense<0.000000e+00> : vector<2x256xf32>
    %664 = tpu.matmul %660, %483, %cst_99 {dimension_numbers = #tpu.dot_dimension_numbers<[1], [0], [0], [1], [0, 0, 1, 1], [], []>} : vector<2x64xf32>, vector<64x256xf32>, vector<2x256xf32> -> vector<2x256xf32>
    %665 = arith.addf %663, %664 : vector<2x256xf32>
    %666 = vector.extract_strided_slice %665 {offsets = [0, 0], sizes = [2, 128], strides = [1, 1]} : vector<2x256xf32> to vector<2x128xf32>
    %667 = vector.extract_strided_slice %666 {offsets = [0, 0], sizes = [2, 32], strides = [1, 1]} : vector<2x128xf32> to vector<2x32xf32>
    %668 = arith.negf %667 : vector<2x32xf32>
    %669 = math.exp %668 : vector<2x32xf32>
    %cst_100 = arith.constant 1.000000e+00 : f32
    %670 = vector.broadcast %cst_100 : f32 to vector<2x32xf32>
    %671 = arith.addf %670, %669 : vector<2x32xf32>
    %672 = arith.divf %670, %671 : vector<2x32xf32>
    %673 = vector.extract_strided_slice %666 {offsets = [0, 32], sizes = [2, 32], strides = [1, 1]} : vector<2x128xf32> to vector<2x32xf32>
    %674 = arith.negf %673 : vector<2x32xf32>
    %675 = math.exp %674 : vector<2x32xf32>
    %cst_101 = arith.constant 1.000000e+00 : f32
    %676 = vector.broadcast %cst_101 : f32 to vector<2x32xf32>
    %677 = arith.addf %676, %675 : vector<2x32xf32>
    %678 = arith.divf %676, %677 : vector<2x32xf32>
    %679 = vector.extract_strided_slice %666 {offsets = [0, 64], sizes = [2, 32], strides = [1, 1]} : vector<2x128xf32> to vector<2x32xf32>
    %680 = math.tanh %679 : vector<2x32xf32>
    %681 = vector.extract_strided_slice %666 {offsets = [0, 96], sizes = [2, 32], strides = [1, 1]} : vector<2x128xf32> to vector<2x32xf32>
    %682 = arith.negf %681 : vector<2x32xf32>
    %683 = math.exp %682 : vector<2x32xf32>
    %cst_102 = arith.constant 1.000000e+00 : f32
    %684 = vector.broadcast %cst_102 : f32 to vector<2x32xf32>
    %685 = arith.addf %684, %683 : vector<2x32xf32>
    %686 = arith.divf %684, %685 : vector<2x32xf32>
    %687 = arith.mulf %678, %631 : vector<2x32xf32>
    %688 = arith.mulf %672, %680 : vector<2x32xf32>
    %689 = arith.addf %687, %688 : vector<2x32xf32>
    %690 = math.tanh %689 : vector<2x32xf32>
    %691 = arith.mulf %686, %690 : vector<2x32xf32>
    %692 = vector.extract_strided_slice %665 {offsets = [0, 128], sizes = [2, 128], strides = [1, 1]} : vector<2x256xf32> to vector<2x128xf32>
    %693 = vector.extract_strided_slice %692 {offsets = [0, 0], sizes = [2, 32], strides = [1, 1]} : vector<2x128xf32> to vector<2x32xf32>
    %694 = arith.negf %693 : vector<2x32xf32>
    %695 = math.exp %694 : vector<2x32xf32>
    %cst_103 = arith.constant 1.000000e+00 : f32
    %696 = vector.broadcast %cst_103 : f32 to vector<2x32xf32>
    %697 = arith.addf %696, %695 : vector<2x32xf32>
    %698 = arith.divf %696, %697 : vector<2x32xf32>
    %699 = vector.extract_strided_slice %692 {offsets = [0, 32], sizes = [2, 32], strides = [1, 1]} : vector<2x128xf32> to vector<2x32xf32>
    %700 = arith.negf %699 : vector<2x32xf32>
    %701 = math.exp %700 : vector<2x32xf32>
    %cst_104 = arith.constant 1.000000e+00 : f32
    %702 = vector.broadcast %cst_104 : f32 to vector<2x32xf32>
    %703 = arith.addf %702, %701 : vector<2x32xf32>
    %704 = arith.divf %702, %703 : vector<2x32xf32>
    %705 = vector.extract_strided_slice %692 {offsets = [0, 64], sizes = [2, 32], strides = [1, 1]} : vector<2x128xf32> to vector<2x32xf32>
    %706 = math.tanh %705 : vector<2x32xf32>
    %707 = vector.extract_strided_slice %692 {offsets = [0, 96], sizes = [2, 32], strides = [1, 1]} : vector<2x128xf32> to vector<2x32xf32>
    %708 = arith.negf %707 : vector<2x32xf32>
    %709 = math.exp %708 : vector<2x32xf32>
    %cst_105 = arith.constant 1.000000e+00 : f32
    %710 = vector.broadcast %cst_105 : f32 to vector<2x32xf32>
    %711 = arith.addf %710, %709 : vector<2x32xf32>
    %712 = arith.divf %710, %711 : vector<2x32xf32>
    %713 = arith.mulf %704, %657 : vector<2x32xf32>
    %714 = arith.mulf %698, %706 : vector<2x32xf32>
    %715 = arith.addf %713, %714 : vector<2x32xf32>
    %716 = math.tanh %715 : vector<2x32xf32>
    %717 = arith.mulf %712, %716 : vector<2x32xf32>
    %718 = tpu.concatenate %691, %717 in 1 : vector<2x32xf32>, vector<2x32xf32> -> vector<2x64xf32>
    %719 = vector.extract_strided_slice %482 {offsets = [8, 0], sizes = [2, 128], strides = [1, 1]} : vector<16x256xf32> to vector<2x128xf32>
    %720 = vector.extract_strided_slice %482 {offsets = [6, 128], sizes = [2, 128], strides = [1, 1]} : vector<16x256xf32> to vector<2x128xf32>
    %721 = tpu.concatenate %719, %720 in 1 : vector<2x128xf32>, vector<2x128xf32> -> vector<2x256xf32>
    %cst_106 = arith.constant dense<0.000000e+00> : vector<2x256xf32>
    %722 = tpu.matmul %718, %483, %cst_106 {dimension_numbers = #tpu.dot_dimension_numbers<[1], [0], [0], [1], [0, 0, 1, 1], [], []>} : vector<2x64xf32>, vector<64x256xf32>, vector<2x256xf32> -> vector<2x256xf32>
    %723 = arith.addf %721, %722 : vector<2x256xf32>
    %724 = vector.extract_strided_slice %723 {offsets = [0, 0], sizes = [2, 128], strides = [1, 1]} : vector<2x256xf32> to vector<2x128xf32>
    %725 = vector.extract_strided_slice %724 {offsets = [0, 0], sizes = [2, 32], strides = [1, 1]} : vector<2x128xf32> to vector<2x32xf32>
    %726 = arith.negf %725 : vector<2x32xf32>
    %727 = math.exp %726 : vector<2x32xf32>
    %cst_107 = arith.constant 1.000000e+00 : f32
    %728 = vector.broadcast %cst_107 : f32 to vector<2x32xf32>
    %729 = arith.addf %728, %727 : vector<2x32xf32>
    %730 = arith.divf %728, %729 : vector<2x32xf32>
    %731 = vector.extract_strided_slice %724 {offsets = [0, 32], sizes = [2, 32], strides = [1, 1]} : vector<2x128xf32> to vector<2x32xf32>
    %732 = arith.negf %731 : vector<2x32xf32>
    %733 = math.exp %732 : vector<2x32xf32>
    %cst_108 = arith.constant 1.000000e+00 : f32
    %734 = vector.broadcast %cst_108 : f32 to vector<2x32xf32>
    %735 = arith.addf %734, %733 : vector<2x32xf32>
    %736 = arith.divf %734, %735 : vector<2x32xf32>
    %737 = vector.extract_strided_slice %724 {offsets = [0, 64], sizes = [2, 32], strides = [1, 1]} : vector<2x128xf32> to vector<2x32xf32>
    %738 = math.tanh %737 : vector<2x32xf32>
    %739 = vector.extract_strided_slice %724 {offsets = [0, 96], sizes = [2, 32], strides = [1, 1]} : vector<2x128xf32> to vector<2x32xf32>
    %740 = arith.negf %739 : vector<2x32xf32>
    %741 = math.exp %740 : vector<2x32xf32>
    %cst_109 = arith.constant 1.000000e+00 : f32
    %742 = vector.broadcast %cst_109 : f32 to vector<2x32xf32>
    %743 = arith.addf %742, %741 : vector<2x32xf32>
    %744 = arith.divf %742, %743 : vector<2x32xf32>
    %745 = arith.mulf %736, %689 : vector<2x32xf32>
    %746 = arith.mulf %730, %738 : vector<2x32xf32>
    %747 = arith.addf %745, %746 : vector<2x32xf32>
    %748 = math.tanh %747 : vector<2x32xf32>
    %749 = arith.mulf %744, %748 : vector<2x32xf32>
    %750 = vector.extract_strided_slice %723 {offsets = [0, 128], sizes = [2, 128], strides = [1, 1]} : vector<2x256xf32> to vector<2x128xf32>
    %751 = vector.extract_strided_slice %750 {offsets = [0, 0], sizes = [2, 32], strides = [1, 1]} : vector<2x128xf32> to vector<2x32xf32>
    %752 = arith.negf %751 : vector<2x32xf32>
    %753 = math.exp %752 : vector<2x32xf32>
    %cst_110 = arith.constant 1.000000e+00 : f32
    %754 = vector.broadcast %cst_110 : f32 to vector<2x32xf32>
    %755 = arith.addf %754, %753 : vector<2x32xf32>
    %756 = arith.divf %754, %755 : vector<2x32xf32>
    %757 = vector.extract_strided_slice %750 {offsets = [0, 32], sizes = [2, 32], strides = [1, 1]} : vector<2x128xf32> to vector<2x32xf32>
    %758 = arith.negf %757 : vector<2x32xf32>
    %759 = math.exp %758 : vector<2x32xf32>
    %cst_111 = arith.constant 1.000000e+00 : f32
    %760 = vector.broadcast %cst_111 : f32 to vector<2x32xf32>
    %761 = arith.addf %760, %759 : vector<2x32xf32>
    %762 = arith.divf %760, %761 : vector<2x32xf32>
    %763 = vector.extract_strided_slice %750 {offsets = [0, 64], sizes = [2, 32], strides = [1, 1]} : vector<2x128xf32> to vector<2x32xf32>
    %764 = math.tanh %763 : vector<2x32xf32>
    %765 = vector.extract_strided_slice %750 {offsets = [0, 96], sizes = [2, 32], strides = [1, 1]} : vector<2x128xf32> to vector<2x32xf32>
    %766 = arith.negf %765 : vector<2x32xf32>
    %767 = math.exp %766 : vector<2x32xf32>
    %cst_112 = arith.constant 1.000000e+00 : f32
    %768 = vector.broadcast %cst_112 : f32 to vector<2x32xf32>
    %769 = arith.addf %768, %767 : vector<2x32xf32>
    %770 = arith.divf %768, %769 : vector<2x32xf32>
    %771 = arith.mulf %762, %715 : vector<2x32xf32>
    %772 = arith.mulf %756, %764 : vector<2x32xf32>
    %773 = arith.addf %771, %772 : vector<2x32xf32>
    %774 = math.tanh %773 : vector<2x32xf32>
    %775 = arith.mulf %770, %774 : vector<2x32xf32>
    %776 = tpu.concatenate %749, %775 in 1 : vector<2x32xf32>, vector<2x32xf32> -> vector<2x64xf32>
    %777 = vector.extract_strided_slice %482 {offsets = [10, 0], sizes = [2, 128], strides = [1, 1]} : vector<16x256xf32> to vector<2x128xf32>
    %778 = vector.extract_strided_slice %482 {offsets = [4, 128], sizes = [2, 128], strides = [1, 1]} : vector<16x256xf32> to vector<2x128xf32>
    %779 = tpu.concatenate %777, %778 in 1 : vector<2x128xf32>, vector<2x128xf32> -> vector<2x256xf32>
    %cst_113 = arith.constant dense<0.000000e+00> : vector<2x256xf32>
    %780 = tpu.matmul %776, %483, %cst_113 {dimension_numbers = #tpu.dot_dimension_numbers<[1], [0], [0], [1], [0, 0, 1, 1], [], []>} : vector<2x64xf32>, vector<64x256xf32>, vector<2x256xf32> -> vector<2x256xf32>
    %781 = arith.addf %779, %780 : vector<2x256xf32>
    %782 = vector.extract_strided_slice %781 {offsets = [0, 0], sizes = [2, 128], strides = [1, 1]} : vector<2x256xf32> to vector<2x128xf32>
    %783 = vector.extract_strided_slice %782 {offsets = [0, 0], sizes = [2, 32], strides = [1, 1]} : vector<2x128xf32> to vector<2x32xf32>
    %784 = arith.negf %783 : vector<2x32xf32>
    %785 = math.exp %784 : vector<2x32xf32>
    %cst_114 = arith.constant 1.000000e+00 : f32
    %786 = vector.broadcast %cst_114 : f32 to vector<2x32xf32>
    %787 = arith.addf %786, %785 : vector<2x32xf32>
    %788 = arith.divf %786, %787 : vector<2x32xf32>
    %789 = vector.extract_strided_slice %782 {offsets = [0, 32], sizes = [2, 32], strides = [1, 1]} : vector<2x128xf32> to vector<2x32xf32>
    %790 = arith.negf %789 : vector<2x32xf32>
    %791 = math.exp %790 : vector<2x32xf32>
    %cst_115 = arith.constant 1.000000e+00 : f32
    %792 = vector.broadcast %cst_115 : f32 to vector<2x32xf32>
    %793 = arith.addf %792, %791 : vector<2x32xf32>
    %794 = arith.divf %792, %793 : vector<2x32xf32>
    %795 = vector.extract_strided_slice %782 {offsets = [0, 64], sizes = [2, 32], strides = [1, 1]} : vector<2x128xf32> to vector<2x32xf32>
    %796 = math.tanh %795 : vector<2x32xf32>
    %797 = vector.extract_strided_slice %782 {offsets = [0, 96], sizes = [2, 32], strides = [1, 1]} : vector<2x128xf32> to vector<2x32xf32>
    %798 = arith.negf %797 : vector<2x32xf32>
    %799 = math.exp %798 : vector<2x32xf32>
    %cst_116 = arith.constant 1.000000e+00 : f32
    %800 = vector.broadcast %cst_116 : f32 to vector<2x32xf32>
    %801 = arith.addf %800, %799 : vector<2x32xf32>
    %802 = arith.divf %800, %801 : vector<2x32xf32>
    %803 = arith.mulf %794, %747 : vector<2x32xf32>
    %804 = arith.mulf %788, %796 : vector<2x32xf32>
    %805 = arith.addf %803, %804 : vector<2x32xf32>
    %806 = math.tanh %805 : vector<2x32xf32>
    %807 = arith.mulf %802, %806 : vector<2x32xf32>
    %808 = vector.extract_strided_slice %781 {offsets = [0, 128], sizes = [2, 128], strides = [1, 1]} : vector<2x256xf32> to vector<2x128xf32>
    %809 = vector.extract_strided_slice %808 {offsets = [0, 0], sizes = [2, 32], strides = [1, 1]} : vector<2x128xf32> to vector<2x32xf32>
    %810 = arith.negf %809 : vector<2x32xf32>
    %811 = math.exp %810 : vector<2x32xf32>
    %cst_117 = arith.constant 1.000000e+00 : f32
    %812 = vector.broadcast %cst_117 : f32 to vector<2x32xf32>
    %813 = arith.addf %812, %811 : vector<2x32xf32>
    %814 = arith.divf %812, %813 : vector<2x32xf32>
    %815 = vector.extract_strided_slice %808 {offsets = [0, 32], sizes = [2, 32], strides = [1, 1]} : vector<2x128xf32> to vector<2x32xf32>
    %816 = arith.negf %815 : vector<2x32xf32>
    %817 = math.exp %816 : vector<2x32xf32>
    %cst_118 = arith.constant 1.000000e+00 : f32
    %818 = vector.broadcast %cst_118 : f32 to vector<2x32xf32>
    %819 = arith.addf %818, %817 : vector<2x32xf32>
    %820 = arith.divf %818, %819 : vector<2x32xf32>
    %821 = vector.extract_strided_slice %808 {offsets = [0, 64], sizes = [2, 32], strides = [1, 1]} : vector<2x128xf32> to vector<2x32xf32>
    %822 = math.tanh %821 : vector<2x32xf32>
    %823 = vector.extract_strided_slice %808 {offsets = [0, 96], sizes = [2, 32], strides = [1, 1]} : vector<2x128xf32> to vector<2x32xf32>
    %824 = arith.negf %823 : vector<2x32xf32>
    %825 = math.exp %824 : vector<2x32xf32>
    %cst_119 = arith.constant 1.000000e+00 : f32
    %826 = vector.broadcast %cst_119 : f32 to vector<2x32xf32>
    %827 = arith.addf %826, %825 : vector<2x32xf32>
    %828 = arith.divf %826, %827 : vector<2x32xf32>
    %829 = arith.mulf %820, %773 : vector<2x32xf32>
    %830 = arith.mulf %814, %822 : vector<2x32xf32>
    %831 = arith.addf %829, %830 : vector<2x32xf32>
    %832 = math.tanh %831 : vector<2x32xf32>
    %833 = arith.mulf %828, %832 : vector<2x32xf32>
    %834 = tpu.concatenate %807, %833 in 1 : vector<2x32xf32>, vector<2x32xf32> -> vector<2x64xf32>
    %835 = vector.extract_strided_slice %482 {offsets = [12, 0], sizes = [2, 128], strides = [1, 1]} : vector<16x256xf32> to vector<2x128xf32>
    %836 = vector.extract_strided_slice %482 {offsets = [2, 128], sizes = [2, 128], strides = [1, 1]} : vector<16x256xf32> to vector<2x128xf32>
    %837 = tpu.concatenate %835, %836 in 1 : vector<2x128xf32>, vector<2x128xf32> -> vector<2x256xf32>
    %cst_120 = arith.constant dense<0.000000e+00> : vector<2x256xf32>
    %838 = tpu.matmul %834, %483, %cst_120 {dimension_numbers = #tpu.dot_dimension_numbers<[1], [0], [0], [1], [0, 0, 1, 1], [], []>} : vector<2x64xf32>, vector<64x256xf32>, vector<2x256xf32> -> vector<2x256xf32>
    %839 = arith.addf %837, %838 : vector<2x256xf32>
    %840 = vector.extract_strided_slice %839 {offsets = [0, 0], sizes = [2, 128], strides = [1, 1]} : vector<2x256xf32> to vector<2x128xf32>
    %841 = vector.extract_strided_slice %840 {offsets = [0, 0], sizes = [2, 32], strides = [1, 1]} : vector<2x128xf32> to vector<2x32xf32>
    %842 = arith.negf %841 : vector<2x32xf32>
    %843 = math.exp %842 : vector<2x32xf32>
    %cst_121 = arith.constant 1.000000e+00 : f32
    %844 = vector.broadcast %cst_121 : f32 to vector<2x32xf32>
    %845 = arith.addf %844, %843 : vector<2x32xf32>
    %846 = arith.divf %844, %845 : vector<2x32xf32>
    %847 = vector.extract_strided_slice %840 {offsets = [0, 32], sizes = [2, 32], strides = [1, 1]} : vector<2x128xf32> to vector<2x32xf32>
    %848 = arith.negf %847 : vector<2x32xf32>
    %849 = math.exp %848 : vector<2x32xf32>
    %cst_122 = arith.constant 1.000000e+00 : f32
    %850 = vector.broadcast %cst_122 : f32 to vector<2x32xf32>
    %851 = arith.addf %850, %849 : vector<2x32xf32>
    %852 = arith.divf %850, %851 : vector<2x32xf32>
    %853 = vector.extract_strided_slice %840 {offsets = [0, 64], sizes = [2, 32], strides = [1, 1]} : vector<2x128xf32> to vector<2x32xf32>
    %854 = math.tanh %853 : vector<2x32xf32>
    %855 = vector.extract_strided_slice %840 {offsets = [0, 96], sizes = [2, 32], strides = [1, 1]} : vector<2x128xf32> to vector<2x32xf32>
    %856 = arith.negf %855 : vector<2x32xf32>
    %857 = math.exp %856 : vector<2x32xf32>
    %cst_123 = arith.constant 1.000000e+00 : f32
    %858 = vector.broadcast %cst_123 : f32 to vector<2x32xf32>
    %859 = arith.addf %858, %857 : vector<2x32xf32>
    %860 = arith.divf %858, %859 : vector<2x32xf32>
    %861 = arith.mulf %852, %805 : vector<2x32xf32>
    %862 = arith.mulf %846, %854 : vector<2x32xf32>
    %863 = arith.addf %861, %862 : vector<2x32xf32>
    %864 = math.tanh %863 : vector<2x32xf32>
    %865 = arith.mulf %860, %864 : vector<2x32xf32>
    %866 = vector.extract_strided_slice %839 {offsets = [0, 128], sizes = [2, 128], strides = [1, 1]} : vector<2x256xf32> to vector<2x128xf32>
    %867 = vector.extract_strided_slice %866 {offsets = [0, 0], sizes = [2, 32], strides = [1, 1]} : vector<2x128xf32> to vector<2x32xf32>
    %868 = arith.negf %867 : vector<2x32xf32>
    %869 = math.exp %868 : vector<2x32xf32>
    %cst_124 = arith.constant 1.000000e+00 : f32
    %870 = vector.broadcast %cst_124 : f32 to vector<2x32xf32>
    %871 = arith.addf %870, %869 : vector<2x32xf32>
    %872 = arith.divf %870, %871 : vector<2x32xf32>
    %873 = vector.extract_strided_slice %866 {offsets = [0, 32], sizes = [2, 32], strides = [1, 1]} : vector<2x128xf32> to vector<2x32xf32>
    %874 = arith.negf %873 : vector<2x32xf32>
    %875 = math.exp %874 : vector<2x32xf32>
    %cst_125 = arith.constant 1.000000e+00 : f32
    %876 = vector.broadcast %cst_125 : f32 to vector<2x32xf32>
    %877 = arith.addf %876, %875 : vector<2x32xf32>
    %878 = arith.divf %876, %877 : vector<2x32xf32>
    %879 = vector.extract_strided_slice %866 {offsets = [0, 64], sizes = [2, 32], strides = [1, 1]} : vector<2x128xf32> to vector<2x32xf32>
    %880 = math.tanh %879 : vector<2x32xf32>
    %881 = vector.extract_strided_slice %866 {offsets = [0, 96], sizes = [2, 32], strides = [1, 1]} : vector<2x128xf32> to vector<2x32xf32>
    %882 = arith.negf %881 : vector<2x32xf32>
    %883 = math.exp %882 : vector<2x32xf32>
    %cst_126 = arith.constant 1.000000e+00 : f32
    %884 = vector.broadcast %cst_126 : f32 to vector<2x32xf32>
    %885 = arith.addf %884, %883 : vector<2x32xf32>
    %886 = arith.divf %884, %885 : vector<2x32xf32>
    %887 = arith.mulf %878, %831 : vector<2x32xf32>
    %888 = arith.mulf %872, %880 : vector<2x32xf32>
    %889 = arith.addf %887, %888 : vector<2x32xf32>
    %890 = math.tanh %889 : vector<2x32xf32>
    %891 = arith.mulf %886, %890 : vector<2x32xf32>
    %892 = tpu.concatenate %865, %891 in 1 : vector<2x32xf32>, vector<2x32xf32> -> vector<2x64xf32>
    %893 = vector.extract_strided_slice %482 {offsets = [14, 0], sizes = [2, 128], strides = [1, 1]} : vector<16x256xf32> to vector<2x128xf32>
    %894 = vector.extract_strided_slice %482 {offsets = [0, 128], sizes = [2, 128], strides = [1, 1]} : vector<16x256xf32> to vector<2x128xf32>
    %895 = tpu.concatenate %893, %894 in 1 : vector<2x128xf32>, vector<2x128xf32> -> vector<2x256xf32>
    %cst_127 = arith.constant dense<0.000000e+00> : vector<2x256xf32>
    %896 = tpu.matmul %892, %483, %cst_127 {dimension_numbers = #tpu.dot_dimension_numbers<[1], [0], [0], [1], [0, 0, 1, 1], [], []>} : vector<2x64xf32>, vector<64x256xf32>, vector<2x256xf32> -> vector<2x256xf32>
    %897 = arith.addf %895, %896 : vector<2x256xf32>
    %898 = vector.extract_strided_slice %897 {offsets = [0, 0], sizes = [2, 128], strides = [1, 1]} : vector<2x256xf32> to vector<2x128xf32>
    %899 = vector.extract_strided_slice %898 {offsets = [0, 0], sizes = [2, 32], strides = [1, 1]} : vector<2x128xf32> to vector<2x32xf32>
    %900 = arith.negf %899 : vector<2x32xf32>
    %901 = math.exp %900 : vector<2x32xf32>
    %cst_128 = arith.constant 1.000000e+00 : f32
    %902 = vector.broadcast %cst_128 : f32 to vector<2x32xf32>
    %903 = arith.addf %902, %901 : vector<2x32xf32>
    %904 = arith.divf %902, %903 : vector<2x32xf32>
    %905 = vector.extract_strided_slice %898 {offsets = [0, 32], sizes = [2, 32], strides = [1, 1]} : vector<2x128xf32> to vector<2x32xf32>
    %906 = arith.negf %905 : vector<2x32xf32>
    %907 = math.exp %906 : vector<2x32xf32>
    %cst_129 = arith.constant 1.000000e+00 : f32
    %908 = vector.broadcast %cst_129 : f32 to vector<2x32xf32>
    %909 = arith.addf %908, %907 : vector<2x32xf32>
    %910 = arith.divf %908, %909 : vector<2x32xf32>
    %911 = vector.extract_strided_slice %898 {offsets = [0, 64], sizes = [2, 32], strides = [1, 1]} : vector<2x128xf32> to vector<2x32xf32>
    %912 = math.tanh %911 : vector<2x32xf32>
    %913 = vector.extract_strided_slice %898 {offsets = [0, 96], sizes = [2, 32], strides = [1, 1]} : vector<2x128xf32> to vector<2x32xf32>
    %914 = arith.negf %913 : vector<2x32xf32>
    %915 = math.exp %914 : vector<2x32xf32>
    %cst_130 = arith.constant 1.000000e+00 : f32
    %916 = vector.broadcast %cst_130 : f32 to vector<2x32xf32>
    %917 = arith.addf %916, %915 : vector<2x32xf32>
    %918 = arith.divf %916, %917 : vector<2x32xf32>
    %919 = arith.mulf %910, %863 : vector<2x32xf32>
    %920 = arith.mulf %904, %912 : vector<2x32xf32>
    %921 = arith.addf %919, %920 : vector<2x32xf32>
    %922 = math.tanh %921 : vector<2x32xf32>
    %923 = arith.mulf %918, %922 : vector<2x32xf32>
    %924 = vector.extract_strided_slice %897 {offsets = [0, 128], sizes = [2, 128], strides = [1, 1]} : vector<2x256xf32> to vector<2x128xf32>
    %925 = vector.extract_strided_slice %924 {offsets = [0, 0], sizes = [2, 32], strides = [1, 1]} : vector<2x128xf32> to vector<2x32xf32>
    %926 = arith.negf %925 : vector<2x32xf32>
    %927 = math.exp %926 : vector<2x32xf32>
    %cst_131 = arith.constant 1.000000e+00 : f32
    %928 = vector.broadcast %cst_131 : f32 to vector<2x32xf32>
    %929 = arith.addf %928, %927 : vector<2x32xf32>
    %930 = arith.divf %928, %929 : vector<2x32xf32>
    %931 = vector.extract_strided_slice %924 {offsets = [0, 32], sizes = [2, 32], strides = [1, 1]} : vector<2x128xf32> to vector<2x32xf32>
    %932 = arith.negf %931 : vector<2x32xf32>
    %933 = math.exp %932 : vector<2x32xf32>
    %cst_132 = arith.constant 1.000000e+00 : f32
    %934 = vector.broadcast %cst_132 : f32 to vector<2x32xf32>
    %935 = arith.addf %934, %933 : vector<2x32xf32>
    %936 = arith.divf %934, %935 : vector<2x32xf32>
    %937 = vector.extract_strided_slice %924 {offsets = [0, 64], sizes = [2, 32], strides = [1, 1]} : vector<2x128xf32> to vector<2x32xf32>
    %938 = math.tanh %937 : vector<2x32xf32>
    %939 = vector.extract_strided_slice %924 {offsets = [0, 96], sizes = [2, 32], strides = [1, 1]} : vector<2x128xf32> to vector<2x32xf32>
    %940 = arith.negf %939 : vector<2x32xf32>
    %941 = math.exp %940 : vector<2x32xf32>
    %cst_133 = arith.constant 1.000000e+00 : f32
    %942 = vector.broadcast %cst_133 : f32 to vector<2x32xf32>
    %943 = arith.addf %942, %941 : vector<2x32xf32>
    %944 = arith.divf %942, %943 : vector<2x32xf32>
    %945 = arith.mulf %936, %889 : vector<2x32xf32>
    %946 = arith.mulf %930, %938 : vector<2x32xf32>
    %947 = arith.addf %945, %946 : vector<2x32xf32>
    %948 = math.tanh %947 : vector<2x32xf32>
    %949 = arith.mulf %944, %948 : vector<2x32xf32>
    %950 = tpu.concatenate %446, %472, %923, %949 in 1 : vector<2x32xf32>, vector<2x32xf32>, vector<2x32xf32>, vector<2x32xf32> -> vector<2x128xf32>
    %c0_134 = arith.constant 0 : index
    %c0_135 = arith.constant 0 : index
    %951 = vector.load %arg7[%c0_134, %c0_135] : memref<16x12xf32, #tpu.memory_space<vmem>>, vector<16x12xf32>
    %c0_136 = arith.constant 0 : index
    %c0_137 = arith.constant 0 : index
    %952 = vector.load %arg10[%c0_136, %c0_137] : memref<1x256xf32, #tpu.memory_space<vmem>>, vector<1x256xf32>
    %c0_138 = arith.constant 0 : index
    %c0_139 = arith.constant 0 : index
    %953 = vector.load %arg8[%c0_138, %c0_139] : memref<12x256xf32, #tpu.memory_space<vmem>>, vector<12x256xf32>
    %cst_140 = arith.constant dense<0.000000e+00> : vector<16x256xf32>
    %954 = tpu.matmul %951, %953, %cst_140 {dimension_numbers = #tpu.dot_dimension_numbers<[1], [0], [0], [1], [0, 0, 1, 1], [], []>} : vector<16x12xf32>, vector<12x256xf32>, vector<16x256xf32> -> vector<16x256xf32>
    %955 = vector.broadcast %952 : vector<1x256xf32> to vector<16x256xf32>
    %956 = arith.addf %955, %954 : vector<16x256xf32>
    %c0_141 = arith.constant 0 : index
    %c0_142 = arith.constant 0 : index
    %957 = vector.load %arg9[%c0_141, %c0_142] : memref<64x256xf32, #tpu.memory_space<vmem>>, vector<64x256xf32>
    %cst_143 = arith.constant 0.000000e+00 : f32
    %958 = vector.broadcast %cst_143 : f32 to vector<2x64xf32>
    %cst_144 = arith.constant 0.000000e+00 : f32
    %959 = vector.broadcast %cst_144 : f32 to vector<2x32xf32>
    %cst_145 = arith.constant 0.000000e+00 : f32
    %960 = vector.broadcast %cst_145 : f32 to vector<2x32xf32>
    %961 = vector.extract_strided_slice %956 {offsets = [0, 0], sizes = [2, 128], strides = [1, 1]} : vector<16x256xf32> to vector<2x128xf32>
    %962 = vector.extract_strided_slice %956 {offsets = [14, 128], sizes = [2, 128], strides = [1, 1]} : vector<16x256xf32> to vector<2x128xf32>
    %963 = tpu.concatenate %961, %962 in 1 : vector<2x128xf32>, vector<2x128xf32> -> vector<2x256xf32>
    %cst_146 = arith.constant dense<0.000000e+00> : vector<2x256xf32>
    %964 = tpu.matmul %958, %957, %cst_146 {dimension_numbers = #tpu.dot_dimension_numbers<[1], [0], [0], [1], [0, 0, 1, 1], [], []>} : vector<2x64xf32>, vector<64x256xf32>, vector<2x256xf32> -> vector<2x256xf32>
    %965 = arith.addf %963, %964 : vector<2x256xf32>
    %966 = vector.extract_strided_slice %965 {offsets = [0, 0], sizes = [2, 128], strides = [1, 1]} : vector<2x256xf32> to vector<2x128xf32>
    %967 = vector.extract_strided_slice %966 {offsets = [0, 0], sizes = [2, 32], strides = [1, 1]} : vector<2x128xf32> to vector<2x32xf32>
    %968 = arith.negf %967 : vector<2x32xf32>
    %969 = math.exp %968 : vector<2x32xf32>
    %cst_147 = arith.constant 1.000000e+00 : f32
    %970 = vector.broadcast %cst_147 : f32 to vector<2x32xf32>
    %971 = arith.addf %970, %969 : vector<2x32xf32>
    %972 = arith.divf %970, %971 : vector<2x32xf32>
    %973 = vector.extract_strided_slice %966 {offsets = [0, 32], sizes = [2, 32], strides = [1, 1]} : vector<2x128xf32> to vector<2x32xf32>
    %974 = arith.negf %973 : vector<2x32xf32>
    %975 = math.exp %974 : vector<2x32xf32>
    %cst_148 = arith.constant 1.000000e+00 : f32
    %976 = vector.broadcast %cst_148 : f32 to vector<2x32xf32>
    %977 = arith.addf %976, %975 : vector<2x32xf32>
    %978 = arith.divf %976, %977 : vector<2x32xf32>
    %979 = vector.extract_strided_slice %966 {offsets = [0, 64], sizes = [2, 32], strides = [1, 1]} : vector<2x128xf32> to vector<2x32xf32>
    %980 = math.tanh %979 : vector<2x32xf32>
    %981 = vector.extract_strided_slice %966 {offsets = [0, 96], sizes = [2, 32], strides = [1, 1]} : vector<2x128xf32> to vector<2x32xf32>
    %982 = arith.negf %981 : vector<2x32xf32>
    %983 = math.exp %982 : vector<2x32xf32>
    %cst_149 = arith.constant 1.000000e+00 : f32
    %984 = vector.broadcast %cst_149 : f32 to vector<2x32xf32>
    %985 = arith.addf %984, %983 : vector<2x32xf32>
    %986 = arith.divf %984, %985 : vector<2x32xf32>
    %987 = arith.mulf %978, %959 : vector<2x32xf32>
    %988 = arith.mulf %972, %980 : vector<2x32xf32>
    %989 = arith.addf %987, %988 : vector<2x32xf32>
    %990 = math.tanh %989 : vector<2x32xf32>
    %991 = arith.mulf %986, %990 : vector<2x32xf32>
    %992 = vector.extract_strided_slice %965 {offsets = [0, 128], sizes = [2, 128], strides = [1, 1]} : vector<2x256xf32> to vector<2x128xf32>
    %993 = vector.extract_strided_slice %992 {offsets = [0, 0], sizes = [2, 32], strides = [1, 1]} : vector<2x128xf32> to vector<2x32xf32>
    %994 = arith.negf %993 : vector<2x32xf32>
    %995 = math.exp %994 : vector<2x32xf32>
    %cst_150 = arith.constant 1.000000e+00 : f32
    %996 = vector.broadcast %cst_150 : f32 to vector<2x32xf32>
    %997 = arith.addf %996, %995 : vector<2x32xf32>
    %998 = arith.divf %996, %997 : vector<2x32xf32>
    %999 = vector.extract_strided_slice %992 {offsets = [0, 32], sizes = [2, 32], strides = [1, 1]} : vector<2x128xf32> to vector<2x32xf32>
    %1000 = arith.negf %999 : vector<2x32xf32>
    %1001 = math.exp %1000 : vector<2x32xf32>
    %cst_151 = arith.constant 1.000000e+00 : f32
    %1002 = vector.broadcast %cst_151 : f32 to vector<2x32xf32>
    %1003 = arith.addf %1002, %1001 : vector<2x32xf32>
    %1004 = arith.divf %1002, %1003 : vector<2x32xf32>
    %1005 = vector.extract_strided_slice %992 {offsets = [0, 64], sizes = [2, 32], strides = [1, 1]} : vector<2x128xf32> to vector<2x32xf32>
    %1006 = math.tanh %1005 : vector<2x32xf32>
    %1007 = vector.extract_strided_slice %992 {offsets = [0, 96], sizes = [2, 32], strides = [1, 1]} : vector<2x128xf32> to vector<2x32xf32>
    %1008 = arith.negf %1007 : vector<2x32xf32>
    %1009 = math.exp %1008 : vector<2x32xf32>
    %cst_152 = arith.constant 1.000000e+00 : f32
    %1010 = vector.broadcast %cst_152 : f32 to vector<2x32xf32>
    %1011 = arith.addf %1010, %1009 : vector<2x32xf32>
    %1012 = arith.divf %1010, %1011 : vector<2x32xf32>
    %1013 = arith.mulf %1004, %960 : vector<2x32xf32>
    %1014 = arith.mulf %998, %1006 : vector<2x32xf32>
    %1015 = arith.addf %1013, %1014 : vector<2x32xf32>
    %1016 = math.tanh %1015 : vector<2x32xf32>
    %1017 = arith.mulf %1012, %1016 : vector<2x32xf32>
    %1018 = tpu.concatenate %991, %1017 in 1 : vector<2x32xf32>, vector<2x32xf32> -> vector<2x64xf32>
    %1019 = vector.extract_strided_slice %956 {offsets = [2, 0], sizes = [2, 128], strides = [1, 1]} : vector<16x256xf32> to vector<2x128xf32>
    %1020 = vector.extract_strided_slice %956 {offsets = [12, 128], sizes = [2, 128], strides = [1, 1]} : vector<16x256xf32> to vector<2x128xf32>
    %1021 = tpu.concatenate %1019, %1020 in 1 : vector<2x128xf32>, vector<2x128xf32> -> vector<2x256xf32>
    %cst_153 = arith.constant dense<0.000000e+00> : vector<2x256xf32>
    %1022 = tpu.matmul %1018, %957, %cst_153 {dimension_numbers = #tpu.dot_dimension_numbers<[1], [0], [0], [1], [0, 0, 1, 1], [], []>} : vector<2x64xf32>, vector<64x256xf32>, vector<2x256xf32> -> vector<2x256xf32>
    %1023 = arith.addf %1021, %1022 : vector<2x256xf32>
    %1024 = vector.extract_strided_slice %1023 {offsets = [0, 0], sizes = [2, 128], strides = [1, 1]} : vector<2x256xf32> to vector<2x128xf32>
    %1025 = vector.extract_strided_slice %1024 {offsets = [0, 0], sizes = [2, 32], strides = [1, 1]} : vector<2x128xf32> to vector<2x32xf32>
    %1026 = arith.negf %1025 : vector<2x32xf32>
    %1027 = math.exp %1026 : vector<2x32xf32>
    %cst_154 = arith.constant 1.000000e+00 : f32
    %1028 = vector.broadcast %cst_154 : f32 to vector<2x32xf32>
    %1029 = arith.addf %1028, %1027 : vector<2x32xf32>
    %1030 = arith.divf %1028, %1029 : vector<2x32xf32>
    %1031 = vector.extract_strided_slice %1024 {offsets = [0, 32], sizes = [2, 32], strides = [1, 1]} : vector<2x128xf32> to vector<2x32xf32>
    %1032 = arith.negf %1031 : vector<2x32xf32>
    %1033 = math.exp %1032 : vector<2x32xf32>
    %cst_155 = arith.constant 1.000000e+00 : f32
    %1034 = vector.broadcast %cst_155 : f32 to vector<2x32xf32>
    %1035 = arith.addf %1034, %1033 : vector<2x32xf32>
    %1036 = arith.divf %1034, %1035 : vector<2x32xf32>
    %1037 = vector.extract_strided_slice %1024 {offsets = [0, 64], sizes = [2, 32], strides = [1, 1]} : vector<2x128xf32> to vector<2x32xf32>
    %1038 = math.tanh %1037 : vector<2x32xf32>
    %1039 = vector.extract_strided_slice %1024 {offsets = [0, 96], sizes = [2, 32], strides = [1, 1]} : vector<2x128xf32> to vector<2x32xf32>
    %1040 = arith.negf %1039 : vector<2x32xf32>
    %1041 = math.exp %1040 : vector<2x32xf32>
    %cst_156 = arith.constant 1.000000e+00 : f32
    %1042 = vector.broadcast %cst_156 : f32 to vector<2x32xf32>
    %1043 = arith.addf %1042, %1041 : vector<2x32xf32>
    %1044 = arith.divf %1042, %1043 : vector<2x32xf32>
    %1045 = arith.mulf %1036, %989 : vector<2x32xf32>
    %1046 = arith.mulf %1030, %1038 : vector<2x32xf32>
    %1047 = arith.addf %1045, %1046 : vector<2x32xf32>
    %1048 = math.tanh %1047 : vector<2x32xf32>
    %1049 = arith.mulf %1044, %1048 : vector<2x32xf32>
    %1050 = vector.extract_strided_slice %1023 {offsets = [0, 128], sizes = [2, 128], strides = [1, 1]} : vector<2x256xf32> to vector<2x128xf32>
    %1051 = vector.extract_strided_slice %1050 {offsets = [0, 0], sizes = [2, 32], strides = [1, 1]} : vector<2x128xf32> to vector<2x32xf32>
    %1052 = arith.negf %1051 : vector<2x32xf32>
    %1053 = math.exp %1052 : vector<2x32xf32>
    %cst_157 = arith.constant 1.000000e+00 : f32
    %1054 = vector.broadcast %cst_157 : f32 to vector<2x32xf32>
    %1055 = arith.addf %1054, %1053 : vector<2x32xf32>
    %1056 = arith.divf %1054, %1055 : vector<2x32xf32>
    %1057 = vector.extract_strided_slice %1050 {offsets = [0, 32], sizes = [2, 32], strides = [1, 1]} : vector<2x128xf32> to vector<2x32xf32>
    %1058 = arith.negf %1057 : vector<2x32xf32>
    %1059 = math.exp %1058 : vector<2x32xf32>
    %cst_158 = arith.constant 1.000000e+00 : f32
    %1060 = vector.broadcast %cst_158 : f32 to vector<2x32xf32>
    %1061 = arith.addf %1060, %1059 : vector<2x32xf32>
    %1062 = arith.divf %1060, %1061 : vector<2x32xf32>
    %1063 = vector.extract_strided_slice %1050 {offsets = [0, 64], sizes = [2, 32], strides = [1, 1]} : vector<2x128xf32> to vector<2x32xf32>
    %1064 = math.tanh %1063 : vector<2x32xf32>
    %1065 = vector.extract_strided_slice %1050 {offsets = [0, 96], sizes = [2, 32], strides = [1, 1]} : vector<2x128xf32> to vector<2x32xf32>
    %1066 = arith.negf %1065 : vector<2x32xf32>
    %1067 = math.exp %1066 : vector<2x32xf32>
    %cst_159 = arith.constant 1.000000e+00 : f32
    %1068 = vector.broadcast %cst_159 : f32 to vector<2x32xf32>
    %1069 = arith.addf %1068, %1067 : vector<2x32xf32>
    %1070 = arith.divf %1068, %1069 : vector<2x32xf32>
    %1071 = arith.mulf %1062, %1015 : vector<2x32xf32>
    %1072 = arith.mulf %1056, %1064 : vector<2x32xf32>
    %1073 = arith.addf %1071, %1072 : vector<2x32xf32>
    %1074 = math.tanh %1073 : vector<2x32xf32>
    %1075 = arith.mulf %1070, %1074 : vector<2x32xf32>
    %1076 = tpu.concatenate %1049, %1075 in 1 : vector<2x32xf32>, vector<2x32xf32> -> vector<2x64xf32>
    %1077 = vector.extract_strided_slice %956 {offsets = [4, 0], sizes = [2, 128], strides = [1, 1]} : vector<16x256xf32> to vector<2x128xf32>
    %1078 = vector.extract_strided_slice %956 {offsets = [10, 128], sizes = [2, 128], strides = [1, 1]} : vector<16x256xf32> to vector<2x128xf32>
    %1079 = tpu.concatenate %1077, %1078 in 1 : vector<2x128xf32>, vector<2x128xf32> -> vector<2x256xf32>
    %cst_160 = arith.constant dense<0.000000e+00> : vector<2x256xf32>
    %1080 = tpu.matmul %1076, %957, %cst_160 {dimension_numbers = #tpu.dot_dimension_numbers<[1], [0], [0], [1], [0, 0, 1, 1], [], []>} : vector<2x64xf32>, vector<64x256xf32>, vector<2x256xf32> -> vector<2x256xf32>
    %1081 = arith.addf %1079, %1080 : vector<2x256xf32>
    %1082 = vector.extract_strided_slice %1081 {offsets = [0, 0], sizes = [2, 128], strides = [1, 1]} : vector<2x256xf32> to vector<2x128xf32>
    %1083 = vector.extract_strided_slice %1082 {offsets = [0, 0], sizes = [2, 32], strides = [1, 1]} : vector<2x128xf32> to vector<2x32xf32>
    %1084 = arith.negf %1083 : vector<2x32xf32>
    %1085 = math.exp %1084 : vector<2x32xf32>
    %cst_161 = arith.constant 1.000000e+00 : f32
    %1086 = vector.broadcast %cst_161 : f32 to vector<2x32xf32>
    %1087 = arith.addf %1086, %1085 : vector<2x32xf32>
    %1088 = arith.divf %1086, %1087 : vector<2x32xf32>
    %1089 = vector.extract_strided_slice %1082 {offsets = [0, 32], sizes = [2, 32], strides = [1, 1]} : vector<2x128xf32> to vector<2x32xf32>
    %1090 = arith.negf %1089 : vector<2x32xf32>
    %1091 = math.exp %1090 : vector<2x32xf32>
    %cst_162 = arith.constant 1.000000e+00 : f32
    %1092 = vector.broadcast %cst_162 : f32 to vector<2x32xf32>
    %1093 = arith.addf %1092, %1091 : vector<2x32xf32>
    %1094 = arith.divf %1092, %1093 : vector<2x32xf32>
    %1095 = vector.extract_strided_slice %1082 {offsets = [0, 64], sizes = [2, 32], strides = [1, 1]} : vector<2x128xf32> to vector<2x32xf32>
    %1096 = math.tanh %1095 : vector<2x32xf32>
    %1097 = vector.extract_strided_slice %1082 {offsets = [0, 96], sizes = [2, 32], strides = [1, 1]} : vector<2x128xf32> to vector<2x32xf32>
    %1098 = arith.negf %1097 : vector<2x32xf32>
    %1099 = math.exp %1098 : vector<2x32xf32>
    %cst_163 = arith.constant 1.000000e+00 : f32
    %1100 = vector.broadcast %cst_163 : f32 to vector<2x32xf32>
    %1101 = arith.addf %1100, %1099 : vector<2x32xf32>
    %1102 = arith.divf %1100, %1101 : vector<2x32xf32>
    %1103 = arith.mulf %1094, %1047 : vector<2x32xf32>
    %1104 = arith.mulf %1088, %1096 : vector<2x32xf32>
    %1105 = arith.addf %1103, %1104 : vector<2x32xf32>
    %1106 = math.tanh %1105 : vector<2x32xf32>
    %1107 = arith.mulf %1102, %1106 : vector<2x32xf32>
    %1108 = vector.extract_strided_slice %1081 {offsets = [0, 128], sizes = [2, 128], strides = [1, 1]} : vector<2x256xf32> to vector<2x128xf32>
    %1109 = vector.extract_strided_slice %1108 {offsets = [0, 0], sizes = [2, 32], strides = [1, 1]} : vector<2x128xf32> to vector<2x32xf32>
    %1110 = arith.negf %1109 : vector<2x32xf32>
    %1111 = math.exp %1110 : vector<2x32xf32>
    %cst_164 = arith.constant 1.000000e+00 : f32
    %1112 = vector.broadcast %cst_164 : f32 to vector<2x32xf32>
    %1113 = arith.addf %1112, %1111 : vector<2x32xf32>
    %1114 = arith.divf %1112, %1113 : vector<2x32xf32>
    %1115 = vector.extract_strided_slice %1108 {offsets = [0, 32], sizes = [2, 32], strides = [1, 1]} : vector<2x128xf32> to vector<2x32xf32>
    %1116 = arith.negf %1115 : vector<2x32xf32>
    %1117 = math.exp %1116 : vector<2x32xf32>
    %cst_165 = arith.constant 1.000000e+00 : f32
    %1118 = vector.broadcast %cst_165 : f32 to vector<2x32xf32>
    %1119 = arith.addf %1118, %1117 : vector<2x32xf32>
    %1120 = arith.divf %1118, %1119 : vector<2x32xf32>
    %1121 = vector.extract_strided_slice %1108 {offsets = [0, 64], sizes = [2, 32], strides = [1, 1]} : vector<2x128xf32> to vector<2x32xf32>
    %1122 = math.tanh %1121 : vector<2x32xf32>
    %1123 = vector.extract_strided_slice %1108 {offsets = [0, 96], sizes = [2, 32], strides = [1, 1]} : vector<2x128xf32> to vector<2x32xf32>
    %1124 = arith.negf %1123 : vector<2x32xf32>
    %1125 = math.exp %1124 : vector<2x32xf32>
    %cst_166 = arith.constant 1.000000e+00 : f32
    %1126 = vector.broadcast %cst_166 : f32 to vector<2x32xf32>
    %1127 = arith.addf %1126, %1125 : vector<2x32xf32>
    %1128 = arith.divf %1126, %1127 : vector<2x32xf32>
    %1129 = arith.mulf %1120, %1073 : vector<2x32xf32>
    %1130 = arith.mulf %1114, %1122 : vector<2x32xf32>
    %1131 = arith.addf %1129, %1130 : vector<2x32xf32>
    %1132 = math.tanh %1131 : vector<2x32xf32>
    %1133 = arith.mulf %1128, %1132 : vector<2x32xf32>
    %1134 = tpu.concatenate %1107, %1133 in 1 : vector<2x32xf32>, vector<2x32xf32> -> vector<2x64xf32>
    %1135 = vector.extract_strided_slice %956 {offsets = [6, 0], sizes = [2, 128], strides = [1, 1]} : vector<16x256xf32> to vector<2x128xf32>
    %1136 = vector.extract_strided_slice %956 {offsets = [8, 128], sizes = [2, 128], strides = [1, 1]} : vector<16x256xf32> to vector<2x128xf32>
    %1137 = tpu.concatenate %1135, %1136 in 1 : vector<2x128xf32>, vector<2x128xf32> -> vector<2x256xf32>
    %cst_167 = arith.constant dense<0.000000e+00> : vector<2x256xf32>
    %1138 = tpu.matmul %1134, %957, %cst_167 {dimension_numbers = #tpu.dot_dimension_numbers<[1], [0], [0], [1], [0, 0, 1, 1], [], []>} : vector<2x64xf32>, vector<64x256xf32>, vector<2x256xf32> -> vector<2x256xf32>
    %1139 = arith.addf %1137, %1138 : vector<2x256xf32>
    %1140 = vector.extract_strided_slice %1139 {offsets = [0, 0], sizes = [2, 128], strides = [1, 1]} : vector<2x256xf32> to vector<2x128xf32>
    %1141 = vector.extract_strided_slice %1140 {offsets = [0, 0], sizes = [2, 32], strides = [1, 1]} : vector<2x128xf32> to vector<2x32xf32>
    %1142 = arith.negf %1141 : vector<2x32xf32>
    %1143 = math.exp %1142 : vector<2x32xf32>
    %cst_168 = arith.constant 1.000000e+00 : f32
    %1144 = vector.broadcast %cst_168 : f32 to vector<2x32xf32>
    %1145 = arith.addf %1144, %1143 : vector<2x32xf32>
    %1146 = arith.divf %1144, %1145 : vector<2x32xf32>
    %1147 = vector.extract_strided_slice %1140 {offsets = [0, 32], sizes = [2, 32], strides = [1, 1]} : vector<2x128xf32> to vector<2x32xf32>
    %1148 = arith.negf %1147 : vector<2x32xf32>
    %1149 = math.exp %1148 : vector<2x32xf32>
    %cst_169 = arith.constant 1.000000e+00 : f32
    %1150 = vector.broadcast %cst_169 : f32 to vector<2x32xf32>
    %1151 = arith.addf %1150, %1149 : vector<2x32xf32>
    %1152 = arith.divf %1150, %1151 : vector<2x32xf32>
    %1153 = vector.extract_strided_slice %1140 {offsets = [0, 64], sizes = [2, 32], strides = [1, 1]} : vector<2x128xf32> to vector<2x32xf32>
    %1154 = math.tanh %1153 : vector<2x32xf32>
    %1155 = vector.extract_strided_slice %1140 {offsets = [0, 96], sizes = [2, 32], strides = [1, 1]} : vector<2x128xf32> to vector<2x32xf32>
    %1156 = arith.negf %1155 : vector<2x32xf32>
    %1157 = math.exp %1156 : vector<2x32xf32>
    %cst_170 = arith.constant 1.000000e+00 : f32
    %1158 = vector.broadcast %cst_170 : f32 to vector<2x32xf32>
    %1159 = arith.addf %1158, %1157 : vector<2x32xf32>
    %1160 = arith.divf %1158, %1159 : vector<2x32xf32>
    %1161 = arith.mulf %1152, %1105 : vector<2x32xf32>
    %1162 = arith.mulf %1146, %1154 : vector<2x32xf32>
    %1163 = arith.addf %1161, %1162 : vector<2x32xf32>
    %1164 = math.tanh %1163 : vector<2x32xf32>
    %1165 = arith.mulf %1160, %1164 : vector<2x32xf32>
    %1166 = vector.extract_strided_slice %1139 {offsets = [0, 128], sizes = [2, 128], strides = [1, 1]} : vector<2x256xf32> to vector<2x128xf32>
    %1167 = vector.extract_strided_slice %1166 {offsets = [0, 0], sizes = [2, 32], strides = [1, 1]} : vector<2x128xf32> to vector<2x32xf32>
    %1168 = arith.negf %1167 : vector<2x32xf32>
    %1169 = math.exp %1168 : vector<2x32xf32>
    %cst_171 = arith.constant 1.000000e+00 : f32
    %1170 = vector.broadcast %cst_171 : f32 to vector<2x32xf32>
    %1171 = arith.addf %1170, %1169 : vector<2x32xf32>
    %1172 = arith.divf %1170, %1171 : vector<2x32xf32>
    %1173 = vector.extract_strided_slice %1166 {offsets = [0, 32], sizes = [2, 32], strides = [1, 1]} : vector<2x128xf32> to vector<2x32xf32>
    %1174 = arith.negf %1173 : vector<2x32xf32>
    %1175 = math.exp %1174 : vector<2x32xf32>
    %cst_172 = arith.constant 1.000000e+00 : f32
    %1176 = vector.broadcast %cst_172 : f32 to vector<2x32xf32>
    %1177 = arith.addf %1176, %1175 : vector<2x32xf32>
    %1178 = arith.divf %1176, %1177 : vector<2x32xf32>
    %1179 = vector.extract_strided_slice %1166 {offsets = [0, 64], sizes = [2, 32], strides = [1, 1]} : vector<2x128xf32> to vector<2x32xf32>
    %1180 = math.tanh %1179 : vector<2x32xf32>
    %1181 = vector.extract_strided_slice %1166 {offsets = [0, 96], sizes = [2, 32], strides = [1, 1]} : vector<2x128xf32> to vector<2x32xf32>
    %1182 = arith.negf %1181 : vector<2x32xf32>
    %1183 = math.exp %1182 : vector<2x32xf32>
    %cst_173 = arith.constant 1.000000e+00 : f32
    %1184 = vector.broadcast %cst_173 : f32 to vector<2x32xf32>
    %1185 = arith.addf %1184, %1183 : vector<2x32xf32>
    %1186 = arith.divf %1184, %1185 : vector<2x32xf32>
    %1187 = arith.mulf %1178, %1131 : vector<2x32xf32>
    %1188 = arith.mulf %1172, %1180 : vector<2x32xf32>
    %1189 = arith.addf %1187, %1188 : vector<2x32xf32>
    %1190 = math.tanh %1189 : vector<2x32xf32>
    %1191 = arith.mulf %1186, %1190 : vector<2x32xf32>
    %1192 = tpu.concatenate %1165, %1191 in 1 : vector<2x32xf32>, vector<2x32xf32> -> vector<2x64xf32>
    %1193 = vector.extract_strided_slice %956 {offsets = [8, 0], sizes = [2, 128], strides = [1, 1]} : vector<16x256xf32> to vector<2x128xf32>
    %1194 = vector.extract_strided_slice %956 {offsets = [6, 128], sizes = [2, 128], strides = [1, 1]} : vector<16x256xf32> to vector<2x128xf32>
    %1195 = tpu.concatenate %1193, %1194 in 1 : vector<2x128xf32>, vector<2x128xf32> -> vector<2x256xf32>
    %cst_174 = arith.constant dense<0.000000e+00> : vector<2x256xf32>
    %1196 = tpu.matmul %1192, %957, %cst_174 {dimension_numbers = #tpu.dot_dimension_numbers<[1], [0], [0], [1], [0, 0, 1, 1], [], []>} : vector<2x64xf32>, vector<64x256xf32>, vector<2x256xf32> -> vector<2x256xf32>
    %1197 = arith.addf %1195, %1196 : vector<2x256xf32>
    %1198 = vector.extract_strided_slice %1197 {offsets = [0, 0], sizes = [2, 128], strides = [1, 1]} : vector<2x256xf32> to vector<2x128xf32>
    %1199 = vector.extract_strided_slice %1198 {offsets = [0, 0], sizes = [2, 32], strides = [1, 1]} : vector<2x128xf32> to vector<2x32xf32>
    %1200 = arith.negf %1199 : vector<2x32xf32>
    %1201 = math.exp %1200 : vector<2x32xf32>
    %cst_175 = arith.constant 1.000000e+00 : f32
    %1202 = vector.broadcast %cst_175 : f32 to vector<2x32xf32>
    %1203 = arith.addf %1202, %1201 : vector<2x32xf32>
    %1204 = arith.divf %1202, %1203 : vector<2x32xf32>
    %1205 = vector.extract_strided_slice %1198 {offsets = [0, 32], sizes = [2, 32], strides = [1, 1]} : vector<2x128xf32> to vector<2x32xf32>
    %1206 = arith.negf %1205 : vector<2x32xf32>
    %1207 = math.exp %1206 : vector<2x32xf32>
    %cst_176 = arith.constant 1.000000e+00 : f32
    %1208 = vector.broadcast %cst_176 : f32 to vector<2x32xf32>
    %1209 = arith.addf %1208, %1207 : vector<2x32xf32>
    %1210 = arith.divf %1208, %1209 : vector<2x32xf32>
    %1211 = vector.extract_strided_slice %1198 {offsets = [0, 64], sizes = [2, 32], strides = [1, 1]} : vector<2x128xf32> to vector<2x32xf32>
    %1212 = math.tanh %1211 : vector<2x32xf32>
    %1213 = vector.extract_strided_slice %1198 {offsets = [0, 96], sizes = [2, 32], strides = [1, 1]} : vector<2x128xf32> to vector<2x32xf32>
    %1214 = arith.negf %1213 : vector<2x32xf32>
    %1215 = math.exp %1214 : vector<2x32xf32>
    %cst_177 = arith.constant 1.000000e+00 : f32
    %1216 = vector.broadcast %cst_177 : f32 to vector<2x32xf32>
    %1217 = arith.addf %1216, %1215 : vector<2x32xf32>
    %1218 = arith.divf %1216, %1217 : vector<2x32xf32>
    %1219 = arith.mulf %1210, %1163 : vector<2x32xf32>
    %1220 = arith.mulf %1204, %1212 : vector<2x32xf32>
    %1221 = arith.addf %1219, %1220 : vector<2x32xf32>
    %1222 = math.tanh %1221 : vector<2x32xf32>
    %1223 = arith.mulf %1218, %1222 : vector<2x32xf32>
    %1224 = vector.extract_strided_slice %1197 {offsets = [0, 128], sizes = [2, 128], strides = [1, 1]} : vector<2x256xf32> to vector<2x128xf32>
    %1225 = vector.extract_strided_slice %1224 {offsets = [0, 0], sizes = [2, 32], strides = [1, 1]} : vector<2x128xf32> to vector<2x32xf32>
    %1226 = arith.negf %1225 : vector<2x32xf32>
    %1227 = math.exp %1226 : vector<2x32xf32>
    %cst_178 = arith.constant 1.000000e+00 : f32
    %1228 = vector.broadcast %cst_178 : f32 to vector<2x32xf32>
    %1229 = arith.addf %1228, %1227 : vector<2x32xf32>
    %1230 = arith.divf %1228, %1229 : vector<2x32xf32>
    %1231 = vector.extract_strided_slice %1224 {offsets = [0, 32], sizes = [2, 32], strides = [1, 1]} : vector<2x128xf32> to vector<2x32xf32>
    %1232 = arith.negf %1231 : vector<2x32xf32>
    %1233 = math.exp %1232 : vector<2x32xf32>
    %cst_179 = arith.constant 1.000000e+00 : f32
    %1234 = vector.broadcast %cst_179 : f32 to vector<2x32xf32>
    %1235 = arith.addf %1234, %1233 : vector<2x32xf32>
    %1236 = arith.divf %1234, %1235 : vector<2x32xf32>
    %1237 = vector.extract_strided_slice %1224 {offsets = [0, 64], sizes = [2, 32], strides = [1, 1]} : vector<2x128xf32> to vector<2x32xf32>
    %1238 = math.tanh %1237 : vector<2x32xf32>
    %1239 = vector.extract_strided_slice %1224 {offsets = [0, 96], sizes = [2, 32], strides = [1, 1]} : vector<2x128xf32> to vector<2x32xf32>
    %1240 = arith.negf %1239 : vector<2x32xf32>
    %1241 = math.exp %1240 : vector<2x32xf32>
    %cst_180 = arith.constant 1.000000e+00 : f32
    %1242 = vector.broadcast %cst_180 : f32 to vector<2x32xf32>
    %1243 = arith.addf %1242, %1241 : vector<2x32xf32>
    %1244 = arith.divf %1242, %1243 : vector<2x32xf32>
    %1245 = arith.mulf %1236, %1189 : vector<2x32xf32>
    %1246 = arith.mulf %1230, %1238 : vector<2x32xf32>
    %1247 = arith.addf %1245, %1246 : vector<2x32xf32>
    %1248 = math.tanh %1247 : vector<2x32xf32>
    %1249 = arith.mulf %1244, %1248 : vector<2x32xf32>
    %1250 = tpu.concatenate %1223, %1249 in 1 : vector<2x32xf32>, vector<2x32xf32> -> vector<2x64xf32>
    %1251 = vector.extract_strided_slice %956 {offsets = [10, 0], sizes = [2, 128], strides = [1, 1]} : vector<16x256xf32> to vector<2x128xf32>
    %1252 = vector.extract_strided_slice %956 {offsets = [4, 128], sizes = [2, 128], strides = [1, 1]} : vector<16x256xf32> to vector<2x128xf32>
    %1253 = tpu.concatenate %1251, %1252 in 1 : vector<2x128xf32>, vector<2x128xf32> -> vector<2x256xf32>
    %cst_181 = arith.constant dense<0.000000e+00> : vector<2x256xf32>
    %1254 = tpu.matmul %1250, %957, %cst_181 {dimension_numbers = #tpu.dot_dimension_numbers<[1], [0], [0], [1], [0, 0, 1, 1], [], []>} : vector<2x64xf32>, vector<64x256xf32>, vector<2x256xf32> -> vector<2x256xf32>
    %1255 = arith.addf %1253, %1254 : vector<2x256xf32>
    %1256 = vector.extract_strided_slice %1255 {offsets = [0, 0], sizes = [2, 128], strides = [1, 1]} : vector<2x256xf32> to vector<2x128xf32>
    %1257 = vector.extract_strided_slice %1256 {offsets = [0, 0], sizes = [2, 32], strides = [1, 1]} : vector<2x128xf32> to vector<2x32xf32>
    %1258 = arith.negf %1257 : vector<2x32xf32>
    %1259 = math.exp %1258 : vector<2x32xf32>
    %cst_182 = arith.constant 1.000000e+00 : f32
    %1260 = vector.broadcast %cst_182 : f32 to vector<2x32xf32>
    %1261 = arith.addf %1260, %1259 : vector<2x32xf32>
    %1262 = arith.divf %1260, %1261 : vector<2x32xf32>
    %1263 = vector.extract_strided_slice %1256 {offsets = [0, 32], sizes = [2, 32], strides = [1, 1]} : vector<2x128xf32> to vector<2x32xf32>
    %1264 = arith.negf %1263 : vector<2x32xf32>
    %1265 = math.exp %1264 : vector<2x32xf32>
    %cst_183 = arith.constant 1.000000e+00 : f32
    %1266 = vector.broadcast %cst_183 : f32 to vector<2x32xf32>
    %1267 = arith.addf %1266, %1265 : vector<2x32xf32>
    %1268 = arith.divf %1266, %1267 : vector<2x32xf32>
    %1269 = vector.extract_strided_slice %1256 {offsets = [0, 64], sizes = [2, 32], strides = [1, 1]} : vector<2x128xf32> to vector<2x32xf32>
    %1270 = math.tanh %1269 : vector<2x32xf32>
    %1271 = vector.extract_strided_slice %1256 {offsets = [0, 96], sizes = [2, 32], strides = [1, 1]} : vector<2x128xf32> to vector<2x32xf32>
    %1272 = arith.negf %1271 : vector<2x32xf32>
    %1273 = math.exp %1272 : vector<2x32xf32>
    %cst_184 = arith.constant 1.000000e+00 : f32
    %1274 = vector.broadcast %cst_184 : f32 to vector<2x32xf32>
    %1275 = arith.addf %1274, %1273 : vector<2x32xf32>
    %1276 = arith.divf %1274, %1275 : vector<2x32xf32>
    %1277 = arith.mulf %1268, %1221 : vector<2x32xf32>
    %1278 = arith.mulf %1262, %1270 : vector<2x32xf32>
    %1279 = arith.addf %1277, %1278 : vector<2x32xf32>
    %1280 = math.tanh %1279 : vector<2x32xf32>
    %1281 = arith.mulf %1276, %1280 : vector<2x32xf32>
    %1282 = vector.extract_strided_slice %1255 {offsets = [0, 128], sizes = [2, 128], strides = [1, 1]} : vector<2x256xf32> to vector<2x128xf32>
    %1283 = vector.extract_strided_slice %1282 {offsets = [0, 0], sizes = [2, 32], strides = [1, 1]} : vector<2x128xf32> to vector<2x32xf32>
    %1284 = arith.negf %1283 : vector<2x32xf32>
    %1285 = math.exp %1284 : vector<2x32xf32>
    %cst_185 = arith.constant 1.000000e+00 : f32
    %1286 = vector.broadcast %cst_185 : f32 to vector<2x32xf32>
    %1287 = arith.addf %1286, %1285 : vector<2x32xf32>
    %1288 = arith.divf %1286, %1287 : vector<2x32xf32>
    %1289 = vector.extract_strided_slice %1282 {offsets = [0, 32], sizes = [2, 32], strides = [1, 1]} : vector<2x128xf32> to vector<2x32xf32>
    %1290 = arith.negf %1289 : vector<2x32xf32>
    %1291 = math.exp %1290 : vector<2x32xf32>
    %cst_186 = arith.constant 1.000000e+00 : f32
    %1292 = vector.broadcast %cst_186 : f32 to vector<2x32xf32>
    %1293 = arith.addf %1292, %1291 : vector<2x32xf32>
    %1294 = arith.divf %1292, %1293 : vector<2x32xf32>
    %1295 = vector.extract_strided_slice %1282 {offsets = [0, 64], sizes = [2, 32], strides = [1, 1]} : vector<2x128xf32> to vector<2x32xf32>
    %1296 = math.tanh %1295 : vector<2x32xf32>
    %1297 = vector.extract_strided_slice %1282 {offsets = [0, 96], sizes = [2, 32], strides = [1, 1]} : vector<2x128xf32> to vector<2x32xf32>
    %1298 = arith.negf %1297 : vector<2x32xf32>
    %1299 = math.exp %1298 : vector<2x32xf32>
    %cst_187 = arith.constant 1.000000e+00 : f32
    %1300 = vector.broadcast %cst_187 : f32 to vector<2x32xf32>
    %1301 = arith.addf %1300, %1299 : vector<2x32xf32>
    %1302 = arith.divf %1300, %1301 : vector<2x32xf32>
    %1303 = arith.mulf %1294, %1247 : vector<2x32xf32>
    %1304 = arith.mulf %1288, %1296 : vector<2x32xf32>
    %1305 = arith.addf %1303, %1304 : vector<2x32xf32>
    %1306 = math.tanh %1305 : vector<2x32xf32>
    %1307 = arith.mulf %1302, %1306 : vector<2x32xf32>
    %1308 = tpu.concatenate %1281, %1307 in 1 : vector<2x32xf32>, vector<2x32xf32> -> vector<2x64xf32>
    %1309 = vector.extract_strided_slice %956 {offsets = [12, 0], sizes = [2, 128], strides = [1, 1]} : vector<16x256xf32> to vector<2x128xf32>
    %1310 = vector.extract_strided_slice %956 {offsets = [2, 128], sizes = [2, 128], strides = [1, 1]} : vector<16x256xf32> to vector<2x128xf32>
    %1311 = tpu.concatenate %1309, %1310 in 1 : vector<2x128xf32>, vector<2x128xf32> -> vector<2x256xf32>
    %cst_188 = arith.constant dense<0.000000e+00> : vector<2x256xf32>
    %1312 = tpu.matmul %1308, %957, %cst_188 {dimension_numbers = #tpu.dot_dimension_numbers<[1], [0], [0], [1], [0, 0, 1, 1], [], []>} : vector<2x64xf32>, vector<64x256xf32>, vector<2x256xf32> -> vector<2x256xf32>
    %1313 = arith.addf %1311, %1312 : vector<2x256xf32>
    %1314 = vector.extract_strided_slice %1313 {offsets = [0, 0], sizes = [2, 128], strides = [1, 1]} : vector<2x256xf32> to vector<2x128xf32>
    %1315 = vector.extract_strided_slice %1314 {offsets = [0, 0], sizes = [2, 32], strides = [1, 1]} : vector<2x128xf32> to vector<2x32xf32>
    %1316 = arith.negf %1315 : vector<2x32xf32>
    %1317 = math.exp %1316 : vector<2x32xf32>
    %cst_189 = arith.constant 1.000000e+00 : f32
    %1318 = vector.broadcast %cst_189 : f32 to vector<2x32xf32>
    %1319 = arith.addf %1318, %1317 : vector<2x32xf32>
    %1320 = arith.divf %1318, %1319 : vector<2x32xf32>
    %1321 = vector.extract_strided_slice %1314 {offsets = [0, 32], sizes = [2, 32], strides = [1, 1]} : vector<2x128xf32> to vector<2x32xf32>
    %1322 = arith.negf %1321 : vector<2x32xf32>
    %1323 = math.exp %1322 : vector<2x32xf32>
    %cst_190 = arith.constant 1.000000e+00 : f32
    %1324 = vector.broadcast %cst_190 : f32 to vector<2x32xf32>
    %1325 = arith.addf %1324, %1323 : vector<2x32xf32>
    %1326 = arith.divf %1324, %1325 : vector<2x32xf32>
    %1327 = vector.extract_strided_slice %1314 {offsets = [0, 64], sizes = [2, 32], strides = [1, 1]} : vector<2x128xf32> to vector<2x32xf32>
    %1328 = math.tanh %1327 : vector<2x32xf32>
    %1329 = vector.extract_strided_slice %1314 {offsets = [0, 96], sizes = [2, 32], strides = [1, 1]} : vector<2x128xf32> to vector<2x32xf32>
    %1330 = arith.negf %1329 : vector<2x32xf32>
    %1331 = math.exp %1330 : vector<2x32xf32>
    %cst_191 = arith.constant 1.000000e+00 : f32
    %1332 = vector.broadcast %cst_191 : f32 to vector<2x32xf32>
    %1333 = arith.addf %1332, %1331 : vector<2x32xf32>
    %1334 = arith.divf %1332, %1333 : vector<2x32xf32>
    %1335 = arith.mulf %1326, %1279 : vector<2x32xf32>
    %1336 = arith.mulf %1320, %1328 : vector<2x32xf32>
    %1337 = arith.addf %1335, %1336 : vector<2x32xf32>
    %1338 = math.tanh %1337 : vector<2x32xf32>
    %1339 = arith.mulf %1334, %1338 : vector<2x32xf32>
    %1340 = vector.extract_strided_slice %1313 {offsets = [0, 128], sizes = [2, 128], strides = [1, 1]} : vector<2x256xf32> to vector<2x128xf32>
    %1341 = vector.extract_strided_slice %1340 {offsets = [0, 0], sizes = [2, 32], strides = [1, 1]} : vector<2x128xf32> to vector<2x32xf32>
    %1342 = arith.negf %1341 : vector<2x32xf32>
    %1343 = math.exp %1342 : vector<2x32xf32>
    %cst_192 = arith.constant 1.000000e+00 : f32
    %1344 = vector.broadcast %cst_192 : f32 to vector<2x32xf32>
    %1345 = arith.addf %1344, %1343 : vector<2x32xf32>
    %1346 = arith.divf %1344, %1345 : vector<2x32xf32>
    %1347 = vector.extract_strided_slice %1340 {offsets = [0, 32], sizes = [2, 32], strides = [1, 1]} : vector<2x128xf32> to vector<2x32xf32>
    %1348 = arith.negf %1347 : vector<2x32xf32>
    %1349 = math.exp %1348 : vector<2x32xf32>
    %cst_193 = arith.constant 1.000000e+00 : f32
    %1350 = vector.broadcast %cst_193 : f32 to vector<2x32xf32>
    %1351 = arith.addf %1350, %1349 : vector<2x32xf32>
    %1352 = arith.divf %1350, %1351 : vector<2x32xf32>
    %1353 = vector.extract_strided_slice %1340 {offsets = [0, 64], sizes = [2, 32], strides = [1, 1]} : vector<2x128xf32> to vector<2x32xf32>
    %1354 = math.tanh %1353 : vector<2x32xf32>
    %1355 = vector.extract_strided_slice %1340 {offsets = [0, 96], sizes = [2, 32], strides = [1, 1]} : vector<2x128xf32> to vector<2x32xf32>
    %1356 = arith.negf %1355 : vector<2x32xf32>
    %1357 = math.exp %1356 : vector<2x32xf32>
    %cst_194 = arith.constant 1.000000e+00 : f32
    %1358 = vector.broadcast %cst_194 : f32 to vector<2x32xf32>
    %1359 = arith.addf %1358, %1357 : vector<2x32xf32>
    %1360 = arith.divf %1358, %1359 : vector<2x32xf32>
    %1361 = arith.mulf %1352, %1305 : vector<2x32xf32>
    %1362 = arith.mulf %1346, %1354 : vector<2x32xf32>
    %1363 = arith.addf %1361, %1362 : vector<2x32xf32>
    %1364 = math.tanh %1363 : vector<2x32xf32>
    %1365 = arith.mulf %1360, %1364 : vector<2x32xf32>
    %1366 = tpu.concatenate %1339, %1365 in 1 : vector<2x32xf32>, vector<2x32xf32> -> vector<2x64xf32>
    %1367 = vector.extract_strided_slice %956 {offsets = [14, 0], sizes = [2, 128], strides = [1, 1]} : vector<16x256xf32> to vector<2x128xf32>
    %1368 = vector.extract_strided_slice %956 {offsets = [0, 128], sizes = [2, 128], strides = [1, 1]} : vector<16x256xf32> to vector<2x128xf32>
    %1369 = tpu.concatenate %1367, %1368 in 1 : vector<2x128xf32>, vector<2x128xf32> -> vector<2x256xf32>
    %cst_195 = arith.constant dense<0.000000e+00> : vector<2x256xf32>
    %1370 = tpu.matmul %1366, %957, %cst_195 {dimension_numbers = #tpu.dot_dimension_numbers<[1], [0], [0], [1], [0, 0, 1, 1], [], []>} : vector<2x64xf32>, vector<64x256xf32>, vector<2x256xf32> -> vector<2x256xf32>
    %1371 = arith.addf %1369, %1370 : vector<2x256xf32>
    %1372 = vector.extract_strided_slice %1371 {offsets = [0, 0], sizes = [2, 128], strides = [1, 1]} : vector<2x256xf32> to vector<2x128xf32>
    %1373 = vector.extract_strided_slice %1372 {offsets = [0, 0], sizes = [2, 32], strides = [1, 1]} : vector<2x128xf32> to vector<2x32xf32>
    %1374 = arith.negf %1373 : vector<2x32xf32>
    %1375 = math.exp %1374 : vector<2x32xf32>
    %cst_196 = arith.constant 1.000000e+00 : f32
    %1376 = vector.broadcast %cst_196 : f32 to vector<2x32xf32>
    %1377 = arith.addf %1376, %1375 : vector<2x32xf32>
    %1378 = arith.divf %1376, %1377 : vector<2x32xf32>
    %1379 = vector.extract_strided_slice %1372 {offsets = [0, 32], sizes = [2, 32], strides = [1, 1]} : vector<2x128xf32> to vector<2x32xf32>
    %1380 = arith.negf %1379 : vector<2x32xf32>
    %1381 = math.exp %1380 : vector<2x32xf32>
    %cst_197 = arith.constant 1.000000e+00 : f32
    %1382 = vector.broadcast %cst_197 : f32 to vector<2x32xf32>
    %1383 = arith.addf %1382, %1381 : vector<2x32xf32>
    %1384 = arith.divf %1382, %1383 : vector<2x32xf32>
    %1385 = vector.extract_strided_slice %1372 {offsets = [0, 64], sizes = [2, 32], strides = [1, 1]} : vector<2x128xf32> to vector<2x32xf32>
    %1386 = math.tanh %1385 : vector<2x32xf32>
    %1387 = vector.extract_strided_slice %1372 {offsets = [0, 96], sizes = [2, 32], strides = [1, 1]} : vector<2x128xf32> to vector<2x32xf32>
    %1388 = arith.negf %1387 : vector<2x32xf32>
    %1389 = math.exp %1388 : vector<2x32xf32>
    %cst_198 = arith.constant 1.000000e+00 : f32
    %1390 = vector.broadcast %cst_198 : f32 to vector<2x32xf32>
    %1391 = arith.addf %1390, %1389 : vector<2x32xf32>
    %1392 = arith.divf %1390, %1391 : vector<2x32xf32>
    %1393 = arith.mulf %1384, %1337 : vector<2x32xf32>
    %1394 = arith.mulf %1378, %1386 : vector<2x32xf32>
    %1395 = arith.addf %1393, %1394 : vector<2x32xf32>
    %1396 = math.tanh %1395 : vector<2x32xf32>
    %1397 = arith.mulf %1392, %1396 : vector<2x32xf32>
    %1398 = vector.extract_strided_slice %1371 {offsets = [0, 128], sizes = [2, 128], strides = [1, 1]} : vector<2x256xf32> to vector<2x128xf32>
    %1399 = vector.extract_strided_slice %1398 {offsets = [0, 0], sizes = [2, 32], strides = [1, 1]} : vector<2x128xf32> to vector<2x32xf32>
    %1400 = arith.negf %1399 : vector<2x32xf32>
    %1401 = math.exp %1400 : vector<2x32xf32>
    %cst_199 = arith.constant 1.000000e+00 : f32
    %1402 = vector.broadcast %cst_199 : f32 to vector<2x32xf32>
    %1403 = arith.addf %1402, %1401 : vector<2x32xf32>
    %1404 = arith.divf %1402, %1403 : vector<2x32xf32>
    %1405 = vector.extract_strided_slice %1398 {offsets = [0, 32], sizes = [2, 32], strides = [1, 1]} : vector<2x128xf32> to vector<2x32xf32>
    %1406 = arith.negf %1405 : vector<2x32xf32>
    %1407 = math.exp %1406 : vector<2x32xf32>
    %cst_200 = arith.constant 1.000000e+00 : f32
    %1408 = vector.broadcast %cst_200 : f32 to vector<2x32xf32>
    %1409 = arith.addf %1408, %1407 : vector<2x32xf32>
    %1410 = arith.divf %1408, %1409 : vector<2x32xf32>
    %1411 = vector.extract_strided_slice %1398 {offsets = [0, 64], sizes = [2, 32], strides = [1, 1]} : vector<2x128xf32> to vector<2x32xf32>
    %1412 = math.tanh %1411 : vector<2x32xf32>
    %1413 = vector.extract_strided_slice %1398 {offsets = [0, 96], sizes = [2, 32], strides = [1, 1]} : vector<2x128xf32> to vector<2x32xf32>
    %1414 = arith.negf %1413 : vector<2x32xf32>
    %1415 = math.exp %1414 : vector<2x32xf32>
    %cst_201 = arith.constant 1.000000e+00 : f32
    %1416 = vector.broadcast %cst_201 : f32 to vector<2x32xf32>
    %1417 = arith.addf %1416, %1415 : vector<2x32xf32>
    %1418 = arith.divf %1416, %1417 : vector<2x32xf32>
    %1419 = arith.mulf %1410, %1363 : vector<2x32xf32>
    %1420 = arith.mulf %1404, %1412 : vector<2x32xf32>
    %1421 = arith.addf %1419, %1420 : vector<2x32xf32>
    %1422 = math.tanh %1421 : vector<2x32xf32>
    %1423 = arith.mulf %1418, %1422 : vector<2x32xf32>
    %1424 = tpu.concatenate %991, %1049, %1107, %1165, %1223, %1281, %1339, %1397 in 0 : vector<2x32xf32>, vector<2x32xf32>, vector<2x32xf32>, vector<2x32xf32>, vector<2x32xf32>, vector<2x32xf32>, vector<2x32xf32>, vector<2x32xf32> -> vector<16x32xf32>
    %1425 = tpu.concatenate %1423, %1365, %1307, %1249, %1191, %1133, %1075, %1017 in 0 : vector<2x32xf32>, vector<2x32xf32>, vector<2x32xf32>, vector<2x32xf32>, vector<2x32xf32>, vector<2x32xf32>, vector<2x32xf32>, vector<2x32xf32> -> vector<16x32xf32>
    %c0_202 = arith.constant 0 : index
    %c0_203 = arith.constant 0 : index
    %1426 = vector.load %arg13[%c0_202, %c0_203] : memref<1x256xf32, #tpu.memory_space<vmem>>, vector<1x256xf32>
    %c0_204 = arith.constant 0 : index
    %c0_205 = arith.constant 0 : index
    %1427 = vector.load %arg11[%c0_204, %c0_205] : memref<64x256xf32, #tpu.memory_space<vmem>>, vector<32x256xf32>
    %cst_206 = arith.constant dense<0.000000e+00> : vector<16x256xf32>
    %1428 = tpu.matmul %1424, %1427, %cst_206 {dimension_numbers = #tpu.dot_dimension_numbers<[1], [0], [0], [1], [0, 0, 1, 1], [], []>} : vector<16x32xf32>, vector<32x256xf32>, vector<16x256xf32> -> vector<16x256xf32>
    %1429 = vector.broadcast %1426 : vector<1x256xf32> to vector<16x256xf32>
    %1430 = arith.addf %1429, %1428 : vector<16x256xf32>
    %c32_207 = arith.constant 32 : index
    %c0_208 = arith.constant 0 : index
    %1431 = vector.load %arg11[%c32_207, %c0_208] : memref<64x256xf32, #tpu.memory_space<vmem>>, vector<32x256xf32>
    %cst_209 = arith.constant dense<0.000000e+00> : vector<16x256xf32>
    %1432 = tpu.matmul %1425, %1431, %cst_209 {dimension_numbers = #tpu.dot_dimension_numbers<[1], [0], [0], [1], [0, 0, 1, 1], [], []>} : vector<16x32xf32>, vector<32x256xf32>, vector<16x256xf32> -> vector<16x256xf32>
    %1433 = arith.addf %1430, %1432 : vector<16x256xf32>
    %c0_210 = arith.constant 0 : index
    %c0_211 = arith.constant 0 : index
    %1434 = vector.load %arg12[%c0_210, %c0_211] : memref<64x256xf32, #tpu.memory_space<vmem>>, vector<64x256xf32>
    %cst_212 = arith.constant 0.000000e+00 : f32
    %1435 = vector.broadcast %cst_212 : f32 to vector<2x64xf32>
    %cst_213 = arith.constant 0.000000e+00 : f32
    %1436 = vector.broadcast %cst_213 : f32 to vector<2x32xf32>
    %cst_214 = arith.constant 0.000000e+00 : f32
    %1437 = vector.broadcast %cst_214 : f32 to vector<2x32xf32>
    %1438 = vector.extract_strided_slice %1433 {offsets = [0, 0], sizes = [2, 128], strides = [1, 1]} : vector<16x256xf32> to vector<2x128xf32>
    %1439 = vector.extract_strided_slice %1433 {offsets = [14, 128], sizes = [2, 128], strides = [1, 1]} : vector<16x256xf32> to vector<2x128xf32>
    %1440 = tpu.concatenate %1438, %1439 in 1 : vector<2x128xf32>, vector<2x128xf32> -> vector<2x256xf32>
    %cst_215 = arith.constant dense<0.000000e+00> : vector<2x256xf32>
    %1441 = tpu.matmul %1435, %1434, %cst_215 {dimension_numbers = #tpu.dot_dimension_numbers<[1], [0], [0], [1], [0, 0, 1, 1], [], []>} : vector<2x64xf32>, vector<64x256xf32>, vector<2x256xf32> -> vector<2x256xf32>
    %1442 = arith.addf %1440, %1441 : vector<2x256xf32>
    %1443 = vector.extract_strided_slice %1442 {offsets = [0, 0], sizes = [2, 128], strides = [1, 1]} : vector<2x256xf32> to vector<2x128xf32>
    %1444 = vector.extract_strided_slice %1443 {offsets = [0, 0], sizes = [2, 32], strides = [1, 1]} : vector<2x128xf32> to vector<2x32xf32>
    %1445 = arith.negf %1444 : vector<2x32xf32>
    %1446 = math.exp %1445 : vector<2x32xf32>
    %cst_216 = arith.constant 1.000000e+00 : f32
    %1447 = vector.broadcast %cst_216 : f32 to vector<2x32xf32>
    %1448 = arith.addf %1447, %1446 : vector<2x32xf32>
    %1449 = arith.divf %1447, %1448 : vector<2x32xf32>
    %1450 = vector.extract_strided_slice %1443 {offsets = [0, 32], sizes = [2, 32], strides = [1, 1]} : vector<2x128xf32> to vector<2x32xf32>
    %1451 = arith.negf %1450 : vector<2x32xf32>
    %1452 = math.exp %1451 : vector<2x32xf32>
    %cst_217 = arith.constant 1.000000e+00 : f32
    %1453 = vector.broadcast %cst_217 : f32 to vector<2x32xf32>
    %1454 = arith.addf %1453, %1452 : vector<2x32xf32>
    %1455 = arith.divf %1453, %1454 : vector<2x32xf32>
    %1456 = vector.extract_strided_slice %1443 {offsets = [0, 64], sizes = [2, 32], strides = [1, 1]} : vector<2x128xf32> to vector<2x32xf32>
    %1457 = math.tanh %1456 : vector<2x32xf32>
    %1458 = vector.extract_strided_slice %1443 {offsets = [0, 96], sizes = [2, 32], strides = [1, 1]} : vector<2x128xf32> to vector<2x32xf32>
    %1459 = arith.negf %1458 : vector<2x32xf32>
    %1460 = math.exp %1459 : vector<2x32xf32>
    %cst_218 = arith.constant 1.000000e+00 : f32
    %1461 = vector.broadcast %cst_218 : f32 to vector<2x32xf32>
    %1462 = arith.addf %1461, %1460 : vector<2x32xf32>
    %1463 = arith.divf %1461, %1462 : vector<2x32xf32>
    %1464 = arith.mulf %1455, %1436 : vector<2x32xf32>
    %1465 = arith.mulf %1449, %1457 : vector<2x32xf32>
    %1466 = arith.addf %1464, %1465 : vector<2x32xf32>
    %1467 = math.tanh %1466 : vector<2x32xf32>
    %1468 = arith.mulf %1463, %1467 : vector<2x32xf32>
    %1469 = vector.extract_strided_slice %1442 {offsets = [0, 128], sizes = [2, 128], strides = [1, 1]} : vector<2x256xf32> to vector<2x128xf32>
    %1470 = vector.extract_strided_slice %1469 {offsets = [0, 0], sizes = [2, 32], strides = [1, 1]} : vector<2x128xf32> to vector<2x32xf32>
    %1471 = arith.negf %1470 : vector<2x32xf32>
    %1472 = math.exp %1471 : vector<2x32xf32>
    %cst_219 = arith.constant 1.000000e+00 : f32
    %1473 = vector.broadcast %cst_219 : f32 to vector<2x32xf32>
    %1474 = arith.addf %1473, %1472 : vector<2x32xf32>
    %1475 = arith.divf %1473, %1474 : vector<2x32xf32>
    %1476 = vector.extract_strided_slice %1469 {offsets = [0, 32], sizes = [2, 32], strides = [1, 1]} : vector<2x128xf32> to vector<2x32xf32>
    %1477 = arith.negf %1476 : vector<2x32xf32>
    %1478 = math.exp %1477 : vector<2x32xf32>
    %cst_220 = arith.constant 1.000000e+00 : f32
    %1479 = vector.broadcast %cst_220 : f32 to vector<2x32xf32>
    %1480 = arith.addf %1479, %1478 : vector<2x32xf32>
    %1481 = arith.divf %1479, %1480 : vector<2x32xf32>
    %1482 = vector.extract_strided_slice %1469 {offsets = [0, 64], sizes = [2, 32], strides = [1, 1]} : vector<2x128xf32> to vector<2x32xf32>
    %1483 = math.tanh %1482 : vector<2x32xf32>
    %1484 = vector.extract_strided_slice %1469 {offsets = [0, 96], sizes = [2, 32], strides = [1, 1]} : vector<2x128xf32> to vector<2x32xf32>
    %1485 = arith.negf %1484 : vector<2x32xf32>
    %1486 = math.exp %1485 : vector<2x32xf32>
    %cst_221 = arith.constant 1.000000e+00 : f32
    %1487 = vector.broadcast %cst_221 : f32 to vector<2x32xf32>
    %1488 = arith.addf %1487, %1486 : vector<2x32xf32>
    %1489 = arith.divf %1487, %1488 : vector<2x32xf32>
    %1490 = arith.mulf %1481, %1437 : vector<2x32xf32>
    %1491 = arith.mulf %1475, %1483 : vector<2x32xf32>
    %1492 = arith.addf %1490, %1491 : vector<2x32xf32>
    %1493 = math.tanh %1492 : vector<2x32xf32>
    %1494 = arith.mulf %1489, %1493 : vector<2x32xf32>
    %1495 = tpu.concatenate %1468, %1494 in 1 : vector<2x32xf32>, vector<2x32xf32> -> vector<2x64xf32>
    %1496 = vector.extract_strided_slice %1433 {offsets = [2, 0], sizes = [2, 128], strides = [1, 1]} : vector<16x256xf32> to vector<2x128xf32>
    %1497 = vector.extract_strided_slice %1433 {offsets = [12, 128], sizes = [2, 128], strides = [1, 1]} : vector<16x256xf32> to vector<2x128xf32>
    %1498 = tpu.concatenate %1496, %1497 in 1 : vector<2x128xf32>, vector<2x128xf32> -> vector<2x256xf32>
    %cst_222 = arith.constant dense<0.000000e+00> : vector<2x256xf32>
    %1499 = tpu.matmul %1495, %1434, %cst_222 {dimension_numbers = #tpu.dot_dimension_numbers<[1], [0], [0], [1], [0, 0, 1, 1], [], []>} : vector<2x64xf32>, vector<64x256xf32>, vector<2x256xf32> -> vector<2x256xf32>
    %1500 = arith.addf %1498, %1499 : vector<2x256xf32>
    %1501 = vector.extract_strided_slice %1500 {offsets = [0, 0], sizes = [2, 128], strides = [1, 1]} : vector<2x256xf32> to vector<2x128xf32>
    %1502 = vector.extract_strided_slice %1501 {offsets = [0, 0], sizes = [2, 32], strides = [1, 1]} : vector<2x128xf32> to vector<2x32xf32>
    %1503 = arith.negf %1502 : vector<2x32xf32>
    %1504 = math.exp %1503 : vector<2x32xf32>
    %cst_223 = arith.constant 1.000000e+00 : f32
    %1505 = vector.broadcast %cst_223 : f32 to vector<2x32xf32>
    %1506 = arith.addf %1505, %1504 : vector<2x32xf32>
    %1507 = arith.divf %1505, %1506 : vector<2x32xf32>
    %1508 = vector.extract_strided_slice %1501 {offsets = [0, 32], sizes = [2, 32], strides = [1, 1]} : vector<2x128xf32> to vector<2x32xf32>
    %1509 = arith.negf %1508 : vector<2x32xf32>
    %1510 = math.exp %1509 : vector<2x32xf32>
    %cst_224 = arith.constant 1.000000e+00 : f32
    %1511 = vector.broadcast %cst_224 : f32 to vector<2x32xf32>
    %1512 = arith.addf %1511, %1510 : vector<2x32xf32>
    %1513 = arith.divf %1511, %1512 : vector<2x32xf32>
    %1514 = vector.extract_strided_slice %1501 {offsets = [0, 64], sizes = [2, 32], strides = [1, 1]} : vector<2x128xf32> to vector<2x32xf32>
    %1515 = math.tanh %1514 : vector<2x32xf32>
    %1516 = vector.extract_strided_slice %1501 {offsets = [0, 96], sizes = [2, 32], strides = [1, 1]} : vector<2x128xf32> to vector<2x32xf32>
    %1517 = arith.negf %1516 : vector<2x32xf32>
    %1518 = math.exp %1517 : vector<2x32xf32>
    %cst_225 = arith.constant 1.000000e+00 : f32
    %1519 = vector.broadcast %cst_225 : f32 to vector<2x32xf32>
    %1520 = arith.addf %1519, %1518 : vector<2x32xf32>
    %1521 = arith.divf %1519, %1520 : vector<2x32xf32>
    %1522 = arith.mulf %1513, %1466 : vector<2x32xf32>
    %1523 = arith.mulf %1507, %1515 : vector<2x32xf32>
    %1524 = arith.addf %1522, %1523 : vector<2x32xf32>
    %1525 = math.tanh %1524 : vector<2x32xf32>
    %1526 = arith.mulf %1521, %1525 : vector<2x32xf32>
    %1527 = vector.extract_strided_slice %1500 {offsets = [0, 128], sizes = [2, 128], strides = [1, 1]} : vector<2x256xf32> to vector<2x128xf32>
    %1528 = vector.extract_strided_slice %1527 {offsets = [0, 0], sizes = [2, 32], strides = [1, 1]} : vector<2x128xf32> to vector<2x32xf32>
    %1529 = arith.negf %1528 : vector<2x32xf32>
    %1530 = math.exp %1529 : vector<2x32xf32>
    %cst_226 = arith.constant 1.000000e+00 : f32
    %1531 = vector.broadcast %cst_226 : f32 to vector<2x32xf32>
    %1532 = arith.addf %1531, %1530 : vector<2x32xf32>
    %1533 = arith.divf %1531, %1532 : vector<2x32xf32>
    %1534 = vector.extract_strided_slice %1527 {offsets = [0, 32], sizes = [2, 32], strides = [1, 1]} : vector<2x128xf32> to vector<2x32xf32>
    %1535 = arith.negf %1534 : vector<2x32xf32>
    %1536 = math.exp %1535 : vector<2x32xf32>
    %cst_227 = arith.constant 1.000000e+00 : f32
    %1537 = vector.broadcast %cst_227 : f32 to vector<2x32xf32>
    %1538 = arith.addf %1537, %1536 : vector<2x32xf32>
    %1539 = arith.divf %1537, %1538 : vector<2x32xf32>
    %1540 = vector.extract_strided_slice %1527 {offsets = [0, 64], sizes = [2, 32], strides = [1, 1]} : vector<2x128xf32> to vector<2x32xf32>
    %1541 = math.tanh %1540 : vector<2x32xf32>
    %1542 = vector.extract_strided_slice %1527 {offsets = [0, 96], sizes = [2, 32], strides = [1, 1]} : vector<2x128xf32> to vector<2x32xf32>
    %1543 = arith.negf %1542 : vector<2x32xf32>
    %1544 = math.exp %1543 : vector<2x32xf32>
    %cst_228 = arith.constant 1.000000e+00 : f32
    %1545 = vector.broadcast %cst_228 : f32 to vector<2x32xf32>
    %1546 = arith.addf %1545, %1544 : vector<2x32xf32>
    %1547 = arith.divf %1545, %1546 : vector<2x32xf32>
    %1548 = arith.mulf %1539, %1492 : vector<2x32xf32>
    %1549 = arith.mulf %1533, %1541 : vector<2x32xf32>
    %1550 = arith.addf %1548, %1549 : vector<2x32xf32>
    %1551 = math.tanh %1550 : vector<2x32xf32>
    %1552 = arith.mulf %1547, %1551 : vector<2x32xf32>
    %1553 = tpu.concatenate %1526, %1552 in 1 : vector<2x32xf32>, vector<2x32xf32> -> vector<2x64xf32>
    %1554 = vector.extract_strided_slice %1433 {offsets = [4, 0], sizes = [2, 128], strides = [1, 1]} : vector<16x256xf32> to vector<2x128xf32>
    %1555 = vector.extract_strided_slice %1433 {offsets = [10, 128], sizes = [2, 128], strides = [1, 1]} : vector<16x256xf32> to vector<2x128xf32>
    %1556 = tpu.concatenate %1554, %1555 in 1 : vector<2x128xf32>, vector<2x128xf32> -> vector<2x256xf32>
    %cst_229 = arith.constant dense<0.000000e+00> : vector<2x256xf32>
    %1557 = tpu.matmul %1553, %1434, %cst_229 {dimension_numbers = #tpu.dot_dimension_numbers<[1], [0], [0], [1], [0, 0, 1, 1], [], []>} : vector<2x64xf32>, vector<64x256xf32>, vector<2x256xf32> -> vector<2x256xf32>
    %1558 = arith.addf %1556, %1557 : vector<2x256xf32>
    %1559 = vector.extract_strided_slice %1558 {offsets = [0, 0], sizes = [2, 128], strides = [1, 1]} : vector<2x256xf32> to vector<2x128xf32>
    %1560 = vector.extract_strided_slice %1559 {offsets = [0, 0], sizes = [2, 32], strides = [1, 1]} : vector<2x128xf32> to vector<2x32xf32>
    %1561 = arith.negf %1560 : vector<2x32xf32>
    %1562 = math.exp %1561 : vector<2x32xf32>
    %cst_230 = arith.constant 1.000000e+00 : f32
    %1563 = vector.broadcast %cst_230 : f32 to vector<2x32xf32>
    %1564 = arith.addf %1563, %1562 : vector<2x32xf32>
    %1565 = arith.divf %1563, %1564 : vector<2x32xf32>
    %1566 = vector.extract_strided_slice %1559 {offsets = [0, 32], sizes = [2, 32], strides = [1, 1]} : vector<2x128xf32> to vector<2x32xf32>
    %1567 = arith.negf %1566 : vector<2x32xf32>
    %1568 = math.exp %1567 : vector<2x32xf32>
    %cst_231 = arith.constant 1.000000e+00 : f32
    %1569 = vector.broadcast %cst_231 : f32 to vector<2x32xf32>
    %1570 = arith.addf %1569, %1568 : vector<2x32xf32>
    %1571 = arith.divf %1569, %1570 : vector<2x32xf32>
    %1572 = vector.extract_strided_slice %1559 {offsets = [0, 64], sizes = [2, 32], strides = [1, 1]} : vector<2x128xf32> to vector<2x32xf32>
    %1573 = math.tanh %1572 : vector<2x32xf32>
    %1574 = vector.extract_strided_slice %1559 {offsets = [0, 96], sizes = [2, 32], strides = [1, 1]} : vector<2x128xf32> to vector<2x32xf32>
    %1575 = arith.negf %1574 : vector<2x32xf32>
    %1576 = math.exp %1575 : vector<2x32xf32>
    %cst_232 = arith.constant 1.000000e+00 : f32
    %1577 = vector.broadcast %cst_232 : f32 to vector<2x32xf32>
    %1578 = arith.addf %1577, %1576 : vector<2x32xf32>
    %1579 = arith.divf %1577, %1578 : vector<2x32xf32>
    %1580 = arith.mulf %1571, %1524 : vector<2x32xf32>
    %1581 = arith.mulf %1565, %1573 : vector<2x32xf32>
    %1582 = arith.addf %1580, %1581 : vector<2x32xf32>
    %1583 = math.tanh %1582 : vector<2x32xf32>
    %1584 = arith.mulf %1579, %1583 : vector<2x32xf32>
    %1585 = vector.extract_strided_slice %1558 {offsets = [0, 128], sizes = [2, 128], strides = [1, 1]} : vector<2x256xf32> to vector<2x128xf32>
    %1586 = vector.extract_strided_slice %1585 {offsets = [0, 0], sizes = [2, 32], strides = [1, 1]} : vector<2x128xf32> to vector<2x32xf32>
    %1587 = arith.negf %1586 : vector<2x32xf32>
    %1588 = math.exp %1587 : vector<2x32xf32>
    %cst_233 = arith.constant 1.000000e+00 : f32
    %1589 = vector.broadcast %cst_233 : f32 to vector<2x32xf32>
    %1590 = arith.addf %1589, %1588 : vector<2x32xf32>
    %1591 = arith.divf %1589, %1590 : vector<2x32xf32>
    %1592 = vector.extract_strided_slice %1585 {offsets = [0, 32], sizes = [2, 32], strides = [1, 1]} : vector<2x128xf32> to vector<2x32xf32>
    %1593 = arith.negf %1592 : vector<2x32xf32>
    %1594 = math.exp %1593 : vector<2x32xf32>
    %cst_234 = arith.constant 1.000000e+00 : f32
    %1595 = vector.broadcast %cst_234 : f32 to vector<2x32xf32>
    %1596 = arith.addf %1595, %1594 : vector<2x32xf32>
    %1597 = arith.divf %1595, %1596 : vector<2x32xf32>
    %1598 = vector.extract_strided_slice %1585 {offsets = [0, 64], sizes = [2, 32], strides = [1, 1]} : vector<2x128xf32> to vector<2x32xf32>
    %1599 = math.tanh %1598 : vector<2x32xf32>
    %1600 = vector.extract_strided_slice %1585 {offsets = [0, 96], sizes = [2, 32], strides = [1, 1]} : vector<2x128xf32> to vector<2x32xf32>
    %1601 = arith.negf %1600 : vector<2x32xf32>
    %1602 = math.exp %1601 : vector<2x32xf32>
    %cst_235 = arith.constant 1.000000e+00 : f32
    %1603 = vector.broadcast %cst_235 : f32 to vector<2x32xf32>
    %1604 = arith.addf %1603, %1602 : vector<2x32xf32>
    %1605 = arith.divf %1603, %1604 : vector<2x32xf32>
    %1606 = arith.mulf %1597, %1550 : vector<2x32xf32>
    %1607 = arith.mulf %1591, %1599 : vector<2x32xf32>
    %1608 = arith.addf %1606, %1607 : vector<2x32xf32>
    %1609 = math.tanh %1608 : vector<2x32xf32>
    %1610 = arith.mulf %1605, %1609 : vector<2x32xf32>
    %1611 = tpu.concatenate %1584, %1610 in 1 : vector<2x32xf32>, vector<2x32xf32> -> vector<2x64xf32>
    %1612 = vector.extract_strided_slice %1433 {offsets = [6, 0], sizes = [2, 128], strides = [1, 1]} : vector<16x256xf32> to vector<2x128xf32>
    %1613 = vector.extract_strided_slice %1433 {offsets = [8, 128], sizes = [2, 128], strides = [1, 1]} : vector<16x256xf32> to vector<2x128xf32>
    %1614 = tpu.concatenate %1612, %1613 in 1 : vector<2x128xf32>, vector<2x128xf32> -> vector<2x256xf32>
    %cst_236 = arith.constant dense<0.000000e+00> : vector<2x256xf32>
    %1615 = tpu.matmul %1611, %1434, %cst_236 {dimension_numbers = #tpu.dot_dimension_numbers<[1], [0], [0], [1], [0, 0, 1, 1], [], []>} : vector<2x64xf32>, vector<64x256xf32>, vector<2x256xf32> -> vector<2x256xf32>
    %1616 = arith.addf %1614, %1615 : vector<2x256xf32>
    %1617 = vector.extract_strided_slice %1616 {offsets = [0, 0], sizes = [2, 128], strides = [1, 1]} : vector<2x256xf32> to vector<2x128xf32>
    %1618 = vector.extract_strided_slice %1617 {offsets = [0, 0], sizes = [2, 32], strides = [1, 1]} : vector<2x128xf32> to vector<2x32xf32>
    %1619 = arith.negf %1618 : vector<2x32xf32>
    %1620 = math.exp %1619 : vector<2x32xf32>
    %cst_237 = arith.constant 1.000000e+00 : f32
    %1621 = vector.broadcast %cst_237 : f32 to vector<2x32xf32>
    %1622 = arith.addf %1621, %1620 : vector<2x32xf32>
    %1623 = arith.divf %1621, %1622 : vector<2x32xf32>
    %1624 = vector.extract_strided_slice %1617 {offsets = [0, 32], sizes = [2, 32], strides = [1, 1]} : vector<2x128xf32> to vector<2x32xf32>
    %1625 = arith.negf %1624 : vector<2x32xf32>
    %1626 = math.exp %1625 : vector<2x32xf32>
    %cst_238 = arith.constant 1.000000e+00 : f32
    %1627 = vector.broadcast %cst_238 : f32 to vector<2x32xf32>
    %1628 = arith.addf %1627, %1626 : vector<2x32xf32>
    %1629 = arith.divf %1627, %1628 : vector<2x32xf32>
    %1630 = vector.extract_strided_slice %1617 {offsets = [0, 64], sizes = [2, 32], strides = [1, 1]} : vector<2x128xf32> to vector<2x32xf32>
    %1631 = math.tanh %1630 : vector<2x32xf32>
    %1632 = vector.extract_strided_slice %1617 {offsets = [0, 96], sizes = [2, 32], strides = [1, 1]} : vector<2x128xf32> to vector<2x32xf32>
    %1633 = arith.negf %1632 : vector<2x32xf32>
    %1634 = math.exp %1633 : vector<2x32xf32>
    %cst_239 = arith.constant 1.000000e+00 : f32
    %1635 = vector.broadcast %cst_239 : f32 to vector<2x32xf32>
    %1636 = arith.addf %1635, %1634 : vector<2x32xf32>
    %1637 = arith.divf %1635, %1636 : vector<2x32xf32>
    %1638 = arith.mulf %1629, %1582 : vector<2x32xf32>
    %1639 = arith.mulf %1623, %1631 : vector<2x32xf32>
    %1640 = arith.addf %1638, %1639 : vector<2x32xf32>
    %1641 = math.tanh %1640 : vector<2x32xf32>
    %1642 = arith.mulf %1637, %1641 : vector<2x32xf32>
    %1643 = vector.extract_strided_slice %1616 {offsets = [0, 128], sizes = [2, 128], strides = [1, 1]} : vector<2x256xf32> to vector<2x128xf32>
    %1644 = vector.extract_strided_slice %1643 {offsets = [0, 0], sizes = [2, 32], strides = [1, 1]} : vector<2x128xf32> to vector<2x32xf32>
    %1645 = arith.negf %1644 : vector<2x32xf32>
    %1646 = math.exp %1645 : vector<2x32xf32>
    %cst_240 = arith.constant 1.000000e+00 : f32
    %1647 = vector.broadcast %cst_240 : f32 to vector<2x32xf32>
    %1648 = arith.addf %1647, %1646 : vector<2x32xf32>
    %1649 = arith.divf %1647, %1648 : vector<2x32xf32>
    %1650 = vector.extract_strided_slice %1643 {offsets = [0, 32], sizes = [2, 32], strides = [1, 1]} : vector<2x128xf32> to vector<2x32xf32>
    %1651 = arith.negf %1650 : vector<2x32xf32>
    %1652 = math.exp %1651 : vector<2x32xf32>
    %cst_241 = arith.constant 1.000000e+00 : f32
    %1653 = vector.broadcast %cst_241 : f32 to vector<2x32xf32>
    %1654 = arith.addf %1653, %1652 : vector<2x32xf32>
    %1655 = arith.divf %1653, %1654 : vector<2x32xf32>
    %1656 = vector.extract_strided_slice %1643 {offsets = [0, 64], sizes = [2, 32], strides = [1, 1]} : vector<2x128xf32> to vector<2x32xf32>
    %1657 = math.tanh %1656 : vector<2x32xf32>
    %1658 = vector.extract_strided_slice %1643 {offsets = [0, 96], sizes = [2, 32], strides = [1, 1]} : vector<2x128xf32> to vector<2x32xf32>
    %1659 = arith.negf %1658 : vector<2x32xf32>
    %1660 = math.exp %1659 : vector<2x32xf32>
    %cst_242 = arith.constant 1.000000e+00 : f32
    %1661 = vector.broadcast %cst_242 : f32 to vector<2x32xf32>
    %1662 = arith.addf %1661, %1660 : vector<2x32xf32>
    %1663 = arith.divf %1661, %1662 : vector<2x32xf32>
    %1664 = arith.mulf %1655, %1608 : vector<2x32xf32>
    %1665 = arith.mulf %1649, %1657 : vector<2x32xf32>
    %1666 = arith.addf %1664, %1665 : vector<2x32xf32>
    %1667 = math.tanh %1666 : vector<2x32xf32>
    %1668 = arith.mulf %1663, %1667 : vector<2x32xf32>
    %1669 = tpu.concatenate %1642, %1668 in 1 : vector<2x32xf32>, vector<2x32xf32> -> vector<2x64xf32>
    %1670 = vector.extract_strided_slice %1433 {offsets = [8, 0], sizes = [2, 128], strides = [1, 1]} : vector<16x256xf32> to vector<2x128xf32>
    %1671 = vector.extract_strided_slice %1433 {offsets = [6, 128], sizes = [2, 128], strides = [1, 1]} : vector<16x256xf32> to vector<2x128xf32>
    %1672 = tpu.concatenate %1670, %1671 in 1 : vector<2x128xf32>, vector<2x128xf32> -> vector<2x256xf32>
    %cst_243 = arith.constant dense<0.000000e+00> : vector<2x256xf32>
    %1673 = tpu.matmul %1669, %1434, %cst_243 {dimension_numbers = #tpu.dot_dimension_numbers<[1], [0], [0], [1], [0, 0, 1, 1], [], []>} : vector<2x64xf32>, vector<64x256xf32>, vector<2x256xf32> -> vector<2x256xf32>
    %1674 = arith.addf %1672, %1673 : vector<2x256xf32>
    %1675 = vector.extract_strided_slice %1674 {offsets = [0, 0], sizes = [2, 128], strides = [1, 1]} : vector<2x256xf32> to vector<2x128xf32>
    %1676 = vector.extract_strided_slice %1675 {offsets = [0, 0], sizes = [2, 32], strides = [1, 1]} : vector<2x128xf32> to vector<2x32xf32>
    %1677 = arith.negf %1676 : vector<2x32xf32>
    %1678 = math.exp %1677 : vector<2x32xf32>
    %cst_244 = arith.constant 1.000000e+00 : f32
    %1679 = vector.broadcast %cst_244 : f32 to vector<2x32xf32>
    %1680 = arith.addf %1679, %1678 : vector<2x32xf32>
    %1681 = arith.divf %1679, %1680 : vector<2x32xf32>
    %1682 = vector.extract_strided_slice %1675 {offsets = [0, 32], sizes = [2, 32], strides = [1, 1]} : vector<2x128xf32> to vector<2x32xf32>
    %1683 = arith.negf %1682 : vector<2x32xf32>
    %1684 = math.exp %1683 : vector<2x32xf32>
    %cst_245 = arith.constant 1.000000e+00 : f32
    %1685 = vector.broadcast %cst_245 : f32 to vector<2x32xf32>
    %1686 = arith.addf %1685, %1684 : vector<2x32xf32>
    %1687 = arith.divf %1685, %1686 : vector<2x32xf32>
    %1688 = vector.extract_strided_slice %1675 {offsets = [0, 64], sizes = [2, 32], strides = [1, 1]} : vector<2x128xf32> to vector<2x32xf32>
    %1689 = math.tanh %1688 : vector<2x32xf32>
    %1690 = vector.extract_strided_slice %1675 {offsets = [0, 96], sizes = [2, 32], strides = [1, 1]} : vector<2x128xf32> to vector<2x32xf32>
    %1691 = arith.negf %1690 : vector<2x32xf32>
    %1692 = math.exp %1691 : vector<2x32xf32>
    %cst_246 = arith.constant 1.000000e+00 : f32
    %1693 = vector.broadcast %cst_246 : f32 to vector<2x32xf32>
    %1694 = arith.addf %1693, %1692 : vector<2x32xf32>
    %1695 = arith.divf %1693, %1694 : vector<2x32xf32>
    %1696 = arith.mulf %1687, %1640 : vector<2x32xf32>
    %1697 = arith.mulf %1681, %1689 : vector<2x32xf32>
    %1698 = arith.addf %1696, %1697 : vector<2x32xf32>
    %1699 = math.tanh %1698 : vector<2x32xf32>
    %1700 = arith.mulf %1695, %1699 : vector<2x32xf32>
    %1701 = vector.extract_strided_slice %1674 {offsets = [0, 128], sizes = [2, 128], strides = [1, 1]} : vector<2x256xf32> to vector<2x128xf32>
    %1702 = vector.extract_strided_slice %1701 {offsets = [0, 0], sizes = [2, 32], strides = [1, 1]} : vector<2x128xf32> to vector<2x32xf32>
    %1703 = arith.negf %1702 : vector<2x32xf32>
    %1704 = math.exp %1703 : vector<2x32xf32>
    %cst_247 = arith.constant 1.000000e+00 : f32
    %1705 = vector.broadcast %cst_247 : f32 to vector<2x32xf32>
    %1706 = arith.addf %1705, %1704 : vector<2x32xf32>
    %1707 = arith.divf %1705, %1706 : vector<2x32xf32>
    %1708 = vector.extract_strided_slice %1701 {offsets = [0, 32], sizes = [2, 32], strides = [1, 1]} : vector<2x128xf32> to vector<2x32xf32>
    %1709 = arith.negf %1708 : vector<2x32xf32>
    %1710 = math.exp %1709 : vector<2x32xf32>
    %cst_248 = arith.constant 1.000000e+00 : f32
    %1711 = vector.broadcast %cst_248 : f32 to vector<2x32xf32>
    %1712 = arith.addf %1711, %1710 : vector<2x32xf32>
    %1713 = arith.divf %1711, %1712 : vector<2x32xf32>
    %1714 = vector.extract_strided_slice %1701 {offsets = [0, 64], sizes = [2, 32], strides = [1, 1]} : vector<2x128xf32> to vector<2x32xf32>
    %1715 = math.tanh %1714 : vector<2x32xf32>
    %1716 = vector.extract_strided_slice %1701 {offsets = [0, 96], sizes = [2, 32], strides = [1, 1]} : vector<2x128xf32> to vector<2x32xf32>
    %1717 = arith.negf %1716 : vector<2x32xf32>
    %1718 = math.exp %1717 : vector<2x32xf32>
    %cst_249 = arith.constant 1.000000e+00 : f32
    %1719 = vector.broadcast %cst_249 : f32 to vector<2x32xf32>
    %1720 = arith.addf %1719, %1718 : vector<2x32xf32>
    %1721 = arith.divf %1719, %1720 : vector<2x32xf32>
    %1722 = arith.mulf %1713, %1666 : vector<2x32xf32>
    %1723 = arith.mulf %1707, %1715 : vector<2x32xf32>
    %1724 = arith.addf %1722, %1723 : vector<2x32xf32>
    %1725 = math.tanh %1724 : vector<2x32xf32>
    %1726 = arith.mulf %1721, %1725 : vector<2x32xf32>
    %1727 = tpu.concatenate %1700, %1726 in 1 : vector<2x32xf32>, vector<2x32xf32> -> vector<2x64xf32>
    %1728 = vector.extract_strided_slice %1433 {offsets = [10, 0], sizes = [2, 128], strides = [1, 1]} : vector<16x256xf32> to vector<2x128xf32>
    %1729 = vector.extract_strided_slice %1433 {offsets = [4, 128], sizes = [2, 128], strides = [1, 1]} : vector<16x256xf32> to vector<2x128xf32>
    %1730 = tpu.concatenate %1728, %1729 in 1 : vector<2x128xf32>, vector<2x128xf32> -> vector<2x256xf32>
    %cst_250 = arith.constant dense<0.000000e+00> : vector<2x256xf32>
    %1731 = tpu.matmul %1727, %1434, %cst_250 {dimension_numbers = #tpu.dot_dimension_numbers<[1], [0], [0], [1], [0, 0, 1, 1], [], []>} : vector<2x64xf32>, vector<64x256xf32>, vector<2x256xf32> -> vector<2x256xf32>
    %1732 = arith.addf %1730, %1731 : vector<2x256xf32>
    %1733 = vector.extract_strided_slice %1732 {offsets = [0, 0], sizes = [2, 128], strides = [1, 1]} : vector<2x256xf32> to vector<2x128xf32>
    %1734 = vector.extract_strided_slice %1733 {offsets = [0, 0], sizes = [2, 32], strides = [1, 1]} : vector<2x128xf32> to vector<2x32xf32>
    %1735 = arith.negf %1734 : vector<2x32xf32>
    %1736 = math.exp %1735 : vector<2x32xf32>
    %cst_251 = arith.constant 1.000000e+00 : f32
    %1737 = vector.broadcast %cst_251 : f32 to vector<2x32xf32>
    %1738 = arith.addf %1737, %1736 : vector<2x32xf32>
    %1739 = arith.divf %1737, %1738 : vector<2x32xf32>
    %1740 = vector.extract_strided_slice %1733 {offsets = [0, 32], sizes = [2, 32], strides = [1, 1]} : vector<2x128xf32> to vector<2x32xf32>
    %1741 = arith.negf %1740 : vector<2x32xf32>
    %1742 = math.exp %1741 : vector<2x32xf32>
    %cst_252 = arith.constant 1.000000e+00 : f32
    %1743 = vector.broadcast %cst_252 : f32 to vector<2x32xf32>
    %1744 = arith.addf %1743, %1742 : vector<2x32xf32>
    %1745 = arith.divf %1743, %1744 : vector<2x32xf32>
    %1746 = vector.extract_strided_slice %1733 {offsets = [0, 64], sizes = [2, 32], strides = [1, 1]} : vector<2x128xf32> to vector<2x32xf32>
    %1747 = math.tanh %1746 : vector<2x32xf32>
    %1748 = vector.extract_strided_slice %1733 {offsets = [0, 96], sizes = [2, 32], strides = [1, 1]} : vector<2x128xf32> to vector<2x32xf32>
    %1749 = arith.negf %1748 : vector<2x32xf32>
    %1750 = math.exp %1749 : vector<2x32xf32>
    %cst_253 = arith.constant 1.000000e+00 : f32
    %1751 = vector.broadcast %cst_253 : f32 to vector<2x32xf32>
    %1752 = arith.addf %1751, %1750 : vector<2x32xf32>
    %1753 = arith.divf %1751, %1752 : vector<2x32xf32>
    %1754 = arith.mulf %1745, %1698 : vector<2x32xf32>
    %1755 = arith.mulf %1739, %1747 : vector<2x32xf32>
    %1756 = arith.addf %1754, %1755 : vector<2x32xf32>
    %1757 = math.tanh %1756 : vector<2x32xf32>
    %1758 = arith.mulf %1753, %1757 : vector<2x32xf32>
    %1759 = vector.extract_strided_slice %1732 {offsets = [0, 128], sizes = [2, 128], strides = [1, 1]} : vector<2x256xf32> to vector<2x128xf32>
    %1760 = vector.extract_strided_slice %1759 {offsets = [0, 0], sizes = [2, 32], strides = [1, 1]} : vector<2x128xf32> to vector<2x32xf32>
    %1761 = arith.negf %1760 : vector<2x32xf32>
    %1762 = math.exp %1761 : vector<2x32xf32>
    %cst_254 = arith.constant 1.000000e+00 : f32
    %1763 = vector.broadcast %cst_254 : f32 to vector<2x32xf32>
    %1764 = arith.addf %1763, %1762 : vector<2x32xf32>
    %1765 = arith.divf %1763, %1764 : vector<2x32xf32>
    %1766 = vector.extract_strided_slice %1759 {offsets = [0, 32], sizes = [2, 32], strides = [1, 1]} : vector<2x128xf32> to vector<2x32xf32>
    %1767 = arith.negf %1766 : vector<2x32xf32>
    %1768 = math.exp %1767 : vector<2x32xf32>
    %cst_255 = arith.constant 1.000000e+00 : f32
    %1769 = vector.broadcast %cst_255 : f32 to vector<2x32xf32>
    %1770 = arith.addf %1769, %1768 : vector<2x32xf32>
    %1771 = arith.divf %1769, %1770 : vector<2x32xf32>
    %1772 = vector.extract_strided_slice %1759 {offsets = [0, 64], sizes = [2, 32], strides = [1, 1]} : vector<2x128xf32> to vector<2x32xf32>
    %1773 = math.tanh %1772 : vector<2x32xf32>
    %1774 = vector.extract_strided_slice %1759 {offsets = [0, 96], sizes = [2, 32], strides = [1, 1]} : vector<2x128xf32> to vector<2x32xf32>
    %1775 = arith.negf %1774 : vector<2x32xf32>
    %1776 = math.exp %1775 : vector<2x32xf32>
    %cst_256 = arith.constant 1.000000e+00 : f32
    %1777 = vector.broadcast %cst_256 : f32 to vector<2x32xf32>
    %1778 = arith.addf %1777, %1776 : vector<2x32xf32>
    %1779 = arith.divf %1777, %1778 : vector<2x32xf32>
    %1780 = arith.mulf %1771, %1724 : vector<2x32xf32>
    %1781 = arith.mulf %1765, %1773 : vector<2x32xf32>
    %1782 = arith.addf %1780, %1781 : vector<2x32xf32>
    %1783 = math.tanh %1782 : vector<2x32xf32>
    %1784 = arith.mulf %1779, %1783 : vector<2x32xf32>
    %1785 = tpu.concatenate %1758, %1784 in 1 : vector<2x32xf32>, vector<2x32xf32> -> vector<2x64xf32>
    %1786 = vector.extract_strided_slice %1433 {offsets = [12, 0], sizes = [2, 128], strides = [1, 1]} : vector<16x256xf32> to vector<2x128xf32>
    %1787 = vector.extract_strided_slice %1433 {offsets = [2, 128], sizes = [2, 128], strides = [1, 1]} : vector<16x256xf32> to vector<2x128xf32>
    %1788 = tpu.concatenate %1786, %1787 in 1 : vector<2x128xf32>, vector<2x128xf32> -> vector<2x256xf32>
    %cst_257 = arith.constant dense<0.000000e+00> : vector<2x256xf32>
    %1789 = tpu.matmul %1785, %1434, %cst_257 {dimension_numbers = #tpu.dot_dimension_numbers<[1], [0], [0], [1], [0, 0, 1, 1], [], []>} : vector<2x64xf32>, vector<64x256xf32>, vector<2x256xf32> -> vector<2x256xf32>
    %1790 = arith.addf %1788, %1789 : vector<2x256xf32>
    %1791 = vector.extract_strided_slice %1790 {offsets = [0, 0], sizes = [2, 128], strides = [1, 1]} : vector<2x256xf32> to vector<2x128xf32>
    %1792 = vector.extract_strided_slice %1791 {offsets = [0, 0], sizes = [2, 32], strides = [1, 1]} : vector<2x128xf32> to vector<2x32xf32>
    %1793 = arith.negf %1792 : vector<2x32xf32>
    %1794 = math.exp %1793 : vector<2x32xf32>
    %cst_258 = arith.constant 1.000000e+00 : f32
    %1795 = vector.broadcast %cst_258 : f32 to vector<2x32xf32>
    %1796 = arith.addf %1795, %1794 : vector<2x32xf32>
    %1797 = arith.divf %1795, %1796 : vector<2x32xf32>
    %1798 = vector.extract_strided_slice %1791 {offsets = [0, 32], sizes = [2, 32], strides = [1, 1]} : vector<2x128xf32> to vector<2x32xf32>
    %1799 = arith.negf %1798 : vector<2x32xf32>
    %1800 = math.exp %1799 : vector<2x32xf32>
    %cst_259 = arith.constant 1.000000e+00 : f32
    %1801 = vector.broadcast %cst_259 : f32 to vector<2x32xf32>
    %1802 = arith.addf %1801, %1800 : vector<2x32xf32>
    %1803 = arith.divf %1801, %1802 : vector<2x32xf32>
    %1804 = vector.extract_strided_slice %1791 {offsets = [0, 64], sizes = [2, 32], strides = [1, 1]} : vector<2x128xf32> to vector<2x32xf32>
    %1805 = math.tanh %1804 : vector<2x32xf32>
    %1806 = vector.extract_strided_slice %1791 {offsets = [0, 96], sizes = [2, 32], strides = [1, 1]} : vector<2x128xf32> to vector<2x32xf32>
    %1807 = arith.negf %1806 : vector<2x32xf32>
    %1808 = math.exp %1807 : vector<2x32xf32>
    %cst_260 = arith.constant 1.000000e+00 : f32
    %1809 = vector.broadcast %cst_260 : f32 to vector<2x32xf32>
    %1810 = arith.addf %1809, %1808 : vector<2x32xf32>
    %1811 = arith.divf %1809, %1810 : vector<2x32xf32>
    %1812 = arith.mulf %1803, %1756 : vector<2x32xf32>
    %1813 = arith.mulf %1797, %1805 : vector<2x32xf32>
    %1814 = arith.addf %1812, %1813 : vector<2x32xf32>
    %1815 = math.tanh %1814 : vector<2x32xf32>
    %1816 = arith.mulf %1811, %1815 : vector<2x32xf32>
    %1817 = vector.extract_strided_slice %1790 {offsets = [0, 128], sizes = [2, 128], strides = [1, 1]} : vector<2x256xf32> to vector<2x128xf32>
    %1818 = vector.extract_strided_slice %1817 {offsets = [0, 0], sizes = [2, 32], strides = [1, 1]} : vector<2x128xf32> to vector<2x32xf32>
    %1819 = arith.negf %1818 : vector<2x32xf32>
    %1820 = math.exp %1819 : vector<2x32xf32>
    %cst_261 = arith.constant 1.000000e+00 : f32
    %1821 = vector.broadcast %cst_261 : f32 to vector<2x32xf32>
    %1822 = arith.addf %1821, %1820 : vector<2x32xf32>
    %1823 = arith.divf %1821, %1822 : vector<2x32xf32>
    %1824 = vector.extract_strided_slice %1817 {offsets = [0, 32], sizes = [2, 32], strides = [1, 1]} : vector<2x128xf32> to vector<2x32xf32>
    %1825 = arith.negf %1824 : vector<2x32xf32>
    %1826 = math.exp %1825 : vector<2x32xf32>
    %cst_262 = arith.constant 1.000000e+00 : f32
    %1827 = vector.broadcast %cst_262 : f32 to vector<2x32xf32>
    %1828 = arith.addf %1827, %1826 : vector<2x32xf32>
    %1829 = arith.divf %1827, %1828 : vector<2x32xf32>
    %1830 = vector.extract_strided_slice %1817 {offsets = [0, 64], sizes = [2, 32], strides = [1, 1]} : vector<2x128xf32> to vector<2x32xf32>
    %1831 = math.tanh %1830 : vector<2x32xf32>
    %1832 = vector.extract_strided_slice %1817 {offsets = [0, 96], sizes = [2, 32], strides = [1, 1]} : vector<2x128xf32> to vector<2x32xf32>
    %1833 = arith.negf %1832 : vector<2x32xf32>
    %1834 = math.exp %1833 : vector<2x32xf32>
    %cst_263 = arith.constant 1.000000e+00 : f32
    %1835 = vector.broadcast %cst_263 : f32 to vector<2x32xf32>
    %1836 = arith.addf %1835, %1834 : vector<2x32xf32>
    %1837 = arith.divf %1835, %1836 : vector<2x32xf32>
    %1838 = arith.mulf %1829, %1782 : vector<2x32xf32>
    %1839 = arith.mulf %1823, %1831 : vector<2x32xf32>
    %1840 = arith.addf %1838, %1839 : vector<2x32xf32>
    %1841 = math.tanh %1840 : vector<2x32xf32>
    %1842 = arith.mulf %1837, %1841 : vector<2x32xf32>
    %1843 = tpu.concatenate %1816, %1842 in 1 : vector<2x32xf32>, vector<2x32xf32> -> vector<2x64xf32>
    %1844 = vector.extract_strided_slice %1433 {offsets = [14, 0], sizes = [2, 128], strides = [1, 1]} : vector<16x256xf32> to vector<2x128xf32>
    %1845 = vector.extract_strided_slice %1433 {offsets = [0, 128], sizes = [2, 128], strides = [1, 1]} : vector<16x256xf32> to vector<2x128xf32>
    %1846 = tpu.concatenate %1844, %1845 in 1 : vector<2x128xf32>, vector<2x128xf32> -> vector<2x256xf32>
    %cst_264 = arith.constant dense<0.000000e+00> : vector<2x256xf32>
    %1847 = tpu.matmul %1843, %1434, %cst_264 {dimension_numbers = #tpu.dot_dimension_numbers<[1], [0], [0], [1], [0, 0, 1, 1], [], []>} : vector<2x64xf32>, vector<64x256xf32>, vector<2x256xf32> -> vector<2x256xf32>
    %1848 = arith.addf %1846, %1847 : vector<2x256xf32>
    %1849 = vector.extract_strided_slice %1848 {offsets = [0, 0], sizes = [2, 128], strides = [1, 1]} : vector<2x256xf32> to vector<2x128xf32>
    %1850 = vector.extract_strided_slice %1849 {offsets = [0, 0], sizes = [2, 32], strides = [1, 1]} : vector<2x128xf32> to vector<2x32xf32>
    %1851 = arith.negf %1850 : vector<2x32xf32>
    %1852 = math.exp %1851 : vector<2x32xf32>
    %cst_265 = arith.constant 1.000000e+00 : f32
    %1853 = vector.broadcast %cst_265 : f32 to vector<2x32xf32>
    %1854 = arith.addf %1853, %1852 : vector<2x32xf32>
    %1855 = arith.divf %1853, %1854 : vector<2x32xf32>
    %1856 = vector.extract_strided_slice %1849 {offsets = [0, 32], sizes = [2, 32], strides = [1, 1]} : vector<2x128xf32> to vector<2x32xf32>
    %1857 = arith.negf %1856 : vector<2x32xf32>
    %1858 = math.exp %1857 : vector<2x32xf32>
    %cst_266 = arith.constant 1.000000e+00 : f32
    %1859 = vector.broadcast %cst_266 : f32 to vector<2x32xf32>
    %1860 = arith.addf %1859, %1858 : vector<2x32xf32>
    %1861 = arith.divf %1859, %1860 : vector<2x32xf32>
    %1862 = vector.extract_strided_slice %1849 {offsets = [0, 64], sizes = [2, 32], strides = [1, 1]} : vector<2x128xf32> to vector<2x32xf32>
    %1863 = math.tanh %1862 : vector<2x32xf32>
    %1864 = vector.extract_strided_slice %1849 {offsets = [0, 96], sizes = [2, 32], strides = [1, 1]} : vector<2x128xf32> to vector<2x32xf32>
    %1865 = arith.negf %1864 : vector<2x32xf32>
    %1866 = math.exp %1865 : vector<2x32xf32>
    %cst_267 = arith.constant 1.000000e+00 : f32
    %1867 = vector.broadcast %cst_267 : f32 to vector<2x32xf32>
    %1868 = arith.addf %1867, %1866 : vector<2x32xf32>
    %1869 = arith.divf %1867, %1868 : vector<2x32xf32>
    %1870 = arith.mulf %1861, %1814 : vector<2x32xf32>
    %1871 = arith.mulf %1855, %1863 : vector<2x32xf32>
    %1872 = arith.addf %1870, %1871 : vector<2x32xf32>
    %1873 = math.tanh %1872 : vector<2x32xf32>
    %1874 = arith.mulf %1869, %1873 : vector<2x32xf32>
    %1875 = vector.extract_strided_slice %1848 {offsets = [0, 128], sizes = [2, 128], strides = [1, 1]} : vector<2x256xf32> to vector<2x128xf32>
    %1876 = vector.extract_strided_slice %1875 {offsets = [0, 0], sizes = [2, 32], strides = [1, 1]} : vector<2x128xf32> to vector<2x32xf32>
    %1877 = arith.negf %1876 : vector<2x32xf32>
    %1878 = math.exp %1877 : vector<2x32xf32>
    %cst_268 = arith.constant 1.000000e+00 : f32
    %1879 = vector.broadcast %cst_268 : f32 to vector<2x32xf32>
    %1880 = arith.addf %1879, %1878 : vector<2x32xf32>
    %1881 = arith.divf %1879, %1880 : vector<2x32xf32>
    %1882 = vector.extract_strided_slice %1875 {offsets = [0, 32], sizes = [2, 32], strides = [1, 1]} : vector<2x128xf32> to vector<2x32xf32>
    %1883 = arith.negf %1882 : vector<2x32xf32>
    %1884 = math.exp %1883 : vector<2x32xf32>
    %cst_269 = arith.constant 1.000000e+00 : f32
    %1885 = vector.broadcast %cst_269 : f32 to vector<2x32xf32>
    %1886 = arith.addf %1885, %1884 : vector<2x32xf32>
    %1887 = arith.divf %1885, %1886 : vector<2x32xf32>
    %1888 = vector.extract_strided_slice %1875 {offsets = [0, 64], sizes = [2, 32], strides = [1, 1]} : vector<2x128xf32> to vector<2x32xf32>
    %1889 = math.tanh %1888 : vector<2x32xf32>
    %1890 = vector.extract_strided_slice %1875 {offsets = [0, 96], sizes = [2, 32], strides = [1, 1]} : vector<2x128xf32> to vector<2x32xf32>
    %1891 = arith.negf %1890 : vector<2x32xf32>
    %1892 = math.exp %1891 : vector<2x32xf32>
    %cst_270 = arith.constant 1.000000e+00 : f32
    %1893 = vector.broadcast %cst_270 : f32 to vector<2x32xf32>
    %1894 = arith.addf %1893, %1892 : vector<2x32xf32>
    %1895 = arith.divf %1893, %1894 : vector<2x32xf32>
    %1896 = arith.mulf %1887, %1840 : vector<2x32xf32>
    %1897 = arith.mulf %1881, %1889 : vector<2x32xf32>
    %1898 = arith.addf %1896, %1897 : vector<2x32xf32>
    %1899 = math.tanh %1898 : vector<2x32xf32>
    %1900 = arith.mulf %1895, %1899 : vector<2x32xf32>
    %1901 = tpu.concatenate %1397, %1423, %1874, %1900 in 1 : vector<2x32xf32>, vector<2x32xf32>, vector<2x32xf32>, vector<2x32xf32> -> vector<2x128xf32>
    %1902 = tpu.concatenate %950, %1901 in 1 : vector<2x128xf32>, vector<2x128xf32> -> vector<2x256xf32>
    %c0_271 = arith.constant 0 : index
    %c0_272 = arith.constant 0 : index
    %1903 = vector.load %arg14[%c0_271, %c0_272] : memref<256x64xf32, #tpu.memory_space<vmem>>, vector<256x64xf32>
    %cst_273 = arith.constant dense<0.000000e+00> : vector<2x64xf32>
    %1904 = tpu.matmul %1902, %1903, %cst_273 {dimension_numbers = #tpu.dot_dimension_numbers<[1], [0], [0], [1], [0, 0, 1, 1], [], []>} : vector<2x256xf32>, vector<256x64xf32>, vector<2x64xf32> -> vector<2x64xf32>
    %c0_274 = arith.constant 0 : index
    %c0_275 = arith.constant 0 : index
    %1905 = vector.load %arg15[%c0_274, %c0_275] : memref<1x64xf32, #tpu.memory_space<vmem>>, vector<1x64xf32>
    %1906 = vector.broadcast %1905 : vector<1x64xf32> to vector<2x64xf32>
    %1907 = arith.addf %1904, %1906 : vector<2x64xf32>
    %cst_276 = arith.constant 0.000000e+00 : f32
    %1908 = vector.broadcast %cst_276 : f32 to vector<2x64xf32>
    %1909 = arith.maximumf %1907, %1908 : vector<2x64xf32>
    %c0_277 = arith.constant 0 : index
    %c0_278 = arith.constant 0 : index
    %1910 = vector.load %arg16[%c0_277, %c0_278] : memref<64x32xf32, #tpu.memory_space<vmem>>, vector<64x32xf32>
    %cst_279 = arith.constant dense<0.000000e+00> : vector<2x32xf32>
    %1911 = tpu.matmul %1909, %1910, %cst_279 {dimension_numbers = #tpu.dot_dimension_numbers<[1], [0], [0], [1], [0, 0, 1, 1], [], []>} : vector<2x64xf32>, vector<64x32xf32>, vector<2x32xf32> -> vector<2x32xf32>
    %c0_280 = arith.constant 0 : index
    %c0_281 = arith.constant 0 : index
    %1912 = vector.load %arg17[%c0_280, %c0_281] : memref<1x32xf32, #tpu.memory_space<vmem>>, vector<1x32xf32>
    %1913 = vector.broadcast %1912 : vector<1x32xf32> to vector<2x32xf32>
    %1914 = arith.addf %1911, %1913 : vector<2x32xf32>
    %cst_282 = arith.constant 0.000000e+00 : f32
    %1915 = vector.broadcast %cst_282 : f32 to vector<2x32xf32>
    %1916 = arith.maximumf %1914, %1915 : vector<2x32xf32>
    %c0_283 = arith.constant 0 : index
    %c0_284 = arith.constant 0 : index
    %1917 = vector.load %arg20[%c0_283, %c0_284] : memref<2x32xf32, #tpu.memory_space<vmem>>, vector<2x32xf32>
    tpu.vector_store %arg20[%c0_283, %c0_284], %1916 {strides = array<i32>} : memref<2x32xf32, #tpu.memory_space<vmem>>, vector<2x32xf32>,
    %c0_285 = arith.constant 0 : index
    %c0_286 = arith.constant 0 : index
    %1918 = vector.load %arg18[%c0_285, %c0_286] : memref<32x8xf32, #tpu.memory_space<vmem>>, vector<32x8xf32>
    %cst_287 = arith.constant dense<0.000000e+00> : vector<2x8xf32>
    %1919 = tpu.matmul %1916, %1918, %cst_287 {dimension_numbers = #tpu.dot_dimension_numbers<[1], [0], [0], [1], [0, 0, 1, 1], [], []>} : vector<2x32xf32>, vector<32x8xf32>, vector<2x8xf32> -> vector<2x8xf32>
    %c0_288 = arith.constant 0 : index
    %c0_289 = arith.constant 0 : index
    %1920 = vector.load %arg19[%c0_288, %c0_289] : memref<1x8xf32, #tpu.memory_space<vmem>>, vector<1x8xf32>
    %1921 = vector.broadcast %1920 : vector<1x8xf32> to vector<2x8xf32>
    %1922 = arith.addf %1919, %1921 : vector<2x8xf32>
    %c0_290 = arith.constant 0 : index
    %c0_291 = arith.constant 0 : index
    %1923 = vector.load %arg21[%c0_290, %c0_291] : memref<2x8xf32, #tpu.memory_space<vmem>>, vector<2x8xf32>
    tpu.vector_store %arg21[%c0_290, %c0_291], %1922 {strides = array<i32>} : memref<2x8xf32, #tpu.memory_space<vmem>>, vector<2x8xf32>,
    return
  }
}

</mosaic_0001>

<bundles_post_ra>
// kernel: tpu_custom_call.1
= control target key start
LH: loop header
LB: loop body
LE: loop exit
PB: predicated region body
PF: predicated region fallthrough
CT: control target
= control target key end

     0   :  { %s8608_s0 = inlined_call_operand.vmem [shape: f32[16,16], index: 0, kind: input, shape index: {}]   ;;  %s8609_s1 = inlined_call_operand.hbm [shape: f32[16,256], index: 1, kind: input, shape index: {}]   ;;  %s8610_s2 = inlined_call_operand.vmem [shape: f32[64,256], index: 2, kind: input, shape index: {}]   ;;  %s8611_s3 = inlined_call_operand.hbm [shape: f32[1,256], index: 3, kind: input, shape index: {}]   ;;  %s8612_s4 = inlined_call_operand.vmem [shape: f32[64,256], index: 4, kind: input, shape index: {}]   ;;  %s8613_s5 = inlined_call_operand.vmem [shape: f32[64,256], index: 5, kind: input, shape index: {}]   ;;  %s8614_s6 = inlined_call_operand.hbm [shape: f32[1,256], index: 6, kind: input, shape index: {}]   ;;  %s8615_s7 = inlined_call_operand.hbm [shape: f32[16,12], index: 7, kind: input, shape index: {}]   ;;  %s8616_s8 = inlined_call_operand.hbm [shape: f32[12,256], index: 8, kind: input, shape index: {}]   ;;  %s8617_s9 = inlined_call_operand.hbm [shape: f32[64,256], index: 9, kind: input, shape index: {}]   ;;  %s8618_s10 = inlined_call_operand.hbm [shape: f32[1,256], index: 10, kind: input, shape index: {}]   ;;  %s8619_s11 = inlined_call_operand.hbm [shape: f32[64,256], index: 11, kind: input, shape index: {}]   ;;  %s8620_s12 = inlined_call_operand.hbm [shape: f32[64,256], index: 12, kind: input, shape index: {}]   ;;  %s8621_s13 = inlined_call_operand.hbm [shape: f32[1,256], index: 13, kind: input, shape index: {}]   ;;  %s8622_s14 = inlined_call_operand.vmem [shape: f32[256,64], index: 14, kind: input, shape index: {}]   ;;  %s8623_s15 = inlined_call_operand.hbm [shape: f32[1,64], index: 15, kind: input, shape index: {}]   ;;  %s8624_s16 = inlined_call_operand.vmem [shape: f32[64,32], index: 16, kind: input, shape index: {}]   ;;  %s8625_s17 = inlined_call_operand.hbm [shape: f32[1,32], index: 17, kind: input, shape index: {}]   ;;  %s8626_s18 = inlined_call_operand.vmem [shape: f32[32,8], index: 18, kind: input, shape index: {}]   ;;  %s8627_s19 = inlined_call_operand.vmem [shape: f32[1,8], index: 19, kind: input, shape index: {}]   ;;  %s8628_s20 = inlined_call_operand.hbm [shape: f32[2,32], index: 20, kind: output, shape index: {0}]   ;;  %s8629_s21 = inlined_call_operand.hbm [shape: f32[2,8], index: 21, kind: output, shape index: {1}]  }
   0x1   :  { %8634 = sst [smem:[#allocation34_spill]] %s8608_s0 }
   0x2   :  { %8635 = sst [smem:[#allocation35_spill]] %s8609_s1 }
   0x3   :  { %8636 = sst [smem:[#allocation36_spill]] %s8610_s2 }
   0x4   :  { %8637 = sst [smem:[#allocation37_spill]] %s8611_s3 }
   0x5   :  { %8638 = sst [smem:[#allocation38_spill]] %s8612_s4 }
   0x6   :  { %8639 = sst [smem:[#allocation39_spill]] %s8613_s5 }
   0x7   :  { %8640 = sst [smem:[#allocation40_spill]] %s8629_s21 }
   0x8   :  { %27 = vsyncpa [#allocation3], 0 }
   0x9   :  { %28 = vsyncpa [#allocation6], 0 }
   0xa   :  { %29 = vsyncpa [#allocation9], 0 }
   0xb   :  { %30 = vsyncpa [#allocation12], 0 }
   0xc   :  { %31 = vsyncpa [#allocation15], 0 }
   0xd   :  { %32 = vsyncpa [#allocation18], 0 }
   0xe   :  { %33 = vsyncpa [#allocation21], 0 }
   0xf   :  { %34 = vsyncpa [#allocation4], 0  ;;  %s8641_s26 = sld [smem:[#allocation37_spill]] }
  0x15   :  { %s58_s27 = sshll.u32 %s8641_s26, 4  ;;  %s59_s27 = int_to_ptr.hbm [resolvable:$true] %s58_s27 }
  0x16   :  { %35 = vsyncpa [#allocation24], 0  ;;  %s6498_s3 = smov [#allocation5]   ;;  %s83_s4 = sshll.u32 %s8615_s7, 4  ;;  %s84_s4 = int_to_ptr.hbm [resolvable:$true] %s83_s4 }
  0x17   :  { %s60_s28 = sshll.u32 %s6498_s3, 4  ;;  %s6499_s30 = smov [#allocation8]   ;;  %s61_s28 = int_to_ptr.vmem [resolvable:$true] %s60_s28 }
  0x18   :  { %63 = dma.hbm_to_vmem [thread:$0]  %s59_s27, 32, %s61_s28, [#allocation6]  }
  0x19   :  { %s85_s5 = sshll.u32 %s6499_s30, 4  ;;  %s6500_s22 = smov 128   ;;  %s86_s5 = int_to_ptr.vmem [resolvable:$true] %s85_s5 }
  0x1a   :  { %s6501_s23 = smov 8   ;;  %s109_s2 = sshll.u32 %s8617_s9, 4  ;;  %s110_s2 = int_to_ptr.hbm [resolvable:$true] %s109_s2 }
  0x1b   :  { %91 = dma.hbm_to_vmem [thread:$0]  %s84_s4, 256, %s86_s5, [#allocation9], %s6500_s22, %s6500_s22, %s6501_s23  }
  0x1c   :  { %s6502_s25 = smov [#allocation11]   ;;  %s133_s7 = sshll.u32 %s8619_s11, 4  ;;  %s134_s7 = int_to_ptr.hbm [resolvable:$true] %s133_s7 }
  0x1d   :  { %s111_s26 = sshll.u32 %s6502_s25, 4  ;;  %s6503_s27 = smov 256   ;;  %s112_s26 = int_to_ptr.vmem [resolvable:$true] %s111_s26 }
  0x1e   :  { %s6504_s28 = smov 16   ;;  %s6505_s29 = smov [#allocation14]  }
  0x1f   :  { %117 = dma.hbm_to_vmem [thread:$0]  %s110_s2, 2048, %s112_s26, [#allocation12], %s6503_s27, %s6503_s27, %s6504_s28  }
  0x20   :  { %s135_s0 = sshll.u32 %s6505_s29, 4  ;;  %s160_s9 = sshll.u32 %s8621_s13, 4  ;;  %s136_s0 = int_to_ptr.vmem [resolvable:$true] %s135_s0  ;;  %s161_s9 = int_to_ptr.hbm [resolvable:$true] %s160_s9 }
  0x21   :  { %141 = dma.hbm_to_vmem [thread:$0]  %s134_s7, 2048, %s136_s0, [#allocation15], %s6503_s27, %s6503_s27, %s6504_s28  }
  0x22   :  { %s8642_s5 = sld [smem:[#allocation35_spill]]  ;;  %s6506_s23 = smov [#allocation17]  }
  0x23   :  { %s162_s1 = sshll.u32 %s6506_s23, 4  ;;  %s6507_s24 = smov [#allocation2]   ;;  %s163_s1 = int_to_ptr.vmem [resolvable:$true] %s162_s1 }
  0x24   :  { %165 = dma.hbm_to_vmem [thread:$0]  %s161_s9, 32, %s163_s1, [#allocation18]  }
  0x25   :  { %s44_s2 = sshll.u32 %s6507_s24, 4  ;;  %s73_s13 = sshll.u32 %s8614_s6, 4  ;;  %s45_s2 = int_to_ptr.vmem [resolvable:$true] %s44_s2  ;;  %s74_s13 = int_to_ptr.hbm [resolvable:$true] %s73_s13 }
  0x26   :  { %s96_s29 = sshll.u32 %s8616_s8, 4  ;;  %s6508_s0 = smov [#allocation7]   ;;  %s97_s29 = int_to_ptr.hbm [resolvable:$true] %s96_s29 }
  0x27   :  { %s75_s4 = sshll.u32 %s6508_s0, 4  ;;  %s6509_s30 = smov [#allocation10]   ;;  %s76_s4 = int_to_ptr.vmem [resolvable:$true] %s75_s4 }
  0x28   :  { %s42_s22 = sshll.u32 %s8642_s5, 4  ;;  %s98_s9 = sshll.u32 %s6509_s30, 4  ;;  %s43_s22 = int_to_ptr.hbm [resolvable:$true] %s42_s22  ;;  %s99_s9 = int_to_ptr.vmem [resolvable:$true] %s98_s9 }
  0x29   :  { %50 = dma.hbm_to_vmem [thread:$0]  %s43_s22, 512, %s45_s2, [#allocation3], %s6503_s27, %s6503_s27, %s6504_s28  }
  0x2a   :  { %78 = dma.hbm_to_vmem [thread:$0]  %s74_s13, 32, %s76_s4, [#allocation6]  }
  0x2b   :  { %s123_s6 = sshll.u32 %s8618_s10, 4  ;;  %s146_s8 = sshll.u32 %s8620_s12, 4  ;;  %s124_s6 = int_to_ptr.hbm [resolvable:$true] %s123_s6  ;;  %s147_s8 = int_to_ptr.hbm [resolvable:$true] %s146_s8 }
  0x2c   :  { %104 = dma.hbm_to_vmem [thread:$0]  %s97_s29, 512, %s99_s9, [#allocation9], %s6503_s27, %s6503_s27, %s6504_s28  }
  0x2d   :  { %s6510_s23 = smov [#allocation13]   ;;  %s6511_s24 = smov [#allocation16]  }
  0x2e   :  { %s125_s1 = sshll.u32 %s6510_s23, 4  ;;  %s148_s2 = sshll.u32 %s6511_s24, 4  ;;  %s126_s1 = int_to_ptr.vmem [resolvable:$true] %s125_s1  ;;  %s149_s2 = int_to_ptr.vmem [resolvable:$true] %s148_s2 }
  0x2f   :  { %128 = dma.hbm_to_vmem [thread:$0]  %s124_s6, 32, %s126_s1, [#allocation12]  }
  0x30   :  { %s173_s10 = sshll.u32 %s8623_s15, 4  ;;  %s186_s12 = sshll.u32 %s8625_s17, 4  ;;  %s174_s10 = int_to_ptr.hbm [resolvable:$true] %s173_s10  ;;  %s187_s12 = int_to_ptr.hbm [resolvable:$true] %s186_s12 }
  0x31   :  { %154 = dma.hbm_to_vmem [thread:$0]  %s147_s8, 2048, %s149_s2, [#allocation15], %s6503_s27, %s6503_s27, %s6504_s28  }
  0x32   :  { %s6512_s7 = smov [#allocation19]   ;;  %s6513_s0 = smov [#allocation20]  }
  0x33   :  { %s175_s29 = sshll.u32 %s6512_s7, 4  ;;  %s188_s4 = sshll.u32 %s6513_s0, 4  ;;  %s176_s29 = int_to_ptr.vmem [resolvable:$true] %s175_s29  ;;  %s189_s4 = int_to_ptr.vmem [resolvable:$true] %s188_s4 }
  0x34   :  { %178 = dma.hbm_to_vmem [thread:$0]  %s174_s10, 16, %s176_s29, [#allocation18]  }
  0x35   :  { %191 = dma.hbm_to_vmem [thread:$0]  %s187_s12, 16, %s189_s4, [#allocation21]  }
  0x36   :  { %6480 = dma.done.wait [#allocation3], 512  }
  0x37   :  { %6481 = vsyncadd [#allocation3], 4294966784 }
  0x38   :  { %6482 = dma.done.wait [#allocation6], 64  }
  0x39   :  { %6483 = vsyncadd [#allocation6], 4294967232 }
  0x3a   :  { %6484 = dma.done.wait [#allocation9], 768  }
  0x3b   :  { %6485 = vsyncadd [#allocation9], 4294966528 }
  0x3c   :  { %6486 = dma.done.wait [#allocation12], 2080  }
  0x3d   :  { %6487 = vsyncadd [#allocation12], 4294965216 }
  0x3e   :  { %6488 = dma.done.wait [#allocation15], 4096  }
  0x3f   :  { %6489 = vsyncadd [#allocation15], 4294963200 }
  0x40   :  { %6490 = dma.done.wait [#allocation18], 48  }
  0x41   :  { %6491 = vsyncadd [#allocation18], 4294967248 }
  0x42   :  { %6492 = dma.done.wait [#allocation21], 16  }
  0x43   :  { %6493 = vsyncadd [#allocation21], 4294967280  ;;  %v249_v0 = vld [vmem:[#allocation2 + $0x10] sm:$0xff]  ;;  %s8643_s27 = sld [smem:[#allocation36_spill]]  ;;  %v247_v2 = vld [vmem:[#allocation2] sm:$0xff]  ;;  %vm251_vm0 = vcmask 130048  }
  0x44   :  { %272 = vmatpush.msra.mxu3 %v249_v0  ;;  %s8644_s21 = sld [smem:[#allocation34_spill]]  ;;  %v250_v7 = vld [vmem:[#allocation2 + $0x18] sm:$0xff]  ;;  %v248_v10 = vld [vmem:[#allocation2 + $0x8] sm:$0xff]  ;;  %v6514_v21 = vmov 0.0   ;;  %v246_v23 = vld [vmem:[#allocation5] sm:$0x3] }
  0x45   :  { %295 = vmatpush.msra.mxu1 %v250_v7  ;;  %v306_v24 = vperm.slane %v246_v23, 1  ;;  %v305_v28 = vperm.slane %v246_v23, 0  ;;  %s6516_s1 = smov 32   ;;  %vm460_vm9 = vcmask 261120   ;;  %vm332_vm10 = vcmask 523264   ;;  %s8645_s25 = sld [smem:[#allocation38_spill]] }
  0x46   :  { %273 = vmatpush.msra.mxu3 %v247_v2  ;;  %s8646_s6 = sld [smem:[#allocation39_spill]]  ;;  %s5412_s3 = sshll.u32 %s8628_s20, 4  ;;  %s5413_s3 = int_to_ptr.hbm [resolvable:$true] %s5412_s3 }
  0x47   :  { %296 = vmatpush.msra.mxu1 %v248_v10  ;;  %s6518_s12 = smov [#allocation22]   ;;  %s6519_s0 = smov [#allocation23]  }
  0x48   :  { %s5410_s7 = sshll.u32 %s6518_s12, 4  ;;  %s5421_s4 = sshll.u32 %s6519_s0, 4  ;;  %s5411_s7 = int_to_ptr.vmem [resolvable:$true] %s5410_s7  ;;  %s5422_s4 = int_to_ptr.vmem [resolvable:$true] %s5421_s4 }
  0x49   :  { %v6684_v1 = vld [vmem:[%s8643_s27 + $0x70] sm:$0xff]  ;;  %v6690_v3 = vld [vmem:[%s8643_s27 + $0x60] sm:$0xff]  ;;  %v6703_v6 = vld [vmem:[%s8643_s27 + $0x78] sm:$0xff]  ;;  %s8647_s28 = sld [smem:[#allocation40_spill]] }
  0x4a   :  { %344 = vmatpush.msra.mxu2 %v6684_v1  ;;  %v244_v4 = vld [vmem:[%s8644_s21] sm:$0xff]  ;;  %v6698_v5 = vld [vmem:[%s8643_s27 + $0x50] sm:$0xff]  ;;  %475 = vmatpush.msra.mxu0 %v6684_v1  ;;  %v6716_v9 = vld [vmem:[%s8643_s27 + $0x68] sm:$0xff] }
  0x4b   :  { %5444 = vmatmul.msk.f32.vlgmr.msra.gmra.mxu3 %vm251_vm0, %v244_v4  ;;  %v6711_v8 = vld [vmem:[%s8643_s27 + $0x40] sm:$0xff]  ;;  %v6723_v11 = vld [vmem:[%s8643_s27 + $0x30] sm:$0xff]  ;;  %v6728_v12 = vld [vmem:[%s8643_s27 + $0x58] sm:$0xff]  ;;  %5446 = vmatmul.msk.f32.vlgmr.msra.gmra.mxu1 %vm251_vm0, %v244_v4 }
  0x4c   :  { %345 = vmatpush.msra.mxu2 %v6690_v3  ;;  %364 = vmatpush.msrb.mxu3 %v6703_v6  ;;  %v6736_v13 = vld [vmem:[%s8643_s27 + $0x20] sm:$0xff]  ;;  %v6741_v14 = vld [vmem:[%s8643_s27 + $0x48] sm:$0xff]  ;;  %v6753_v16 = vld [vmem:[%s8643_s27 + $0x10] sm:$0xff] }
  0x4d   :  { %476 = vmatpush.msra.mxu0 %v6690_v3  ;;  %v245_v15 = vld [vmem:[%s8644_s21 + $0x8] sm:$0xff]  ;;  %v6758_v17 = vld [vmem:[%s8643_s27 + $0x38] sm:$0xff]  ;;  %495 = vmatpush.msrb.mxu1 %v6703_v6  ;;  %v6768_v18 = vld [vmem:[%s8643_s27] sm:$0xff] }
  0x4e   :  { %346 = vmatpush.msra.mxu2 %v6698_v5  ;;  %365 = vmatpush.msrb.mxu3 %v6716_v9  ;;  %v6773_v19 = vld [vmem:[%s8643_s27 + $0x28] sm:$0xff]  ;;  %v6781_v20 = vld [vmem:[%s8643_s27 + $0x18] sm:$0xff] }
  0x4f   :  { %477 = vmatpush.msra.mxu0 %v6698_v5  ;;  %496 = vmatpush.msrb.mxu1 %v6716_v9  ;;  %v6791_v22 = vld [vmem:[%s8643_s27 + $0x8] sm:$0xff]  ;;  %s6515_s27 = smov 64  }
  0x50   :  { %347 = vmatpush.msra.mxu2 %v6711_v8  ;;  %366 = vmatpush.msrb.mxu3 %v6728_v12 }
  0x51   :  { %478 = vmatpush.msra.mxu0 %v6711_v8  ;;  %497 = vmatpush.msrb.mxu1 %v6728_v12 }
  0x52   :  { %348 = vmatpush.msra.mxu2 %v6723_v11  ;;  %367 = vmatpush.msrb.mxu3 %v6741_v14 }
  0x53   :  { %5445 = vmatmul.msk.f32.gmra.mxu3 %vm251_vm0, %v245_v15  ;;  %479 = vmatpush.msra.mxu0 %v6723_v11 }
  0x54   :  { %349 = vmatpush.msra.mxu2 %v6736_v13  ;;  %368 = vmatpush.msrb.mxu3 %v6758_v17 }
  0x55   :  { %5447 = vmatmul.msk.f32.gmra.mxu1 %vm251_vm0, %v245_v15  ;;  %480 = vmatpush.msra.mxu0 %v6736_v13 }
  0x56   :  { %350 = vmatpush.msra.mxu2 %v6753_v16  ;;  %369 = vmatpush.msrb.mxu3 %v6773_v19 }
  0x57   :  { %498 = vmatpush.msrb.mxu1 %v6741_v14  ;;  %481 = vmatpush.msra.mxu0 %v6753_v16 }
  0x58   :  { %351 = vmatpush.msra.mxu2 %v6768_v18  ;;  %370 = vmatpush.msrb.mxu3 %v6781_v20 }
  0x59   :  { %352 = vmatmul.f32.vlgmr.msra.gmra.mxu2 %v6514_v21  ;;  %499 = vmatpush.msrb.mxu1 %v6758_v17 }
  0x5a   :  { %616 = vmatpush.msrb.mxu2 %v6684_v1  ;;  %371 = vmatpush.msrb.mxu3 %v6791_v22 }
  0x5b   :  { %372 = vmatmul.f32.vlgmr.msrb.gmra.mxu3 %v6514_v21  ;;  %500 = vmatpush.msrb.mxu1 %v6773_v19 }
  0x5c   :  { %636 = vmatpush.msra.mxu3 %v6703_v6  ;;  %482 = vmatpush.msra.mxu0 %v6768_v18 }
  0x5d   :  { %617 = vmatpush.msrb.mxu2 %v6690_v3  ;;  %501 = vmatpush.msrb.mxu1 %v6781_v20 }
  0x5e   :  { %637 = vmatpush.msra.mxu3 %v6716_v9  ;;  %757 = vmatpush.msrb.mxu0 %v6684_v1 }
  0x5f   :  { %618 = vmatpush.msrb.mxu2 %v6698_v5  ;;  %502 = vmatpush.msrb.mxu1 %v6791_v22 }
  0x60   :  { %638 = vmatpush.msra.mxu3 %v6728_v12  ;;  %758 = vmatpush.msrb.mxu0 %v6690_v3 }
  0x61   :  { %619 = vmatpush.msrb.mxu2 %v6711_v8  ;;  %777 = vmatpush.msra.mxu1 %v6703_v6 }
  0x62   :  { %639 = vmatpush.msra.mxu3 %v6741_v14  ;;  %759 = vmatpush.msrb.mxu0 %v6698_v5 }
  0x63   :  { %620 = vmatpush.msrb.mxu2 %v6723_v11  ;;  %778 = vmatpush.msra.mxu1 %v6716_v9 }
  0x64   :  { %640 = vmatpush.msra.mxu3 %v6758_v17  ;;  %760 = vmatpush.msrb.mxu0 %v6711_v8 }
  0x65   :  { %621 = vmatpush.msrb.mxu2 %v6736_v13  ;;  %779 = vmatpush.msra.mxu1 %v6728_v12 }
  0x66   :  { %641 = vmatpush.msra.mxu3 %v6773_v19  ;;  %761 = vmatpush.msrb.mxu0 %v6723_v11 }
  0x67   :  { %622 = vmatpush.msrb.mxu2 %v6753_v16  ;;  %780 = vmatpush.msra.mxu1 %v6741_v14 }
  0x68   :  { %642 = vmatpush.msra.mxu3 %v6781_v20  ;;  %762 = vmatpush.msrb.mxu0 %v6736_v13 }
  0x69   :  { %623 = vmatpush.msrb.mxu2 %v6768_v18  ;;  %781 = vmatpush.msra.mxu1 %v6758_v17 }
  0x6a   :  { %643 = vmatpush.msra.mxu3 %v6791_v22  ;;  %763 = vmatpush.msrb.mxu0 %v6753_v16 }
  0x6b   :  { %782 = vmatpush.msra.mxu1 %v6773_v19  ;;  %901 = vmatpush.msra.mxu2 %v6684_v1 }
  0x6c   :  { %921 = vmatpush.msrb.mxu3 %v6703_v6  ;;  %764 = vmatpush.msrb.mxu0 %v6768_v18 }
  0x6d   :  { %783 = vmatpush.msra.mxu1 %v6781_v20  ;;  %902 = vmatpush.msra.mxu2 %v6690_v3 }
  0x6e   :  { %922 = vmatpush.msrb.mxu3 %v6716_v9 }
  0x6f   :  { %784 = vmatpush.msra.mxu1 %v6791_v22  ;;  %903 = vmatpush.msra.mxu2 %v6698_v5 }
  0x70   :  { %923 = vmatpush.msrb.mxu3 %v6728_v12 }
  0x71   :  { %904 = vmatpush.msra.mxu2 %v6711_v8 }
  0x72   :  { %924 = vmatpush.msrb.mxu3 %v6741_v14 }
  0x73   :  { %905 = vmatpush.msra.mxu2 %v6723_v11 }
  0x74   :  { %925 = vmatpush.msrb.mxu3 %v6758_v17 }
  0x75   :  { %906 = vmatpush.msra.mxu2 %v6736_v13 }
  0x76   :  { %926 = vmatpush.msrb.mxu3 %v6773_v19 }
  0x77   :  { %907 = vmatpush.msra.mxu2 %v6753_v16 }
  0x78   :  { %927 = vmatpush.msrb.mxu3 %v6781_v20 }
  0x79   :  { %908 = vmatpush.msra.mxu2 %v6768_v18 }
  0x7a   :  { %928 = vmatpush.msrb.mxu3 %v6791_v22 }
  0xc8   :  { %v298_v25 = vpop.f32.mrf.mxu1 }
  0xc9   :  { %v6853_v26 = vadd.f32 %v306_v24, %v298_v25 }
  0xce   :  { %v275_v27 = vpop.f32.mrf.mxu3 }
  0xcf   :  { %v6857_v32 = vadd.f32 %v305_v28, %v275_v27 }
  0xd2   :  { %v301_v30 = vpop.f32.mrf.mxu1 }
  0xd3   :  { %v6859_v33 = vadd.f32 %v306_v24, %v301_v30 }
  0xd5   :  { %v330_v36 = vrot.slane %v6859_v33, 6 }
  0xd6   :  { %v278_v29 = vpop.f32.mrf.mxu3 }
  0xd7   :  { %v6855_v31 = vadd.f32 %v305_v28, %v278_v29 }
  0xdc   :  { %v353_v34 = vpop.f32.mrf.mxu2 }
  0xdd   :  { %v376_v35 = vadd.f32 %v353_v34, %v6857_v32 }
  0xde   :  { %v373_v37 = vpop.f32.mrf.mxu3 }
  0xdf   :  { %5632 = vtanh.f32 %v376_v35  ;;  %v377_v38 = vadd.f32 %v373_v37, %v330_v36  ;;  %v5448_v41 = vmul.f32 -1.442695, %v376_v35 }
  0xe1   :  { %5634 = vtanh.f32 %v377_v38  ;;  %v5449_v42 = vmul.f32 -1.442695, %v377_v38 }
  0xe2   :  { %5636 = vpow2.f32 %v5448_v41 }
  0xe3   :  { %5638 = vpow2.f32 %v5449_v42 }
  0xe5   :  { %v5633_v39 = vpop.eup %5632 }
  0xe6   :  { %400 = vrot.lane.b32.xlu0 %v5633_v39, %s6515_s27 }
  0xe7   :  { %v5635_v40 = vpop.eup %5634 }
  0xe8   :  { %v5637_v43 = vpop.eup %5636 }
  0xe9   :  { %v381_v44 = vadd.f32 1.0, %v5637_v43  ;;  %v5639_v45 = vpop.eup %5638 }
  0xea   :  { %v418_v46 = vadd.f32 1.0, %v5639_v45 }
  0xeb   :  { %5640 = vrcp.f32 %v381_v44  ;;  %v393_v55 = vand.u32 2147483648, %v381_v44  ;;  %vm387_vm2 = vweird.f32 %v381_v44  ;;  %v391_v56 = vand.u32 2147483647, %v381_v44 }
  0xec   :  { %5642 = vrcp.f32 %v418_v46  ;;  %v430_v0 = vand.u32 2147483648, %v418_v46  ;;  %vm424_vm6 = vweird.f32 %v418_v46  ;;  %v428_v2 = vand.u32 2147483647, %v418_v46 }
  0xed   :  { %v394_v59 = vor.u32 1.1754944e-38, %v393_v55  ;;  %vm392_vm4 = vcmp.eq.f32.partialorder %v391_v56, 8.507059e+37 }
  0xee   :  { %437 = vrot.lane.b32.xlu0 %v5635_v40, %s6515_s27  ;;  %v431_v7 = vor.u32 1.1754944e-38, %v430_v0  ;;  %vm429_vm8 = vcmp.eq.f32.partialorder %v428_v2, 8.507059e+37 }
  0xf1   :  { %v5641_v47 = vpop.eup %5640 }
  0xf2   :  { %v383_v48 = vmul.f32 %v5641_v47, %v381_v44  ;;  %v5643_v50 = vpop.eup %5642  ;;  %vm388_vm1 = vweird.f32 %v5641_v47 }
  0xf3   :  { %v420_v52 = vmul.f32 %v5643_v50, %v418_v46  ;;  %vm389_vm3 = vmor %vm387_vm2, %vm388_vm1  ;;  %vm425_vm5 = vweird.f32 %v5643_v50  ;;  %v462_v46 = vrot.slane %v6859_v33, 2 }
  0xf4   :  { %v384_v49 = vsub.f32 1.0, %v383_v48  ;;  %vm426_vm7 = vmor %vm424_vm6, %vm425_vm5 }
  0xf5   :  { %v421_v54 = vsub.f32 1.0, %v420_v52 }
  0xf6   :  { %v385_v51 = vmul.f32 %v5641_v47, %v384_v49 }
  0xf7   :  { %v422_v58 = vmul.f32 %v5643_v50, %v421_v54 }
  0xf8   :  { %v386_v53 = vadd.f32 %v5641_v47, %v385_v51 }
  0xf9   :  { %v423_v63 = vadd.f32 %v5643_v50, %v422_v58 }
  0xfa   :  { %v390_v57 = vsel %vm389_vm3, %v5641_v47, %v386_v53 }
  0xfb   :  { %v395_v61 = vsel %vm392_vm4, %v394_v59, %v390_v57  ;;  %v427_v4 = vsel %vm426_vm7, %v5643_v50, %v423_v63 }
  0xfc   :  { %v432_v15 = vsel %vm429_vm8, %v431_v7, %v427_v4  ;;  %v398_v24 = vmul.f32 0.0, %v395_v61 }
  0xfd   :  { %v435_v28 = vmul.f32 0.0, %v432_v15 }
 0x158   :  { %v401_v60 = vpop.permute.xlu0 %400 }
 0x159   :  { %v403_v62 = vmul.f32 %v401_v60, %v395_v61 }
 0x15b   :  { %405 = vrot.lane.b32.xlu1 %v403_v62, %s6516_s1 }
 0x160   :  { %v438_v10 = vpop.permute.xlu0 %437 }
 0x161   :  { %v440_v23 = vmul.f32 %v438_v10, %v432_v15 }
 0x163   :  { %442 = vrot.lane.b32.xlu1 %v440_v23, %s6516_s1 }
 0x1cd   :  { %v406_v25 = vpop.permute.xlu1 %405 }
 0x1ce   :  { %v6869_v27 = vadd.f32 %v406_v25, %v398_v24 }
 0x1d0   :  { %5644 = vtanh.f32 %v6869_v27 }
 0x1d5   :  { %v443_v29 = vpop.permute.xlu1 %442 }
 0x1d6   :  { %v5645_v30 = vpop.eup %5644  ;;  %v6872_v34 = vadd.f32 %v443_v29, %v435_v28 }
 0x1d7   :  { %411 = vrot.lane.b32.xlu2 %v5645_v30, %s6515_s27 }
 0x1d8   :  { %5646 = vtanh.f32 %v6872_v34 }
 0x1de   :  { %v5647_v35 = vpop.eup %5646 }
 0x1df   :  { %448 = vrot.lane.b32.xlu2 %v5647_v35, %s6515_s27 }
 0x231   :  { %v412_v37 = vpop.permute.xlu2 %411 }
 0x232   :  { %v6877_v38 = vmul.f32 %v412_v37, %v395_v61 }
 0x234   :  { %453 = vrot.lane.b32.xlu0 %v6877_v38, %s6516_s1 }
 0x239   :  { %v449_v39 = vpop.permute.xlu2 %448 }
 0x23a   :  { %v6881_v40 = vmul.f32 %v449_v39, %v432_v15 }
 0x23c   :  { %457 = vrot.lane.b32.xlu1 %v6881_v40, %s6515_s27 }
 0x2a6   :  { %v454_v41 = vpop.permute.xlu0 %453 }
 0x2ae   :  { %v458_v42 = vpop.permute.xlu1 %457 }
 0x2af   :  { %v461_v43 = vsel %vm460_vm9, %v454_v41, %v458_v42 }
 0x2b0   :  { %5450 = vmatmul.msk.f32.vlgmr.msra.gmra.mxu0 %vm332_vm10, %v461_v43  ;;  %5451 = vmatmul.msk.f32.vlgmr.msrb.gmra.mxu1 %vm332_vm10, %v461_v43 }
 0x2b1   :  { %1037 = vmatpush.msra.mxu0 %v6684_v1  ;;  %1057 = vmatpush.msrb.mxu1 %v6703_v6 }
 0x2b3   :  { %1038 = vmatpush.msra.mxu0 %v6690_v3  ;;  %1058 = vmatpush.msrb.mxu1 %v6716_v9 }
 0x2b5   :  { %1039 = vmatpush.msra.mxu0 %v6698_v5  ;;  %1059 = vmatpush.msrb.mxu1 %v6728_v12 }
 0x2b7   :  { %1040 = vmatpush.msra.mxu0 %v6711_v8  ;;  %1060 = vmatpush.msrb.mxu1 %v6741_v14 }
 0x2b9   :  { %1041 = vmatpush.msra.mxu0 %v6723_v11  ;;  %1061 = vmatpush.msrb.mxu1 %v6758_v17 }
 0x2bb   :  { %1042 = vmatpush.msra.mxu0 %v6736_v13  ;;  %1062 = vmatpush.msrb.mxu1 %v6773_v19 }
 0x2bd   :  { %1043 = vmatpush.msra.mxu0 %v6753_v16  ;;  %1063 = vmatpush.msrb.mxu1 %v6781_v20 }
 0x2bf   :  { %1044 = vmatpush.msra.mxu0 %v6768_v18  ;;  %1064 = vmatpush.msrb.mxu1 %v6791_v22 }
 0x32d   :  { %v484_v44 = vpop.f32.mrf.mxu0  ;;  %v504_v45 = vpop.f32.mrf.mxu1 }
 0x32e   :  { %v509_v47 = vrot.slane %v484_v44, 6  ;;  %v510_v48 = vrot.slane %v504_v45, 6  ;;  %v536_v45 = vrot.slane %v6869_v27, 6 }
 0x330   :  { %v513_v49 = vadd.f32 %v509_v47, %v6857_v32  ;;  %v514_v50 = vadd.f32 %v510_v48, %v462_v46  ;;  %v576_v47 = vrot.slane %v6872_v34, 6 }
 0x332   :  { %5648 = vtanh.f32 %v513_v49  ;;  %v5452_v53 = vmul.f32 -1.442695, %v513_v49  ;;  %v5453_v57 = vmul.f32 -1.442695, %v514_v50 }
 0x333   :  { %5650 = vtanh.f32 %v514_v50 }
 0x334   :  { %5652 = vpow2.f32 %v5452_v53 }
 0x338   :  { %v5649_v51 = vpop.eup %5648 }
 0x339   :  { %v5651_v52 = vpop.eup %5650  ;;  %540 = vrot.lane.b32.xlu2 %v5649_v51, %s6515_s27 }
 0x33a   :  { %580 = vrot.lane.b32.xlu0 %v5651_v52, %s6515_s27  ;;  %v5653_v54 = vpop.eup %5652 }
 0x33b   :  { %v518_v55 = vadd.f32 1.0, %v5653_v54 }
 0x33d   :  { %5654 = vrcp.f32 %v518_v55  ;;  %v530_v0 = vand.u32 2147483648, %v518_v55  ;;  %vm524_vm12 = vweird.f32 %v518_v55  ;;  %v528_v2 = vand.u32 2147483647, %v518_v55 }
 0x33e   :  { %5656 = vpow2.f32 %v5453_v57 }
 0x33f   :  { %v531_v7 = vor.u32 1.1754944e-38, %v530_v0  ;;  %vm529_vm14 = vcmp.eq.f32.partialorder %v528_v2, 8.507059e+37 }
 0x343   :  { %v5655_v56 = vpop.eup %5654 }
 0x344   :  { %v520_v58 = vmul.f32 %v5655_v56, %v518_v55  ;;  %v5657_v61 = vpop.eup %5656  ;;  %vm525_vm11 = vweird.f32 %v5655_v56 }
 0x345   :  { %v558_v62 = vadd.f32 1.0, %v5657_v61  ;;  %vm526_vm13 = vmor %vm524_vm12, %vm525_vm11 }
 0x346   :  { %v521_v59 = vsub.f32 1.0, %v520_v58 }
 0x347   :  { %5658 = vrcp.f32 %v558_v62  ;;  %v570_v35 = vand.u32 2147483648, %v558_v62  ;;  %vm564_vm0 = vweird.f32 %v558_v62  ;;  %v568_v37 = vand.u32 2147483647, %v558_v62 }
 0x348   :  { %v522_v60 = vmul.f32 %v5655_v56, %v521_v59 }
 0x349   :  { %v571_v41 = vor.u32 1.1754944e-38, %v570_v35  ;;  %vm569_vm2 = vcmp.eq.f32.partialorder %v568_v37, 8.507059e+37 }
 0x34a   :  { %v523_v63 = vadd.f32 %v5655_v56, %v522_v60 }
 0x34c   :  { %v527_v4 = vsel %vm526_vm13, %v5655_v56, %v523_v63  ;;  %vm1439_vm13 = vcmask 1041408  }
 0x34d   :  { %v532_v15 = vsel %vm529_vm14, %v531_v7, %v527_v4  ;;  %v5659_v24 = vpop.eup %5658  ;;  %vm1441_vm14 = vcmask 1043456  }
 0x34e   :  { %v560_v25 = vmul.f32 %v5659_v24, %v558_v62  ;;  %vm565_vm15 = vweird.f32 %v5659_v24  ;;  %v538_v48 = vmul.f32 %v536_v45, %v532_v15 }
 0x34f   :  { %vm566_vm1 = vmor %vm564_vm0, %vm565_vm15 }
 0x350   :  { %v561_v28 = vsub.f32 1.0, %v560_v25 }
 0x352   :  { %v562_v29 = vmul.f32 %v5659_v24, %v561_v28 }
 0x354   :  { %v563_v30 = vadd.f32 %v5659_v24, %v562_v29 }
 0x356   :  { %v567_v39 = vsel %vm566_vm1, %v5659_v24, %v563_v30 }
 0x357   :  { %v572_v43 = vsel %vm569_vm2, %v571_v41, %v567_v39 }
 0x358   :  { %v578_v49 = vmul.f32 %v576_v47, %v572_v43 }
 0x393   :  { %v541_v10 = vpop.permute.xlu2 %540 }
 0x394   :  { %v543_v23 = vmul.f32 %v541_v10, %v532_v15 }
 0x396   :  { %545 = vrot.lane.b32.xlu1 %v543_v23, %s6516_s1 }
 0x3ac   :  { %v581_v42 = vpop.permute.xlu0 %580 }
 0x3ad   :  { %v583_v44 = vmul.f32 %v581_v42, %v572_v43 }
 0x3af   :  { %585 = vrot.lane.b32.xlu2 %v583_v44, %s6516_s1 }
 0x408   :  { %v546_v50 = vpop.permute.xlu1 %545 }
 0x409   :  { %v586_v51 = vpop.permute.xlu2 %585  ;;  %v6914_v52 = vadd.f32 %v546_v50, %v538_v48 }
 0x40a   :  { %v6916_v53 = vadd.f32 %v586_v51, %v578_v49 }
 0x40b   :  { %5660 = vtanh.f32 %v6914_v52 }
 0x40c   :  { %5662 = vtanh.f32 %v6916_v53 }
 0x411   :  { %v5661_v54 = vpop.eup %5660 }
 0x412   :  { %v5663_v55 = vpop.eup %5662  ;;  %551 = vrot.lane.b32.xlu0 %v5661_v54, %s6515_s27 }
 0x413   :  { %591 = vrot.lane.b32.xlu1 %v5663_v55, %s6515_s27 }
 0x484   :  { %v552_v27 = vpop.permute.xlu0 %551 }
 0x485   :  { %v592_v34 = vpop.permute.xlu1 %591  ;;  %v6922_v56 = vmul.f32 %v552_v27, %v532_v15 }
 0x486   :  { %v6924_v57 = vmul.f32 %v592_v34, %v572_v43 }
 0x487   :  { %596 = vrot.lane.b32.xlu2 %v6922_v56, %s6516_s1 }
 0x488   :  { %600 = vrot.lane.b32.xlu0 %v6924_v57, %s6515_s27 }
 0x4e1   :  { %v597_v58 = vpop.permute.xlu2 %596 }
 0x4fa   :  { %v601_v59 = vpop.permute.xlu0 %600 }
 0x4fb   :  { %v603_v60 = vsel %vm460_vm9, %v597_v58, %v601_v59 }
 0x4fc   :  { %v605_v61 = vrot.slane %v603_v60, 2 }
 0x4fe   :  { %5454 = vmatmul.msk.f32.vlgmr.msrb.gmra.mxu2 %vm332_vm10, %v605_v61  ;;  %5455 = vmatmul.msk.f32.vlgmr.msra.gmra.mxu3 %vm332_vm10, %v605_v61 }
 0x4ff   :  { %1178 = vmatpush.msrb.mxu2 %v6684_v1  ;;  %1198 = vmatpush.msra.mxu3 %v6703_v6 }
 0x501   :  { %1179 = vmatpush.msrb.mxu2 %v6690_v3  ;;  %1199 = vmatpush.msra.mxu3 %v6716_v9 }
 0x503   :  { %1180 = vmatpush.msrb.mxu2 %v6698_v5  ;;  %1200 = vmatpush.msra.mxu3 %v6728_v12 }
 0x505   :  { %1181 = vmatpush.msrb.mxu2 %v6711_v8  ;;  %1201 = vmatpush.msra.mxu3 %v6741_v14 }
 0x507   :  { %1182 = vmatpush.msrb.mxu2 %v6723_v11  ;;  %1202 = vmatpush.msra.mxu3 %v6758_v17 }
 0x509   :  { %1183 = vmatpush.msrb.mxu2 %v6736_v13  ;;  %1203 = vmatpush.msra.mxu3 %v6773_v19 }
 0x50b   :  { %1184 = vmatpush.msrb.mxu2 %v6753_v16  ;;  %1204 = vmatpush.msra.mxu3 %v6781_v20 }
 0x50d   :  { %1185 = vmatpush.msrb.mxu2 %v6768_v18  ;;  %1205 = vmatpush.msra.mxu3 %v6791_v22 }
 0x581   :  { %v625_v62 = vpop.f32.mrf.mxu2  ;;  %v645_v63 = vpop.f32.mrf.mxu3 }
 0x582   :  { %v650_v0 = vrot.slane %v625_v62, 4  ;;  %v651_v2 = vrot.slane %v645_v63, 4 }
 0x584   :  { %v654_v4 = vadd.f32 %v650_v0, %v6857_v32  ;;  %v655_v7 = vadd.f32 %v651_v2, %v330_v36  ;;  %v717_v0 = vrot.slane %v6916_v53, 6 }
 0x586   :  { %5664 = vtanh.f32 %v654_v4  ;;  %v5457_v23 = vmul.f32 -1.442695, %v655_v7  ;;  %v5456_v29 = vmul.f32 -1.442695, %v654_v4 }
 0x587   :  { %5666 = vtanh.f32 %v655_v7 }
 0x588   :  { %5668 = vpow2.f32 %v5457_v23 }
 0x58c   :  { %v5665_v10 = vpop.eup %5664 }
 0x58d   :  { %v5667_v15 = vpop.eup %5666  ;;  %681 = vrot.lane.b32.xlu1 %v5665_v10, %s6515_s27 }
 0x58e   :  { %721 = vrot.lane.b32.xlu2 %v5667_v15, %s6515_s27  ;;  %v5669_v24 = vpop.eup %5668  ;;  %v677_v15 = vrot.slane %v6914_v52, 6  ;;  %v1440_v52 = vsel %vm1439_vm13, %v6877_v38, %v6922_v56 }
 0x58f   :  { %v699_v25 = vadd.f32 1.0, %v5669_v24 }
 0x591   :  { %5670 = vrcp.f32 %v699_v25  ;;  %v711_v42 = vand.u32 2147483648, %v699_v25  ;;  %vm705_vm4 = vweird.f32 %v699_v25  ;;  %v709_v43 = vand.u32 2147483647, %v699_v25 }
 0x592   :  { %5672 = vpow2.f32 %v5456_v29 }
 0x593   :  { %v712_v45 = vor.u32 1.1754944e-38, %v711_v42  ;;  %vm710_vm6 = vcmp.eq.f32.partialorder %v709_v43, 8.507059e+37 }
 0x597   :  { %v5671_v28 = vpop.eup %5670 }
 0x598   :  { %v701_v30 = vmul.f32 %v5671_v28, %v699_v25  ;;  %v5673_v37 = vpop.eup %5672  ;;  %vm706_vm3 = vweird.f32 %v5671_v28 }
 0x599   :  { %v659_v39 = vadd.f32 1.0, %v5673_v37  ;;  %vm707_vm5 = vmor %vm705_vm4, %vm706_vm3 }
 0x59a   :  { %v702_v35 = vsub.f32 1.0, %v701_v30 }
 0x59b   :  { %5674 = vrcp.f32 %v659_v39  ;;  %v671_v34 = vand.u32 2147483648, %v659_v39  ;;  %vm665_vm8 = vweird.f32 %v659_v39  ;;  %v669_v58 = vand.u32 2147483647, %v659_v39 }
 0x59c   :  { %v703_v36 = vmul.f32 %v5671_v28, %v702_v35 }
 0x59d   :  { %v672_v60 = vor.u32 1.1754944e-38, %v671_v34  ;;  %vm670_vm12 = vcmp.eq.f32.partialorder %v669_v58, 8.507059e+37 }
 0x59e   :  { %v704_v41 = vadd.f32 %v5671_v28, %v703_v36 }
 0x5a0   :  { %v708_v44 = vsel %vm707_vm5, %v5671_v28, %v704_v41 }
 0x5a1   :  { %v713_v48 = vsel %vm710_vm6, %v712_v45, %v708_v44  ;;  %v5675_v49 = vpop.eup %5674 }
 0x5a2   :  { %v661_v51 = vmul.f32 %v5675_v49, %v659_v39  ;;  %vm666_vm7 = vweird.f32 %v5675_v49  ;;  %v719_v2 = vmul.f32 %v717_v0, %v713_v48 }
 0x5a3   :  { %vm667_vm11 = vmor %vm665_vm8, %vm666_vm7  ;;  %vm1443_vm7 = vcmask 1045504  }
 0x5a4   :  { %v662_v54 = vsub.f32 1.0, %v661_v51 }
 0x5a6   :  { %v663_v55 = vmul.f32 %v5675_v49, %v662_v54 }
 0x5a8   :  { %v664_v27 = vadd.f32 %v5675_v49, %v663_v55 }
 0x5aa   :  { %v668_v59 = vsel %vm667_vm11, %v5675_v49, %v664_v27 }
 0x5ab   :  { %v673_v62 = vsel %vm670_vm12, %v672_v60, %v668_v59 }
 0x5ac   :  { %v679_v23 = vmul.f32 %v677_v15, %v673_v62 }
 0x5e8   :  { %v722_v47 = vpop.permute.xlu2 %721 }
 0x5e9   :  { %v724_v50 = vmul.f32 %v722_v47, %v713_v48 }
 0x5eb   :  { %726 = vrot.lane.b32.xlu1 %v724_v50, %s6516_s1 }
 0x5ff   :  { %v682_v61 = vpop.permute.xlu1 %681 }
 0x600   :  { %v684_v63 = vmul.f32 %v682_v61, %v673_v62 }
 0x602   :  { %686 = vrot.lane.b32.xlu0 %v684_v63, %s6516_s1 }
 0x65d   :  { %v727_v4 = vpop.permute.xlu1 %726 }
 0x65e   :  { %v6957_v7 = vadd.f32 %v727_v4, %v719_v2 }
 0x660   :  { %5676 = vtanh.f32 %v6957_v7  ;;  %v858_v15 = vrot.slane %v6957_v7, 6 }
 0x666   :  { %v5677_v10 = vpop.eup %5676 }
 0x667   :  { %732 = vrot.lane.b32.xlu0 %v5677_v10, %s6515_s27 }
 0x674   :  { %v687_v24 = vpop.permute.xlu0 %686 }
 0x675   :  { %v6962_v25 = vadd.f32 %v687_v24, %v679_v23 }
 0x677   :  { %5678 = vtanh.f32 %v6962_v25  ;;  %v818_v63 = vrot.slane %v6962_v25, 6 }
 0x67d   :  { %v5679_v28 = vpop.eup %5678 }
 0x67e   :  { %692 = vrot.lane.b32.xlu2 %v5679_v28, %s6515_s27 }
 0x6d8   :  { %v693_v53 = vpop.permute.xlu2 %692 }
 0x6d9   :  { %v733_v29 = vpop.permute.xlu0 %732  ;;  %v695_v30 = vmul.f32 %v693_v53, %v673_v62 }
 0x6da   :  { %v6966_v35 = vmul.f32 %v733_v29, %v713_v48 }
 0x6db   :  { %737 = vrot.lane.b32.xlu1 %v695_v30, %s6516_s1  ;;  %v6973_v37 = vsel %vm1441_vm14, %v1440_v52, %v695_v30 }
 0x6dc   :  { %741 = vrot.lane.b32.xlu2 %v6966_v35, %s6515_s27  ;;  %v1459_v7 = vrot.slane %v6966_v35, 2 }
 0x736   :  { %v742_v36 = vpop.permute.xlu2 %741 }
 0x74d   :  { %v738_v39 = vpop.permute.xlu1 %737 }
 0x74e   :  { %v744_v41 = vsel %vm460_vm9, %v738_v39, %v742_v36 }
 0x74f   :  { %v746_v42 = vrot.slane %v744_v41, 4  ;;  %v1461_v41 = vrot.slane %v6924_v57, 6  ;;  %v887_v57 = vrot.slane %v6853_v26, 6 }
 0x751   :  { %5458 = vmatmul.msk.f32.vlgmr.msrb.gmra.mxu0 %vm332_vm10, %v746_v42  ;;  %5459 = vmatmul.msk.f32.vlgmr.msra.gmra.mxu1 %vm332_vm10, %v746_v42  ;;  %v1463_v42 = vrot.slane %v6881_v40, 2 }
 0x752   :  { %1319 = vmatpush.msrb.mxu0 %v6684_v1  ;;  %1339 = vmatpush.msra.mxu1 %v6703_v6 }
 0x754   :  { %1320 = vmatpush.msrb.mxu0 %v6690_v3  ;;  %1340 = vmatpush.msra.mxu1 %v6716_v9 }
 0x756   :  { %1321 = vmatpush.msrb.mxu0 %v6698_v5  ;;  %1341 = vmatpush.msra.mxu1 %v6728_v12 }
 0x758   :  { %1322 = vmatpush.msrb.mxu0 %v6711_v8  ;;  %1342 = vmatpush.msra.mxu1 %v6741_v14 }
 0x75a   :  { %1323 = vmatpush.msrb.mxu0 %v6723_v11  ;;  %1343 = vmatpush.msra.mxu1 %v6758_v17 }
 0x75c   :  { %1324 = vmatpush.msrb.mxu0 %v6736_v13  ;;  %1344 = vmatpush.msra.mxu1 %v6773_v19 }
 0x75e   :  { %1325 = vmatpush.msrb.mxu0 %v6753_v16  ;;  %1345 = vmatpush.msra.mxu1 %v6781_v20 }
 0x760   :  { %1326 = vmatpush.msrb.mxu0 %v6768_v18  ;;  %1346 = vmatpush.msra.mxu1 %v6791_v22 }
 0x7ce   :  { %v766_v1 = vpop.f32.mrf.mxu0  ;;  %v786_v3 = vpop.f32.mrf.mxu1 }
 0x7cf   :  { %v791_v5 = vrot.slane %v766_v1, 2  ;;  %v792_v6 = vrot.slane %v786_v3, 2 }
 0x7d1   :  { %v795_v8 = vadd.f32 %v791_v5, %v6857_v32  ;;  %v796_v9 = vadd.f32 %v792_v6, %v462_v46 }
 0x7d3   :  { %5680 = vtanh.f32 %v795_v8  ;;  %v5460_v13 = vmul.f32 -1.442695, %v795_v8  ;;  %v5461_v14 = vmul.f32 -1.442695, %v796_v9 }
 0x7d4   :  { %5682 = vtanh.f32 %v796_v9 }
 0x7d5   :  { %5684 = vpow2.f32 %v5460_v13 }
 0x7d6   :  { %5686 = vpow2.f32 %v5461_v14 }
 0x7d9   :  { %v5681_v11 = vpop.eup %5680 }
 0x7da   :  { %v5683_v12 = vpop.eup %5682  ;;  %822 = vrot.lane.b32.xlu0 %v5681_v11, %s6515_s27 }
 0x7db   :  { %862 = vrot.lane.b32.xlu1 %v5683_v12, %s6515_s27  ;;  %v5685_v16 = vpop.eup %5684 }
 0x7dc   :  { %v5687_v17 = vpop.eup %5686  ;;  %v800_v18 = vadd.f32 1.0, %v5685_v16 }
 0x7dd   :  { %v840_v19 = vadd.f32 1.0, %v5687_v17 }
 0x7de   :  { %5688 = vrcp.f32 %v800_v18  ;;  %v812_v47 = vand.u32 2147483648, %v800_v18  ;;  %vm806_vm1 = vweird.f32 %v800_v18  ;;  %v810_v49 = vand.u32 2147483647, %v800_v18 }
 0x7df   :  { %5690 = vrcp.f32 %v840_v19  ;;  %v852_v48 = vand.u32 2147483648, %v840_v19  ;;  %vm846_vm2 = vweird.f32 %v840_v19  ;;  %v850_v50 = vand.u32 2147483647, %v840_v19 }
 0x7e0   :  { %v813_v55 = vor.u32 1.1754944e-38, %v812_v47  ;;  %vm811_vm5 = vcmp.eq.f32.partialorder %v810_v49, 8.507059e+37 }
 0x7e1   :  { %v853_v27 = vor.u32 1.1754944e-38, %v852_v48  ;;  %vm851_vm6 = vcmp.eq.f32.partialorder %v850_v50, 8.507059e+37 }
 0x7e4   :  { %v5689_v20 = vpop.eup %5688 }
 0x7e5   :  { %v5691_v22 = vpop.eup %5690  ;;  %v802_v32 = vmul.f32 %v5689_v20, %v800_v18  ;;  %vm807_vm15 = vweird.f32 %v5689_v20 }
 0x7e6   :  { %v842_v33 = vmul.f32 %v5691_v22, %v840_v19  ;;  %vm847_vm0 = vweird.f32 %v5691_v22  ;;  %vm808_vm3 = vmor %vm806_vm1, %vm807_vm15 }
 0x7e7   :  { %v803_v38 = vsub.f32 1.0, %v802_v32  ;;  %vm848_vm4 = vmor %vm846_vm2, %vm847_vm0 }
 0x7e8   :  { %v843_v46 = vsub.f32 1.0, %v842_v33 }
 0x7e9   :  { %v804_v56 = vmul.f32 %v5689_v20, %v803_v38 }
 0x7ea   :  { %v844_v43 = vmul.f32 %v5691_v22, %v843_v46 }
 0x7eb   :  { %v805_v44 = vadd.f32 %v5689_v20, %v804_v56 }
 0x7ec   :  { %v845_v45 = vadd.f32 %v5691_v22, %v844_v43 }
 0x7ed   :  { %v809_v51 = vsel %vm808_vm3, %v5689_v20, %v805_v44 }
 0x7ee   :  { %v849_v54 = vsel %vm848_vm4, %v5691_v22, %v845_v45  ;;  %v814_v58 = vsel %vm811_vm5, %v813_v55, %v809_v51 }
 0x7ef   :  { %v854_v60 = vsel %vm851_vm6, %v853_v27, %v849_v54  ;;  %v820_v0 = vmul.f32 %v818_v63, %v814_v58 }
 0x7f0   :  { %v860_v23 = vmul.f32 %v858_v15, %v854_v60 }
 0x84c   :  { %v823_v34 = vpop.permute.xlu0 %822 }
 0x84d   :  { %v863_v59 = vpop.permute.xlu1 %862  ;;  %v825_v61 = vmul.f32 %v823_v34, %v814_v58 }
 0x84e   :  { %v865_v62 = vmul.f32 %v863_v59, %v854_v60 }
 0x84f   :  { %827 = vrot.lane.b32.xlu2 %v825_v61, %s6516_s1 }
 0x850   :  { %867 = vrot.lane.b32.xlu0 %v865_v62, %s6516_s1 }
 0x8a9   :  { %v828_v2 = vpop.permute.xlu2 %827 }
 0x8aa   :  { %v7004_v4 = vadd.f32 %v828_v2, %v820_v0 }
 0x8ac   :  { %5692 = vtanh.f32 %v7004_v4  ;;  %v956_v2 = vrot.slane %v7004_v4, 6 }
 0x8b2   :  { %v5693_v10 = vpop.eup %5692 }
 0x8b3   :  { %833 = vrot.lane.b32.xlu1 %v5693_v10, %s6515_s27 }
 0x8c2   :  { %v868_v24 = vpop.permute.xlu0 %867 }
 0x8c3   :  { %v7009_v28 = vadd.f32 %v868_v24, %v860_v23 }
 0x8c5   :  { %5694 = vtanh.f32 %v7009_v28  ;;  %v996_v10 = vrot.slane %v7009_v28, 6 }
 0x8cb   :  { %v5695_v53 = vpop.eup %5694 }
 0x8cc   :  { %873 = vrot.lane.b32.xlu2 %v5695_v53, %s6515_s27 }
 0x925   :  { %v834_v25 = vpop.permute.xlu1 %833 }
 0x926   :  { %v874_v29 = vpop.permute.xlu2 %873  ;;  %v836_v30 = vmul.f32 %v834_v25, %v814_v58 }
 0x927   :  { %v876_v52 = vmul.f32 %v874_v29, %v854_v60 }
 0x928   :  { %878 = vrot.lane.b32.xlu0 %v836_v30, %s6516_s1  ;;  %v7016_v36 = vsel %vm1443_vm7, %v6973_v37, %v836_v30 }
 0x929   :  { %v1457_v39 = vrot.slane %v876_v52, 6  ;;  %882 = vrot.lane.b32.xlu1 %v876_v52, %s6515_s27 }
 0x92b   :  { %v1468_v1 = vsel %vm1439_vm13, %v1457_v39, %v1459_v7 }
 0x92c   :  { %v1469_v3 = vsel %vm1441_vm14, %v1468_v1, %v1461_v41 }
 0x92d   :  { %v7025_v5 = vsel %vm1443_vm7, %v1469_v3, %v1463_v42 }
 0x99a   :  { %v879_v6 = vpop.permute.xlu0 %878 }
 0x99b   :  { %v883_v8 = vpop.permute.xlu1 %882 }
 0x99c   :  { %v885_v37 = vsel %vm460_vm9, %v879_v6, %v883_v8  ;;  %v1024_v8 = vrot.slane %v6853_v26, 2 }
 0x99d   :  { %v890_v9 = vrot.slane %v885_v37, 6 }
 0x99f   :  { %5462 = vmatmul.msk.f32.vlgmr.msra.gmra.mxu2 %vm332_vm10, %v890_v9  ;;  %5463 = vmatmul.msk.f32.vlgmr.msrb.gmra.mxu3 %vm332_vm10, %v890_v9 }
 0xa22   :  { %v910_v35 = vpop.f32.mrf.mxu2  ;;  %v930_v40 = vpop.f32.mrf.mxu3 }
 0xa23   :  { %v933_v11 = vadd.f32 %v910_v35, %v6855_v31  ;;  %v934_v12 = vadd.f32 %v930_v40, %v887_v57 }
 0xa25   :  { %5696 = vtanh.f32 %v933_v11  ;;  %v5464_v16 = vmul.f32 -1.442695, %v933_v11  ;;  %v5465_v20 = vmul.f32 -1.442695, %v934_v12 }
 0xa26   :  { %5698 = vtanh.f32 %v934_v12 }
 0xa27   :  { %5700 = vpow2.f32 %v5464_v16 }
 0xa2b   :  { %v5697_v13 = vpop.eup %5696 }
 0xa2c   :  { %v5699_v14 = vpop.eup %5698  ;;  %960 = vrot.lane.b32.xlu2 %v5697_v13, %s6515_s27 }
 0xa2d   :  { %1000 = vrot.lane.b32.xlu0 %v5699_v14, %s6515_s27  ;;  %v5701_v17 = vpop.eup %5700 }
 0xa2e   :  { %v938_v18 = vadd.f32 1.0, %v5701_v17 }
 0xa30   :  { %5702 = vrcp.f32 %v938_v18  ;;  %v950_v43 = vand.u32 2147483648, %v938_v18  ;;  %vm944_vm11 = vweird.f32 %v938_v18  ;;  %v948_v44 = vand.u32 2147483647, %v938_v18 }
 0xa31   :  { %5704 = vpow2.f32 %v5465_v20 }
 0xa32   :  { %v951_v47 = vor.u32 1.1754944e-38, %v950_v43  ;;  %vm949_vm15 = vcmp.eq.f32.partialorder %v948_v44, 8.507059e+37 }
 0xa36   :  { %v5703_v19 = vpop.eup %5702 }
 0xa37   :  { %v940_v22 = vmul.f32 %v5703_v19, %v938_v18  ;;  %v5705_v38 = vpop.eup %5704  ;;  %vm945_vm8 = vweird.f32 %v5703_v19 }
 0xa38   :  { %v978_v46 = vadd.f32 1.0, %v5705_v38  ;;  %vm946_vm12 = vmor %vm944_vm11, %vm945_vm8 }
 0xa39   :  { %v941_v32 = vsub.f32 1.0, %v940_v22 }
 0xa3a   :  { %5706 = vrcp.f32 %v978_v46  ;;  %v990_v58 = vand.u32 2147483648, %v978_v46  ;;  %vm984_vm1 = vweird.f32 %v978_v46  ;;  %v988_v59 = vand.u32 2147483647, %v978_v46 }
 0xa3b   :  { %v942_v33 = vmul.f32 %v5703_v19, %v941_v32 }
 0xa3c   :  { %v991_v61 = vor.u32 1.1754944e-38, %v990_v58  ;;  %vm989_vm3 = vcmp.eq.f32.partialorder %v988_v59, 8.507059e+37 }
 0xa3d   :  { %v943_v56 = vadd.f32 %v5703_v19, %v942_v33 }
 0xa3f   :  { %v947_v45 = vsel %vm946_vm12, %v5703_v19, %v943_v56 }
 0xa40   :  { %v952_v49 = vsel %vm949_vm15, %v951_v47, %v947_v45  ;;  %v5707_v51 = vpop.eup %5706 }
 0xa41   :  { %v980_v54 = vmul.f32 %v5707_v51, %v978_v46  ;;  %vm985_vm0 = vweird.f32 %v5707_v51  ;;  %v958_v15 = vmul.f32 %v956_v2, %v952_v49 }
 0xa42   :  { %vm986_vm2 = vmor %vm984_vm1, %vm985_vm0 }
 0xa43   :  { %v981_v55 = vsub.f32 1.0, %v980_v54 }
 0xa45   :  { %v982_v27 = vmul.f32 %v5707_v51, %v981_v55 }
 0xa47   :  { %v983_v34 = vadd.f32 %v5707_v51, %v982_v27 }
 0xa49   :  { %v987_v60 = vsel %vm986_vm2, %v5707_v51, %v983_v34 }
 0xa4a   :  { %v992_v63 = vsel %vm989_vm3, %v991_v61, %v987_v60 }
 0xa4b   :  { %v998_v23 = vmul.f32 %v996_v10, %v992_v63 }
 0xa86   :  { %v961_v48 = vpop.permute.xlu2 %960 }
 0xa87   :  { %v963_v50 = vmul.f32 %v961_v48, %v952_v49 }
 0xa89   :  { %965 = vrot.lane.b32.xlu1 %v963_v50, %s6516_s1 }
 0xa9f   :  { %v1001_v62 = vpop.permute.xlu0 %1000 }
 0xaa0   :  { %v1003_v0 = vmul.f32 %v1001_v62, %v992_v63 }
 0xaa2   :  { %1005 = vrot.lane.b32.xlu2 %v1003_v0, %s6516_s1 }
 0xafb   :  { %v966_v24 = vpop.permute.xlu1 %965 }
 0xafc   :  { %v1006_v53 = vpop.permute.xlu2 %1005  ;;  %v7040_v25 = vadd.f32 %v966_v24, %v958_v15 }
 0xafd   :  { %v7042_v29 = vadd.f32 %v1006_v53, %v998_v23 }
 0xafe   :  { %5708 = vtanh.f32 %v7040_v25  ;;  %v1098_v23 = vrot.slane %v7040_v25, 6 }
 0xaff   :  { %5710 = vtanh.f32 %v7042_v29 }
 0xb04   :  { %v5709_v30 = vpop.eup %5708 }
 0xb05   :  { %v5711_v52 = vpop.eup %5710  ;;  %971 = vrot.lane.b32.xlu0 %v5709_v30, %s6515_s27 }
 0xb06   :  { %1011 = vrot.lane.b32.xlu1 %v5711_v52, %s6515_s27 }
 0xb77   :  { %v972_v4 = vpop.permute.xlu0 %971 }
 0xb78   :  { %v1012_v28 = vpop.permute.xlu1 %1011  ;;  %v7048_v7 = vmul.f32 %v972_v4, %v952_v49 }
 0xb79   :  { %v7050_v39 = vmul.f32 %v1012_v28, %v992_v63  ;;  %v1138_v63 = vrot.slane %v7042_v29, 6 }
 0xb7a   :  { %1016 = vrot.lane.b32.xlu2 %v7048_v7, %s6516_s1 }
 0xb7b   :  { %1020 = vrot.lane.b32.xlu0 %v7050_v39, %s6515_s27 }
 0xbd4   :  { %v1017_v41 = vpop.permute.xlu2 %1016 }
 0xbed   :  { %v1021_v42 = vpop.permute.xlu0 %1020 }
 0xbee   :  { %v1023_v1 = vsel %vm460_vm9, %v1017_v41, %v1021_v42 }
 0xbef   :  { %5466 = vmatmul.msk.f32.vlgmr.msra.gmra.mxu0 %vm332_vm10, %v1023_v1  ;;  %5467 = vmatmul.msk.f32.vlgmr.msrb.gmra.mxu1 %vm332_vm10, %v1023_v1 }
 0xc6c   :  { %v1046_v3 = vpop.f32.mrf.mxu0  ;;  %v1066_v6 = vpop.f32.mrf.mxu1 }
 0xc6d   :  { %v1071_v37 = vrot.slane %v1046_v3, 6  ;;  %v1072_v9 = vrot.slane %v1066_v6, 6 }
 0xc6f   :  { %v1075_v35 = vadd.f32 %v1071_v37, %v6855_v31  ;;  %v1076_v40 = vadd.f32 %v1072_v9, %v1024_v8 }
 0xc71   :  { %5712 = vtanh.f32 %v1075_v35  ;;  %v5469_v13 = vmul.f32 -1.442695, %v1076_v40  ;;  %v5468_v18 = vmul.f32 -1.442695, %v1075_v35 }
 0xc72   :  { %5714 = vtanh.f32 %v1076_v40 }
 0xc73   :  { %5716 = vpow2.f32 %v5469_v13 }
 0xc77   :  { %v5713_v11 = vpop.eup %5712 }
 0xc78   :  { %v5715_v12 = vpop.eup %5714  ;;  %1102 = vrot.lane.b32.xlu1 %v5713_v11, %s6515_s27 }
 0xc79   :  { %1142 = vrot.lane.b32.xlu2 %v5715_v12, %s6515_s27  ;;  %v5717_v14 = vpop.eup %5716 }
 0xc7a   :  { %v1120_v16 = vadd.f32 1.0, %v5717_v14 }
 0xc7c   :  { %5718 = vrcp.f32 %v1120_v16  ;;  %v1132_v46 = vand.u32 2147483648, %v1120_v16  ;;  %vm1126_vm5 = vweird.f32 %v1120_v16  ;;  %v1130_v56 = vand.u32 2147483647, %v1120_v16 }
 0xc7d   :  { %5720 = vpow2.f32 %v5468_v18 }
 0xc7e   :  { %v1133_v44 = vor.u32 1.1754944e-38, %v1132_v46  ;;  %vm1131_vm8 = vcmp.eq.f32.partialorder %v1130_v56, 8.507059e+37 }
 0xc82   :  { %v5719_v17 = vpop.eup %5718 }
 0xc83   :  { %v1122_v19 = vmul.f32 %v5719_v17, %v1120_v16  ;;  %v5721_v22 = vpop.eup %5720  ;;  %vm1127_vm4 = vweird.f32 %v5719_v17 }
 0xc84   :  { %v1080_v33 = vadd.f32 1.0, %v5721_v22  ;;  %vm1128_vm6 = vmor %vm1126_vm5, %vm1127_vm4 }
 0xc85   :  { %v1123_v20 = vsub.f32 1.0, %v1122_v19 }
 0xc86   :  { %5722 = vrcp.f32 %v1080_v33  ;;  %v1092_v27 = vand.u32 2147483648, %v1080_v33  ;;  %vm1086_vm12 = vweird.f32 %v1080_v33  ;;  %v1090_v34 = vand.u32 2147483647, %v1080_v33 }
 0xc87   :  { %v1124_v32 = vmul.f32 %v5719_v17, %v1123_v20 }
 0xc88   :  { %v1093_v59 = vor.u32 1.1754944e-38, %v1092_v27  ;;  %vm1091_vm0 = vcmp.eq.f32.partialorder %v1090_v34, 8.507059e+37 }
 0xc89   :  { %v1125_v38 = vadd.f32 %v5719_v17, %v1124_v32 }
 0xc8b   :  { %v1129_v43 = vsel %vm1128_vm6, %v5719_v17, %v1125_v38 }
 0xc8c   :  { %v1134_v47 = vsel %vm1131_vm8, %v1133_v44, %v1129_v43  ;;  %v5723_v48 = vpop.eup %5722 }
 0xc8d   :  { %v1082_v50 = vmul.f32 %v5723_v48, %v1080_v33  ;;  %vm1087_vm11 = vweird.f32 %v5723_v48  ;;  %v1140_v0 = vmul.f32 %v1138_v63, %v1134_v47 }
 0xc8e   :  { %vm1088_vm15 = vmor %vm1086_vm12, %vm1087_vm11 }
 0xc8f   :  { %v1083_v51 = vsub.f32 1.0, %v1082_v50 }
 0xc91   :  { %v1084_v54 = vmul.f32 %v5723_v48, %v1083_v51 }
 0xc93   :  { %v1085_v55 = vadd.f32 %v5723_v48, %v1084_v54 }
 0xc95   :  { %v1089_v58 = vsel %vm1088_vm15, %v5723_v48, %v1085_v55 }
 0xc96   :  { %v1094_v61 = vsel %vm1091_vm0, %v1093_v59, %v1089_v58 }
 0xc97   :  { %v1100_v24 = vmul.f32 %v1098_v23, %v1094_v61 }
 0xcd3   :  { %v1143_v45 = vpop.permute.xlu2 %1142 }
 0xcd4   :  { %v1145_v49 = vmul.f32 %v1143_v45, %v1134_v47 }
 0xcd6   :  { %1147 = vrot.lane.b32.xlu1 %v1145_v49, %s6516_s1 }
 0xcea   :  { %v1103_v60 = vpop.permute.xlu1 %1102 }
 0xceb   :  { %v1105_v62 = vmul.f32 %v1103_v60, %v1094_v61 }
 0xced   :  { %1107 = vrot.lane.b32.xlu0 %v1105_v62, %s6516_s1 }
 0xd48   :  { %v1148_v2 = vpop.permute.xlu1 %1147 }
 0xd49   :  { %v7068_v10 = vadd.f32 %v1148_v2, %v1140_v0 }
 0xd4b   :  { %5724 = vtanh.f32 %v7068_v10 }
 0xd51   :  { %v5725_v15 = vpop.eup %5724 }
 0xd52   :  { %1153 = vrot.lane.b32.xlu0 %v5725_v15, %s6515_s27 }
 0xd5f   :  { %v1108_v53 = vpop.permute.xlu0 %1107 }
 0xd60   :  { %v7073_v30 = vadd.f32 %v1108_v53, %v1100_v24  ;;  %v1279_v24 = vrot.slane %v7068_v10, 6 }
 0xd62   :  { %5726 = vtanh.f32 %v7073_v30  ;;  %v1239_v63 = vrot.slane %v7073_v30, 6 }
 0xd68   :  { %v5727_v52 = vpop.eup %5726 }
 0xd69   :  { %1113 = vrot.lane.b32.xlu2 %v5727_v52, %s6515_s27 }
 0xdc3   :  { %v1114_v29 = vpop.permute.xlu2 %1113 }
 0xdc4   :  { %v1154_v4 = vpop.permute.xlu0 %1153  ;;  %v7077_v28 = vmul.f32 %v1114_v29, %v1094_v61 }
 0xdc5   :  { %v7079_v41 = vmul.f32 %v1154_v4, %v1134_v47 }
 0xdc6   :  { %1158 = vrot.lane.b32.xlu1 %v7077_v28, %s6516_s1 }
 0xdc7   :  { %1162 = vrot.lane.b32.xlu2 %v7079_v41, %s6515_s27 }
 0xe21   :  { %v1163_v25 = vpop.permute.xlu2 %1162 }
 0xe38   :  { %v1159_v42 = vpop.permute.xlu1 %1158 }
 0xe39   :  { %v1165_v1 = vsel %vm460_vm9, %v1159_v42, %v1163_v25 }
 0xe3a   :  { %v1167_v3 = vrot.slane %v1165_v1, 2 }
 0xe3c   :  { %5470 = vmatmul.msk.f32.vlgmr.msrb.gmra.mxu2 %vm332_vm10, %v1167_v3  ;;  %5471 = vmatmul.msk.f32.vlgmr.msra.gmra.mxu3 %vm332_vm10, %v1167_v3  ;;  %v1445_v3 = vsel %vm1439_vm13, %v7048_v7, %v7077_v28 }
 0xebf   :  { %v1187_v6 = vpop.f32.mrf.mxu2  ;;  %v1207_v37 = vpop.f32.mrf.mxu3 }
 0xec0   :  { %v1212_v9 = vrot.slane %v1187_v6, 4  ;;  %v1213_v35 = vrot.slane %v1207_v37, 4 }
 0xec2   :  { %v1216_v40 = vadd.f32 %v1212_v9, %v6855_v31  ;;  %v1217_v11 = vadd.f32 %v1213_v35, %v887_v57 }
 0xec4   :  { %5728 = vtanh.f32 %v1216_v40  ;;  %v5472_v14 = vmul.f32 -1.442695, %v1216_v40  ;;  %v5473_v16 = vmul.f32 -1.442695, %v1217_v11 }
 0xec5   :  { %5730 = vtanh.f32 %v1217_v11 }
 0xec6   :  { %5732 = vpow2.f32 %v5472_v14 }
 0xec7   :  { %5734 = vpow2.f32 %v5473_v16 }
 0xeca   :  { %v5729_v12 = vpop.eup %5728 }
 0xecb   :  { %v5731_v13 = vpop.eup %5730  ;;  %1243 = vrot.lane.b32.xlu0 %v5729_v12, %s6515_s27 }
 0xecc   :  { %1283 = vrot.lane.b32.xlu1 %v5731_v13, %s6515_s27  ;;  %v5733_v17 = vpop.eup %5732 }
 0xecd   :  { %v5735_v18 = vpop.eup %5734  ;;  %v1221_v19 = vadd.f32 1.0, %v5733_v17 }
 0xece   :  { %v1261_v20 = vadd.f32 1.0, %v5735_v18 }
 0xecf   :  { %5736 = vrcp.f32 %v1221_v19  ;;  %v1233_v47 = vand.u32 2147483648, %v1221_v19  ;;  %vm1227_vm3 = vweird.f32 %v1221_v19  ;;  %v1231_v49 = vand.u32 2147483647, %v1221_v19 }
 0xed0   :  { %5738 = vrcp.f32 %v1261_v20  ;;  %v1273_v48 = vand.u32 2147483648, %v1261_v20  ;;  %vm1267_vm4 = vweird.f32 %v1261_v20  ;;  %v1271_v50 = vand.u32 2147483647, %v1261_v20 }
 0xed1   :  { %v1234_v55 = vor.u32 1.1754944e-38, %v1233_v47  ;;  %vm1232_vm8 = vcmp.eq.f32.partialorder %v1231_v49, 8.507059e+37 }
 0xed2   :  { %v1274_v27 = vor.u32 1.1754944e-38, %v1273_v48  ;;  %vm1272_vm11 = vcmp.eq.f32.partialorder %v1271_v50, 8.507059e+37 }
 0xed5   :  { %v5737_v22 = vpop.eup %5736 }
 0xed6   :  { %v5739_v57 = vpop.eup %5738  ;;  %v1223_v32 = vmul.f32 %v5737_v22, %v1221_v19  ;;  %vm1228_vm1 = vweird.f32 %v5737_v22 }
 0xed7   :  { %v1263_v33 = vmul.f32 %v5739_v57, %v1261_v20  ;;  %vm1268_vm2 = vweird.f32 %v5739_v57  ;;  %vm1229_vm5 = vmor %vm1227_vm3, %vm1228_vm1 }
 0xed8   :  { %v1224_v38 = vsub.f32 1.0, %v1223_v32  ;;  %vm1269_vm6 = vmor %vm1267_vm4, %vm1268_vm2 }
 0xed9   :  { %v1264_v46 = vsub.f32 1.0, %v1263_v33 }
 0xeda   :  { %v1225_v56 = vmul.f32 %v5737_v22, %v1224_v38 }
 0xedb   :  { %v1265_v43 = vmul.f32 %v5739_v57, %v1264_v46 }
 0xedc   :  { %v1226_v44 = vadd.f32 %v5737_v22, %v1225_v56 }
 0xedd   :  { %v1266_v45 = vadd.f32 %v5739_v57, %v1265_v43 }
 0xede   :  { %v1230_v51 = vsel %vm1229_vm5, %v5737_v22, %v1226_v44 }
 0xedf   :  { %v1270_v54 = vsel %vm1269_vm6, %v5739_v57, %v1266_v45  ;;  %v1235_v58 = vsel %vm1232_vm8, %v1234_v55, %v1230_v51 }
 0xee0   :  { %v1275_v60 = vsel %vm1272_vm11, %v1274_v27, %v1270_v54  ;;  %v1241_v0 = vmul.f32 %v1239_v63, %v1235_v58  ;;  %v1479_v63 = vld [vmem:[%s8645_s25 + $0x38] sm:$0xff] }
 0xee1   :  { %v1281_v53 = vmul.f32 %v1279_v24, %v1275_v60  ;;  %1525 = vmatpush.msrb.mxu3 %v1479_v63  ;;  %v1473_v24 = vld [vmem:[%s8645_s25 + $0x8] sm:$0xff] }
 0xf3d   :  { %v1244_v34 = vpop.permute.xlu0 %1243 }
 0xf3e   :  { %v1284_v59 = vpop.permute.xlu1 %1283  ;;  %v1246_v61 = vmul.f32 %v1244_v34, %v1235_v58 }
 0xf3f   :  { %v1286_v62 = vmul.f32 %v1284_v59, %v1275_v60 }
 0xf40   :  { %1248 = vrot.lane.b32.xlu2 %v1246_v61, %s6516_s1 }
 0xf41   :  { %1288 = vrot.lane.b32.xlu0 %v1286_v62, %s6516_s1  ;;  %v1478_v62 = vld [vmem:[%s8645_s25 + $0x30] sm:$0xff] }
 0xf42   :  { %1502 = vmatpush.msra.mxu2 %v1478_v62 }
 0xf9a   :  { %v1249_v2 = vpop.permute.xlu2 %1248 }
 0xf9b   :  { %v7096_v15 = vadd.f32 %v1249_v2, %v1241_v0  ;;  %v1476_v0 = vld [vmem:[%s8645_s25 + $0x20] sm:$0xff]  ;;  %v1475_v2 = vld [vmem:[%s8645_s25 + $0x18] sm:$0xff] }
 0xf9c   :  { %1503 = vmatpush.msra.mxu2 %v1476_v0 }
 0xf9d   :  { %5740 = vtanh.f32 %v7096_v15 }
 0xfa3   :  { %v5741_v23 = vpop.eup %5740 }
 0xfa4   :  { %1254 = vrot.lane.b32.xlu1 %v5741_v23, %s6515_s27  ;;  %v1472_v23 = vld [vmem:[%s8645_s25] sm:$0xff] }
 0xfb3   :  { %v1289_v52 = vpop.permute.xlu0 %1288 }
 0xfb4   :  { %v7101_v29 = vadd.f32 %v1289_v52, %v1281_v53  ;;  %v1380_v53 = vrot.slane %v7096_v15, 6  ;;  %v7167_v15 = vld [vmem:[%s8646_s6 + $0x70] sm:$0xff] }
 0xfb6   :  { %5742 = vtanh.f32 %v7101_v29  ;;  %v1420_v52 = vrot.slane %v7101_v29, 6  ;;  %v7172_v29 = vld [vmem:[%s8646_s6 + $0x78] sm:$0xff] }
 0xfbc   :  { %v5743_v4 = vpop.eup %5742 }
 0xfbd   :  { %1294 = vrot.lane.b32.xlu2 %v5743_v4, %s6515_s27 }
0x1016   :  { %v1255_v30 = vpop.permute.xlu1 %1254 }
0x1017   :  { %v1295_v25 = vpop.permute.xlu2 %1294  ;;  %v1257_v42 = vmul.f32 %v1255_v30, %v1235_v58 }
0x1018   :  { %v7105_v1 = vmul.f32 %v1295_v25, %v1275_v60 }
0x1019   :  { %1299 = vrot.lane.b32.xlu0 %v1257_v42, %s6516_s1  ;;  %v7112_v10 = vsel %vm1441_vm14, %v1445_v3, %v1257_v42 }
0x101a   :  { %1303 = vrot.lane.b32.xlu1 %v7105_v1, %s6515_s27 }
0x108b   :  { %v1300_v6 = vpop.permute.xlu0 %1299 }
0x108c   :  { %v1304_v37 = vpop.permute.xlu1 %1303 }
0x108d   :  { %v1306_v9 = vsel %vm460_vm9, %v1300_v6, %v1304_v37 }
0x108e   :  { %v1308_v35 = vrot.slane %v1306_v9, 4 }
0x1090   :  { %5474 = vmatmul.msk.f32.vlgmr.msrb.gmra.mxu0 %vm332_vm10, %v1308_v35  ;;  %5475 = vmatmul.msk.f32.vlgmr.msra.gmra.mxu1 %vm332_vm10, %v1308_v35 }
0x110d   :  { %v1328_v40 = vpop.f32.mrf.mxu0  ;;  %v1348_v11 = vpop.f32.mrf.mxu1 }
0x110e   :  { %v1353_v7 = vrot.slane %v1328_v40, 2  ;;  %v1354_v28 = vrot.slane %v1348_v11, 2  ;;  %v7177_v40 = vld [vmem:[%s8646_s6 + $0x60] sm:$0xff]  ;;  %v1552_v11 = vld [vmem:[%s8645_s25 + $0x78] sm:$0xff] }
0x110f   :  { %1598 = vmatpush.msrb.mxu1 %v1552_v11 }
0x1110   :  { %v1357_v12 = vadd.f32 %v1353_v7, %v6855_v31  ;;  %v1358_v13 = vadd.f32 %v1354_v28, %v1024_v8  ;;  %v7187_v7 = vld [vmem:[%s8646_s6 + $0x68] sm:$0xff]  ;;  %v1551_v28 = vld [vmem:[%s8645_s25 + $0x70] sm:$0xff] }
0x1111   :  { %1575 = vmatpush.msra.mxu0 %v1551_v28 }
0x1112   :  { %5744 = vtanh.f32 %v1357_v12  ;;  %v5477_v17 = vmul.f32 -1.442695, %v1358_v13  ;;  %v5476_v22 = vmul.f32 -1.442695, %v1357_v12  ;;  %v7195_v12 = vld [vmem:[%s8646_s6 + $0x50] sm:$0xff] }
0x1113   :  { %5746 = vtanh.f32 %v1358_v13  ;;  %v1550_v13 = vld [vmem:[%s8645_s25 + $0x68] sm:$0xff] }
0x1114   :  { %5748 = vpow2.f32 %v5477_v17  ;;  %1599 = vmatpush.msrb.mxu1 %v1550_v13  ;;  %v7213_v17 = vld [vmem:[%s8646_s6 + $0x40] sm:$0xff] }
0x1118   :  { %v5745_v14 = vpop.eup %5744 }
0x1119   :  { %v5747_v16 = vpop.eup %5746  ;;  %1384 = vrot.lane.b32.xlu0 %v5745_v14, %s6515_s27  ;;  %v7203_v14 = vld [vmem:[%s8646_s6 + $0x58] sm:$0xff] }
0x111a   :  { %1424 = vrot.lane.b32.xlu2 %v5747_v16, %s6515_s27  ;;  %v5749_v18 = vpop.eup %5748  ;;  %v1549_v16 = vld [vmem:[%s8645_s25 + $0x60] sm:$0xff] }
0x111b   :  { %v1402_v19 = vadd.f32 1.0, %v5749_v18  ;;  %1576 = vmatpush.msra.mxu0 %v1549_v16 }
0x111d   :  { %5750 = vrcp.f32 %v1402_v19  ;;  %v1414_v38 = vand.u32 2147483648, %v1402_v19  ;;  %vm1408_vm15 = vweird.f32 %v1402_v19  ;;  %v1412_v46 = vand.u32 2147483647, %v1402_v19 }
0x111e   :  { %5752 = vpow2.f32 %v5476_v22 }
0x111f   :  { %v1415_v43 = vor.u32 1.1754944e-38, %v1414_v38  ;;  %vm1413_vm1 = vcmp.eq.f32.partialorder %v1412_v46, 8.507059e+37 }
0x1123   :  { %v5751_v20 = vpop.eup %5750 }
0x1124   :  { %v1404_v57 = vmul.f32 %v5751_v20, %v1402_v19  ;;  %v5753_v26 = vpop.eup %5752  ;;  %vm1409_vm12 = vweird.f32 %v5751_v20 }
0x1125   :  { %v1362_v32 = vadd.f32 1.0, %v5753_v26  ;;  %vm1410_vm0 = vmor %vm1408_vm15, %vm1409_vm12 }
0x1126   :  { %v1405_v31 = vsub.f32 1.0, %v1404_v57 }
0x1127   :  { %5754 = vrcp.f32 %v1362_v32  ;;  %v1374_v55 = vand.u32 2147483648, %v1362_v32  ;;  %vm1368_vm3 = vweird.f32 %v1362_v32  ;;  %v1372_v27 = vand.u32 2147483647, %v1362_v32 }
0x1128   :  { %v1406_v8 = vmul.f32 %v5751_v20, %v1405_v31  ;;  %v1451_v31 = vrot.slane %v7105_v1, 2  ;;  %v1548_v1 = vld [vmem:[%s8645_s25 + $0x58] sm:$0xff] }
0x1129   :  { %v1375_v58 = vor.u32 1.1754944e-38, %v1374_v55  ;;  %vm1373_vm5 = vcmp.eq.f32.partialorder %v1372_v27, 8.507059e+37  ;;  %1600 = vmatpush.msrb.mxu1 %v1548_v1 }
0x112a   :  { %v1407_v33 = vadd.f32 %v5751_v20, %v1406_v8  ;;  %v1453_v8 = vrot.slane %v7079_v41, 6  ;;  %v7250_v41 = vld [vmem:[%s8646_s6 + $0x30] sm:$0xff] }
0x112c   :  { %v1411_v56 = vsel %vm1410_vm0, %v5751_v20, %v1407_v33 }
0x112d   :  { %v7124_v45 = vsel %vm1413_vm1, %v1415_v43, %v1411_v56  ;;  %v5755_v47 = vpop.eup %5754  ;;  %v1546_v56 = vld [vmem:[%s8645_s25 + $0x48] sm:$0xff]  ;;  %v7258_v43 = vld [vmem:[%s8646_s6 + $0x38] sm:$0xff] }
0x112e   :  { %v1364_v49 = vmul.f32 %v5755_v47, %v1362_v32  ;;  %vm1369_vm2 = vweird.f32 %v5755_v47  ;;  %v1422_v30 = vmul.f32 %v1420_v52, %v7124_v45  ;;  %v1455_v32 = vrot.slane %v7050_v39, 2  ;;  %v1547_v39 = vld [vmem:[%s8645_s25 + $0x50] sm:$0xff]  ;;  %1601 = vmatpush.msrb.mxu1 %v1546_v56 }
0x112f   :  { %vm1370_vm4 = vmor %vm1368_vm3, %vm1369_vm2  ;;  %1577 = vmatpush.msra.mxu0 %v1547_v39 }
0x1130   :  { %v1365_v50 = vsub.f32 1.0, %v1364_v49  ;;  %v7284_v49 = vld [vmem:[%s8646_s6 + $0x18] sm:$0xff]  ;;  %1790 = vmatpush.msra.mxu1 %v7172_v29 }
0x1132   :  { %v1366_v51 = vmul.f32 %v5755_v47, %v1365_v50  ;;  %v7293_v50 = vld [vmem:[%s8646_s6] sm:$0xff]  ;;  %1791 = vmatpush.msra.mxu1 %v7187_v7 }
0x1134   :  { %v1367_v54 = vadd.f32 %v5755_v47, %v1366_v51  ;;  %v7302_v51 = vld [vmem:[%s8646_s6 + $0x8] sm:$0xff]  ;;  %1792 = vmatpush.msra.mxu1 %v7203_v14 }
0x1136   :  { %v1371_v34 = vsel %vm1370_vm4, %v5755_v47, %v1367_v54  ;;  %v7274_v47 = vld [vmem:[%s8646_s6 + $0x28] sm:$0xff] }
0x1137   :  { %v1376_v60 = vsel %vm1373_vm5, %v1375_v58, %v1371_v34 }
0x1138   :  { %v1382_v4 = vmul.f32 %v1380_v53, %v1376_v60 }
0x1174   :  { %v1425_v44 = vpop.permute.xlu2 %1424 }
0x1175   :  { %v1427_v48 = vmul.f32 %v1425_v44, %v7124_v45  ;;  %v1545_v44 = vld [vmem:[%s8645_s25 + $0x40] sm:$0xff] }
0x1176   :  { %1578 = vmatpush.msra.mxu0 %v1545_v44 }
0x1177   :  { %1429 = vrot.lane.b32.xlu1 %v1427_v48, %s6516_s1  ;;  %v7279_v48 = vld [vmem:[%s8646_s6 + $0x10] sm:$0xff] }
0x1178   :  { %1770 = vmatpush.msrb.mxu0 %v7167_v15 }
0x117a   :  { %1771 = vmatpush.msrb.mxu0 %v7177_v40 }
0x117c   :  { %1772 = vmatpush.msrb.mxu0 %v7195_v12 }
0x117e   :  { %1773 = vmatpush.msrb.mxu0 %v7213_v17 }
0x1180   :  { %1774 = vmatpush.msrb.mxu0 %v7250_v41 }
0x118b   :  { %v1385_v59 = vpop.permute.xlu0 %1384 }
0x118c   :  { %v1387_v61 = vmul.f32 %v1385_v59, %v1376_v60  ;;  %v7375_v59 = vld [vmem:[#allocation7] sm:$0x3] }
0x118d   :  { %v1537_v62 = vperm.slane %v7375_v59, 0  ;;  %v1538_v0 = vperm.slane %v7375_v59, 1 }
0x118e   :  { %1389 = vrot.lane.b32.xlu2 %v1387_v61, %s6516_s1 }
0x1196   :  { %1482 = vrot.lane.b32.xlu2 %v7016_v36, %s6516_s1  ;;  %v1477_v36 = vld [vmem:[%s8645_s25 + $0x28] sm:$0xff] }
0x1197   :  { %1526 = vmatpush.msrb.mxu3 %v1477_v36 }
0x1199   :  { %1527 = vmatpush.msrb.mxu3 %v1475_v2 }
0x119b   :  { %1528 = vmatpush.msrb.mxu3 %v1473_v24 }
0x119d   :  { %1660 = vmatpush.msra.mxu3 %v7172_v29 }
0x119e   :  { %1557 = vrot.lane.b32.xlu2 %v7025_v5, %s6516_s1  ;;  %v1474_v5 = vld [vmem:[%s8645_s25 + $0x10] sm:$0xff]  ;;  %s5423_s25 = sshll.u32 %s8647_s28, 4  ;;  %s5424_s25 = int_to_ptr.hbm [resolvable:$true] %s5423_s25 }
0x119f   :  { %1504 = vmatpush.msra.mxu2 %v1474_v5  ;;  %1661 = vmatpush.msra.mxu3 %v7187_v7 }
0x11a1   :  { %1505 = vmatpush.msra.mxu2 %v1472_v23  ;;  %1662 = vmatpush.msra.mxu3 %v7203_v14 }
0x11a3   :  { %1640 = vmatpush.msrb.mxu2 %v7167_v15 }
0x11a5   :  { %1641 = vmatpush.msrb.mxu2 %v7177_v40 }
0x11a7   :  { %1642 = vmatpush.msrb.mxu2 %v7195_v12 }
0x11a9   :  { %1643 = vmatpush.msrb.mxu2 %v7213_v17 }
0x11ab   :  { %1644 = vmatpush.msrb.mxu2 %v7250_v41 }
0x11e8   :  { %v1390_v25 = vpop.permute.xlu2 %1389 }
0x11e9   :  { %v1430_v42 = vpop.permute.xlu1 %1429  ;;  %v1392_v3 = vadd.f32 %v1390_v25, %v1382_v4 }
0x11ea   :  { %v1432_v6 = vadd.f32 %v1430_v42, %v1422_v30 }
0x11eb   :  { %5756 = vtanh.f32 %v1392_v3 }
0x11ec   :  { %5758 = vtanh.f32 %v1432_v6 }
0x11f0   :  { %v1483_v37 = vpop.permute.xlu2 %1482 }
0x11f1   :  { %v5757_v9 = vpop.eup %5756  ;;  %5478 = vmatmul.msk.f32.vlgmr.msra.gmra.mxu2 %vm460_vm9, %v1483_v37  ;;  %5480 = vmatmul.msk.f32.vlgmr.msrb.gmra.mxu3 %vm460_vm9, %v1483_v37 }
0x11f2   :  { %v5759_v35 = vpop.eup %5758  ;;  %1395 = vrot.lane.b32.xlu1 %v5757_v9, %s6515_s27 }
0x11f3   :  { %1435 = vrot.lane.b32.xlu0 %v5759_v35, %s6515_s27 }
0x11f8   :  { %v1558_v27 = vpop.permute.xlu2 %1557 }
0x1264   :  { %v1396_v18 = vpop.permute.xlu1 %1395 }
0x1265   :  { %v1436_v19 = vpop.permute.xlu0 %1435  ;;  %v7218_v20 = vmul.f32 %v1396_v18, %v1376_v60 }
0x1266   :  { %v7221_v22 = vmul.f32 %v1436_v19, %v7124_v45  ;;  %v7267_v45 = vld [vmem:[%s8646_s6 + $0x20] sm:$0xff] }
0x1267   :  { %v1447_v57 = vsel %vm1443_vm7, %v7112_v10, %v7218_v20  ;;  %v7241_v10 = vld [vmem:[%s8646_s6 + $0x48] sm:$0xff]  ;;  %1645 = vmatpush.msrb.mxu2 %v7267_v45  ;;  %1775 = vmatpush.msrb.mxu0 %v7267_v45 }
0x1268   :  { %v1449_v26 = vrot.slane %v7221_v22, 6  ;;  %1484 = vrot.lane.b32.xlu0 %v1447_v57, %s6516_s1  ;;  %1663 = vmatpush.msra.mxu3 %v7241_v10 }
0x1269   :  { %1646 = vmatpush.msrb.mxu2 %v7279_v48  ;;  %1793 = vmatpush.msra.mxu1 %v7241_v10 }
0x126a   :  { %v1465_v33 = vsel %vm1439_vm13, %v1449_v26, %v1451_v31  ;;  %1664 = vmatpush.msra.mxu3 %v7258_v43  ;;  %1776 = vmatpush.msrb.mxu0 %v7279_v48 }
0x126b   :  { %v1466_v38 = vsel %vm1441_vm14, %v1465_v33, %v1453_v8  ;;  %1647 = vmatpush.msrb.mxu2 %v7293_v50  ;;  %1794 = vmatpush.msra.mxu1 %v7258_v43 }
0x126c   :  { %v1467_v46 = vsel %vm1443_vm7, %v1466_v38, %v1455_v32  ;;  %1665 = vmatpush.msra.mxu3 %v7274_v47  ;;  %1777 = vmatpush.msrb.mxu0 %v7293_v50 }
0x126d   :  { %1555 = vrot.lane.b32.xlu1 %v1467_v46, %s6516_s1  ;;  %1911 = vmatpush.msra.mxu2 %v7167_v15 }
0x126e   :  { %1666 = vmatpush.msra.mxu3 %v7284_v49  ;;  %1795 = vmatpush.msra.mxu1 %v7274_v47 }
0x126f   :  { %1912 = vmatpush.msra.mxu2 %v7177_v40 }
0x1270   :  { %1667 = vmatpush.msra.mxu3 %v7302_v51  ;;  %1796 = vmatpush.msra.mxu1 %v7284_v49 }
0x1271   :  { %1913 = vmatpush.msra.mxu2 %v7195_v12 }
0x1272   :  { %1931 = vmatpush.msrb.mxu3 %v7172_v29  ;;  %1797 = vmatpush.msra.mxu1 %v7302_v51 }
0x1273   :  { %1914 = vmatpush.msra.mxu2 %v7213_v17 }
0x1274   :  { %1932 = vmatpush.msrb.mxu3 %v7187_v7  ;;  %v1507_v34 = vpop.f32.mrf.mxu2  ;;  %v7373_v58 = vpop.f32.mrf.mxu3 }
0x1275   :  { %1915 = vmatpush.msra.mxu2 %v7250_v41  ;;  %v1541_v5 = vadd.f32 %v1537_v62, %v1507_v34 }
0x1276   :  { %1933 = vmatpush.msrb.mxu3 %v7203_v14 }
0x1277   :  { %1916 = vmatpush.msra.mxu2 %v7267_v45 }
0x1278   :  { %1934 = vmatpush.msrb.mxu3 %v7241_v10 }
0x1279   :  { %1917 = vmatpush.msra.mxu2 %v7279_v48 }
0x127a   :  { %1935 = vmatpush.msrb.mxu3 %v7258_v43 }
0x127b   :  { %1918 = vmatpush.msra.mxu2 %v7293_v50 }
0x127c   :  { %1936 = vmatpush.msrb.mxu3 %v7274_v47 }
0x127e   :  { %1937 = vmatpush.msrb.mxu3 %v7284_v49 }
0x1280   :  { %1938 = vmatpush.msrb.mxu3 %v7302_v51 }
0x12da   :  { %v1485_v54 = vpop.permute.xlu0 %1484 }
0x12db   :  { %5479 = vmatmul.msk.f32.gmra.mxu2 %vm460_vm9, %v1485_v54  ;;  %5481 = vmatmul.msk.f32.gmra.mxu3 %vm460_vm9, %v1485_v54 }
0x12df   :  { %v1556_v55 = vpop.permute.xlu1 %1555 }
0x12e0   :  { %5482 = vmatmul.msk.f32.vlgmr.msra.gmra.mxu0 %vm460_vm9, %v1556_v55  ;;  %5484 = vmatmul.msk.f32.vlgmr.msrb.gmra.mxu1 %vm460_vm9, %v1556_v55 }
0x12e1   :  { %2052 = vmatpush.msra.mxu0 %v7167_v15  ;;  %2072 = vmatpush.msrb.mxu1 %v7172_v29 }
0x12e3   :  { %1648 = vmatmul.f32.vlgmr.msrb.gmra.mxu2 %v6514_v21  ;;  %1668 = vmatmul.f32.vlgmr.msra.gmra.mxu3 %v6514_v21 }
0x12e4   :  { %2053 = vmatpush.msra.mxu0 %v7177_v40  ;;  %2073 = vmatpush.msrb.mxu1 %v7187_v7 }
0x12e5   :  { %2196 = vmatpush.msrb.mxu2 %v7167_v15  ;;  %2216 = vmatpush.msra.mxu3 %v7172_v29 }
0x12e6   :  { %2054 = vmatpush.msra.mxu0 %v7195_v12  ;;  %2074 = vmatpush.msrb.mxu1 %v7203_v14 }
0x12e7   :  { %2197 = vmatpush.msrb.mxu2 %v7177_v40  ;;  %2217 = vmatpush.msra.mxu3 %v7187_v7 }
0x12e8   :  { %5483 = vmatmul.msk.f32.gmra.mxu0 %vm460_vm9, %v1558_v27  ;;  %5485 = vmatmul.msk.f32.gmra.mxu1 %vm460_vm9, %v1558_v27 }
0x12e9   :  { %2055 = vmatpush.msra.mxu0 %v7213_v17  ;;  %2075 = vmatpush.msrb.mxu1 %v7241_v10 }
0x12ea   :  { %2198 = vmatpush.msrb.mxu2 %v7195_v12  ;;  %2218 = vmatpush.msra.mxu3 %v7203_v14 }
0x12eb   :  { %2056 = vmatpush.msra.mxu0 %v7250_v41  ;;  %2076 = vmatpush.msrb.mxu1 %v7258_v43 }
0x12ec   :  { %2199 = vmatpush.msrb.mxu2 %v7213_v17  ;;  %2219 = vmatpush.msra.mxu3 %v7241_v10 }
0x12ed   :  { %2057 = vmatpush.msra.mxu0 %v7267_v45  ;;  %2077 = vmatpush.msrb.mxu1 %v7274_v47 }
0x12ee   :  { %2200 = vmatpush.msrb.mxu2 %v7250_v41  ;;  %2220 = vmatpush.msra.mxu3 %v7258_v43 }
0x12ef   :  { %2058 = vmatpush.msra.mxu0 %v7279_v48  ;;  %2078 = vmatpush.msrb.mxu1 %v7284_v49 }
0x12f0   :  { %2201 = vmatpush.msrb.mxu2 %v7267_v45  ;;  %2221 = vmatpush.msra.mxu3 %v7274_v47 }
0x12f1   :  { %2059 = vmatpush.msra.mxu0 %v7293_v50  ;;  %2079 = vmatpush.msrb.mxu1 %v7302_v51 }
0x12f2   :  { %2202 = vmatpush.msrb.mxu2 %v7279_v48  ;;  %2222 = vmatpush.msra.mxu3 %v7284_v49 }
0x12f4   :  { %2203 = vmatpush.msrb.mxu2 %v7293_v50  ;;  %2223 = vmatpush.msra.mxu3 %v7302_v51 }
0x135d   :  { %v7377_v60 = vpop.f32.mrf.mxu1  ;;  %v1580_v36 = vpop.f32.mrf.mxu0 }
0x135e   :  { %v7379_v61 = vpop.f32.mrf.mxu2  ;;  %v1533_v63 = vpop.f32.mrf.mxu3  ;;  %v7387_v23 = vadd.f32 %v1580_v36, %v1541_v5 }
0x135f   :  { %v1544_v2 = vadd.f32 %v1538_v0, %v1533_v63 }
0x1365   :  { %v1606_v24 = vpop.f32.mrf.mxu1 }
0x1366   :  { %v7389_v53 = vadd.f32 %v1606_v24, %v1544_v2  ;;  %v1649_v52 = vpop.f32.mrf.mxu2  ;;  %v1669_v30 = vpop.f32.mrf.mxu3 }
0x1367   :  { %v1672_v4 = vadd.f32 %v1649_v52, %v7387_v23 }
0x1368   :  { %v1630_v25 = vrot.slane %v7389_v53, 6 }
0x1369   :  { %5760 = vtanh.f32 %v1672_v4  ;;  %v5486_v37 = vmul.f32 -1.442695, %v1672_v4 }
0x136a   :  { %v1673_v42 = vadd.f32 %v1669_v30, %v1630_v25 }
0x136c   :  { %5762 = vtanh.f32 %v1673_v42  ;;  %v5487_v9 = vmul.f32 -1.442695, %v1673_v42 }
0x136d   :  { %5764 = vpow2.f32 %v5486_v37 }
0x136e   :  { %5766 = vpow2.f32 %v5487_v9 }
0x136f   :  { %v5761_v3 = vpop.eup %5760 }
0x1370   :  { %1696 = vrot.lane.b32.xlu0 %v5761_v3, %s6515_s27 }
0x1372   :  { %v5763_v6 = vpop.eup %5762 }
0x1373   :  { %1733 = vrot.lane.b32.xlu1 %v5763_v6, %s6515_s27  ;;  %v5765_v35 = vpop.eup %5764 }
0x1374   :  { %v5767_v11 = vpop.eup %5766  ;;  %v1677_v28 = vadd.f32 1.0, %v5765_v35 }
0x1375   :  { %v1714_v13 = vadd.f32 1.0, %v5767_v11 }
0x1376   :  { %5768 = vrcp.f32 %v1677_v28  ;;  %v1689_v38 = vand.u32 2147483648, %v1677_v28  ;;  %vm1683_vm8 = vweird.f32 %v1677_v28  ;;  %v1687_v46 = vand.u32 2147483647, %v1677_v28 }
0x1377   :  { %5770 = vrcp.f32 %v1714_v13  ;;  %v1726_v56 = vand.u32 2147483648, %v1714_v13  ;;  %vm1720_vm15 = vweird.f32 %v1714_v13  ;;  %v1724_v54 = vand.u32 2147483647, %v1714_v13 }
0x1378   :  { %v1690_v44 = vor.u32 1.1754944e-38, %v1689_v38  ;;  %vm1688_vm0 = vcmp.eq.f32.partialorder %v1687_v46, 8.507059e+37 }
0x1379   :  { %v1727_v36 = vor.u32 1.1754944e-38, %v1726_v56  ;;  %vm1725_vm2 = vcmp.eq.f32.partialorder %v1724_v54, 8.507059e+37 }
0x137c   :  { %v5769_v16 = vpop.eup %5768 }
0x137d   :  { %v5771_v18 = vpop.eup %5770  ;;  %v1679_v19 = vmul.f32 %v5769_v16, %v1677_v28  ;;  %vm1684_vm6 = vweird.f32 %v5769_v16 }
0x137e   :  { %v1716_v57 = vmul.f32 %v5771_v18, %v1714_v13  ;;  %vm1685_vm11 = vmor %vm1683_vm8, %vm1684_vm6  ;;  %vm1721_vm12 = vweird.f32 %v5771_v18 }
0x137f   :  { %v1680_v31 = vsub.f32 1.0, %v1679_v19  ;;  %vm1722_vm1 = vmor %vm1720_vm15, %vm1721_vm12 }
0x1380   :  { %v1717_v26 = vsub.f32 1.0, %v1716_v57  ;;  %v7428_v57 = vpop.f32.mrf.mxu0 }
0x1381   :  { %v1681_v8 = vmul.f32 %v5769_v16, %v1680_v31 }
0x1382   :  { %v1718_v32 = vmul.f32 %v5771_v18, %v1717_v26 }
0x1383   :  { %v1682_v33 = vadd.f32 %v5769_v16, %v1681_v8  ;;  %v1757_v8 = vrot.slane %v7389_v53, 2 }
0x1384   :  { %v1719_v1 = vadd.f32 %v5771_v18, %v1718_v32 }
0x1385   :  { %v1686_v39 = vsel %vm1685_vm11, %v5769_v16, %v1682_v33 }
0x1386   :  { %v1691_v27 = vsel %vm1688_vm0, %v1690_v44, %v1686_v39  ;;  %v1723_v34 = vsel %vm1722_vm1, %v5771_v18, %v1719_v1 }
0x1387   :  { %v1728_v2 = vsel %vm1725_vm2, %v1727_v36, %v1723_v34  ;;  %v1694_v52 = vmul.f32 0.0, %v1691_v27 }
0x1388   :  { %v1731_v3 = vmul.f32 0.0, %v1728_v2 }
0x13e2   :  { %v1697_v55 = vpop.permute.xlu0 %1696 }
0x13e3   :  { %v1699_v63 = vmul.f32 %v1697_v55, %v1691_v27 }
0x13e5   :  { %v1734_v5 = vpop.permute.xlu1 %1733  ;;  %1701 = vrot.lane.b32.xlu2 %v1699_v63, %s6516_s1 }
0x13e6   :  { %v1736_v24 = vmul.f32 %v1734_v5, %v1728_v2 }
0x13e8   :  { %1738 = vrot.lane.b32.xlu0 %v1736_v24, %s6516_s1 }
0x143f   :  { %v1702_v4 = vpop.permute.xlu2 %1701 }
0x1440   :  { %v7399_v30 = vadd.f32 %v1702_v4, %v1694_v52 }
0x1442   :  { %5772 = vtanh.f32 %v7399_v30 }
0x1448   :  { %v5773_v42 = vpop.eup %5772 }
0x1449   :  { %1707 = vrot.lane.b32.xlu1 %v5773_v42, %s6515_s27 }
0x145a   :  { %v1739_v6 = vpop.permute.xlu0 %1738 }
0x145b   :  { %v7403_v37 = vadd.f32 %v1739_v6, %v1731_v3 }
0x145d   :  { %5774 = vtanh.f32 %v7403_v37 }
0x1463   :  { %v5775_v9 = vpop.eup %5774 }
0x1464   :  { %1744 = vrot.lane.b32.xlu2 %v5775_v9, %s6515_s27 }
0x14bb   :  { %v1708_v35 = vpop.permute.xlu1 %1707 }
0x14bc   :  { %v1710_v11 = vmul.f32 %v1708_v35, %v1691_v27 }
0x14be   :  { %v1745_v28 = vpop.permute.xlu2 %1744  ;;  %1749 = vrot.lane.b32.xlu0 %v1710_v11, %s6516_s1 }
0x14bf   :  { %v1747_v13 = vmul.f32 %v1745_v28, %v1728_v2 }
0x14c1   :  { %1753 = vrot.lane.b32.xlu1 %v1747_v13, %s6515_s27 }
0x1530   :  { %v1750_v16 = vpop.permute.xlu0 %1749 }
0x1533   :  { %v1754_v18 = vpop.permute.xlu1 %1753 }
0x1534   :  { %v1756_v19 = vsel %vm460_vm9, %v1750_v16, %v1754_v18 }
0x1535   :  { %5488 = vmatmul.msk.f32.vlgmr.msrb.gmra.mxu0 %vm332_vm10, %v1756_v19  ;;  %5489 = vmatmul.msk.f32.vlgmr.msra.gmra.mxu1 %vm332_vm10, %v1756_v19 }
0x1536   :  { %2332 = vmatpush.msrb.mxu0 %v7167_v15  ;;  %2352 = vmatpush.msra.mxu1 %v7172_v29 }
0x1538   :  { %2333 = vmatpush.msrb.mxu0 %v7177_v40  ;;  %2353 = vmatpush.msra.mxu1 %v7187_v7 }
0x153a   :  { %2334 = vmatpush.msrb.mxu0 %v7195_v12  ;;  %2354 = vmatpush.msra.mxu1 %v7203_v14 }
0x153c   :  { %2335 = vmatpush.msrb.mxu0 %v7213_v17  ;;  %2355 = vmatpush.msra.mxu1 %v7241_v10 }
0x153e   :  { %2336 = vmatpush.msrb.mxu0 %v7250_v41  ;;  %2356 = vmatpush.msra.mxu1 %v7258_v43 }
0x1540   :  { %2337 = vmatpush.msrb.mxu0 %v7267_v45  ;;  %2357 = vmatpush.msra.mxu1 %v7274_v47 }
0x1542   :  { %2338 = vmatpush.msrb.mxu0 %v7279_v48  ;;  %2358 = vmatpush.msra.mxu1 %v7284_v49 }
0x1544   :  { %2339 = vmatpush.msrb.mxu0 %v7293_v50  ;;  %2359 = vmatpush.msra.mxu1 %v7302_v51 }
0x15b2   :  { %v1779_v31 = vpop.f32.mrf.mxu0  ;;  %v1799_v26 = vpop.f32.mrf.mxu1 }
0x15b3   :  { %v1804_v32 = vrot.slane %v1779_v31, 6  ;;  %v1805_v33 = vrot.slane %v1799_v26, 6 }
0x15b5   :  { %v1808_v38 = vadd.f32 %v1804_v32, %v7387_v23  ;;  %v1809_v46 = vadd.f32 %v1805_v33, %v1757_v8 }
0x15b7   :  { %5776 = vtanh.f32 %v1808_v38  ;;  %v5490_v56 = vmul.f32 -1.442695, %v1808_v38  ;;  %v5491_v27 = vmul.f32 -1.442695, %v1809_v46 }
0x15b8   :  { %5778 = vtanh.f32 %v1809_v46 }
0x15b9   :  { %5780 = vpow2.f32 %v5490_v56 }
0x15bd   :  { %v5777_v1 = vpop.eup %5776 }
0x15be   :  { %v5779_v39 = vpop.eup %5778  ;;  %1835 = vrot.lane.b32.xlu2 %v5777_v1, %s6515_s27  ;;  %v1831_v1 = vrot.slane %v7399_v30, 6 }
0x15bf   :  { %1875 = vrot.lane.b32.xlu0 %v5779_v39, %s6515_s27  ;;  %v5781_v44 = vpop.eup %5780  ;;  %v1871_v39 = vrot.slane %v7403_v37, 6 }
0x15c0   :  { %v1813_v54 = vadd.f32 1.0, %v5781_v44 }
0x15c2   :  { %5782 = vrcp.f32 %v1813_v54  ;;  %v1825_v52 = vand.u32 2147483648, %v1813_v54  ;;  %vm1819_vm4 = vweird.f32 %v1813_v54  ;;  %v1823_v4 = vand.u32 2147483647, %v1813_v54 }
0x15c3   :  { %5784 = vpow2.f32 %v5491_v27 }
0x15c4   :  { %v1826_v3 = vor.u32 1.1754944e-38, %v1825_v52  ;;  %vm1824_vm6 = vcmp.eq.f32.partialorder %v1823_v4, 8.507059e+37 }
0x15c8   :  { %v5783_v55 = vpop.eup %5782 }
0x15c9   :  { %v1815_v34 = vmul.f32 %v5783_v55, %v1813_v54  ;;  %v5785_v5 = vpop.eup %5784  ;;  %vm1820_vm3 = vweird.f32 %v5783_v55 }
0x15ca   :  { %v1853_v2 = vadd.f32 1.0, %v5785_v5  ;;  %vm1821_vm5 = vmor %vm1819_vm4, %vm1820_vm3 }
0x15cb   :  { %v1816_v63 = vsub.f32 1.0, %v1815_v34 }
0x15cc   :  { %5786 = vrcp.f32 %v1853_v2  ;;  %v1865_v19 = vand.u32 2147483648, %v1853_v2  ;;  %vm1859_vm11 = vweird.f32 %v1853_v2  ;;  %v1863_v31 = vand.u32 2147483647, %v1853_v2 }
0x15cd   :  { %v1817_v36 = vmul.f32 %v5783_v55, %v1816_v63 }
0x15ce   :  { %v1866_v32 = vor.u32 1.1754944e-38, %v1865_v19  ;;  %vm1864_vm15 = vcmp.eq.f32.partialorder %v1863_v31, 8.507059e+37 }
0x15cf   :  { %v1818_v24 = vadd.f32 %v5783_v55, %v1817_v36 }
0x15d1   :  { %v1822_v42 = vsel %vm1821_vm5, %v5783_v55, %v1818_v24 }
0x15d2   :  { %v1827_v9 = vsel %vm1824_vm6, %v1826_v3, %v1822_v42  ;;  %v5787_v11 = vpop.eup %5786 }
0x15d3   :  { %v1855_v28 = vmul.f32 %v5787_v11, %v1853_v2  ;;  %vm1860_vm8 = vweird.f32 %v5787_v11  ;;  %v1833_v56 = vmul.f32 %v1831_v1, %v1827_v9 }
0x15d4   :  { %vm1861_vm12 = vmor %vm1859_vm11, %vm1860_vm8 }
0x15d5   :  { %v1856_v13 = vsub.f32 1.0, %v1855_v28 }
0x15d7   :  { %v1857_v16 = vmul.f32 %v5787_v11, %v1856_v13 }
0x15d9   :  { %v1858_v18 = vadd.f32 %v5787_v11, %v1857_v16 }
0x15db   :  { %v1862_v26 = vsel %vm1861_vm12, %v5787_v11, %v1858_v18 }
0x15dc   :  { %v1867_v38 = vsel %vm1864_vm15, %v1866_v32, %v1862_v26 }
0x15dd   :  { %v1873_v44 = vmul.f32 %v1871_v39, %v1867_v38 }
0x1618   :  { %v1836_v6 = vpop.permute.xlu2 %1835 }
0x1619   :  { %v1838_v35 = vmul.f32 %v1836_v6, %v1827_v9 }
0x161b   :  { %1840 = vrot.lane.b32.xlu1 %v1838_v35, %s6516_s1 }
0x1631   :  { %v1876_v33 = vpop.permute.xlu0 %1875 }
0x1632   :  { %v1878_v46 = vmul.f32 %v1876_v33, %v1867_v38 }
0x1634   :  { %1880 = vrot.lane.b32.xlu2 %v1878_v46, %s6516_s1 }
0x168d   :  { %v1841_v54 = vpop.permute.xlu1 %1840 }
0x168e   :  { %v1881_v55 = vpop.permute.xlu2 %1880  ;;  %v7440_v27 = vadd.f32 %v1841_v54, %v1833_v56 }
0x168f   :  { %v7442_v34 = vadd.f32 %v1881_v55, %v1873_v44 }
0x1690   :  { %5788 = vtanh.f32 %v7440_v27 }
0x1691   :  { %5790 = vtanh.f32 %v7442_v34 }
0x1696   :  { %v5789_v63 = vpop.eup %5788 }
0x1697   :  { %v5791_v36 = vpop.eup %5790  ;;  %1846 = vrot.lane.b32.xlu0 %v5789_v63, %s6515_s27 }
0x1698   :  { %1886 = vrot.lane.b32.xlu1 %v5791_v36, %s6515_s27 }
0x1709   :  { %v1847_v30 = vpop.permute.xlu0 %1846 }
0x170a   :  { %v1887_v37 = vpop.permute.xlu1 %1886  ;;  %v1849_v5 = vmul.f32 %v1847_v30, %v1827_v9 }
0x170b   :  { %v1889_v2 = vmul.f32 %v1887_v37, %v1867_v38 }
0x170c   :  { %1891 = vrot.lane.b32.xlu2 %v1849_v5, %s6516_s1 }
0x170d   :  { %1895 = vrot.lane.b32.xlu0 %v1889_v2, %s6515_s27 }
0x1766   :  { %v1892_v24 = vpop.permute.xlu2 %1891 }
0x177f   :  { %v1896_v52 = vpop.permute.xlu0 %1895 }
0x1780   :  { %v1898_v4 = vsel %vm460_vm9, %v1892_v24, %v1896_v52 }
0x1781   :  { %v1900_v42 = vrot.slane %v1898_v4, 2 }
0x1783   :  { %5492 = vmatmul.msk.f32.vlgmr.msra.gmra.mxu2 %vm332_vm10, %v1900_v42  ;;  %5493 = vmatmul.msk.f32.vlgmr.msrb.gmra.mxu3 %vm332_vm10, %v1900_v42 }
0x1784   :  { %2473 = vmatpush.msra.mxu2 %v7167_v15  ;;  %2493 = vmatpush.msrb.mxu3 %v7172_v29 }
0x1786   :  { %2474 = vmatpush.msra.mxu2 %v7177_v40  ;;  %2494 = vmatpush.msrb.mxu3 %v7187_v7 }
0x1788   :  { %2475 = vmatpush.msra.mxu2 %v7195_v12  ;;  %2495 = vmatpush.msrb.mxu3 %v7203_v14 }
0x178a   :  { %2476 = vmatpush.msra.mxu2 %v7213_v17  ;;  %2496 = vmatpush.msrb.mxu3 %v7241_v10 }
0x178c   :  { %2477 = vmatpush.msra.mxu2 %v7250_v41  ;;  %2497 = vmatpush.msrb.mxu3 %v7258_v43 }
0x178e   :  { %2478 = vmatpush.msra.mxu2 %v7267_v45  ;;  %2498 = vmatpush.msrb.mxu3 %v7274_v47 }
0x1790   :  { %2479 = vmatpush.msra.mxu2 %v7279_v48  ;;  %2499 = vmatpush.msrb.mxu3 %v7284_v49 }
0x1792   :  { %2480 = vmatpush.msra.mxu2 %v7293_v50  ;;  %2500 = vmatpush.msrb.mxu3 %v7302_v51 }
0x1806   :  { %v1920_v3 = vpop.f32.mrf.mxu2  ;;  %v1940_v6 = vpop.f32.mrf.mxu3 }
0x1807   :  { %v1945_v9 = vrot.slane %v1920_v3, 4  ;;  %v1946_v35 = vrot.slane %v1940_v6, 4 }
0x1809   :  { %v1949_v11 = vadd.f32 %v1945_v9, %v7387_v23  ;;  %v1950_v28 = vadd.f32 %v1946_v35, %v1630_v25 }
0x180b   :  { %5792 = vtanh.f32 %v1949_v11  ;;  %v5495_v18 = vmul.f32 -1.442695, %v1950_v28  ;;  %v5494_v32 = vmul.f32 -1.442695, %v1949_v11 }
0x180c   :  { %5794 = vtanh.f32 %v1950_v28  ;;  %v2012_v28 = vrot.slane %v7442_v34, 6 }
0x180d   :  { %5796 = vpow2.f32 %v5495_v18 }
0x1811   :  { %v5793_v13 = vpop.eup %5792 }
0x1812   :  { %v5795_v16 = vpop.eup %5794  ;;  %1976 = vrot.lane.b32.xlu1 %v5793_v13, %s6515_s27 }
0x1813   :  { %2016 = vrot.lane.b32.xlu2 %v5795_v16, %s6515_s27  ;;  %v5797_v19 = vpop.eup %5796 }
0x1814   :  { %v1994_v31 = vadd.f32 1.0, %v5797_v19 }
0x1816   :  { %5798 = vrcp.f32 %v1994_v31  ;;  %v2006_v56 = vand.u32 2147483648, %v1994_v31  ;;  %vm2000_vm1 = vweird.f32 %v1994_v31  ;;  %v2004_v44 = vand.u32 2147483647, %v1994_v31 }
0x1817   :  { %5800 = vpow2.f32 %v5494_v32 }
0x1818   :  { %v2007_v55 = vor.u32 1.1754944e-38, %v2006_v56  ;;  %vm2005_vm3 = vcmp.eq.f32.partialorder %v2004_v44, 8.507059e+37 }
0x181c   :  { %v5799_v26 = vpop.eup %5798 }
0x181d   :  { %v1996_v33 = vmul.f32 %v5799_v26, %v1994_v31  ;;  %v5801_v46 = vpop.eup %5800  ;;  %vm2001_vm0 = vweird.f32 %v5799_v26  ;;  %v1972_v31 = vrot.slane %v7440_v27, 6 }
0x181e   :  { %v1954_v1 = vadd.f32 1.0, %v5801_v46  ;;  %vm2002_vm2 = vmor %vm2000_vm1, %vm2001_vm0 }
0x181f   :  { %v1997_v38 = vsub.f32 1.0, %v1996_v33 }
0x1820   :  { %5802 = vrcp.f32 %v1954_v1  ;;  %v1966_v4 = vand.u32 2147483648, %v1954_v1  ;;  %vm1960_vm5 = vweird.f32 %v1954_v1  ;;  %v1964_v42 = vand.u32 2147483647, %v1954_v1 }
0x1821   :  { %v1998_v25 = vmul.f32 %v5799_v26, %v1997_v38 }
0x1822   :  { %v1967_v6 = vor.u32 1.1754944e-38, %v1966_v4  ;;  %vm1965_vm8 = vcmp.eq.f32.partialorder %v1964_v42, 8.507059e+37 }
0x1823   :  { %v1999_v39 = vadd.f32 %v5799_v26, %v1998_v25 }
0x1825   :  { %v2003_v54 = vsel %vm2002_vm2, %v5799_v26, %v1999_v39 }
0x1826   :  { %v2008_v36 = vsel %vm2005_vm3, %v2007_v55, %v2003_v54  ;;  %v5803_v30 = vpop.eup %5802 }
0x1827   :  { %v1956_v5 = vmul.f32 %v5803_v30, %v1954_v1  ;;  %vm1961_vm4 = vweird.f32 %v5803_v30  ;;  %v2014_v13 = vmul.f32 %v2012_v28, %v2008_v36 }
0x1828   :  { %vm1962_vm6 = vmor %vm1960_vm5, %vm1961_vm4 }
0x1829   :  { %v1957_v2 = vsub.f32 1.0, %v1956_v5 }
0x182b   :  { %v1958_v24 = vmul.f32 %v5803_v30, %v1957_v2 }
0x182d   :  { %v1959_v52 = vadd.f32 %v5803_v30, %v1958_v24 }
0x182f   :  { %v1963_v3 = vsel %vm1962_vm6, %v5803_v30, %v1959_v52 }
0x1830   :  { %v1968_v35 = vsel %vm1965_vm8, %v1967_v6, %v1963_v3 }
0x1831   :  { %v1974_v26 = vmul.f32 %v1972_v31, %v1968_v35 }
0x186d   :  { %v2017_v63 = vpop.permute.xlu2 %2016 }
0x186e   :  { %v2019_v37 = vmul.f32 %v2017_v63, %v2008_v36 }
0x1870   :  { %2021 = vrot.lane.b32.xlu1 %v2019_v37, %s6516_s1 }
0x1884   :  { %v1977_v9 = vpop.permute.xlu1 %1976 }
0x1885   :  { %v1979_v11 = vmul.f32 %v1977_v9, %v1968_v35 }
0x1887   :  { %1981 = vrot.lane.b32.xlu0 %v1979_v11, %s6516_s1 }
0x18e2   :  { %v2022_v16 = vpop.permute.xlu1 %2021 }
0x18e3   :  { %v7477_v18 = vadd.f32 %v2022_v16, %v2014_v13 }
0x18e5   :  { %5804 = vtanh.f32 %v7477_v18 }
0x18eb   :  { %v5805_v19 = vpop.eup %5804 }
0x18ec   :  { %2027 = vrot.lane.b32.xlu0 %v5805_v19, %s6515_s27 }
0x18f9   :  { %v1982_v32 = vpop.permute.xlu0 %1981 }
0x18fa   :  { %v7482_v33 = vadd.f32 %v1982_v32, %v1974_v26 }
0x18fc   :  { %5806 = vtanh.f32 %v7482_v33  ;;  %v2113_v16 = vrot.slane %v7482_v33, 6 }
0x1902   :  { %v5807_v38 = vpop.eup %5806 }
0x1903   :  { %1987 = vrot.lane.b32.xlu2 %v5807_v38, %s6515_s27  ;;  %v2153_v38 = vrot.slane %v7477_v18, 6 }
0x195d   :  { %v1988_v34 = vpop.permute.xlu2 %1987 }
0x195e   :  { %v2028_v46 = vpop.permute.xlu0 %2027  ;;  %v1990_v25 = vmul.f32 %v1988_v34, %v1968_v35 }
0x195f   :  { %v2030_v1 = vmul.f32 %v2028_v46, %v2008_v36 }
0x1960   :  { %2032 = vrot.lane.b32.xlu1 %v1990_v25, %s6516_s1 }
0x1961   :  { %2036 = vrot.lane.b32.xlu2 %v2030_v1, %s6515_s27 }
0x19bb   :  { %v2037_v39 = vpop.permute.xlu2 %2036 }
0x19d2   :  { %v2033_v56 = vpop.permute.xlu1 %2032 }
0x19d3   :  { %v2039_v27 = vsel %vm460_vm9, %v2033_v56, %v2037_v39 }
0x19d4   :  { %v2041_v44 = vrot.slane %v2039_v27, 4 }
0x19d6   :  { %5496 = vmatmul.msk.f32.vlgmr.msra.gmra.mxu0 %vm332_vm10, %v2041_v44  ;;  %5497 = vmatmul.msk.f32.vlgmr.msrb.gmra.mxu1 %vm332_vm10, %v2041_v44 }
0x19d7   :  { %2614 = vmatpush.msra.mxu0 %v7167_v15  ;;  %2634 = vmatpush.msrb.mxu1 %v7172_v29 }
0x19d9   :  { %2615 = vmatpush.msra.mxu0 %v7177_v40  ;;  %2635 = vmatpush.msrb.mxu1 %v7187_v7 }
0x19db   :  { %2616 = vmatpush.msra.mxu0 %v7195_v12  ;;  %2636 = vmatpush.msrb.mxu1 %v7203_v14 }
0x19dd   :  { %2617 = vmatpush.msra.mxu0 %v7213_v17  ;;  %2637 = vmatpush.msrb.mxu1 %v7241_v10 }
0x19df   :  { %2618 = vmatpush.msra.mxu0 %v7250_v41  ;;  %2638 = vmatpush.msrb.mxu1 %v7258_v43 }
0x19e1   :  { %2619 = vmatpush.msra.mxu0 %v7267_v45  ;;  %2639 = vmatpush.msrb.mxu1 %v7274_v47 }
0x19e3   :  { %2620 = vmatpush.msra.mxu0 %v7279_v48  ;;  %2640 = vmatpush.msrb.mxu1 %v7284_v49 }
0x19e5   :  { %2621 = vmatpush.msra.mxu0 %v7293_v50  ;;  %2641 = vmatpush.msrb.mxu1 %v7302_v51 }
0x1a53   :  { %v2061_v15 = vpop.f32.mrf.mxu0  ;;  %v2081_v29 = vpop.f32.mrf.mxu1 }
0x1a54   :  { %v2086_v40 = vrot.slane %v2061_v15, 2  ;;  %v2087_v7 = vrot.slane %v2081_v29, 2 }
0x1a56   :  { %v2090_v12 = vadd.f32 %v2086_v40, %v7387_v23  ;;  %v2091_v14 = vadd.f32 %v2087_v7, %v1757_v8  ;;  %v1542_v40 = vadd.f32 %v1538_v0, %v7373_v58 }
0x1a58   :  { %5808 = vtanh.f32 %v2090_v12  ;;  %v5498_v41 = vmul.f32 -1.442695, %v2090_v12  ;;  %v5499_v43 = vmul.f32 -1.442695, %v2091_v14  ;;  %v7533_v7 = vadd.f32 %v7377_v60, %v1542_v40 }
0x1a59   :  { %5810 = vtanh.f32 %v2091_v14  ;;  %v1543_v12 = vadd.f32 %v1537_v62, %v7379_v61 }
0x1a5a   :  { %5812 = vpow2.f32 %v5498_v41 }
0x1a5b   :  { %5814 = vpow2.f32 %v5499_v43  ;;  %v7539_v14 = vadd.f32 %v7428_v57, %v1543_v12 }
0x1a5e   :  { %v5809_v17 = vpop.eup %5808 }
0x1a5f   :  { %v5811_v10 = vpop.eup %5810  ;;  %2117 = vrot.lane.b32.xlu0 %v5809_v17, %s6515_s27  ;;  %v2182_v17 = vrot.slane %v7533_v7, 6 }
0x1a60   :  { %2157 = vrot.lane.b32.xlu1 %v5811_v10, %s6515_s27  ;;  %v5813_v45 = vpop.eup %5812 }
0x1a61   :  { %v5815_v47 = vpop.eup %5814  ;;  %v2095_v48 = vadd.f32 1.0, %v5813_v45 }
0x1a62   :  { %v2135_v49 = vadd.f32 1.0, %v5815_v47 }
0x1a63   :  { %5816 = vrcp.f32 %v2095_v48  ;;  %v2107_v37 = vand.u32 2147483648, %v2095_v48  ;;  %vm2101_vm15 = vweird.f32 %v2095_v48  ;;  %v2105_v2 = vand.u32 2147483647, %v2095_v48 }
0x1a64   :  { %5818 = vrcp.f32 %v2135_v49  ;;  %v2147_v5 = vand.u32 2147483648, %v2135_v49  ;;  %vm2141_vm0 = vweird.f32 %v2135_v49  ;;  %v2145_v24 = vand.u32 2147483647, %v2135_v49 }
0x1a65   :  { %v2108_v42 = vor.u32 1.1754944e-38, %v2107_v37  ;;  %vm2106_vm3 = vcmp.eq.f32.partialorder %v2105_v2, 8.507059e+37 }
0x1a66   :  { %v2148_v3 = vor.u32 1.1754944e-38, %v2147_v5  ;;  %vm2146_vm4 = vcmp.eq.f32.partialorder %v2145_v24, 8.507059e+37 }
0x1a69   :  { %v5817_v50 = vpop.eup %5816 }
0x1a6a   :  { %v5819_v51 = vpop.eup %5818  ;;  %v2097_v23 = vmul.f32 %v5817_v50, %v2095_v48  ;;  %vm2102_vm11 = vweird.f32 %v5817_v50 }
0x1a6b   :  { %v2137_v53 = vmul.f32 %v5819_v51, %v2135_v49  ;;  %vm2142_vm12 = vweird.f32 %v5819_v51  ;;  %vm2103_vm1 = vmor %vm2101_vm15, %vm2102_vm11 }
0x1a6c   :  { %v2098_v8 = vsub.f32 1.0, %v2097_v23  ;;  %vm2143_vm2 = vmor %vm2141_vm0, %vm2142_vm12 }
0x1a6d   :  { %v2138_v54 = vsub.f32 1.0, %v2137_v53 }
0x1a6e   :  { %v2099_v55 = vmul.f32 %v5817_v50, %v2098_v8 }
0x1a6f   :  { %v2139_v63 = vmul.f32 %v5819_v51, %v2138_v54 }
0x1a70   :  { %v2100_v36 = vadd.f32 %v5817_v50, %v2099_v55 }
0x1a71   :  { %v2140_v30 = vadd.f32 %v5819_v51, %v2139_v63 }
0x1a72   :  { %v2104_v52 = vsel %vm2103_vm1, %v5817_v50, %v2100_v36 }
0x1a73   :  { %v2144_v4 = vsel %vm2143_vm2, %v5819_v51, %v2140_v30  ;;  %v2109_v9 = vsel %vm2106_vm3, %v2108_v42, %v2104_v52 }
0x1a74   :  { %v2149_v11 = vsel %vm2146_vm4, %v2148_v3, %v2144_v4  ;;  %v2115_v19 = vmul.f32 %v2113_v16, %v2109_v9 }
0x1a75   :  { %v2155_v34 = vmul.f32 %v2153_v38, %v2149_v11 }
0x1ad1   :  { %v2118_v6 = vpop.permute.xlu0 %2117 }
0x1ad2   :  { %v2158_v35 = vpop.permute.xlu1 %2157  ;;  %v2120_v28 = vmul.f32 %v2118_v6, %v2109_v9 }
0x1ad3   :  { %v2160_v13 = vmul.f32 %v2158_v35, %v2149_v11 }
0x1ad4   :  { %2122 = vrot.lane.b32.xlu2 %v2120_v28, %s6516_s1 }
0x1ad5   :  { %2162 = vrot.lane.b32.xlu0 %v2160_v13, %s6516_s1 }
0x1b2e   :  { %v2123_v31 = vpop.permute.xlu2 %2122 }
0x1b2f   :  { %v7515_v26 = vadd.f32 %v2123_v31, %v2115_v19 }
0x1b31   :  { %5820 = vtanh.f32 %v7515_v26  ;;  %v2251_v28 = vrot.slane %v7515_v26, 6 }
0x1b37   :  { %v5821_v32 = vpop.eup %5820 }
0x1b38   :  { %2128 = vrot.lane.b32.xlu1 %v5821_v32, %s6515_s27 }
0x1b47   :  { %v2163_v46 = vpop.permute.xlu0 %2162 }
0x1b48   :  { %v7520_v25 = vadd.f32 %v2163_v46, %v2155_v34 }
0x1b4a   :  { %5822 = vtanh.f32 %v7520_v25  ;;  %v2291_v13 = vrot.slane %v7520_v25, 6 }
0x1b50   :  { %v5823_v1 = vpop.eup %5822 }
0x1b51   :  { %2168 = vrot.lane.b32.xlu2 %v5823_v1, %s6515_s27 }
0x1baa   :  { %v2129_v33 = vpop.permute.xlu1 %2128 }
0x1bab   :  { %v2169_v39 = vpop.permute.xlu2 %2168  ;;  %v2131_v56 = vmul.f32 %v2129_v33, %v2109_v9 }
0x1bac   :  { %v2171_v27 = vmul.f32 %v2169_v39, %v2149_v11 }
0x1bad   :  { %2173 = vrot.lane.b32.xlu0 %v2131_v56, %s6516_s1 }
0x1bae   :  { %2177 = vrot.lane.b32.xlu1 %v2171_v27, %s6515_s27 }
0x1c1f   :  { %v2174_v44 = vpop.permute.xlu0 %2173 }
0x1c20   :  { %v2178_v15 = vpop.permute.xlu1 %2177 }
0x1c21   :  { %v2180_v18 = vsel %vm460_vm9, %v2174_v44, %v2178_v15 }
0x1c22   :  { %v2185_v29 = vrot.slane %v2180_v18, 6 }
0x1c24   :  { %5500 = vmatmul.msk.f32.vlgmr.msrb.gmra.mxu2 %vm332_vm10, %v2185_v29  ;;  %5501 = vmatmul.msk.f32.vlgmr.msra.gmra.mxu3 %vm332_vm10, %v2185_v29  ;;  %v2319_v29 = vrot.slane %v7533_v7, 2 }
0x1ca7   :  { %v2205_v10 = vpop.f32.mrf.mxu2  ;;  %v2225_v41 = vpop.f32.mrf.mxu3 }
0x1ca8   :  { %v2228_v43 = vadd.f32 %v2205_v10, %v7539_v14  ;;  %v2229_v45 = vadd.f32 %v2225_v41, %v2182_v17 }
0x1caa   :  { %5824 = vtanh.f32 %v2228_v43  ;;  %v5502_v59 = vmul.f32 -1.442695, %v2228_v43  ;;  %v5503_v57 = vmul.f32 -1.442695, %v2229_v45 }
0x1cab   :  { %5826 = vtanh.f32 %v2229_v45 }
0x1cac   :  { %5828 = vpow2.f32 %v5502_v59 }
0x1cb0   :  { %v5825_v58 = vpop.eup %5824 }
0x1cb1   :  { %v5827_v60 = vpop.eup %5826  ;;  %2255 = vrot.lane.b32.xlu2 %v5825_v58, %s6515_s27 }
0x1cb2   :  { %2295 = vrot.lane.b32.xlu0 %v5827_v60, %s6515_s27  ;;  %v5829_v61 = vpop.eup %5828 }
0x1cb3   :  { %v2233_v62 = vadd.f32 1.0, %v5829_v61 }
0x1cb5   :  { %5830 = vrcp.f32 %v2233_v62  ;;  %v2245_v53 = vand.u32 2147483648, %v2233_v62  ;;  %vm2239_vm6 = vweird.f32 %v2233_v62  ;;  %v2243_v8 = vand.u32 2147483647, %v2233_v62 }
0x1cb6   :  { %5832 = vpow2.f32 %v5503_v57 }
0x1cb7   :  { %v2246_v55 = vor.u32 1.1754944e-38, %v2245_v53  ;;  %vm2244_vm11 = vcmp.eq.f32.partialorder %v2243_v8, 8.507059e+37 }
0x1cbb   :  { %v5831_v0 = vpop.eup %5830 }
0x1cbc   :  { %v2235_v47 = vmul.f32 %v5831_v0, %v2233_v62  ;;  %v5833_v50 = vpop.eup %5832  ;;  %vm2240_vm5 = vweird.f32 %v5831_v0 }
0x1cbd   :  { %v2273_v51 = vadd.f32 1.0, %v5833_v50  ;;  %vm2241_vm8 = vmor %vm2239_vm6, %vm2240_vm5 }
0x1cbe   :  { %v2236_v48 = vsub.f32 1.0, %v2235_v47 }
0x1cbf   :  { %5834 = vrcp.f32 %v2273_v51  ;;  %v2285_v4 = vand.u32 2147483648, %v2273_v51  ;;  %vm2279_vm15 = vweird.f32 %v2273_v51  ;;  %v2283_v42 = vand.u32 2147483647, %v2273_v51 }
0x1cc0   :  { %v2237_v49 = vmul.f32 %v5831_v0, %v2236_v48 }
0x1cc1   :  { %v2286_v6 = vor.u32 1.1754944e-38, %v2285_v4  ;;  %vm2284_vm1 = vcmp.eq.f32.partialorder %v2283_v42, 8.507059e+37 }
0x1cc2   :  { %v2238_v23 = vadd.f32 %v5831_v0, %v2237_v49 }
0x1cc4   :  { %v2242_v54 = vsel %vm2241_vm8, %v5831_v0, %v2238_v23 }
0x1cc5   :  { %v2247_v36 = vsel %vm2244_vm11, %v2246_v55, %v2242_v54  ;;  %v5835_v37 = vpop.eup %5834 }
0x1cc6   :  { %v2275_v5 = vmul.f32 %v5835_v37, %v2273_v51  ;;  %vm2280_vm12 = vweird.f32 %v5835_v37  ;;  %v2253_v16 = vmul.f32 %v2251_v28, %v2247_v36 }
0x1cc7   :  { %vm2281_vm0 = vmor %vm2279_vm15, %vm2280_vm12 }
0x1cc8   :  { %v2276_v2 = vsub.f32 1.0, %v2275_v5 }
0x1cca   :  { %v2277_v24 = vmul.f32 %v5835_v37, %v2276_v2 }
0x1ccc   :  { %v2278_v52 = vadd.f32 %v5835_v37, %v2277_v24 }
0x1cce   :  { %v2282_v3 = vsel %vm2281_vm0, %v5835_v37, %v2278_v52 }
0x1ccf   :  { %v2287_v35 = vsel %vm2284_vm1, %v2286_v6, %v2282_v3 }
0x1cd0   :  { %v2293_v19 = vmul.f32 %v2291_v13, %v2287_v35 }
0x1d0b   :  { %v2256_v63 = vpop.permute.xlu2 %2255 }
0x1d0c   :  { %v2258_v30 = vmul.f32 %v2256_v63, %v2247_v36 }
0x1d0e   :  { %2260 = vrot.lane.b32.xlu1 %v2258_v30, %s6516_s1 }
0x1d24   :  { %v2296_v9 = vpop.permute.xlu0 %2295 }
0x1d25   :  { %v2298_v11 = vmul.f32 %v2296_v9, %v2287_v35 }
0x1d27   :  { %2300 = vrot.lane.b32.xlu2 %v2298_v11, %s6516_s1 }
0x1d80   :  { %v2261_v31 = vpop.permute.xlu1 %2260 }
0x1d81   :  { %v2301_v32 = vpop.permute.xlu2 %2300  ;;  %v7551_v38 = vadd.f32 %v2261_v31, %v2253_v16 }
0x1d82   :  { %v7553_v34 = vadd.f32 %v2301_v32, %v2293_v19 }
0x1d83   :  { %5836 = vtanh.f32 %v7551_v38  ;;  %v2393_v19 = vrot.slane %v7551_v38, 6 }
0x1d84   :  { %5838 = vtanh.f32 %v7553_v34 }
0x1d89   :  { %v5837_v46 = vpop.eup %5836 }
0x1d8a   :  { %v5839_v1 = vpop.eup %5838  ;;  %2266 = vrot.lane.b32.xlu0 %v5837_v46, %s6515_s27 }
0x1d8b   :  { %2306 = vrot.lane.b32.xlu1 %v5839_v1, %s6515_s27 }
0x1dfc   :  { %v2267_v26 = vpop.permute.xlu0 %2266 }
0x1dfd   :  { %v2307_v25 = vpop.permute.xlu1 %2306  ;;  %v2269_v33 = vmul.f32 %v2267_v26, %v2247_v36 }
0x1dfe   :  { %v2309_v39 = vmul.f32 %v2307_v25, %v2287_v35  ;;  %v2433_v35 = vrot.slane %v7553_v34, 6 }
0x1dff   :  { %2311 = vrot.lane.b32.xlu2 %v2269_v33, %s6516_s1 }
0x1e00   :  { %2315 = vrot.lane.b32.xlu0 %v2309_v39, %s6515_s27 }
0x1e59   :  { %v2312_v56 = vpop.permute.xlu2 %2311 }
0x1e72   :  { %v2316_v27 = vpop.permute.xlu0 %2315 }
0x1e73   :  { %v2318_v44 = vsel %vm460_vm9, %v2312_v56, %v2316_v27 }
0x1e74   :  { %5504 = vmatmul.msk.f32.vlgmr.msrb.gmra.mxu0 %vm332_vm10, %v2318_v44  ;;  %5505 = vmatmul.msk.f32.vlgmr.msra.gmra.mxu1 %vm332_vm10, %v2318_v44 }
0x1ef1   :  { %v2341_v15 = vpop.f32.mrf.mxu0  ;;  %v2361_v18 = vpop.f32.mrf.mxu1 }
0x1ef2   :  { %v2366_v40 = vrot.slane %v2341_v15, 6  ;;  %v2367_v12 = vrot.slane %v2361_v18, 6 }
0x1ef4   :  { %v2370_v10 = vadd.f32 %v2366_v40, %v7539_v14  ;;  %v2371_v41 = vadd.f32 %v2367_v12, %v2319_v29 }
0x1ef6   :  { %5840 = vtanh.f32 %v2370_v10  ;;  %v5507_v58 = vmul.f32 -1.442695, %v2371_v41  ;;  %v5506_v62 = vmul.f32 -1.442695, %v2370_v10 }
0x1ef7   :  { %5842 = vtanh.f32 %v2371_v41 }
0x1ef8   :  { %5844 = vpow2.f32 %v5507_v58 }
0x1efc   :  { %v5841_v43 = vpop.eup %5840 }
0x1efd   :  { %v5843_v45 = vpop.eup %5842  ;;  %2397 = vrot.lane.b32.xlu1 %v5841_v43, %s6515_s27 }
0x1efe   :  { %2437 = vrot.lane.b32.xlu2 %v5843_v45, %s6515_s27  ;;  %v5845_v60 = vpop.eup %5844 }
0x1eff   :  { %v2415_v59 = vadd.f32 1.0, %v5845_v60 }
0x1f01   :  { %5846 = vrcp.f32 %v2415_v59  ;;  %v2427_v51 = vand.u32 2147483648, %v2415_v59  ;;  %vm2421_vm3 = vweird.f32 %v2415_v59  ;;  %v2425_v23 = vand.u32 2147483647, %v2415_v59 }
0x1f02   :  { %5848 = vpow2.f32 %v5506_v62 }
0x1f03   :  { %v2428_v8 = vor.u32 1.1754944e-38, %v2427_v51  ;;  %vm2426_vm5 = vcmp.eq.f32.partialorder %v2425_v23, 8.507059e+37 }
0x1f07   :  { %v5847_v61 = vpop.eup %5846 }
0x1f08   :  { %v2417_v0 = vmul.f32 %v5847_v61, %v2415_v59  ;;  %v5849_v47 = vpop.eup %5848  ;;  %vm2422_vm2 = vweird.f32 %v5847_v61 }
0x1f09   :  { %v2375_v49 = vadd.f32 1.0, %v5849_v47  ;;  %vm2423_vm4 = vmor %vm2421_vm3, %vm2422_vm2 }
0x1f0a   :  { %v2418_v57 = vsub.f32 1.0, %v2417_v0 }
0x1f0b   :  { %5850 = vrcp.f32 %v2375_v49  ;;  %v2387_v24 = vand.u32 2147483648, %v2375_v49  ;;  %vm2381_vm8 = vweird.f32 %v2375_v49  ;;  %v2385_v52 = vand.u32 2147483647, %v2375_v49 }
0x1f0c   :  { %v2419_v48 = vmul.f32 %v5847_v61, %v2418_v57 }
0x1f0d   :  { %v2388_v42 = vor.u32 1.1754944e-38, %v2387_v24  ;;  %vm2386_vm12 = vcmp.eq.f32.partialorder %v2385_v52, 8.507059e+37 }
0x1f0e   :  { %v2420_v50 = vadd.f32 %v5847_v61, %v2419_v48 }
0x1f10   :  { %v2424_v53 = vsel %vm2423_vm4, %v5847_v61, %v2420_v50 }
0x1f11   :  { %v2429_v55 = vsel %vm2426_vm5, %v2428_v8, %v2424_v53  ;;  %v5851_v63 = vpop.eup %5850 }
0x1f12   :  { %v2377_v30 = vmul.f32 %v5851_v63, %v2375_v49  ;;  %vm2382_vm6 = vweird.f32 %v5851_v63  ;;  %v2435_v11 = vmul.f32 %v2433_v35, %v2429_v55 }
0x1f13   :  { %vm2383_vm11 = vmor %vm2381_vm8, %vm2382_vm6  ;;  %vm2756_vm8 = vcmask 97280  }
0x1f14   :  { %v2378_v37 = vsub.f32 1.0, %v2377_v30 }
0x1f16   :  { %v2379_v5 = vmul.f32 %v5851_v63, %v2378_v37 }
0x1f18   :  { %v2380_v2 = vadd.f32 %v5851_v63, %v2379_v5 }
0x1f1a   :  { %v2384_v4 = vsel %vm2383_vm11, %v5851_v63, %v2380_v2 }
0x1f1b   :  { %v2389_v6 = vsel %vm2386_vm12, %v2388_v42, %v2384_v4 }
0x1f1c   :  { %v2395_v31 = vmul.f32 %v2393_v19, %v2389_v6 }
0x1f58   :  { %v2438_v54 = vpop.permute.xlu2 %2437 }
0x1f59   :  { %v2440_v36 = vmul.f32 %v2438_v54, %v2429_v55 }
0x1f5b   :  { %2442 = vrot.lane.b32.xlu1 %v2440_v36, %s6516_s1 }
0x1f6f   :  { %v2398_v3 = vpop.permute.xlu1 %2397 }
0x1f70   :  { %v2400_v9 = vmul.f32 %v2398_v3, %v2389_v6 }
0x1f72   :  { %2402 = vrot.lane.b32.xlu0 %v2400_v9, %s6516_s1 }
0x1fcd   :  { %v2443_v28 = vpop.permute.xlu1 %2442 }
0x1fce   :  { %v7573_v13 = vadd.f32 %v2443_v28, %v2435_v11 }
0x1fd0   :  { %5852 = vtanh.f32 %v7573_v13 }
0x1fd6   :  { %v5853_v16 = vpop.eup %5852 }
0x1fd7   :  { %2448 = vrot.lane.b32.xlu0 %v5853_v16, %s6515_s27  ;;  %v2574_v16 = vrot.slane %v7573_v13, 6  ;;  %v7609_v13 = vld [vmem:[#allocation11 + $0x60] sm:$0xff] }
0x1fe4   :  { %v2403_v32 = vpop.permute.xlu0 %2402 }
0x1fe5   :  { %v7578_v46 = vadd.f32 %v2403_v32, %v2395_v31 }
0x1fe7   :  { %5854 = vtanh.f32 %v7578_v46 }
0x1fed   :  { %v5855_v1 = vpop.eup %5854 }
0x1fee   :  { %2408 = vrot.lane.b32.xlu2 %v5855_v1, %s6515_s27 }
0x2048   :  { %v2409_v34 = vpop.permute.xlu2 %2408 }
0x2049   :  { %v2449_v26 = vpop.permute.xlu0 %2448  ;;  %v2411_v25 = vmul.f32 %v2409_v34, %v2389_v6  ;;  %v2534_v6 = vrot.slane %v7578_v46, 6  ;;  %v2755_v46 = vld [vmem:[#allocation10 + $0x18] sm:$0xf]  ;;  %v2753_v34 = vld [vmem:[#allocation10 + $0x8] sm:$0xff] }
0x204a   :  { %v2451_v33 = vmul.f32 %v2449_v26, %v2429_v55  ;;  %v2749_v26 = vld [vmem:[#allocation8] sm:$0xff]  ;;  %5519 = vmatpush.msk.msra.mxu3 %vm1441_vm14, %v2755_v46 }
0x204b   :  { %2453 = vrot.lane.b32.xlu1 %v2411_v25, %s6516_s1  ;;  %v7605_v25 = vld [vmem:[#allocation11 + $0x70] sm:$0xff] }
0x204c   :  { %2457 = vrot.lane.b32.xlu2 %v2451_v33, %s6515_s27  ;;  %v7607_v33 = vld [vmem:[#allocation11 + $0x78] sm:$0xff]  ;;  %2851 = vmatpush.msrb.mxu0 %v7605_v25 }
0x204d   :  { %2871 = vmatpush.msra.mxu1 %v7607_v33  ;;  %2807 = vmatpush.msra.mxu3 %v2753_v34 }
0x204e   :  { %2852 = vmatpush.msrb.mxu0 %v7609_v13 }
0x20a6   :  { %v2458_v39 = vpop.permute.xlu2 %2457 }
0x20bd   :  { %v2454_v56 = vpop.permute.xlu1 %2453 }
0x20be   :  { %v2460_v38 = vsel %vm460_vm9, %v2454_v56, %v2458_v39  ;;  %v7613_v39 = vld [vmem:[#allocation11 + $0x68] sm:$0xff] }
0x20bf   :  { %v2462_v27 = vrot.slane %v2460_v38, 2  ;;  %2872 = vmatpush.msra.mxu1 %v7613_v39 }
0x20c1   :  { %5508 = vmatmul.msk.f32.vlgmr.msra.gmra.mxu2 %vm332_vm10, %v2462_v27  ;;  %5509 = vmatmul.msk.f32.vlgmr.msrb.gmra.mxu3 %vm332_vm10, %v2462_v27 }
0x20c2   :  { %3001 = vmatpush.msrb.mxu3 %v7607_v33 }
0x20c4   :  { %3002 = vmatpush.msrb.mxu3 %v7613_v39 }
0x20c9   :  { %5520 = vmatmul.msk.f32.vlgmr.msra.gmra.mxu3 %vm2756_vm8, %v2749_v26 }
0x2144   :  { %v2482_v44 = vpop.f32.mrf.mxu2  ;;  %v2502_v15 = vpop.f32.mrf.mxu3 }
0x2145   :  { %v2507_v18 = vrot.slane %v2482_v44, 4  ;;  %v2508_v40 = vrot.slane %v2502_v15, 4  ;;  %v2754_v15 = vld [vmem:[#allocation10 + $0x10] sm:$0xf] }
0x2146   :  { %5516 = vmatpush.msk.msrb.mxu2 %vm1441_vm14, %v2754_v15 }
0x2147   :  { %v2511_v12 = vadd.f32 %v2507_v18, %v7539_v14  ;;  %v2512_v10 = vadd.f32 %v2508_v40, %v2182_v17  ;;  %v7622_v18 = vld [vmem:[#allocation11 + $0x50] sm:$0xff]  ;;  %v7624_v40 = vld [vmem:[#allocation11 + $0x58] sm:$0xff] }
0x2148   :  { %2853 = vmatpush.msrb.mxu0 %v7622_v18  ;;  %2873 = vmatpush.msra.mxu1 %v7624_v40 }
0x2149   :  { %5856 = vtanh.f32 %v2511_v12  ;;  %v5510_v45 = vmul.f32 -1.442695, %v2511_v12  ;;  %v5511_v58 = vmul.f32 -1.442695, %v2512_v10  ;;  %v2750_v12 = vld [vmem:[#allocation8 + $0x8] sm:$0xff]  ;;  %3003 = vmatpush.msrb.mxu3 %v7624_v40 }
0x214a   :  { %5858 = vtanh.f32 %v2512_v10  ;;  %5521 = vmatmul.msk.f32.gmra.mxu3 %vm2756_vm8, %v2750_v12  ;;  %v2752_v10 = vld [vmem:[#allocation10] sm:$0xff] }
0x214b   :  { %5860 = vpow2.f32 %v5510_v45  ;;  %2784 = vmatpush.msrb.mxu2 %v2752_v10  ;;  %v7637_v45 = vld [vmem:[#allocation11 + $0x30] sm:$0xff] }
0x214c   :  { %5862 = vpow2.f32 %v5511_v58  ;;  %5517 = vmatmul.msk.f32.vlgmr.msrb.gmra.mxu2 %vm2756_vm8, %v2749_v26  ;;  %v7639_v58 = vld [vmem:[#allocation11 + $0x38] sm:$0xff] }
0x214d   :  { %2981 = vmatpush.msra.mxu2 %v7605_v25 }
0x214f   :  { %v5857_v41 = vpop.eup %5856  ;;  %2982 = vmatpush.msra.mxu2 %v7609_v13 }
0x2150   :  { %v5859_v43 = vpop.eup %5858  ;;  %2538 = vrot.lane.b32.xlu0 %v5857_v41, %s6515_s27  ;;  %v7630_v41 = vld [vmem:[#allocation11 + $0x40] sm:$0xff] }
0x2151   :  { %2578 = vrot.lane.b32.xlu1 %v5859_v43, %s6515_s27  ;;  %v5861_v60 = vpop.eup %5860  ;;  %v7632_v43 = vld [vmem:[#allocation11 + $0x48] sm:$0xff]  ;;  %2854 = vmatpush.msrb.mxu0 %v7630_v41 }
0x2152   :  { %v5863_v59 = vpop.eup %5862  ;;  %v2516_v61 = vadd.f32 1.0, %v5861_v60  ;;  %2874 = vmatpush.msra.mxu1 %v7632_v43  ;;  %v7641_v60 = vld [vmem:[#allocation11 + $0x20] sm:$0xff]  ;;  %3004 = vmatpush.msrb.mxu3 %v7632_v43 }
0x2153   :  { %v2556_v62 = vadd.f32 1.0, %v5863_v59  ;;  %2855 = vmatpush.msrb.mxu0 %v7637_v45  ;;  %v7644_v59 = vld [vmem:[#allocation11 + $0x28] sm:$0xff]  ;;  %2983 = vmatpush.msra.mxu2 %v7622_v18 }
0x2154   :  { %5864 = vrcp.f32 %v2516_v61  ;;  %v2528_v8 = vand.u32 2147483648, %v2516_v61  ;;  %vm2522_vm1 = vweird.f32 %v2516_v61  ;;  %v2526_v55 = vand.u32 2147483647, %v2516_v61  ;;  %2875 = vmatpush.msra.mxu1 %v7639_v58  ;;  %3005 = vmatpush.msrb.mxu3 %v7639_v58 }
0x2155   :  { %5866 = vrcp.f32 %v2556_v62  ;;  %v2568_v54 = vand.u32 2147483648, %v2556_v62  ;;  %vm2562_vm2 = vweird.f32 %v2556_v62  ;;  %v2566_v63 = vand.u32 2147483647, %v2556_v62  ;;  %2856 = vmatpush.msrb.mxu0 %v7641_v60  ;;  %2984 = vmatpush.msra.mxu2 %v7630_v41 }
0x2156   :  { %v2529_v37 = vor.u32 1.1754944e-38, %v2528_v8  ;;  %vm2527_vm5 = vcmp.eq.f32.partialorder %v2526_v55, 8.507059e+37  ;;  %2876 = vmatpush.msra.mxu1 %v7644_v59  ;;  %5518 = vmatmul.msk.f32.gmra.mxu2 %vm2756_vm8, %v2750_v12 }
0x2157   :  { %v2569_v5 = vor.u32 1.1754944e-38, %v2568_v54  ;;  %vm2567_vm6 = vcmp.eq.f32.partialorder %v2566_v63, 8.507059e+37  ;;  %2985 = vmatpush.msra.mxu2 %v7637_v45  ;;  %3006 = vmatpush.msrb.mxu3 %v7644_v59 }
0x2159   :  { %2986 = vmatpush.msra.mxu2 %v7641_v60 }
0x215a   :  { %v5865_v0 = vpop.eup %5864 }
0x215b   :  { %v5867_v17 = vpop.eup %5866  ;;  %v2518_v57 = vmul.f32 %v5865_v0, %v2516_v61  ;;  %vm2523_vm15 = vweird.f32 %v5865_v0  ;;  %v7648_v61 = vld [vmem:[#allocation11 + $0x10] sm:$0xff] }
0x215c   :  { %v2558_v47 = vmul.f32 %v5867_v17, %v2556_v62  ;;  %vm2563_vm0 = vweird.f32 %v5867_v17  ;;  %vm2524_vm3 = vmor %vm2522_vm1, %vm2523_vm15  ;;  %v7652_v62 = vld [vmem:[#allocation11 + $0x18] sm:$0xff]  ;;  %2857 = vmatpush.msrb.mxu0 %v7648_v61  ;;  %2987 = vmatpush.msra.mxu2 %v7648_v61 }
0x215d   :  { %v2519_v48 = vsub.f32 1.0, %v2518_v57  ;;  %vm2564_vm4 = vmor %vm2562_vm2, %vm2563_vm0  ;;  %2877 = vmatpush.msra.mxu1 %v7652_v62  ;;  %3007 = vmatpush.msrb.mxu3 %v7652_v62 }
0x215e   :  { %v2559_v49 = vsub.f32 1.0, %v2558_v47 }
0x215f   :  { %v2520_v50 = vmul.f32 %v5865_v0, %v2519_v48 }
0x2160   :  { %v2560_v51 = vmul.f32 %v5867_v17, %v2559_v49 }
0x2161   :  { %v2521_v23 = vadd.f32 %v5865_v0, %v2520_v50  ;;  %v7729_v50 = vpop.f32.mrf.mxu3 }
0x2162   :  { %v2561_v53 = vadd.f32 %v5867_v17, %v2560_v51  ;;  %v7731_v51 = vld [vmem:[#allocation13] sm:$0x3] }
0x2163   :  { %v2525_v36 = vsel %vm2524_vm3, %v5865_v0, %v2521_v23  ;;  %v7656_v0 = vld [vmem:[#allocation11] sm:$0xff]  ;;  %v2816_v63 = vperm.slane %v7731_v51, 0 }
0x2164   :  { %v2565_v30 = vsel %vm2564_vm4, %v5867_v17, %v2561_v53  ;;  %v2530_v24 = vsel %vm2527_vm5, %v2529_v37, %v2525_v36  ;;  %v7660_v17 = vld [vmem:[#allocation11 + $0x8] sm:$0xff]  ;;  %2858 = vmatpush.msrb.mxu0 %v7656_v0  ;;  %2988 = vmatpush.msra.mxu2 %v7656_v0  ;;  %v2817_v53 = vperm.slane %v7731_v51, 1 }
0x2165   :  { %v2570_v4 = vsel %vm2567_vm6, %v2569_v5, %v2565_v30  ;;  %v2536_v9 = vmul.f32 %v2534_v6, %v2530_v24  ;;  %2878 = vmatpush.msra.mxu1 %v7660_v17  ;;  %3008 = vmatpush.msrb.mxu3 %v7660_v17 }
0x2166   :  { %v2576_v19 = vmul.f32 %v2574_v16, %v2570_v4  ;;  %3263 = vmatpush.msrb.mxu2 %v7605_v25 }
0x2167   :  { %3283 = vmatpush.msra.mxu3 %v7607_v33 }
0x2168   :  { %3264 = vmatpush.msrb.mxu2 %v7609_v13 }
0x2169   :  { %3284 = vmatpush.msra.mxu3 %v7613_v39 }
0x216a   :  { %3265 = vmatpush.msrb.mxu2 %v7622_v18 }
0x216b   :  { %3285 = vmatpush.msra.mxu3 %v7624_v40 }
0x216c   :  { %3266 = vmatpush.msrb.mxu2 %v7630_v41 }
0x216d   :  { %3286 = vmatpush.msra.mxu3 %v7632_v43 }
0x216e   :  { %3267 = vmatpush.msrb.mxu2 %v7637_v45 }
0x216f   :  { %3287 = vmatpush.msra.mxu3 %v7639_v58 }
0x2170   :  { %3268 = vmatpush.msrb.mxu2 %v7641_v60 }
0x2171   :  { %3288 = vmatpush.msra.mxu3 %v7644_v59 }
0x2172   :  { %3269 = vmatpush.msrb.mxu2 %v7648_v61 }
0x2173   :  { %3289 = vmatpush.msra.mxu3 %v7652_v62 }
0x2174   :  { %3270 = vmatpush.msrb.mxu2 %v7656_v0 }
0x2175   :  { %3290 = vmatpush.msra.mxu3 %v7660_v17 }
0x21c2   :  { %v2539_v2 = vpop.permute.xlu0 %2538 }
0x21c3   :  { %v2579_v52 = vpop.permute.xlu1 %2578  ;;  %v2541_v42 = vmul.f32 %v2539_v2, %v2530_v24 }
0x21c4   :  { %v2581_v3 = vmul.f32 %v2579_v52, %v2570_v4 }
0x21c5   :  { %2543 = vrot.lane.b32.xlu2 %v2541_v42, %s6516_s1 }
0x21c6   :  { %2583 = vrot.lane.b32.xlu0 %v2581_v3, %s6516_s1 }
0x21cd   :  { %v2812_v23 = vpop.f32.mrf.mxu3 }
0x21ce   :  { %v7740_v55 = vadd.f32 %v2817_v53, %v2812_v23 }
0x21cf   :  { %v2786_v36 = vpop.f32.mrf.mxu2 }
0x21d0   :  { %v7745_v30 = vadd.f32 %v2816_v63, %v2786_v36  ;;  %v2841_v37 = vrot.slane %v7740_v55, 6 }
0x221f   :  { %v2544_v35 = vpop.permute.xlu2 %2543 }
0x2220   :  { %v7595_v11 = vadd.f32 %v2544_v35, %v2536_v9 }
0x2222   :  { %5868 = vtanh.f32 %v7595_v11 }
0x2228   :  { %v5869_v28 = vpop.eup %5868 }
0x2229   :  { %2549 = vrot.lane.b32.xlu1 %v5869_v28, %s6515_s27 }
0x2238   :  { %v2584_v31 = vpop.permute.xlu0 %2583 }
0x2239   :  { %v7600_v32 = vadd.f32 %v2584_v31, %v2576_v19 }
0x223b   :  { %5870 = vtanh.f32 %v7600_v32 }
0x2241   :  { %v5871_v1 = vpop.eup %5870 }
0x2242   :  { %2589 = vrot.lane.b32.xlu2 %v5871_v1, %s6515_s27 }
0x229b   :  { %v2550_v56 = vpop.permute.xlu1 %2549 }
0x229c   :  { %v2590_v38 = vpop.permute.xlu2 %2589  ;;  %v2552_v27 = vmul.f32 %v2550_v56, %v2530_v24 }
0x229d   :  { %v2592_v44 = vmul.f32 %v2590_v38, %v2570_v4 }
0x229e   :  { %2594 = vrot.lane.b32.xlu0 %v2552_v27, %s6516_s1 }
0x229f   :  { %2598 = vrot.lane.b32.xlu1 %v2592_v44, %s6515_s27 }
0x2310   :  { %v2595_v57 = vpop.permute.xlu0 %2594 }
0x2311   :  { %v2599_v47 = vpop.permute.xlu1 %2598 }
0x2312   :  { %v2601_v48 = vsel %vm460_vm9, %v2595_v57, %v2599_v47 }
0x2313   :  { %v2603_v49 = vrot.slane %v2601_v48, 4 }
0x2315   :  { %5512 = vmatmul.msk.f32.vlgmr.msra.gmra.mxu0 %vm332_vm10, %v2603_v49  ;;  %5513 = vmatmul.msk.f32.vlgmr.msrb.gmra.mxu1 %vm332_vm10, %v2603_v49 }
0x2316   :  { %3122 = vmatpush.msra.mxu0 %v7605_v25  ;;  %3142 = vmatpush.msrb.mxu1 %v7607_v33 }
0x2318   :  { %3123 = vmatpush.msra.mxu0 %v7609_v13  ;;  %3143 = vmatpush.msrb.mxu1 %v7613_v39 }
0x231a   :  { %3124 = vmatpush.msra.mxu0 %v7622_v18  ;;  %3144 = vmatpush.msrb.mxu1 %v7624_v40 }
0x231c   :  { %3125 = vmatpush.msra.mxu0 %v7630_v41  ;;  %3145 = vmatpush.msrb.mxu1 %v7632_v43 }
0x231d   :  { %2859 = vmatmul.f32.vlgmr.msrb.gmra.mxu0 %v6514_v21  ;;  %2879 = vmatmul.f32.vlgmr.msra.gmra.mxu1 %v6514_v21 }
0x231e   :  { %3126 = vmatpush.msra.mxu0 %v7637_v45  ;;  %3146 = vmatpush.msrb.mxu1 %v7639_v58 }
0x2320   :  { %3127 = vmatpush.msra.mxu0 %v7641_v60  ;;  %3147 = vmatpush.msrb.mxu1 %v7644_v59 }
0x2322   :  { %3128 = vmatpush.msra.mxu0 %v7648_v61  ;;  %3148 = vmatpush.msrb.mxu1 %v7652_v62 }
0x2324   :  { %3129 = vmatpush.msra.mxu0 %v7656_v0  ;;  %3149 = vmatpush.msrb.mxu1 %v7660_v17 }
0x2326   :  { %3407 = vmatpush.msrb.mxu0 %v7605_v25  ;;  %3427 = vmatpush.msra.mxu1 %v7607_v33 }
0x2328   :  { %3408 = vmatpush.msrb.mxu0 %v7609_v13  ;;  %3428 = vmatpush.msra.mxu1 %v7613_v39 }
0x232a   :  { %3409 = vmatpush.msrb.mxu0 %v7622_v18  ;;  %3429 = vmatpush.msra.mxu1 %v7624_v40 }
0x232c   :  { %3410 = vmatpush.msrb.mxu0 %v7630_v41  ;;  %3430 = vmatpush.msra.mxu1 %v7632_v43 }
0x232e   :  { %3411 = vmatpush.msrb.mxu0 %v7637_v45  ;;  %3431 = vmatpush.msra.mxu1 %v7639_v58 }
0x2330   :  { %3412 = vmatpush.msrb.mxu0 %v7641_v60  ;;  %3432 = vmatpush.msra.mxu1 %v7644_v59 }
0x2332   :  { %3413 = vmatpush.msrb.mxu0 %v7648_v61  ;;  %3433 = vmatpush.msra.mxu1 %v7652_v62 }
0x2334   :  { %3414 = vmatpush.msrb.mxu0 %v7656_v0  ;;  %3434 = vmatpush.msra.mxu1 %v7660_v17 }
0x2392   :  { %v7734_v8 = vpop.f32.mrf.mxu0  ;;  %v7736_v54 = vpop.f32.mrf.mxu1 }
0x239a   :  { %v2860_v5 = vpop.f32.mrf.mxu0  ;;  %v2880_v2 = vpop.f32.mrf.mxu1 }
0x239b   :  { %v2883_v24 = vadd.f32 %v2860_v5, %v7745_v30  ;;  %v2884_v52 = vadd.f32 %v2880_v2, %v2841_v37 }
0x239d   :  { %5872 = vtanh.f32 %v2883_v24  ;;  %v5522_v3 = vmul.f32 -1.442695, %v2883_v24  ;;  %v5523_v28 = vmul.f32 -1.442695, %v2884_v52 }
0x239e   :  { %5874 = vtanh.f32 %v2884_v52 }
0x239f   :  { %5876 = vpow2.f32 %v5522_v3 }
0x23a3   :  { %v5873_v4 = vpop.eup %5872 }
0x23a4   :  { %v5875_v42 = vpop.eup %5874  ;;  %2907 = vrot.lane.b32.xlu2 %v5873_v4, %s6515_s27 }
0x23a5   :  { %2944 = vrot.lane.b32.xlu0 %v5875_v42, %s6515_s27  ;;  %v5877_v6 = vpop.eup %5876 }
0x23a6   :  { %v2888_v9 = vadd.f32 1.0, %v5877_v6 }
0x23a8   :  { %5878 = vrcp.f32 %v2888_v9  ;;  %vm2894_vm11 = vweird.f32 %v2888_v9  ;;  %v2900_v46 = vand.u32 2147483648, %v2888_v9  ;;  %v2898_v56 = vand.u32 2147483647, %v2888_v9 }
0x23a9   :  { %5880 = vpow2.f32 %v5523_v28 }
0x23aa   :  { %v2901_v38 = vor.u32 1.1754944e-38, %v2900_v46  ;;  %vm2899_vm0 = vcmp.eq.f32.partialorder %v2898_v56, 8.507059e+37 }
0x23ae   :  { %v5879_v35 = vpop.eup %5878 }
0x23af   :  { %v2890_v16 = vmul.f32 %v5879_v35, %v2888_v9  ;;  %v5881_v1 = vpop.eup %5880  ;;  %vm2895_vm12 = vweird.f32 %v5879_v35 }
0x23b0   :  { %v2925_v34 = vadd.f32 1.0, %v5881_v1  ;;  %vm2896_vm15 = vmor %vm2894_vm11, %vm2895_vm12 }
0x23b1   :  { %v2891_v19 = vsub.f32 1.0, %v2890_v16 }
0x23b2   :  { %5882 = vrcp.f32 %v2925_v34  ;;  %v2937_v23 = vand.u32 2147483648, %v2925_v34  ;;  %vm2931_vm2 = vweird.f32 %v2925_v34  ;;  %v2935_v36 = vand.u32 2147483647, %v2925_v34 }
0x23b3   :  { %v2892_v31 = vmul.f32 %v5879_v35, %v2891_v19 }
0x23b4   :  { %v2938_v2 = vor.u32 1.1754944e-38, %v2937_v23  ;;  %vm2936_vm4 = vcmp.eq.f32.partialorder %v2935_v36, 8.507059e+37 }
0x23b5   :  { %v2893_v26 = vadd.f32 %v5879_v35, %v2892_v31 }
0x23b7   :  { %v2897_v27 = vsel %vm2896_vm15, %v5879_v35, %v2893_v26 }
0x23b8   :  { %v2902_v15 = vsel %vm2899_vm0, %v2901_v38, %v2897_v27  ;;  %v5883_v10 = vpop.eup %5882  ;;  %v7790_v27 = vpop.f32.mrf.mxu2 }
0x23b9   :  { %v2927_v57 = vmul.f32 %v5883_v10, %v2925_v34  ;;  %vm2932_vm1 = vweird.f32 %v5883_v10  ;;  %v2905_v42 = vmul.f32 0.0, %v2902_v15 }
0x23ba   :  { %vm2933_vm3 = vmor %vm2931_vm2, %vm2932_vm1 }
0x23bb   :  { %v2928_v47 = vsub.f32 1.0, %v2927_v57 }
0x23bd   :  { %v2929_v48 = vmul.f32 %v5883_v10, %v2928_v47 }
0x23bf   :  { %v2930_v49 = vadd.f32 %v5883_v10, %v2929_v48 }
0x23c1   :  { %v2934_v5 = vsel %vm2933_vm3, %v5883_v10, %v2930_v49 }
0x23c2   :  { %v2939_v52 = vsel %vm2936_vm4, %v2938_v2, %v2934_v5 }
0x23c3   :  { %v2942_v3 = vmul.f32 0.0, %v2939_v52 }
0x23fe   :  { %v2908_v44 = vpop.permute.xlu2 %2907 }
0x23ff   :  { %v2910_v12 = vmul.f32 %v2908_v44, %v2902_v15 }
0x2401   :  { %2912 = vrot.lane.b32.xlu1 %v2910_v12, %s6516_s1  ;;  %v2968_v12 = vrot.slane %v7740_v55, 2 }
0x2417   :  { %v2945_v24 = vpop.permute.xlu0 %2944 }
0x2418   :  { %v2947_v4 = vmul.f32 %v2945_v24, %v2939_v52 }
0x241a   :  { %2949 = vrot.lane.b32.xlu2 %v2947_v4, %s6516_s1 }
0x2473   :  { %v2913_v6 = vpop.permute.xlu1 %2912 }
0x2474   :  { %v2950_v9 = vpop.permute.xlu2 %2949  ;;  %v7755_v35 = vadd.f32 %v2913_v6, %v2905_v42 }
0x2475   :  { %v7757_v28 = vadd.f32 %v2950_v9, %v2942_v3 }
0x2476   :  { %5884 = vtanh.f32 %v7755_v35 }
0x2477   :  { %5886 = vtanh.f32 %v7757_v28 }
0x247c   :  { %v5885_v16 = vpop.eup %5884 }
0x247d   :  { %v5887_v19 = vpop.eup %5886  ;;  %2918 = vrot.lane.b32.xlu0 %v5885_v16, %s6515_s27 }
0x247e   :  { %2955 = vrot.lane.b32.xlu1 %v5887_v19, %s6515_s27 }
0x24ef   :  { %v2919_v31 = vpop.permute.xlu0 %2918 }
0x24f0   :  { %v2956_v1 = vpop.permute.xlu1 %2955  ;;  %v7763_v46 = vmul.f32 %v2919_v31, %v2902_v15 }
0x24f1   :  { %v7765_v34 = vmul.f32 %v2956_v1, %v2939_v52 }
0x24f2   :  { %2960 = vrot.lane.b32.xlu2 %v7763_v46, %s6516_s1 }
0x24f3   :  { %2964 = vrot.lane.b32.xlu0 %v7765_v34, %s6515_s27 }
0x254c   :  { %v2961_v26 = vpop.permute.xlu2 %2960 }
0x2565   :  { %v2965_v56 = vpop.permute.xlu0 %2964 }
0x2566   :  { %v2967_v38 = vsel %vm460_vm9, %v2961_v26, %v2965_v56 }
0x2567   :  { %5524 = vmatmul.msk.f32.vlgmr.msra.gmra.mxu2 %vm332_vm10, %v2967_v38  ;;  %5525 = vmatmul.msk.f32.vlgmr.msrb.gmra.mxu3 %vm332_vm10, %v2967_v38 }
0x2568   :  { %3543 = vmatpush.msra.mxu2 %v7605_v25  ;;  %3563 = vmatpush.msrb.mxu3 %v7607_v33 }
0x256a   :  { %3544 = vmatpush.msra.mxu2 %v7609_v13  ;;  %3564 = vmatpush.msrb.mxu3 %v7613_v39 }
0x256c   :  { %3545 = vmatpush.msra.mxu2 %v7622_v18  ;;  %3565 = vmatpush.msrb.mxu3 %v7624_v40 }
0x256e   :  { %3546 = vmatpush.msra.mxu2 %v7630_v41  ;;  %3566 = vmatpush.msrb.mxu3 %v7632_v43 }
0x2570   :  { %3547 = vmatpush.msra.mxu2 %v7637_v45  ;;  %3567 = vmatpush.msrb.mxu3 %v7639_v58 }
0x2572   :  { %3548 = vmatpush.msra.mxu2 %v7641_v60  ;;  %3568 = vmatpush.msrb.mxu3 %v7644_v59 }
0x2574   :  { %3549 = vmatpush.msra.mxu2 %v7648_v61  ;;  %3569 = vmatpush.msrb.mxu3 %v7652_v62 }
0x2576   :  { %3550 = vmatpush.msra.mxu2 %v7656_v0  ;;  %3570 = vmatpush.msrb.mxu3 %v7660_v17 }
0x25ea   :  { %v2990_v44 = vpop.f32.mrf.mxu2  ;;  %v3010_v15 = vpop.f32.mrf.mxu3 }
0x25eb   :  { %v3015_v10 = vrot.slane %v2990_v44, 6  ;;  %v3016_v57 = vrot.slane %v3010_v15, 6 }
0x25ed   :  { %v3019_v47 = vadd.f32 %v3015_v10, %v7745_v30  ;;  %v3020_v48 = vadd.f32 %v3016_v57, %v2968_v12 }
0x25ef   :  { %5888 = vtanh.f32 %v3019_v47  ;;  %v5527_v36 = vmul.f32 -1.442695, %v3020_v48  ;;  %v5526_v52 = vmul.f32 -1.442695, %v3019_v47 }
0x25f0   :  { %5890 = vtanh.f32 %v3020_v48 }
0x25f1   :  { %5892 = vpow2.f32 %v5527_v36 }
0x25f5   :  { %v5889_v49 = vpop.eup %5888 }
0x25f6   :  { %v5891_v23 = vpop.eup %5890  ;;  %3046 = vrot.lane.b32.xlu1 %v5889_v49, %s6515_s27 }
0x25f7   :  { %3086 = vrot.lane.b32.xlu2 %v5891_v23, %s6515_s27  ;;  %v5893_v5 = vpop.eup %5892 }
0x25f8   :  { %v3064_v2 = vadd.f32 1.0, %v5893_v5 }
0x25fa   :  { %5894 = vrcp.f32 %v3064_v2  ;;  %v3076_v19 = vand.u32 2147483648, %v3064_v2  ;;  %vm3070_vm6 = vweird.f32 %v3064_v2  ;;  %v3074_v31 = vand.u32 2147483647, %v3064_v2 }
0x25fb   :  { %5896 = vpow2.f32 %v5526_v52 }
0x25fc   :  { %v3077_v26 = vor.u32 1.1754944e-38, %v3076_v19  ;;  %vm3075_vm11 = vcmp.eq.f32.partialorder %v3074_v31, 8.507059e+37 }
0x2600   :  { %v5895_v24 = vpop.eup %5894 }
0x2601   :  { %v3066_v4 = vmul.f32 %v5895_v24, %v3064_v2  ;;  %v5897_v3 = vpop.eup %5896  ;;  %vm3071_vm5 = vweird.f32 %v5895_v24 }
0x2602   :  { %v3024_v9 = vadd.f32 1.0, %v5897_v3  ;;  %vm3072_vm8 = vmor %vm3070_vm6, %vm3071_vm5 }
0x2603   :  { %v3067_v42 = vsub.f32 1.0, %v3066_v4  ;;  %v3082_v4 = vrot.slane %v7757_v28, 6 }
0x2604   :  { %5898 = vrcp.f32 %v3024_v9  ;;  %v3036_v49 = vand.u32 2147483648, %v3024_v9  ;;  %vm3030_vm15 = vweird.f32 %v3024_v9  ;;  %v3034_v23 = vand.u32 2147483647, %v3024_v9 }
0x2605   :  { %v3068_v6 = vmul.f32 %v5895_v24, %v3067_v42 }
0x2606   :  { %v3037_v5 = vor.u32 1.1754944e-38, %v3036_v49  ;;  %vm3035_vm1 = vcmp.eq.f32.partialorder %v3034_v23, 8.507059e+37 }
0x2607   :  { %v3069_v16 = vadd.f32 %v5895_v24, %v3068_v6 }
0x2609   :  { %v3073_v1 = vsel %vm3072_vm8, %v5895_v24, %v3069_v16 }
0x260a   :  { %v3078_v38 = vsel %vm3075_vm11, %v3077_v26, %v3073_v1  ;;  %v5899_v44 = vpop.eup %5898 }
0x260b   :  { %v3026_v10 = vmul.f32 %v5899_v44, %v3024_v9  ;;  %vm3031_vm12 = vweird.f32 %v5899_v44  ;;  %v3084_v42 = vmul.f32 %v3082_v4, %v3078_v38  ;;  %v3042_v9 = vrot.slane %v7755_v35, 6 }
0x260c   :  { %vm3032_vm0 = vmor %vm3030_vm15, %vm3031_vm12 }
0x260d   :  { %v3027_v57 = vsub.f32 1.0, %v3026_v10 }
0x260f   :  { %v3028_v47 = vmul.f32 %v5899_v44, %v3027_v57 }
0x2611   :  { %v3029_v48 = vadd.f32 %v5899_v44, %v3028_v47 }
0x2613   :  { %v3033_v36 = vsel %vm3032_vm0, %v5899_v44, %v3029_v48 }
0x2614   :  { %v3038_v24 = vsel %vm3035_vm1, %v3037_v5, %v3033_v36 }
0x2615   :  { %v3044_v19 = vmul.f32 %v3042_v9, %v3038_v24 }
0x2651   :  { %v3087_v56 = vpop.permute.xlu2 %3086 }
0x2652   :  { %v3089_v15 = vmul.f32 %v3087_v56, %v3078_v38 }
0x2654   :  { %3091 = vrot.lane.b32.xlu1 %v3089_v15, %s6516_s1 }
0x2668   :  { %v3047_v2 = vpop.permute.xlu1 %3046 }
0x2669   :  { %v3049_v52 = vmul.f32 %v3047_v2, %v3038_v24 }
0x266b   :  { %3051 = vrot.lane.b32.xlu0 %v3049_v52, %s6516_s1 }
0x26c6   :  { %v3092_v3 = vpop.permute.xlu1 %3091 }
0x26c7   :  { %v7801_v6 = vadd.f32 %v3092_v3, %v3084_v42 }
0x26c9   :  { %5900 = vtanh.f32 %v7801_v6 }
0x26cf   :  { %v5901_v16 = vpop.eup %5900 }
0x26d0   :  { %3097 = vrot.lane.b32.xlu0 %v5901_v16, %s6515_s27 }
0x26dd   :  { %v3052_v31 = vpop.permute.xlu0 %3051 }
0x26de   :  { %v7806_v1 = vadd.f32 %v3052_v31, %v3044_v19 }
0x26e0   :  { %5902 = vtanh.f32 %v7806_v1 }
0x26e6   :  { %v5903_v26 = vpop.eup %5902 }
0x26e7   :  { %3057 = vrot.lane.b32.xlu2 %v5903_v26, %s6515_s27 }
0x2741   :  { %v3058_v28 = vpop.permute.xlu2 %3057 }
0x2742   :  { %v3098_v56 = vpop.permute.xlu0 %3097  ;;  %v7810_v44 = vmul.f32 %v3058_v28, %v3038_v24 }
0x2743   :  { %v7812_v15 = vmul.f32 %v3098_v56, %v3078_v38 }
0x2744   :  { %3102 = vrot.lane.b32.xlu1 %v7810_v44, %s6516_s1 }
0x2745   :  { %3106 = vrot.lane.b32.xlu2 %v7812_v15, %s6515_s27 }
0x279f   :  { %v3107_v35 = vpop.permute.xlu2 %3106 }
0x27b6   :  { %v3103_v10 = vpop.permute.xlu1 %3102 }
0x27b7   :  { %v3109_v57 = vsel %vm460_vm9, %v3103_v10, %v3107_v35 }
0x27b8   :  { %v3111_v47 = vrot.slane %v3109_v57, 2 }
0x27ba   :  { %5528 = vmatmul.msk.f32.vlgmr.msra.gmra.mxu0 %vm332_vm10, %v3111_v47  ;;  %5529 = vmatmul.msk.f32.vlgmr.msrb.gmra.mxu1 %vm332_vm10, %v3111_v47 }
0x27bb   :  { %3684 = vmatpush.msra.mxu0 %v7605_v25  ;;  %3704 = vmatpush.msrb.mxu1 %v7607_v33 }
0x27bd   :  { %3685 = vmatpush.msra.mxu0 %v7609_v13  ;;  %3705 = vmatpush.msrb.mxu1 %v7613_v39 }
0x27bf   :  { %3686 = vmatpush.msra.mxu0 %v7622_v18  ;;  %3706 = vmatpush.msrb.mxu1 %v7624_v40 }
0x27c1   :  { %3687 = vmatpush.msra.mxu0 %v7630_v41  ;;  %3707 = vmatpush.msrb.mxu1 %v7632_v43 }
0x27c3   :  { %3688 = vmatpush.msra.mxu0 %v7637_v45  ;;  %3708 = vmatpush.msrb.mxu1 %v7639_v58 }
0x27c5   :  { %3689 = vmatpush.msra.mxu0 %v7641_v60  ;;  %3709 = vmatpush.msrb.mxu1 %v7644_v59 }
0x27c7   :  { %3690 = vmatpush.msra.mxu0 %v7648_v61  ;;  %3710 = vmatpush.msrb.mxu1 %v7652_v62 }
0x27c9   :  { %3691 = vmatpush.msra.mxu0 %v7656_v0  ;;  %3711 = vmatpush.msrb.mxu1 %v7660_v17 }
0x2837   :  { %v3131_v38 = vpop.f32.mrf.mxu0  ;;  %v3151_v48 = vpop.f32.mrf.mxu1 }
0x2838   :  { %v3156_v49 = vrot.slane %v3131_v38, 4  ;;  %v3157_v23 = vrot.slane %v3151_v48, 4 }
0x283a   :  { %v3160_v36 = vadd.f32 %v3156_v49, %v7745_v30  ;;  %v3161_v5 = vadd.f32 %v3157_v23, %v2841_v37 }
0x283c   :  { %5904 = vtanh.f32 %v3160_v36  ;;  %v5530_v52 = vmul.f32 -1.442695, %v3160_v36  ;;  %v5531_v4 = vmul.f32 -1.442695, %v3161_v5 }
0x283d   :  { %5906 = vtanh.f32 %v3161_v5 }
0x283e   :  { %5908 = vpow2.f32 %v5530_v52 }
0x283f   :  { %5910 = vpow2.f32 %v5531_v4 }
0x2842   :  { %v5905_v2 = vpop.eup %5904 }
0x2843   :  { %v5907_v24 = vpop.eup %5906  ;;  %3187 = vrot.lane.b32.xlu0 %v5905_v2, %s6515_s27 }
0x2844   :  { %3227 = vrot.lane.b32.xlu1 %v5907_v24, %s6515_s27  ;;  %v5909_v42 = vpop.eup %5908 }
0x2845   :  { %v5911_v3 = vpop.eup %5910  ;;  %v3165_v16 = vadd.f32 1.0, %v5909_v42 }
0x2846   :  { %v3205_v9 = vadd.f32 1.0, %v5911_v3 }
0x2847   :  { %5912 = vrcp.f32 %v3165_v16  ;;  %v3177_v38 = vand.u32 2147483648, %v3165_v16  ;;  %vm3171_vm4 = vweird.f32 %v3165_v16  ;;  %v3175_v49 = vand.u32 2147483647, %v3165_v16 }
0x2848   :  { %5914 = vrcp.f32 %v3205_v9  ;;  %v3217_v48 = vand.u32 2147483648, %v3205_v9  ;;  %vm3211_vm5 = vweird.f32 %v3205_v9  ;;  %v3215_v23 = vand.u32 2147483647, %v3205_v9 }
0x2849   :  { %v3178_v2 = vor.u32 1.1754944e-38, %v3177_v38  ;;  %vm3176_vm11 = vcmp.eq.f32.partialorder %v3175_v49, 8.507059e+37  ;;  %v3945_v49 = vsel %vm1439_vm13, %v7763_v46, %v7810_v44 }
0x284a   :  { %v3218_v24 = vor.u32 1.1754944e-38, %v3217_v48  ;;  %vm3216_vm12 = vcmp.eq.f32.partialorder %v3215_v23, 8.507059e+37 }
0x284d   :  { %v5913_v19 = vpop.eup %5912 }
0x284e   :  { %v5915_v37 = vpop.eup %5914  ;;  %v3167_v31 = vmul.f32 %v5913_v19, %v3165_v16  ;;  %vm3172_vm2 = vweird.f32 %v5913_v19  ;;  %v3183_v16 = vrot.slane %v7806_v1, 6 }
0x284f   :  { %v3207_v26 = vmul.f32 %v5915_v37, %v3205_v9  ;;  %vm3212_vm3 = vweird.f32 %v5915_v37  ;;  %vm3173_vm6 = vmor %vm3171_vm4, %vm3172_vm2 }
0x2850   :  { %v3168_v28 = vsub.f32 1.0, %v3167_v31  ;;  %vm3213_vm8 = vmor %vm3211_vm5, %vm3212_vm3 }
0x2851   :  { %v3208_v56 = vsub.f32 1.0, %v3207_v26 }
0x2852   :  { %v3169_v35 = vmul.f32 %v5913_v19, %v3168_v28 }
0x2853   :  { %v3209_v10 = vmul.f32 %v5915_v37, %v3208_v56  ;;  %v3223_v56 = vrot.slane %v7801_v6, 6 }
0x2854   :  { %v3170_v57 = vadd.f32 %v5913_v19, %v3169_v35 }
0x2855   :  { %v3210_v47 = vadd.f32 %v5915_v37, %v3209_v10 }
0x2856   :  { %v3174_v36 = vsel %vm3173_vm6, %v5913_v19, %v3170_v57 }
0x2857   :  { %v3214_v5 = vsel %vm3213_vm8, %v5915_v37, %v3210_v47  ;;  %v3179_v4 = vsel %vm3176_vm11, %v3178_v2, %v3174_v36 }
0x2858   :  { %v3219_v3 = vsel %vm3216_vm12, %v3218_v24, %v3214_v5  ;;  %v3185_v9 = vmul.f32 %v3183_v16, %v3179_v4 }
0x2859   :  { %v3225_v35 = vmul.f32 %v3223_v56, %v3219_v3 }
0x28b5   :  { %v3188_v52 = vpop.permute.xlu0 %3187 }
0x28b6   :  { %v3228_v42 = vpop.permute.xlu1 %3227  ;;  %v3190_v31 = vmul.f32 %v3188_v52, %v3179_v4 }
0x28b7   :  { %v3230_v26 = vmul.f32 %v3228_v42, %v3219_v3 }
0x28b8   :  { %3192 = vrot.lane.b32.xlu2 %v3190_v31, %s6516_s1 }
0x28b9   :  { %3232 = vrot.lane.b32.xlu0 %v3230_v26, %s6516_s1 }
0x2912   :  { %v3193_v28 = vpop.permute.xlu2 %3192 }
0x2913   :  { %v7845_v19 = vadd.f32 %v3193_v28, %v3185_v9 }
0x2915   :  { %5916 = vtanh.f32 %v7845_v19 }
0x291b   :  { %v5917_v37 = vpop.eup %5916 }
0x291c   :  { %3198 = vrot.lane.b32.xlu1 %v5917_v37, %s6515_s27 }
0x292b   :  { %v3233_v10 = vpop.permute.xlu0 %3232 }
0x292c   :  { %v7850_v57 = vadd.f32 %v3233_v10, %v3225_v35 }
0x292e   :  { %5918 = vtanh.f32 %v7850_v57 }
0x2934   :  { %v5919_v47 = vpop.eup %5918 }
0x2935   :  { %3238 = vrot.lane.b32.xlu2 %v5919_v47, %s6515_s27 }
0x298e   :  { %v3199_v1 = vpop.permute.xlu1 %3198 }
0x298f   :  { %v3239_v38 = vpop.permute.xlu2 %3238  ;;  %v3201_v48 = vmul.f32 %v3199_v1, %v3179_v4 }
0x2990   :  { %v7857_v23 = vmul.f32 %v3239_v38, %v3219_v3 }
0x2991   :  { %v7860_v6 = vsel %vm1441_vm14, %v3945_v49, %v3201_v48  ;;  %3243 = vrot.lane.b32.xlu0 %v3201_v48, %s6516_s1  ;;  %v3324_v49 = vrot.slane %v7845_v19, 6 }
0x2992   :  { %3247 = vrot.lane.b32.xlu1 %v7857_v23, %s6515_s27 }
0x2a03   :  { %v3244_v36 = vpop.permute.xlu0 %3243 }
0x2a04   :  { %v3248_v5 = vpop.permute.xlu1 %3247 }
0x2a05   :  { %v3250_v2 = vsel %vm460_vm9, %v3244_v36, %v3248_v5  ;;  %v3364_v36 = vrot.slane %v7850_v57, 6 }
0x2a06   :  { %v3252_v24 = vrot.slane %v3250_v2, 4 }
0x2a08   :  { %5532 = vmatmul.msk.f32.vlgmr.msrb.gmra.mxu2 %vm332_vm10, %v3252_v24  ;;  %5533 = vmatmul.msk.f32.vlgmr.msra.gmra.mxu3 %vm332_vm10, %v3252_v24 }
0x2a09   :  { %3825 = vmatpush.msrb.mxu2 %v7605_v25  ;;  %3845 = vmatpush.msra.mxu3 %v7607_v33 }
0x2a0b   :  { %3826 = vmatpush.msrb.mxu2 %v7609_v13  ;;  %3846 = vmatpush.msra.mxu3 %v7613_v39 }
0x2a0d   :  { %3827 = vmatpush.msrb.mxu2 %v7622_v18  ;;  %3847 = vmatpush.msra.mxu3 %v7624_v40 }
0x2a0f   :  { %3828 = vmatpush.msrb.mxu2 %v7630_v41  ;;  %3848 = vmatpush.msra.mxu3 %v7632_v43 }
0x2a11   :  { %3829 = vmatpush.msrb.mxu2 %v7637_v45  ;;  %3849 = vmatpush.msra.mxu3 %v7639_v58 }
0x2a13   :  { %3830 = vmatpush.msrb.mxu2 %v7641_v60  ;;  %3850 = vmatpush.msra.mxu3 %v7644_v59 }
0x2a15   :  { %3831 = vmatpush.msrb.mxu2 %v7648_v61  ;;  %3851 = vmatpush.msra.mxu3 %v7652_v62 }
0x2a17   :  { %3832 = vmatpush.msrb.mxu2 %v7656_v0  ;;  %3852 = vmatpush.msra.mxu3 %v7660_v17 }
0x2a8b   :  { %v3272_v25 = vpop.f32.mrf.mxu2  ;;  %v3292_v33 = vpop.f32.mrf.mxu3 }
0x2a8c   :  { %v3297_v13 = vrot.slane %v3272_v25, 2  ;;  %v3298_v39 = vrot.slane %v3292_v33, 2 }
0x2a8e   :  { %v3301_v18 = vadd.f32 %v3297_v13, %v7745_v30  ;;  %v3302_v40 = vadd.f32 %v3298_v39, %v2968_v12 }
0x2a90   :  { %5920 = vtanh.f32 %v3301_v18  ;;  %v5534_v45 = vmul.f32 -1.442695, %v3301_v18  ;;  %v5535_v61 = vmul.f32 -1.442695, %v3302_v40 }
0x2a91   :  { %5922 = vtanh.f32 %v3302_v40 }
0x2a92   :  { %5924 = vpow2.f32 %v5534_v45  ;;  %v3962_v45 = vrot.slane %v7857_v23, 2 }
0x2a96   :  { %v5921_v41 = vpop.eup %5920 }
0x2a97   :  { %v5923_v43 = vpop.eup %5922  ;;  %3328 = vrot.lane.b32.xlu2 %v5921_v41, %s6515_s27 }
0x2a98   :  { %3368 = vrot.lane.b32.xlu0 %v5923_v43, %s6515_s27  ;;  %v5925_v58 = vpop.eup %5924 }
0x2a99   :  { %v3306_v60 = vadd.f32 1.0, %v5925_v58 }
0x2a9b   :  { %5926 = vrcp.f32 %v3306_v60  ;;  %v3318_v12 = vand.u32 2147483648, %v3306_v60  ;;  %vm3312_vm0 = vweird.f32 %v3306_v60  ;;  %v3316_v44 = vand.u32 2147483647, %v3306_v60 }
0x2a9c   :  { %5928 = vpow2.f32 %v5535_v61 }
0x2a9d   :  { %v3319_v4 = vor.u32 1.1754944e-38, %v3318_v12  ;;  %vm3317_vm2 = vcmp.eq.f32.partialorder %v3316_v44, 8.507059e+37 }
0x2aa1   :  { %v5927_v59 = vpop.eup %5926 }
0x2aa2   :  { %v3308_v62 = vmul.f32 %v5927_v59, %v3306_v60  ;;  %v5929_v55 = vpop.eup %5928  ;;  %vm3313_vm15 = vweird.f32 %v5927_v59  ;;  %v3964_v60 = vrot.slane %v7812_v15, 6  ;;  %v7926_v15 = vadd.f32 %v2816_v63, %v7790_v27 }
0x2aa3   :  { %v3346_v30 = vadd.f32 1.0, %v5929_v55  ;;  %vm3314_vm1 = vmor %vm3312_vm0, %vm3313_vm15 }
0x2aa4   :  { %v3309_v0 = vsub.f32 1.0, %v3308_v62 }
0x2aa5   :  { %5930 = vrcp.f32 %v3346_v30  ;;  %v3358_v56 = vand.u32 2147483648, %v3346_v30  ;;  %vm3352_vm4 = vweird.f32 %v3346_v30  ;;  %v3356_v35 = vand.u32 2147483647, %v3346_v30 }
0x2aa6   :  { %v3310_v17 = vmul.f32 %v5927_v59, %v3309_v0 }
0x2aa7   :  { %v3359_v47 = vor.u32 1.1754944e-38, %v3358_v56  ;;  %vm3357_vm6 = vcmp.eq.f32.partialorder %v3356_v35, 8.507059e+37 }
0x2aa8   :  { %v3311_v46 = vadd.f32 %v5927_v59, %v3310_v17 }
0x2aaa   :  { %v3315_v52 = vsel %vm3314_vm1, %v5927_v59, %v3311_v46  ;;  %v3966_v59 = vrot.slane %v7765_v34, 2  ;;  %v7921_v34 = vadd.f32 %v2817_v53, %v7729_v50 }
0x2aab   :  { %v3320_v3 = vsel %vm3317_vm2, %v3319_v4, %v3315_v52  ;;  %v5931_v26 = vpop.eup %5930 }
0x2aac   :  { %v3348_v16 = vmul.f32 %v5931_v26, %v3346_v30  ;;  %vm3353_vm3 = vweird.f32 %v5931_v26  ;;  %v3326_v5 = vmul.f32 %v3324_v49, %v3320_v3  ;;  %v3393_v23 = vrot.slane %v7921_v34, 6 }
0x2aad   :  { %vm3354_vm5 = vmor %vm3352_vm4, %vm3353_vm3 }
0x2aae   :  { %v3349_v9 = vsub.f32 1.0, %v3348_v16 }
0x2ab0   :  { %v3350_v28 = vmul.f32 %v5931_v26, %v3349_v9 }
0x2ab2   :  { %v3351_v37 = vadd.f32 %v5931_v26, %v3350_v28 }
0x2ab4   :  { %v3355_v10 = vsel %vm3354_vm5, %v5931_v26, %v3351_v37 }
0x2ab5   :  { %v3360_v38 = vsel %vm3357_vm6, %v3359_v47, %v3355_v10 }
0x2ab6   :  { %v3366_v2 = vmul.f32 %v3364_v36, %v3360_v38 }
0x2af1   :  { %v3329_v42 = vpop.permute.xlu2 %3328 }
0x2af2   :  { %v3331_v31 = vmul.f32 %v3329_v42, %v3320_v3 }
0x2af4   :  { %3333 = vrot.lane.b32.xlu1 %v3331_v31, %s6516_s1 }
0x2b0a   :  { %v3369_v1 = vpop.permute.xlu0 %3368 }
0x2b0b   :  { %v3371_v48 = vmul.f32 %v3369_v1, %v3360_v38 }
0x2b0d   :  { %3373 = vrot.lane.b32.xlu2 %v3371_v48, %s6516_s1 }
0x2b66   :  { %v3334_v24 = vpop.permute.xlu1 %3333 }
0x2b67   :  { %v3374_v25 = vpop.permute.xlu2 %3373  ;;  %v7893_v33 = vadd.f32 %v3334_v24, %v3326_v5 }
0x2b68   :  { %v7895_v13 = vadd.f32 %v3374_v25, %v3366_v2 }
0x2b69   :  { %5932 = vtanh.f32 %v7893_v33 }
0x2b6a   :  { %5934 = vtanh.f32 %v7895_v13 }
0x2b6f   :  { %v5933_v39 = vpop.eup %5932 }
0x2b70   :  { %v5935_v18 = vpop.eup %5934  ;;  %3339 = vrot.lane.b32.xlu0 %v5933_v39, %s6515_s27 }
0x2b71   :  { %3379 = vrot.lane.b32.xlu1 %v5935_v18, %s6515_s27 }
0x2be2   :  { %v3340_v19 = vpop.permute.xlu0 %3339 }
0x2be3   :  { %v3380_v57 = vpop.permute.xlu1 %3379  ;;  %v3342_v40 = vmul.f32 %v3340_v19, %v3320_v3 }
0x2be4   :  { %v3382_v41 = vmul.f32 %v3380_v57, %v3360_v38 }
0x2be5   :  { %3384 = vrot.lane.b32.xlu2 %v3342_v40, %s6516_s1  ;;  %v7904_v43 = vsel %vm1443_vm7, %v7860_v6, %v3342_v40 }
0x2be6   :  { %v3960_v58 = vrot.slane %v3382_v41, 6  ;;  %3388 = vrot.lane.b32.xlu0 %v3382_v41, %s6515_s27  ;;  %v3502_v41 = vrot.slane %v7895_v13, 6 }
0x2be8   :  { %v3971_v61 = vsel %vm1439_vm13, %v3960_v58, %v3962_v45 }
0x2be9   :  { %v3972_v62 = vsel %vm1441_vm14, %v3971_v61, %v3964_v60  ;;  %v3462_v61 = vrot.slane %v7893_v33, 6 }
0x2bea   :  { %v7913_v0 = vsel %vm1443_vm7, %v3972_v62, %v3966_v59 }
0x2c3f   :  { %v3385_v17 = vpop.permute.xlu2 %3384 }
0x2c58   :  { %v3389_v55 = vpop.permute.xlu0 %3388 }
0x2c59   :  { %v3391_v6 = vsel %vm460_vm9, %v3385_v17, %v3389_v55 }
0x2c5a   :  { %v3396_v30 = vrot.slane %v3391_v6, 6 }
0x2c5c   :  { %5536 = vmatmul.msk.f32.vlgmr.msrb.gmra.mxu0 %vm332_vm10, %v3396_v30  ;;  %5537 = vmatmul.msk.f32.vlgmr.msra.gmra.mxu1 %vm332_vm10, %v3396_v30 }
0x2cd9   :  { %v3416_v46 = vpop.f32.mrf.mxu0  ;;  %v3436_v12 = vpop.f32.mrf.mxu1 }
0x2cda   :  { %v3439_v44 = vadd.f32 %v3416_v46, %v7926_v15  ;;  %v3440_v52 = vadd.f32 %v3436_v12, %v3393_v23 }
0x2cdc   :  { %5936 = vtanh.f32 %v3439_v44  ;;  %v5539_v50 = vmul.f32 -1.442695, %v3440_v52  ;;  %v5538_v27 = vmul.f32 -1.442695, %v3439_v44 }
0x2cdd   :  { %5938 = vtanh.f32 %v3440_v52 }
0x2cde   :  { %5940 = vpow2.f32 %v5539_v50  ;;  %v3530_v50 = vrot.slane %v7921_v34, 2 }
0x2ce2   :  { %v5937_v4 = vpop.eup %5936 }
0x2ce3   :  { %v5939_v42 = vpop.eup %5938  ;;  %3466 = vrot.lane.b32.xlu1 %v5937_v4, %s6515_s27 }
0x2ce4   :  { %3506 = vrot.lane.b32.xlu2 %v5939_v42, %s6515_s27  ;;  %v5941_v51 = vpop.eup %5940 }
0x2ce5   :  { %v3484_v53 = vadd.f32 1.0, %v5941_v51 }
0x2ce7   :  { %5942 = vrcp.f32 %v3484_v53  ;;  %v3496_v37 = vand.u32 2147483648, %v3484_v53  ;;  %vm3490_vm11 = vweird.f32 %v3484_v53  ;;  %v3494_v56 = vand.u32 2147483647, %v3484_v53 }
0x2ce8   :  { %5944 = vpow2.f32 %v5538_v27 }
0x2ce9   :  { %v3497_v10 = vor.u32 1.1754944e-38, %v3496_v37  ;;  %vm3495_vm15 = vcmp.eq.f32.partialorder %v3494_v56, 8.507059e+37 }
0x2ced   :  { %v5943_v63 = vpop.eup %5942 }
0x2cee   :  { %v3486_v3 = vmul.f32 %v5943_v63, %v3484_v53  ;;  %v5945_v26 = vpop.eup %5944  ;;  %vm3491_vm8 = vweird.f32 %v5943_v63 }
0x2cef   :  { %v3444_v9 = vadd.f32 1.0, %v5945_v26  ;;  %vm3492_vm12 = vmor %vm3490_vm11, %vm3491_vm8 }
0x2cf0   :  { %v3487_v31 = vsub.f32 1.0, %v3486_v3 }
0x2cf1   :  { %5946 = vrcp.f32 %v3444_v9  ;;  %v3456_v24 = vand.u32 2147483648, %v3444_v9  ;;  %vm3450_vm1 = vweird.f32 %v3444_v9  ;;  %v3454_v25 = vand.u32 2147483647, %v3444_v9 }
0x2cf2   :  { %v3488_v16 = vmul.f32 %v5943_v63, %v3487_v31 }
0x2cf3   :  { %v3457_v18 = vor.u32 1.1754944e-38, %v3456_v24  ;;  %vm3455_vm3 = vcmp.eq.f32.partialorder %v3454_v25, 8.507059e+37 }
0x2cf4   :  { %v3489_v28 = vadd.f32 %v5943_v63, %v3488_v16 }
0x2cf6   :  { %v3493_v35 = vsel %vm3492_vm12, %v5943_v63, %v3489_v28 }
0x2cf7   :  { %v3498_v1 = vsel %vm3495_vm15, %v3497_v10, %v3493_v35  ;;  %v5947_v38 = vpop.eup %5946 }
0x2cf8   :  { %v3446_v49 = vmul.f32 %v5947_v38, %v3444_v9  ;;  %vm3451_vm0 = vweird.f32 %v5947_v38  ;;  %v3504_v45 = vmul.f32 %v3502_v41, %v3498_v1 }
0x2cf9   :  { %vm3452_vm2 = vmor %vm3450_vm1, %vm3451_vm0 }
0x2cfa   :  { %v3447_v36 = vsub.f32 1.0, %v3446_v49 }
0x2cfc   :  { %v3448_v5 = vmul.f32 %v5947_v38, %v3447_v36 }
0x2cfe   :  { %v3449_v2 = vadd.f32 %v5947_v38, %v3448_v5 }
0x2d00   :  { %v3453_v39 = vsel %vm3452_vm2, %v5947_v38, %v3449_v2 }
0x2d01   :  { %v3458_v57 = vsel %vm3455_vm3, %v3457_v18, %v3453_v39 }
0x2d02   :  { %v3464_v62 = vmul.f32 %v3462_v61, %v3458_v57 }
0x2d3e   :  { %v3507_v47 = vpop.permute.xlu2 %3506 }
0x2d3f   :  { %v3509_v48 = vmul.f32 %v3507_v47, %v3498_v1 }
0x2d41   :  { %3511 = vrot.lane.b32.xlu1 %v3509_v48, %s6516_s1 }
0x2d55   :  { %v3467_v19 = vpop.permute.xlu1 %3466 }
0x2d56   :  { %v3469_v40 = vmul.f32 %v3467_v19, %v3458_v57 }
0x2d58   :  { %3471 = vrot.lane.b32.xlu0 %v3469_v40, %s6516_s1 }
0x2db3   :  { %v3512_v58 = vpop.permute.xlu1 %3511 }
0x2db4   :  { %v7937_v60 = vadd.f32 %v3512_v58, %v3504_v45 }
0x2db6   :  { %5948 = vtanh.f32 %v7937_v60 }
0x2dbc   :  { %v5949_v59 = vpop.eup %5948 }
0x2dbd   :  { %3517 = vrot.lane.b32.xlu0 %v5949_v59, %s6515_s27 }
0x2dca   :  { %v3472_v17 = vpop.permute.xlu0 %3471 }
0x2dcb   :  { %v7942_v55 = vadd.f32 %v3472_v17, %v3464_v62 }
0x2dcd   :  { %5950 = vtanh.f32 %v7942_v55 }
0x2dd3   :  { %v5951_v6 = vpop.eup %5950 }
0x2dd4   :  { %3477 = vrot.lane.b32.xlu2 %v5951_v6, %s6515_s27  ;;  %v3604_v6 = vrot.slane %v7942_v55, 6 }
0x2e2e   :  { %v3478_v13 = vpop.permute.xlu2 %3477 }
0x2e2f   :  { %v3518_v30 = vpop.permute.xlu0 %3517  ;;  %v7946_v46 = vmul.f32 %v3478_v13, %v3458_v57 }
0x2e30   :  { %v7948_v12 = vmul.f32 %v3518_v30, %v3498_v1 }
0x2e31   :  { %3522 = vrot.lane.b32.xlu1 %v7946_v46, %s6516_s1 }
0x2e32   :  { %3526 = vrot.lane.b32.xlu2 %v7948_v12, %s6515_s27 }
0x2e8c   :  { %v3527_v33 = vpop.permute.xlu2 %3526 }
0x2ea3   :  { %v3523_v44 = vpop.permute.xlu1 %3522 }
0x2ea4   :  { %v3529_v52 = vsel %vm460_vm9, %v3523_v44, %v3527_v33 }
0x2ea5   :  { %5540 = vmatmul.msk.f32.vlgmr.msra.gmra.mxu2 %vm332_vm10, %v3529_v52  ;;  %5541 = vmatmul.msk.f32.vlgmr.msrb.gmra.mxu3 %vm332_vm10, %v3529_v52  ;;  %v3644_v52 = vrot.slane %v7937_v60, 6 }
0x2f28   :  { %v3552_v4 = vpop.f32.mrf.mxu2  ;;  %v3572_v42 = vpop.f32.mrf.mxu3 }
0x2f29   :  { %v3577_v51 = vrot.slane %v3552_v4, 6  ;;  %v3578_v53 = vrot.slane %v3572_v42, 6 }
0x2f2b   :  { %v3581_v63 = vadd.f32 %v3577_v51, %v7926_v15  ;;  %v3582_v27 = vadd.f32 %v3578_v53, %v3530_v50 }
0x2f2d   :  { %5952 = vtanh.f32 %v3581_v63  ;;  %v5542_v26 = vmul.f32 -1.442695, %v3581_v63  ;;  %v5543_v16 = vmul.f32 -1.442695, %v3582_v27 }
0x2f2e   :  { %5954 = vtanh.f32 %v3582_v27 }
0x2f2f   :  { %5956 = vpow2.f32 %v5542_v26 }
0x2f30   :  { %5958 = vpow2.f32 %v5543_v16 }
0x2f33   :  { %v5953_v3 = vpop.eup %5952 }
0x2f34   :  { %v5955_v31 = vpop.eup %5954  ;;  %3608 = vrot.lane.b32.xlu0 %v5953_v3, %s6515_s27 }
0x2f35   :  { %3648 = vrot.lane.b32.xlu1 %v5955_v31, %s6515_s27  ;;  %v5957_v9 = vpop.eup %5956 }
0x2f36   :  { %v5959_v28 = vpop.eup %5958  ;;  %v3586_v37 = vadd.f32 1.0, %v5957_v9 }
0x2f37   :  { %v3626_v56 = vadd.f32 1.0, %v5959_v28 }
0x2f38   :  { %5960 = vrcp.f32 %v3586_v37  ;;  %v3598_v24 = vand.u32 2147483648, %v3586_v37  ;;  %vm3592_vm6 = vweird.f32 %v3586_v37  ;;  %v3596_v39 = vand.u32 2147483647, %v3586_v37 }
0x2f39   :  { %5962 = vrcp.f32 %v3626_v56  ;;  %v3638_v25 = vand.u32 2147483648, %v3626_v56  ;;  %vm3632_vm8 = vweird.f32 %v3626_v56  ;;  %v3636_v18 = vand.u32 2147483647, %v3626_v56 }
0x2f3a   :  { %v3599_v40 = vor.u32 1.1754944e-38, %v3598_v24  ;;  %vm3597_vm15 = vcmp.eq.f32.partialorder %v3596_v39, 8.507059e+37 }
0x2f3b   :  { %v3639_v41 = vor.u32 1.1754944e-38, %v3638_v25  ;;  %vm3637_vm0 = vcmp.eq.f32.partialorder %v3636_v18, 8.507059e+37 }
0x2f3e   :  { %v5961_v35 = vpop.eup %5960 }
0x2f3f   :  { %v5963_v10 = vpop.eup %5962  ;;  %v3588_v47 = vmul.f32 %v5961_v35, %v3586_v37  ;;  %vm3593_vm4 = vweird.f32 %v5961_v35 }
0x2f40   :  { %v3628_v1 = vmul.f32 %v5963_v10, %v3626_v56  ;;  %vm3633_vm5 = vweird.f32 %v5963_v10  ;;  %vm3594_vm11 = vmor %vm3592_vm6, %vm3593_vm4 }
0x2f41   :  { %v3589_v38 = vsub.f32 1.0, %v3588_v47  ;;  %vm3634_vm12 = vmor %vm3632_vm8, %vm3633_vm5 }
0x2f42   :  { %v3629_v48 = vsub.f32 1.0, %v3628_v1 }
0x2f43   :  { %v3590_v49 = vmul.f32 %v5961_v35, %v3589_v38 }
0x2f44   :  { %v3630_v36 = vmul.f32 %v5963_v10, %v3629_v48 }
0x2f45   :  { %v3591_v5 = vadd.f32 %v5961_v35, %v3590_v49 }
0x2f46   :  { %v3631_v2 = vadd.f32 %v5963_v10, %v3630_v36 }
0x2f47   :  { %v3595_v19 = vsel %vm3594_vm11, %v5961_v35, %v3591_v5 }
0x2f48   :  { %v3635_v57 = vsel %vm3634_vm12, %v5963_v10, %v3631_v2  ;;  %v3600_v58 = vsel %vm3597_vm15, %v3599_v40, %v3595_v19 }
0x2f49   :  { %v3640_v61 = vsel %vm3637_vm0, %v3639_v41, %v3635_v57  ;;  %v3606_v13 = vmul.f32 %v3604_v6, %v3600_v58 }
0x2f4a   :  { %v3646_v4 = vmul.f32 %v3644_v52, %v3640_v61 }
0x2fa6   :  { %v3609_v45 = vpop.permute.xlu0 %3608 }
0x2fa7   :  { %v3649_v59 = vpop.permute.xlu1 %3648  ;;  %v3611_v62 = vmul.f32 %v3609_v45, %v3600_v58 }
0x2fa8   :  { %v3651_v17 = vmul.f32 %v3649_v59, %v3640_v61 }
0x2fa9   :  { %3613 = vrot.lane.b32.xlu2 %v3611_v62, %s6516_s1 }
0x2faa   :  { %3653 = vrot.lane.b32.xlu0 %v3651_v17, %s6516_s1 }
0x3003   :  { %v3614_v30 = vpop.permute.xlu2 %3613 }
0x3004   :  { %v7966_v33 = vadd.f32 %v3614_v30, %v3606_v13 }
0x3006   :  { %5964 = vtanh.f32 %v7966_v33 }
0x300c   :  { %v5965_v44 = vpop.eup %5964 }
0x300d   :  { %3619 = vrot.lane.b32.xlu1 %v5965_v44, %s6515_s27 }
0x301c   :  { %v3654_v42 = vpop.permute.xlu0 %3653 }
0x301d   :  { %v7971_v51 = vadd.f32 %v3654_v42, %v3646_v4 }
0x301f   :  { %5966 = vtanh.f32 %v7971_v51 }
0x3025   :  { %v5967_v53 = vpop.eup %5966 }
0x3026   :  { %3659 = vrot.lane.b32.xlu2 %v5967_v53, %s6515_s27 }
0x307f   :  { %v3620_v55 = vpop.permute.xlu1 %3619 }
0x3080   :  { %v3660_v63 = vpop.permute.xlu2 %3659  ;;  %v7975_v27 = vmul.f32 %v3620_v55, %v3600_v58 }
0x3081   :  { %v7977_v3 = vmul.f32 %v3660_v63, %v3640_v61  ;;  %v3745_v63 = vrot.slane %v7966_v33, 6 }
0x3082   :  { %3664 = vrot.lane.b32.xlu0 %v7975_v27, %s6516_s1 }
0x3083   :  { %3668 = vrot.lane.b32.xlu1 %v7977_v3, %s6515_s27 }
0x30f4   :  { %v3665_v60 = vpop.permute.xlu0 %3664 }
0x30f5   :  { %v3669_v31 = vpop.permute.xlu1 %3668 }
0x30f6   :  { %v3671_v26 = vsel %vm460_vm9, %v3665_v60, %v3669_v31  ;;  %v3785_v60 = vrot.slane %v7971_v51, 6 }
0x30f7   :  { %v3673_v16 = vrot.slane %v3671_v26, 2 }
0x30f9   :  { %5544 = vmatmul.msk.f32.vlgmr.msra.gmra.mxu0 %vm332_vm10, %v3673_v16  ;;  %5545 = vmatmul.msk.f32.vlgmr.msrb.gmra.mxu1 %vm332_vm10, %v3673_v16 }
0x3176   :  { %v3693_v9 = vpop.f32.mrf.mxu0  ;;  %v3713_v28 = vpop.f32.mrf.mxu1 }
0x3177   :  { %v3718_v37 = vrot.slane %v3693_v9, 4  ;;  %v3719_v56 = vrot.slane %v3713_v28, 4 }
0x3179   :  { %v3722_v35 = vadd.f32 %v3718_v37, %v7926_v15  ;;  %v3723_v10 = vadd.f32 %v3719_v56, %v3393_v23 }
0x317b   :  { %5968 = vtanh.f32 %v3722_v35  ;;  %v5546_v38 = vmul.f32 -1.442695, %v3722_v35  ;;  %v5547_v5 = vmul.f32 -1.442695, %v3723_v10 }
0x317c   :  { %5970 = vtanh.f32 %v3723_v10 }
0x317d   :  { %5972 = vpow2.f32 %v5546_v38 }
0x3181   :  { %v5969_v47 = vpop.eup %5968 }
0x3182   :  { %v5971_v1 = vpop.eup %5970  ;;  %3749 = vrot.lane.b32.xlu2 %v5969_v47, %s6515_s27  ;;  %v3948_v47 = vsel %vm1439_vm13, %v7946_v46, %v7975_v27 }
0x3183   :  { %3789 = vrot.lane.b32.xlu0 %v5971_v1, %s6515_s27  ;;  %v5973_v48 = vpop.eup %5972 }
0x3184   :  { %v3727_v49 = vadd.f32 1.0, %v5973_v48 }
0x3186   :  { %5974 = vrcp.f32 %v3727_v49  ;;  %v3739_v19 = vand.u32 2147483648, %v3727_v49  ;;  %vm3733_vm2 = vweird.f32 %v3727_v49  ;;  %v3737_v57 = vand.u32 2147483647, %v3727_v49 }
0x3187   :  { %5976 = vpow2.f32 %v5547_v5 }
0x3188   :  { %v3740_v41 = vor.u32 1.1754944e-38, %v3739_v19  ;;  %vm3738_vm4 = vcmp.eq.f32.partialorder %v3737_v57, 8.507059e+37 }
0x318c   :  { %v5975_v36 = vpop.eup %5974 }
0x318d   :  { %v3729_v2 = vmul.f32 %v5975_v36, %v3727_v49  ;;  %v5977_v23 = vpop.eup %5976  ;;  %vm3734_vm1 = vweird.f32 %v5975_v36 }
0x318e   :  { %v3767_v39 = vadd.f32 1.0, %v5977_v23  ;;  %vm3735_vm3 = vmor %vm3733_vm2, %vm3734_vm1 }
0x318f   :  { %v3730_v24 = vsub.f32 1.0, %v3729_v2 }
0x3190   :  { %5978 = vrcp.f32 %v3767_v39  ;;  %v3779_v30 = vand.u32 2147483648, %v3767_v39  ;;  %vm3773_vm6 = vweird.f32 %v3767_v39  ;;  %v3777_v44 = vand.u32 2147483647, %v3767_v39 }
0x3191   :  { %v3731_v25 = vmul.f32 %v5975_v36, %v3730_v24 }
0x3192   :  { %v3780_v4 = vor.u32 1.1754944e-38, %v3779_v30  ;;  %vm3778_vm11 = vcmp.eq.f32.partialorder %v3777_v44, 8.507059e+37 }
0x3193   :  { %v3732_v18 = vadd.f32 %v5975_v36, %v3731_v25 }
0x3195   :  { %v3736_v40 = vsel %vm3735_vm3, %v5975_v36, %v3732_v18 }
0x3196   :  { %v3741_v58 = vsel %vm3738_vm4, %v3740_v41, %v3736_v40  ;;  %v5979_v61 = vpop.eup %5978 }
0x3197   :  { %v3769_v62 = vmul.f32 %v5979_v61, %v3767_v39  ;;  %vm3774_vm5 = vweird.f32 %v5979_v61  ;;  %v3747_v31 = vmul.f32 %v3745_v63, %v3741_v58 }
0x3198   :  { %vm3775_vm8 = vmor %vm3773_vm6, %vm3774_vm5 }
0x3199   :  { %v3770_v17 = vsub.f32 1.0, %v3769_v62 }
0x319b   :  { %v3771_v6 = vmul.f32 %v5979_v61, %v3770_v17 }
0x319d   :  { %v3772_v13 = vadd.f32 %v5979_v61, %v3771_v6 }
0x319f   :  { %v3776_v52 = vsel %vm3775_vm8, %v5979_v61, %v3772_v13 }
0x31a0   :  { %v3781_v53 = vsel %vm3778_vm11, %v3780_v4, %v3776_v52 }
0x31a1   :  { %v3787_v26 = vmul.f32 %v3785_v60, %v3781_v53 }
0x31dc   :  { %v3750_v45 = vpop.permute.xlu2 %3749 }
0x31dd   :  { %v3752_v59 = vmul.f32 %v3750_v45, %v3741_v58 }
0x31df   :  { %3754 = vrot.lane.b32.xlu1 %v3752_v59, %s6516_s1 }
0x31f5   :  { %v3790_v42 = vpop.permute.xlu0 %3789 }
0x31f6   :  { %v3792_v55 = vmul.f32 %v3790_v42, %v3781_v53 }
0x31f8   :  { %3794 = vrot.lane.b32.xlu2 %v3792_v55, %s6516_s1 }
0x3251   :  { %v3755_v16 = vpop.permute.xlu1 %3754 }
0x3252   :  { %v3795_v9 = vpop.permute.xlu2 %3794  ;;  %v7995_v28 = vadd.f32 %v3755_v16, %v3747_v31 }
0x3253   :  { %v7997_v37 = vadd.f32 %v3795_v9, %v3787_v26 }
0x3254   :  { %5980 = vtanh.f32 %v7995_v28 }
0x3255   :  { %5982 = vtanh.f32 %v7997_v37 }
0x325a   :  { %v5981_v56 = vpop.eup %5980 }
0x325b   :  { %v5983_v35 = vpop.eup %5982  ;;  %3760 = vrot.lane.b32.xlu0 %v5981_v56, %s6515_s27 }
0x325c   :  { %3800 = vrot.lane.b32.xlu1 %v5983_v35, %s6515_s27 }
0x32cd   :  { %v3761_v33 = vpop.permute.xlu0 %3760 }
0x32ce   :  { %v3801_v51 = vpop.permute.xlu1 %3800  ;;  %v3763_v10 = vmul.f32 %v3761_v33, %v3741_v58  ;;  %v3886_v33 = vrot.slane %v7995_v28, 6  ;;  %v3981_v28 = vld [vmem:[#allocation14 + $0x30] sm:$0xff] }
0x32cf   :  { %v8006_v1 = vmul.f32 %v3801_v51, %v3781_v53  ;;  %4005 = vmatpush.msrb.mxu0 %v3981_v28 }
0x32d0   :  { %v8009_v38 = vsel %vm1441_vm14, %v3948_v47, %v3763_v10  ;;  %3805 = vrot.lane.b32.xlu2 %v3763_v10, %s6516_s1 }
0x32d1   :  { %3809 = vrot.lane.b32.xlu0 %v8006_v1, %s6515_s27 }
0x332a   :  { %v3806_v48 = vpop.permute.xlu2 %3805 }
0x3343   :  { %v3810_v49 = vpop.permute.xlu0 %3809 }
0x3344   :  { %v3812_v36 = vsel %vm460_vm9, %v3806_v48, %v3810_v49  ;;  %v3926_v49 = vrot.slane %v7997_v37, 6  ;;  %v3978_v37 = vld [vmem:[#allocation14 + $0x18] sm:$0xff] }
0x3345   :  { %v3814_v5 = vrot.slane %v3812_v36, 4 }
0x3347   :  { %5548 = vmatmul.msk.f32.vlgmr.msrb.gmra.mxu2 %vm332_vm10, %v3814_v5  ;;  %5549 = vmatmul.msk.f32.vlgmr.msra.gmra.mxu3 %vm332_vm10, %v3814_v5 }
0x33ca   :  { %v3834_v46 = vpop.f32.mrf.mxu2  ;;  %v3854_v27 = vpop.f32.mrf.mxu3 }
0x33cb   :  { %v3859_v2 = vrot.slane %v3834_v46, 2  ;;  %v3860_v24 = vrot.slane %v3854_v27, 2 }
0x33cd   :  { %v3863_v25 = vadd.f32 %v3859_v2, %v7926_v15  ;;  %v3864_v23 = vadd.f32 %v3860_v24, %v3530_v50  ;;  %v3982_v2 = vld [vmem:[#allocation14 + $0x38] sm:$0xff]  ;;  %v3979_v24 = vld [vmem:[#allocation14 + $0x20] sm:$0xff] }
0x33ce   :  { %4028 = vmatpush.msra.mxu1 %v3982_v2  ;;  %4006 = vmatpush.msrb.mxu0 %v3979_v24 }
0x33cf   :  { %5984 = vtanh.f32 %v3863_v25  ;;  %v5550_v19 = vmul.f32 -1.442695, %v3863_v25  ;;  %v5551_v45 = vmul.f32 -1.442695, %v3864_v23  ;;  %v3980_v25 = vld [vmem:[#allocation14 + $0x28] sm:$0xff] }
0x33d0   :  { %5986 = vtanh.f32 %v3864_v23  ;;  %4029 = vmatpush.msra.mxu1 %v3980_v25  ;;  %v3975_v23 = vld [vmem:[#allocation14] sm:$0xff] }
0x33d1   :  { %5988 = vpow2.f32 %v5550_v19  ;;  %v4054_v19 = vld [vmem:[#allocation14 + $0x70] sm:$0xff] }
0x33d2   :  { %4030 = vmatpush.msra.mxu1 %v3978_v37  ;;  %4078 = vmatpush.msra.mxu2 %v4054_v19 }
0x33d5   :  { %v5985_v39 = vpop.eup %5984 }
0x33d6   :  { %v5987_v18 = vpop.eup %5986  ;;  %3890 = vrot.lane.b32.xlu2 %v5985_v39, %s6515_s27  ;;  %v3976_v39 = vld [vmem:[#allocation14 + $0x8] sm:$0xff] }
0x33d7   :  { %3930 = vrot.lane.b32.xlu1 %v5987_v18, %s6515_s27  ;;  %v5989_v57 = vpop.eup %5988  ;;  %4031 = vmatpush.msra.mxu1 %v3976_v39  ;;  %v4055_v18 = vld [vmem:[#allocation14 + $0x78] sm:$0xff] }
0x33d8   :  { %v3868_v40 = vadd.f32 1.0, %v5989_v57  ;;  %v4053_v57 = vld [vmem:[#allocation14 + $0x68] sm:$0xff]  ;;  %4101 = vmatpush.msrb.mxu3 %v4055_v18 }
0x33da   :  { %5990 = vrcp.f32 %v3868_v40  ;;  %v3880_v62 = vand.u32 2147483648, %v3868_v40  ;;  %vm3874_vm15 = vweird.f32 %v3868_v40  ;;  %v3878_v17 = vand.u32 2147483647, %v3868_v40  ;;  %4102 = vmatpush.msrb.mxu3 %v4053_v57 }
0x33db   :  { %5992 = vpow2.f32 %v5551_v45  ;;  %v4049_v45 = vld [vmem:[#allocation14 + $0x48] sm:$0xff] }
0x33dc   :  { %v3881_v13 = vor.u32 1.1754944e-38, %v3880_v62  ;;  %vm3879_vm1 = vcmp.eq.f32.partialorder %v3878_v17, 8.507059e+37  ;;  %v3958_v62 = vrot.slane %v7948_v12, 2 }
0x33e0   :  { %v5991_v41 = vpop.eup %5990 }
0x33e1   :  { %v3870_v58 = vmul.f32 %v5991_v41, %v3868_v40  ;;  %v5993_v50 = vpop.eup %5992  ;;  %vm3875_vm12 = vweird.f32 %v5991_v41  ;;  %v4051_v40 = vld [vmem:[#allocation14 + $0x58] sm:$0xff] }
0x33e2   :  { %v3908_v59 = vadd.f32 1.0, %v5993_v50  ;;  %vm3876_vm0 = vmor %vm3874_vm15, %vm3875_vm12  ;;  %4103 = vmatpush.msrb.mxu3 %v4051_v40  ;;  %v3954_v50 = vrot.slane %v8006_v1, 2 }
0x33e3   :  { %v3871_v15 = vsub.f32 1.0, %v3870_v58  ;;  %v4048_v58 = vld [vmem:[#allocation14 + $0x40] sm:$0xff] }
0x33e4   :  { %5994 = vrcp.f32 %v3908_v59  ;;  %v3920_v60 = vand.u32 2147483648, %v3908_v59  ;;  %vm3914_vm3 = vweird.f32 %v3908_v59  ;;  %v3918_v31 = vand.u32 2147483647, %v3908_v59  ;;  %4104 = vmatpush.msrb.mxu3 %v4049_v45 }
0x33e5   :  { %v3872_v34 = vmul.f32 %v5991_v41, %v3871_v15 }
0x33e6   :  { %v3921_v16 = vor.u32 1.1754944e-38, %v3920_v60  ;;  %vm3919_vm5 = vcmp.eq.f32.partialorder %v3918_v31, 8.507059e+37  ;;  %v8085_v60 = vld [vmem:[#allocation16 + $0x30] sm:$0xff]  ;;  %v8087_v31 = vld [vmem:[#allocation16 + $0x38] sm:$0xff] }
0x33e7   :  { %v3873_v61 = vadd.f32 %v5991_v41, %v3872_v34 }
0x33e9   :  { %v3877_v6 = vsel %vm3876_vm0, %v5991_v41, %v3873_v61  ;;  %v4050_v41 = vld [vmem:[#allocation14 + $0x50] sm:$0xff]  ;;  %v3956_v61 = vrot.slane %v7977_v3, 6 }
0x33ea   :  { %v8022_v44 = vsel %vm3879_vm1, %v3881_v13, %v3877_v6  ;;  %v5995_v4 = vpop.eup %5994  ;;  %v8055_v3 = vld [vmem:[#allocation16 + $0x70] sm:$0xff] }
0x33eb   :  { %v3910_v42 = vmul.f32 %v5995_v4, %v3908_v59  ;;  %vm3915_vm2 = vweird.f32 %v5995_v4  ;;  %v3888_v51 = vmul.f32 %v3886_v33, %v8022_v44  ;;  %v8113_v33 = vld [vmem:[#allocation16 + $0x8] sm:$0xff] }
0x33ec   :  { %vm3916_vm4 = vmor %vm3914_vm3, %vm3915_vm2 }
0x33ed   :  { %v3911_v53 = vsub.f32 1.0, %v3910_v42  ;;  %v8059_v42 = vld [vmem:[#allocation16 + $0x60] sm:$0xff] }
0x33ef   :  { %v3912_v55 = vmul.f32 %v5995_v4, %v3911_v53  ;;  %v8063_v53 = vld [vmem:[#allocation16 + $0x68] sm:$0xff] }
0x33f1   :  { %v3913_v63 = vadd.f32 %v5995_v4, %v3912_v55  ;;  %v8067_v55 = vld [vmem:[#allocation16 + $0x58] sm:$0xff] }
0x33f3   :  { %v3917_v26 = vsel %vm3916_vm4, %v5995_v4, %v3913_v63  ;;  %v8057_v4 = vld [vmem:[#allocation16 + $0x78] sm:$0xff]  ;;  %v8083_v63 = vld [vmem:[#allocation16 + $0x48] sm:$0xff] }
0x33f4   :  { %v3922_v56 = vsel %vm3919_vm5, %v3921_v16, %v3917_v26  ;;  %4163 = vmatpush.msrb.mxu1 %v8057_v4  ;;  %4293 = vmatpush.msra.mxu3 %v8057_v4  ;;  %v8091_v26 = vld [vmem:[#allocation16 + $0x20] sm:$0xff]  ;;  %v8097_v16 = vld [vmem:[#allocation16 + $0x28] sm:$0xff] }
0x33f5   :  { %v3928_v36 = vmul.f32 %v3926_v49, %v3922_v56  ;;  %v8177_v49 = vld [vmem:[#allocation17] sm:$0x3] }
0x33f6   :  { %4164 = vmatpush.msrb.mxu1 %v8063_v53  ;;  %4294 = vmatpush.msra.mxu3 %v8063_v53  ;;  %v4041_v28 = vperm.slane %v8177_v49, 1 }
0x33f8   :  { %4165 = vmatpush.msrb.mxu1 %v8067_v55  ;;  %4295 = vmatpush.msra.mxu3 %v8067_v55 }
0x33fa   :  { %4166 = vmatpush.msrb.mxu1 %v8083_v63  ;;  %4296 = vmatpush.msra.mxu3 %v8083_v63 }
0x33fc   :  { %4167 = vmatpush.msrb.mxu1 %v8087_v31  ;;  %4297 = vmatpush.msra.mxu3 %v8087_v31 }
0x33fe   :  { %4168 = vmatpush.msrb.mxu1 %v8097_v16  ;;  %4298 = vmatpush.msra.mxu3 %v8097_v16 }
0x3430   :  { %v3891_v30 = vpop.permute.xlu2 %3890 }
0x3431   :  { %v3893_v52 = vmul.f32 %v3891_v30, %v8022_v44 }
0x3433   :  { %3895 = vrot.lane.b32.xlu1 %v3893_v52, %s6516_s1 }
0x3449   :  { %v3931_v9 = vpop.permute.xlu1 %3930 }
0x344a   :  { %v3933_v35 = vmul.f32 %v3931_v9, %v3922_v56  ;;  %v8099_v9 = vld [vmem:[#allocation16 + $0x10] sm:$0xff] }
0x344c   :  { %3935 = vrot.lane.b32.xlu0 %v3933_v35, %s6516_s1  ;;  %v8103_v35 = vld [vmem:[#allocation16] sm:$0xff] }
0x34a5   :  { %v3896_v10 = vpop.permute.xlu1 %3895 }
0x34a6   :  { %v3898_v47 = vadd.f32 %v3896_v10, %v3888_v51 }
0x34a8   :  { %5996 = vtanh.f32 %v3898_v47 }
0x34ae   :  { %v5997_v48 = vpop.eup %5996 }
0x34af   :  { %3901 = vrot.lane.b32.xlu0 %v5997_v48, %s6515_s27 }
0x34b7   :  { %4060 = vrot.lane.b32.xlu0 %v7913_v0, %s6516_s1  ;;  %v3977_v0 = vld [vmem:[#allocation14 + $0x10] sm:$0xff] }
0x34b8   :  { %4007 = vmatpush.msrb.mxu0 %v3977_v0 }
0x34ba   :  { %4008 = vmatpush.msrb.mxu0 %v3975_v23 }
0x34bc   :  { %4143 = vmatpush.msra.mxu0 %v8055_v3 }
0x34be   :  { %v3936_v5 = vpop.permute.xlu0 %3935  ;;  %4144 = vmatpush.msra.mxu0 %v8059_v42 }
0x34bf   :  { %v3938_v46 = vadd.f32 %v3936_v5, %v3928_v36 }
0x34c1   :  { %5998 = vtanh.f32 %v3938_v46  ;;  %v4040_v46 = vperm.slane %v8177_v49, 0 }
0x34c7   :  { %v5999_v27 = vpop.eup %5998 }
0x34c8   :  { %3941 = vrot.lane.b32.xlu2 %v5999_v27, %s6515_s27 }
0x34d0   :  { %3985 = vrot.lane.b32.xlu2 %v7904_v43, %s6516_s1  ;;  %v4052_v43 = vld [vmem:[#allocation14 + $0x60] sm:$0xff] }
0x34d1   :  { %4079 = vmatpush.msra.mxu2 %v4052_v43 }
0x34d3   :  { %4080 = vmatpush.msra.mxu2 %v4050_v41 }
0x34d5   :  { %4081 = vmatpush.msra.mxu2 %v4048_v58 }
0x34d7   :  { %4273 = vmatpush.msrb.mxu2 %v8055_v3 }
0x34d9   :  { %4274 = vmatpush.msrb.mxu2 %v8059_v42 }
0x3521   :  { %v3902_v30 = vpop.permute.xlu0 %3901 }
0x3522   :  { %v3942_v15 = vpop.permute.xlu2 %3941  ;;  %v8049_v1 = vmul.f32 %v3902_v30, %v8022_v44  ;;  %v8065_v44 = vld [vmem:[#allocation16 + $0x50] sm:$0xff] }
0x3523   :  { %v8036_v34 = vmul.f32 %v3942_v15, %v3922_v56  ;;  %4145 = vmatpush.msra.mxu0 %v8065_v44  ;;  %4275 = vmatpush.msrb.mxu2 %v8065_v44  ;;  %v8101_v56 = vld [vmem:[#allocation16 + $0x18] sm:$0xff] }
0x3524   :  { %v3950_v12 = vsel %vm1443_vm7, %v8009_v38, %v8049_v1  ;;  %v8073_v38 = vld [vmem:[#allocation16 + $0x40] sm:$0xff]  ;;  %4169 = vmatpush.msrb.mxu1 %v8101_v56  ;;  %4299 = vmatpush.msra.mxu3 %v8101_v56 }
0x3525   :  { %v3952_v59 = vrot.slane %v8036_v34, 6  ;;  %4146 = vmatpush.msra.mxu0 %v8073_v38  ;;  %4276 = vmatpush.msrb.mxu2 %v8073_v38 }
0x3526   :  { %4170 = vmatpush.msrb.mxu1 %v8113_v33  ;;  %4300 = vmatpush.msra.mxu3 %v8113_v33 }
0x3527   :  { %v3968_v17 = vsel %vm1439_vm13, %v3952_v59, %v3954_v50  ;;  %4147 = vmatpush.msra.mxu0 %v8085_v60  ;;  %4277 = vmatpush.msrb.mxu2 %v8085_v60 }
0x3528   :  { %v3969_v6 = vsel %vm1441_vm14, %v3968_v17, %v3956_v61 }
0x3529   :  { %v3970_v13 = vsel %vm1443_vm7, %v3969_v6, %v3958_v62  ;;  %4148 = vmatpush.msra.mxu0 %v8091_v26  ;;  %4278 = vmatpush.msrb.mxu2 %v8091_v26  ;;  %v4061_v47 = vpop.permute.xlu0 %4060 }
0x352a   :  { %v3986_v52 = vpop.permute.xlu2 %3985  ;;  %4058 = vrot.lane.b32.xlu1 %v3970_v13, %s6516_s1 }
0x352b   :  { %5552 = vmatmul.msk.f32.vlgmr.msrb.gmra.mxu0 %vm460_vm9, %v3986_v52  ;;  %5554 = vmatmul.msk.f32.vlgmr.msra.gmra.mxu1 %vm460_vm9, %v3986_v52 }
0x352c   :  { %4149 = vmatpush.msra.mxu0 %v8099_v9  ;;  %4279 = vmatpush.msrb.mxu2 %v8099_v9 }
0x352d   :  { %4434 = vmatpush.msra.mxu1 %v8057_v4 }
0x352e   :  { %4150 = vmatpush.msra.mxu0 %v8103_v35  ;;  %4280 = vmatpush.msrb.mxu2 %v8103_v35 }
0x352f   :  { %4435 = vmatpush.msra.mxu1 %v8063_v53 }
0x3530   :  { %4414 = vmatpush.msrb.mxu0 %v8055_v3 }
0x3531   :  { %4436 = vmatpush.msra.mxu1 %v8067_v55 }
0x3532   :  { %3987 = vrot.lane.b32.xlu1 %v3950_v12, %s6516_s1  ;;  %4415 = vmatpush.msrb.mxu0 %v8059_v42 }
0x3533   :  { %4437 = vmatpush.msra.mxu1 %v8083_v63 }
0x3534   :  { %4416 = vmatpush.msrb.mxu0 %v8065_v44 }
0x3535   :  { %4438 = vmatpush.msra.mxu1 %v8087_v31 }
0x3536   :  { %4417 = vmatpush.msrb.mxu0 %v8073_v38 }
0x3537   :  { %4439 = vmatpush.msra.mxu1 %v8097_v16 }
0x3538   :  { %4418 = vmatpush.msrb.mxu0 %v8085_v60 }
0x3539   :  { %4440 = vmatpush.msra.mxu1 %v8101_v56 }
0x353a   :  { %4419 = vmatpush.msrb.mxu0 %v8091_v26 }
0x353b   :  { %4441 = vmatpush.msra.mxu1 %v8113_v33 }
0x353c   :  { %4420 = vmatpush.msrb.mxu0 %v8099_v9 }
0x353e   :  { %4421 = vmatpush.msrb.mxu0 %v8103_v35 }
0x359c   :  { %v4059_v51 = vpop.permute.xlu1 %4058 }
0x359d   :  { %5556 = vmatmul.msk.f32.vlgmr.msra.gmra.mxu2 %vm460_vm9, %v4059_v51  ;;  %5558 = vmatmul.msk.f32.vlgmr.msrb.gmra.mxu3 %vm460_vm9, %v4059_v51 }
0x359e   :  { %4555 = vmatpush.msra.mxu2 %v8055_v3  ;;  %4575 = vmatpush.msrb.mxu3 %v8057_v4 }
0x35a0   :  { %4556 = vmatpush.msra.mxu2 %v8059_v42  ;;  %4576 = vmatpush.msrb.mxu3 %v8063_v53 }
0x35a2   :  { %4557 = vmatpush.msra.mxu2 %v8065_v44  ;;  %4577 = vmatpush.msrb.mxu3 %v8067_v55 }
0x35a4   :  { %v3988_v10 = vpop.permute.xlu1 %3987  ;;  %4558 = vmatpush.msra.mxu2 %v8073_v38  ;;  %4578 = vmatpush.msrb.mxu3 %v8083_v63 }
0x35a5   :  { %5553 = vmatmul.msk.f32.gmra.mxu0 %vm460_vm9, %v3988_v10  ;;  %5555 = vmatmul.msk.f32.gmra.mxu1 %vm460_vm9, %v3988_v10 }
0x35a6   :  { %5557 = vmatmul.msk.f32.gmra.mxu2 %vm460_vm9, %v4061_v47  ;;  %5559 = vmatmul.msk.f32.gmra.mxu3 %vm460_vm9, %v4061_v47 }
0x35a7   :  { %4559 = vmatpush.msra.mxu2 %v8085_v60  ;;  %4579 = vmatpush.msrb.mxu3 %v8087_v31 }
0x35a8   :  { %v8175_v48 = vpop.f32.mrf.mxu1 }
0x35a9   :  { %4560 = vmatpush.msra.mxu2 %v8091_v26  ;;  %4580 = vmatpush.msrb.mxu3 %v8097_v16 }
0x35ab   :  { %4561 = vmatpush.msra.mxu2 %v8099_v9  ;;  %4581 = vmatpush.msrb.mxu3 %v8101_v56 }
0x35ad   :  { %4151 = vmatmul.f32.vlgmr.msra.gmra.mxu0 %v6514_v21  ;;  %4171 = vmatmul.f32.vlgmr.msrb.gmra.mxu1 %v6514_v21  ;;  %v4010_v21 = vpop.f32.mrf.mxu0 }
0x35ae   :  { %4699 = vmatpush.msra.mxu0 %v8055_v3  ;;  %4719 = vmatpush.msrb.mxu1 %v8057_v4  ;;  %v4044_v24 = vadd.f32 %v4040_v46, %v4010_v21 }
0x35af   :  { %4562 = vmatpush.msra.mxu2 %v8103_v35  ;;  %4582 = vmatpush.msrb.mxu3 %v8113_v33 }
0x35b0   :  { %4700 = vmatpush.msra.mxu0 %v8059_v42  ;;  %4720 = vmatpush.msrb.mxu1 %v8063_v53 }
0x35b2   :  { %4701 = vmatpush.msra.mxu0 %v8065_v44  ;;  %4721 = vmatpush.msrb.mxu1 %v8067_v55 }
0x35b4   :  { %4702 = vmatpush.msra.mxu0 %v8073_v38  ;;  %4722 = vmatpush.msrb.mxu1 %v8083_v63 }
0x35b6   :  { %4703 = vmatpush.msra.mxu0 %v8085_v60  ;;  %4723 = vmatpush.msrb.mxu1 %v8087_v31 }
0x35b8   :  { %4704 = vmatpush.msra.mxu0 %v8091_v26  ;;  %4724 = vmatpush.msrb.mxu1 %v8097_v16 }
0x35ba   :  { %4705 = vmatpush.msra.mxu0 %v8099_v9  ;;  %4725 = vmatpush.msrb.mxu1 %v8101_v56 }
0x35bc   :  { %4706 = vmatpush.msra.mxu0 %v8103_v35  ;;  %4726 = vmatpush.msrb.mxu1 %v8113_v33 }
0x3620   :  { %v8179_v36 = vpop.f32.mrf.mxu3  ;;  %v4083_v2 = vpop.f32.mrf.mxu2 }
0x3621   :  { %v8189_v0 = vadd.f32 %v4083_v2, %v4044_v24 }
0x3622   :  { %v8181_v5 = vpop.f32.mrf.mxu0  ;;  %v4036_v27 = vpop.f32.mrf.mxu1 }
0x3623   :  { %v4047_v25 = vadd.f32 %v4041_v28, %v4036_v27 }
0x3629   :  { %v4109_v37 = vpop.f32.mrf.mxu3 }
0x362a   :  { %v8191_v23 = vadd.f32 %v4109_v37, %v4047_v25  ;;  %v4152_v39 = vpop.f32.mrf.mxu0  ;;  %v4172_v19 = vpop.f32.mrf.mxu1 }
0x362b   :  { %v4175_v18 = vadd.f32 %v4152_v39, %v8189_v0 }
0x362c   :  { %v4133_v57 = vrot.slane %v8191_v23, 6 }
0x362d   :  { %6000 = vtanh.f32 %v4175_v18  ;;  %v5560_v45 = vmul.f32 -1.442695, %v4175_v18 }
0x362e   :  { %v4176_v43 = vadd.f32 %v4172_v19, %v4133_v57 }
0x3630   :  { %6002 = vtanh.f32 %v4176_v43  ;;  %v5561_v61 = vmul.f32 -1.442695, %v4176_v43 }
0x3631   :  { %6004 = vpow2.f32 %v5560_v45 }
0x3633   :  { %v6001_v40 = vpop.eup %6000 }
0x3634   :  { %4199 = vrot.lane.b32.xlu2 %v6001_v40, %s6515_s27 }
0x3636   :  { %v6003_v41 = vpop.eup %6002 }
0x3637   :  { %4236 = vrot.lane.b32.xlu0 %v6003_v41, %s6515_s27  ;;  %v6005_v58 = vpop.eup %6004 }
0x3638   :  { %v4180_v15 = vadd.f32 1.0, %v6005_v58 }
0x363a   :  { %6006 = vrcp.f32 %v4180_v15  ;;  %v4192_v30 = vand.u32 2147483648, %v4180_v15  ;;  %vm4186_vm14 = vweird.f32 %v4180_v15  ;;  %v4190_v12 = vand.u32 2147483647, %v4180_v15 }
0x363b   :  { %6008 = vpow2.f32 %v5561_v61 }
0x363c   :  { %v4193_v10 = vor.u32 1.1754944e-38, %v4192_v30  ;;  %vm4191_vm6 = vcmp.eq.f32.partialorder %v4190_v12, 8.507059e+37 }
0x3640   :  { %v6007_v50 = vpop.eup %6006 }
0x3641   :  { %v4182_v59 = vmul.f32 %v6007_v50, %v4180_v15  ;;  %v6009_v6 = vpop.eup %6008  ;;  %vm4187_vm13 = vweird.f32 %v6007_v50 }
0x3642   :  { %v4217_v52 = vadd.f32 1.0, %v6009_v6  ;;  %vm4188_vm7 = vmor %vm4186_vm14, %vm4187_vm13 }
0x3643   :  { %v4183_v62 = vsub.f32 1.0, %v4182_v59 }
0x3644   :  { %6010 = vrcp.f32 %v4217_v52  ;;  %v4229_v18 = vand.u32 2147483648, %v4217_v52  ;;  %vm4223_vm11 = vweird.f32 %v4217_v52  ;;  %v4227_v19 = vand.u32 2147483647, %v4217_v52 }
0x3645   :  { %v4184_v17 = vmul.f32 %v6007_v50, %v4183_v62 }
0x3646   :  { %v4230_v40 = vor.u32 1.1754944e-38, %v4229_v18  ;;  %vm4228_vm15 = vcmp.eq.f32.partialorder %v4227_v19, 8.507059e+37 }
0x3647   :  { %v4185_v13 = vadd.f32 %v6007_v50, %v4184_v17 }
0x3649   :  { %v4189_v51 = vsel %vm4188_vm7, %v6007_v50, %v4185_v13 }
0x364a   :  { %v4194_v21 = vsel %vm4191_vm6, %v4193_v10, %v4189_v51  ;;  %v6011_v2 = vpop.eup %6010 }
0x364b   :  { %v4219_v24 = vmul.f32 %v6011_v2, %v4217_v52  ;;  %vm4224_vm8 = vweird.f32 %v6011_v2  ;;  %v4197_v15 = vmul.f32 0.0, %v4194_v21 }
0x364c   :  { %vm4225_vm12 = vmor %vm4223_vm11, %vm4224_vm8 }
0x364d   :  { %v4220_v25 = vsub.f32 1.0, %v4219_v24 }
0x364f   :  { %v4221_v37 = vmul.f32 %v6011_v2, %v4220_v25  ;;  %v4260_v25 = vrot.slane %v8191_v23, 2 }
0x3651   :  { %v4222_v39 = vadd.f32 %v6011_v2, %v4221_v37 }
0x3653   :  { %v4226_v43 = vsel %vm4225_vm12, %v6011_v2, %v4222_v39 }
0x3654   :  { %v4231_v45 = vsel %vm4228_vm15, %v4230_v40, %v4226_v43 }
0x3655   :  { %v4234_v61 = vmul.f32 0.0, %v4231_v45 }
0x368e   :  { %v4200_v47 = vpop.permute.xlu2 %4199 }
0x368f   :  { %v4202_v27 = vmul.f32 %v4200_v47, %v4194_v21 }
0x3691   :  { %4204 = vrot.lane.b32.xlu1 %v4202_v27, %s6516_s1 }
0x36a9   :  { %v4237_v41 = vpop.permute.xlu0 %4236 }
0x36aa   :  { %v4239_v58 = vmul.f32 %v4237_v41, %v4231_v45 }
0x36ac   :  { %4241 = vrot.lane.b32.xlu2 %v4239_v58, %s6516_s1 }
0x3703   :  { %v4205_v50 = vpop.permute.xlu1 %4204 }
0x3704   :  { %v8201_v59 = vadd.f32 %v4205_v50, %v4197_v15 }
0x3706   :  { %6012 = vtanh.f32 %v8201_v59  ;;  %v4242_v62 = vpop.permute.xlu2 %4241 }
0x3707   :  { %v8204_v17 = vadd.f32 %v4242_v62, %v4234_v61 }
0x3709   :  { %6014 = vtanh.f32 %v8204_v17 }
0x370c   :  { %v6013_v6 = vpop.eup %6012 }
0x370d   :  { %4210 = vrot.lane.b32.xlu0 %v6013_v6, %s6515_s27 }
0x370f   :  { %v6015_v13 = vpop.eup %6014 }
0x3710   :  { %4247 = vrot.lane.b32.xlu1 %v6015_v13, %s6515_s27 }
0x377f   :  { %v4211_v30 = vpop.permute.xlu0 %4210 }
0x3780   :  { %v4213_v52 = vmul.f32 %v4211_v30, %v4194_v21  ;;  %v8230_v21 = vpop.f32.mrf.mxu2 }
0x3782   :  { %v4248_v12 = vpop.permute.xlu1 %4247  ;;  %4252 = vrot.lane.b32.xlu2 %v4213_v52, %s6516_s1 }
0x3783   :  { %v4250_v51 = vmul.f32 %v4248_v12, %v4231_v45 }
0x3785   :  { %4256 = vrot.lane.b32.xlu0 %v4250_v51, %s6515_s27 }
0x37dc   :  { %v4253_v10 = vpop.permute.xlu2 %4252 }
0x37f7   :  { %v4257_v47 = vpop.permute.xlu0 %4256 }
0x37f8   :  { %v4259_v27 = vsel %vm460_vm9, %v4253_v10, %v4257_v47 }
0x37f9   :  { %5562 = vmatmul.msk.f32.vlgmr.msrb.gmra.mxu2 %vm332_vm10, %v4259_v27  ;;  %5563 = vmatmul.msk.f32.vlgmr.msra.gmra.mxu3 %vm332_vm10, %v4259_v27 }
0x37fa   :  { %4835 = vmatpush.msrb.mxu2 %v8055_v3  ;;  %4855 = vmatpush.msra.mxu3 %v8057_v4 }
0x37fc   :  { %4836 = vmatpush.msrb.mxu2 %v8059_v42  ;;  %4856 = vmatpush.msra.mxu3 %v8063_v53 }
0x37fe   :  { %4837 = vmatpush.msrb.mxu2 %v8065_v44  ;;  %4857 = vmatpush.msra.mxu3 %v8067_v55 }
0x3800   :  { %4838 = vmatpush.msrb.mxu2 %v8073_v38  ;;  %4858 = vmatpush.msra.mxu3 %v8083_v63 }
0x3802   :  { %4839 = vmatpush.msrb.mxu2 %v8085_v60  ;;  %4859 = vmatpush.msra.mxu3 %v8087_v31 }
0x3804   :  { %4840 = vmatpush.msrb.mxu2 %v8091_v26  ;;  %4860 = vmatpush.msra.mxu3 %v8097_v16 }
0x3806   :  { %4841 = vmatpush.msrb.mxu2 %v8099_v9  ;;  %4861 = vmatpush.msra.mxu3 %v8101_v56 }
0x3808   :  { %4842 = vmatpush.msrb.mxu2 %v8103_v35  ;;  %4862 = vmatpush.msra.mxu3 %v8113_v33 }
0x387c   :  { %v4282_v2 = vpop.f32.mrf.mxu2  ;;  %v4302_v24 = vpop.f32.mrf.mxu3 }
0x387d   :  { %v4307_v37 = vrot.slane %v4282_v2, 6  ;;  %v4308_v39 = vrot.slane %v4302_v24, 6 }
0x387f   :  { %v4311_v18 = vadd.f32 %v4307_v37, %v8189_v0  ;;  %v4312_v19 = vadd.f32 %v4308_v39, %v4260_v25 }
0x3881   :  { %6016 = vtanh.f32 %v4311_v18  ;;  %v5565_v41 = vmul.f32 -1.442695, %v4312_v19  ;;  %v5564_v50 = vmul.f32 -1.442695, %v4311_v18 }
0x3882   :  { %6018 = vtanh.f32 %v4312_v19 }
0x3883   :  { %6020 = vpow2.f32 %v5565_v41 }
0x3887   :  { %v6017_v43 = vpop.eup %6016 }
0x3888   :  { %v6019_v40 = vpop.eup %6018  ;;  %4338 = vrot.lane.b32.xlu1 %v6017_v43, %s6515_s27 }
0x3889   :  { %4378 = vrot.lane.b32.xlu2 %v6019_v40, %s6515_s27  ;;  %v6021_v45 = vpop.eup %6020 }
0x388a   :  { %v4356_v58 = vadd.f32 1.0, %v6021_v45 }
0x388c   :  { %6022 = vrcp.f32 %v4356_v58  ;;  %v4368_v12 = vand.u32 2147483648, %v4356_v58  ;;  %vm4362_vm1 = vweird.f32 %v4356_v58  ;;  %v4366_v51 = vand.u32 2147483647, %v4356_v58 }
0x388d   :  { %6024 = vpow2.f32 %v5564_v50 }
0x388e   :  { %v4369_v47 = vor.u32 1.1754944e-38, %v4368_v12  ;;  %vm4367_vm3 = vcmp.eq.f32.partialorder %v4366_v51, 8.507059e+37 }
0x3892   :  { %v6023_v15 = vpop.eup %6022 }
0x3893   :  { %v4358_v61 = vmul.f32 %v6023_v15, %v4356_v58  ;;  %v6025_v6 = vpop.eup %6024  ;;  %vm4363_vm0 = vweird.f32 %v6023_v15 }
0x3894   :  { %v4316_v30 = vadd.f32 1.0, %v6025_v6  ;;  %vm4364_vm2 = vmor %vm4362_vm1, %vm4363_vm0 }
0x3895   :  { %v4359_v62 = vsub.f32 1.0, %v4358_v61 }
0x3896   :  { %6026 = vrcp.f32 %v4316_v30  ;;  %v4328_v40 = vand.u32 2147483648, %v4316_v30  ;;  %vm4322_vm5 = vweird.f32 %v4316_v30  ;;  %v4326_v41 = vand.u32 2147483647, %v4316_v30 }
0x3897   :  { %v4360_v13 = vmul.f32 %v6023_v15, %v4359_v62  ;;  %v4374_v62 = vrot.slane %v8204_v17, 6 }
0x3898   :  { %v4329_v58 = vor.u32 1.1754944e-38, %v4328_v40  ;;  %vm4327_vm14 = vcmp.eq.f32.partialorder %v4326_v41, 8.507059e+37 }
0x3899   :  { %v4361_v52 = vadd.f32 %v6023_v15, %v4360_v13 }
0x389b   :  { %v4365_v10 = vsel %vm4364_vm2, %v6023_v15, %v4361_v52 }
0x389c   :  { %v4370_v2 = vsel %vm4367_vm3, %v4369_v47, %v4365_v10  ;;  %v6027_v24 = vpop.eup %6026 }
0x389d   :  { %v4318_v39 = vmul.f32 %v6027_v24, %v4316_v30  ;;  %vm4323_vm4 = vweird.f32 %v6027_v24  ;;  %v4376_v6 = vmul.f32 %v4374_v62, %v4370_v2  ;;  %v4334_v30 = vrot.slane %v8201_v59, 6 }
0x389e   :  { %vm4324_vm13 = vmor %vm4322_vm5, %vm4323_vm4 }
0x389f   :  { %v4319_v18 = vsub.f32 1.0, %v4318_v39 }
0x38a1   :  { %v4320_v19 = vmul.f32 %v6027_v24, %v4319_v18 }
0x38a3   :  { %v4321_v43 = vadd.f32 %v6027_v24, %v4320_v19 }
0x38a5   :  { %v4325_v45 = vsel %vm4324_vm13, %v6027_v24, %v4321_v43 }
0x38a6   :  { %v4330_v50 = vsel %vm4327_vm14, %v4329_v58, %v4325_v45 }
0x38a7   :  { %v4336_v51 = vmul.f32 %v4334_v30, %v4330_v50 }
0x38e3   :  { %v4379_v27 = vpop.permute.xlu2 %4378 }
0x38e4   :  { %v4381_v37 = vmul.f32 %v4379_v27, %v4370_v2 }
0x38e6   :  { %4383 = vrot.lane.b32.xlu1 %v4381_v37, %s6516_s1 }
0x38fa   :  { %v4339_v15 = vpop.permute.xlu1 %4338 }
0x38fb   :  { %v4341_v61 = vmul.f32 %v4339_v15, %v4330_v50 }
0x38fd   :  { %4343 = vrot.lane.b32.xlu0 %v4341_v61, %s6516_s1 }
0x3958   :  { %v4384_v13 = vpop.permute.xlu1 %4383 }
0x3959   :  { %v8241_v52 = vadd.f32 %v4384_v13, %v4376_v6 }
0x395b   :  { %6028 = vtanh.f32 %v8241_v52 }
0x3961   :  { %v6029_v12 = vpop.eup %6028 }
0x3962   :  { %4389 = vrot.lane.b32.xlu0 %v6029_v12, %s6515_s27 }
0x396f   :  { %v4344_v10 = vpop.permute.xlu0 %4343 }
0x3970   :  { %v8246_v47 = vadd.f32 %v4344_v10, %v4336_v51 }
0x3972   :  { %6030 = vtanh.f32 %v8246_v47 }
0x3978   :  { %v6031_v27 = vpop.eup %6030 }
0x3979   :  { %4349 = vrot.lane.b32.xlu2 %v6031_v27, %s6515_s27 }
0x39d3   :  { %v4350_v17 = vpop.permute.xlu2 %4349 }
0x39d4   :  { %v4390_v24 = vpop.permute.xlu0 %4389  ;;  %v4352_v37 = vmul.f32 %v4350_v17, %v4330_v50 }
0x39d5   :  { %v4392_v39 = vmul.f32 %v4390_v24, %v4370_v2 }
0x39d6   :  { %4394 = vrot.lane.b32.xlu1 %v4352_v37, %s6516_s1 }
0x39d7   :  { %4398 = vrot.lane.b32.xlu2 %v4392_v39, %s6515_s27 }
0x3a31   :  { %v4399_v18 = vpop.permute.xlu2 %4398 }
0x3a48   :  { %v4395_v19 = vpop.permute.xlu1 %4394 }
0x3a49   :  { %v4401_v59 = vsel %vm460_vm9, %v4395_v19, %v4399_v18 }
0x3a4a   :  { %v4403_v43 = vrot.slane %v4401_v59, 2 }
0x3a4c   :  { %5566 = vmatmul.msk.f32.vlgmr.msrb.gmra.mxu0 %vm332_vm10, %v4403_v43  ;;  %5567 = vmatmul.msk.f32.vlgmr.msra.gmra.mxu1 %vm332_vm10, %v4403_v43 }
0x3a4d   :  { %4976 = vmatpush.msrb.mxu0 %v8055_v3  ;;  %4996 = vmatpush.msra.mxu1 %v8057_v4 }
0x3a4f   :  { %4977 = vmatpush.msrb.mxu0 %v8059_v42  ;;  %4997 = vmatpush.msra.mxu1 %v8063_v53 }
0x3a51   :  { %4978 = vmatpush.msrb.mxu0 %v8065_v44  ;;  %4998 = vmatpush.msra.mxu1 %v8067_v55 }
0x3a53   :  { %4979 = vmatpush.msrb.mxu0 %v8073_v38  ;;  %4999 = vmatpush.msra.mxu1 %v8083_v63 }
0x3a55   :  { %4980 = vmatpush.msrb.mxu0 %v8085_v60  ;;  %5000 = vmatpush.msra.mxu1 %v8087_v31 }
0x3a57   :  { %4981 = vmatpush.msrb.mxu0 %v8091_v26  ;;  %5001 = vmatpush.msra.mxu1 %v8097_v16 }
0x3a59   :  { %4982 = vmatpush.msrb.mxu0 %v8099_v9  ;;  %5002 = vmatpush.msra.mxu1 %v8101_v56 }
0x3a5b   :  { %4983 = vmatpush.msrb.mxu0 %v8103_v35  ;;  %5003 = vmatpush.msra.mxu1 %v8113_v33 }
0x3ac9   :  { %v4423_v2 = vpop.f32.mrf.mxu0  ;;  %v4443_v40 = vpop.f32.mrf.mxu1 }
0x3aca   :  { %v4448_v41 = vrot.slane %v4423_v2, 4  ;;  %v4449_v45 = vrot.slane %v4443_v40, 4 }
0x3acc   :  { %v4452_v58 = vadd.f32 %v4448_v41, %v8189_v0  ;;  %v4453_v15 = vadd.f32 %v4449_v45, %v4133_v57 }
0x3ace   :  { %6032 = vtanh.f32 %v4452_v58  ;;  %v5568_v62 = vmul.f32 -1.442695, %v4452_v58  ;;  %v5569_v6 = vmul.f32 -1.442695, %v4453_v15 }
0x3acf   :  { %6034 = vtanh.f32 %v4453_v15 }
0x3ad0   :  { %6036 = vpow2.f32 %v5568_v62 }
0x3ad1   :  { %6038 = vpow2.f32 %v5569_v6 }
0x3ad4   :  { %v6033_v50 = vpop.eup %6032 }
0x3ad5   :  { %v6035_v61 = vpop.eup %6034  ;;  %4479 = vrot.lane.b32.xlu0 %v6033_v50, %s6515_s27 }
0x3ad6   :  { %4519 = vrot.lane.b32.xlu1 %v6035_v61, %s6515_s27  ;;  %v6037_v13 = vpop.eup %6036 }
0x3ad7   :  { %v6039_v12 = vpop.eup %6038  ;;  %v4457_v30 = vadd.f32 1.0, %v6037_v13 }
0x3ad8   :  { %v4497_v51 = vadd.f32 1.0, %v6039_v12 }
0x3ad9   :  { %6040 = vrcp.f32 %v4457_v30  ;;  %v4469_v43 = vand.u32 2147483648, %v4457_v30  ;;  %vm4463_vm8 = vweird.f32 %v4457_v30  ;;  %v4467_v40 = vand.u32 2147483647, %v4457_v30 }
0x3ada   :  { %6042 = vrcp.f32 %v4497_v51  ;;  %v4509_v2 = vand.u32 2147483648, %v4497_v51  ;;  %vm4503_vm11 = vweird.f32 %v4497_v51  ;;  %v4507_v41 = vand.u32 2147483647, %v4497_v51 }
0x3adb   :  { %v4470_v15 = vor.u32 1.1754944e-38, %v4469_v43  ;;  %vm4468_vm0 = vcmp.eq.f32.partialorder %v4467_v40, 8.507059e+37 }
0x3adc   :  { %v4510_v50 = vor.u32 1.1754944e-38, %v4509_v2  ;;  %vm4508_vm1 = vcmp.eq.f32.partialorder %v4507_v41, 8.507059e+37 }
0x3adf   :  { %v6041_v10 = vpop.eup %6040 }
0x3ae0   :  { %v6043_v57 = vpop.eup %6042  ;;  %v4459_v27 = vmul.f32 %v6041_v10, %v4457_v30  ;;  %vm4464_vm7 = vweird.f32 %v6041_v10  ;;  %v4475_v30 = vrot.slane %v8246_v47, 6 }
0x3ae1   :  { %v4499_v17 = vmul.f32 %v6043_v57, %v4497_v51  ;;  %vm4504_vm6 = vweird.f32 %v6043_v57  ;;  %vm4465_vm12 = vmor %vm4463_vm8, %vm4464_vm7 }
0x3ae2   :  { %v4460_v24 = vsub.f32 1.0, %v4459_v27  ;;  %vm4505_vm15 = vmor %vm4503_vm11, %vm4504_vm6 }
0x3ae3   :  { %v4500_v37 = vsub.f32 1.0, %v4499_v17 }
0x3ae4   :  { %v4461_v39 = vmul.f32 %v6041_v10, %v4460_v24  ;;  %v4515_v24 = vrot.slane %v8241_v52, 6 }
0x3ae5   :  { %v4501_v18 = vmul.f32 %v6043_v57, %v4500_v37 }
0x3ae6   :  { %v4462_v19 = vadd.f32 %v6041_v10, %v4461_v39 }
0x3ae7   :  { %v4502_v59 = vadd.f32 %v6043_v57, %v4501_v18 }
0x3ae8   :  { %v4466_v45 = vsel %vm4465_vm12, %v6041_v10, %v4462_v19 }
0x3ae9   :  { %v4506_v58 = vsel %vm4505_vm15, %v6043_v57, %v4502_v59  ;;  %v4471_v62 = vsel %vm4468_vm0, %v4470_v15, %v4466_v45 }
0x3aea   :  { %v4511_v13 = vsel %vm4508_vm1, %v4510_v50, %v4506_v58  ;;  %v4477_v51 = vmul.f32 %v4475_v30, %v4471_v62 }
0x3aeb   :  { %v4517_v37 = vmul.f32 %v4515_v24, %v4511_v13 }
0x3b47   :  { %v4480_v61 = vpop.permute.xlu0 %4479 }
0x3b48   :  { %v4520_v6 = vpop.permute.xlu1 %4519  ;;  %v4482_v12 = vmul.f32 %v4480_v61, %v4471_v62 }
0x3b49   :  { %v4522_v27 = vmul.f32 %v4520_v6, %v4511_v13 }
0x3b4a   :  { %4484 = vrot.lane.b32.xlu2 %v4482_v12, %s6516_s1 }
0x3b4b   :  { %4524 = vrot.lane.b32.xlu0 %v4522_v27, %s6516_s1 }
0x3ba4   :  { %v4485_v17 = vpop.permute.xlu2 %4484 }
0x3ba5   :  { %v8279_v10 = vadd.f32 %v4485_v17, %v4477_v51 }
0x3ba7   :  { %6044 = vtanh.f32 %v8279_v10 }
0x3bad   :  { %v6045_v57 = vpop.eup %6044 }
0x3bae   :  { %4490 = vrot.lane.b32.xlu1 %v6045_v57, %s6515_s27 }
0x3bbd   :  { %v4525_v39 = vpop.permute.xlu0 %4524 }
0x3bbe   :  { %v8284_v18 = vadd.f32 %v4525_v39, %v4517_v37 }
0x3bc0   :  { %6046 = vtanh.f32 %v8284_v18 }
0x3bc6   :  { %v6047_v19 = vpop.eup %6046 }
0x3bc7   :  { %4530 = vrot.lane.b32.xlu2 %v6047_v19, %s6515_s27 }
0x3c20   :  { %v4491_v47 = vpop.permute.xlu1 %4490 }
0x3c21   :  { %v4531_v59 = vpop.permute.xlu2 %4530  ;;  %v4493_v43 = vmul.f32 %v4491_v47, %v4471_v62 }
0x3c22   :  { %v4533_v2 = vmul.f32 %v4531_v59, %v4511_v13 }
0x3c23   :  { %4535 = vrot.lane.b32.xlu0 %v4493_v43, %s6516_s1  ;;  %v4616_v43 = vrot.slane %v8279_v10, 6 }
0x3c24   :  { %4539 = vrot.lane.b32.xlu1 %v4533_v2, %s6515_s27  ;;  %v4656_v2 = vrot.slane %v8284_v18, 6 }
0x3c95   :  { %v4536_v40 = vpop.permute.xlu0 %4535 }
0x3c96   :  { %v4540_v41 = vpop.permute.xlu1 %4539 }
0x3c97   :  { %v4542_v52 = vsel %vm460_vm9, %v4536_v40, %v4540_v41 }
0x3c98   :  { %v4544_v45 = vrot.slane %v4542_v52, 4 }
0x3c9a   :  { %5570 = vmatmul.msk.f32.vlgmr.msra.gmra.mxu2 %vm332_vm10, %v4544_v45  ;;  %5571 = vmatmul.msk.f32.vlgmr.msrb.gmra.mxu3 %vm332_vm10, %v4544_v45 }
0x3c9b   :  { %5117 = vmatpush.msra.mxu2 %v8055_v3  ;;  %5137 = vmatpush.msrb.mxu3 %v8057_v4 }
0x3c9d   :  { %5118 = vmatpush.msra.mxu2 %v8059_v42  ;;  %5138 = vmatpush.msrb.mxu3 %v8063_v53 }
0x3c9f   :  { %5119 = vmatpush.msra.mxu2 %v8065_v44  ;;  %5139 = vmatpush.msrb.mxu3 %v8067_v55 }
0x3ca1   :  { %5120 = vmatpush.msra.mxu2 %v8073_v38  ;;  %5140 = vmatpush.msrb.mxu3 %v8083_v63 }
0x3ca3   :  { %5121 = vmatpush.msra.mxu2 %v8085_v60  ;;  %5141 = vmatpush.msrb.mxu3 %v8087_v31 }
0x3ca5   :  { %5122 = vmatpush.msra.mxu2 %v8091_v26  ;;  %5142 = vmatpush.msrb.mxu3 %v8097_v16 }
0x3ca7   :  { %5123 = vmatpush.msra.mxu2 %v8099_v9  ;;  %5143 = vmatpush.msrb.mxu3 %v8101_v56 }
0x3ca9   :  { %5124 = vmatpush.msra.mxu2 %v8103_v35  ;;  %5144 = vmatpush.msrb.mxu3 %v8113_v33 }
0x3d1d   :  { %v4564_v3 = vpop.f32.mrf.mxu2  ;;  %v4584_v4 = vpop.f32.mrf.mxu3 }
0x3d1e   :  { %v4589_v42 = vrot.slane %v4564_v3, 2  ;;  %v4590_v53 = vrot.slane %v4584_v4, 2 }
0x3d20   :  { %v4593_v44 = vadd.f32 %v4589_v42, %v8189_v0  ;;  %v4594_v55 = vadd.f32 %v4590_v53, %v4260_v25 }
0x3d22   :  { %6048 = vtanh.f32 %v4593_v44  ;;  %v5572_v60 = vmul.f32 -1.442695, %v4593_v44  ;;  %v5573_v9 = vmul.f32 -1.442695, %v4594_v55 }
0x3d23   :  { %6050 = vtanh.f32 %v4594_v55 }
0x3d24   :  { %6052 = vpow2.f32 %v5572_v60 }
0x3d28   :  { %v6049_v38 = vpop.eup %6048 }
0x3d29   :  { %v6051_v63 = vpop.eup %6050  ;;  %4620 = vrot.lane.b32.xlu2 %v6049_v38, %s6515_s27 }
0x3d2a   :  { %4660 = vrot.lane.b32.xlu0 %v6051_v63, %s6515_s27  ;;  %v6053_v31 = vpop.eup %6052 }
0x3d2b   :  { %v4598_v26 = vadd.f32 1.0, %v6053_v31 }
0x3d2d   :  { %6054 = vrcp.f32 %v4598_v26  ;;  %v4610_v58 = vand.u32 2147483648, %v4598_v26  ;;  %vm4604_vm3 = vweird.f32 %v4598_v26  ;;  %v4608_v15 = vand.u32 2147483647, %v4598_v26 }
0x3d2e   :  { %6056 = vpow2.f32 %v5573_v9  ;;  %v4046_v9 = vadd.f32 %v4040_v46, %v8181_v5 }
0x3d2f   :  { %v4611_v61 = vor.u32 1.1754944e-38, %v4610_v58  ;;  %vm4609_vm5 = vcmp.eq.f32.partialorder %v4608_v15, 8.507059e+37 }
0x3d33   :  { %v6055_v16 = vpop.eup %6054 }
0x3d34   :  { %v4600_v56 = vmul.f32 %v6055_v16, %v4598_v26  ;;  %v6057_v0 = vpop.eup %6056  ;;  %vm4605_vm2 = vweird.f32 %v6055_v16  ;;  %v4045_v26 = vadd.f32 %v4041_v28, %v8175_v48 }
0x3d35   :  { %v4638_v23 = vadd.f32 1.0, %v6057_v0  ;;  %vm4606_vm4 = vmor %vm4604_vm3, %vm4605_vm2 }
0x3d36   :  { %v4601_v35 = vsub.f32 1.0, %v4600_v56  ;;  %v8341_v56 = vadd.f32 %v8230_v21, %v4046_v9 }
0x3d37   :  { %6058 = vrcp.f32 %v4638_v23  ;;  %v4650_v57 = vand.u32 2147483648, %v4638_v23  ;;  %vm4644_vm14 = vweird.f32 %v4638_v23  ;;  %v4648_v24 = vand.u32 2147483647, %v4638_v23 }
0x3d38   :  { %v4602_v33 = vmul.f32 %v6055_v16, %v4601_v35 }
0x3d39   :  { %v4651_v39 = vor.u32 1.1754944e-38, %v4650_v57  ;;  %vm4649_vm6 = vcmp.eq.f32.partialorder %v4648_v24, 8.507059e+37 }
0x3d3a   :  { %v4603_v25 = vadd.f32 %v6055_v16, %v4602_v33 }
0x3d3c   :  { %v4607_v50 = vsel %vm4606_vm4, %v6055_v16, %v4603_v25  ;;  %v8335_v16 = vadd.f32 %v8179_v36, %v4045_v26 }
0x3d3d   :  { %v4612_v6 = vsel %vm4609_vm5, %v4611_v61, %v4607_v50  ;;  %v6059_v12 = vpop.eup %6058 }
0x3d3e   :  { %v4640_v27 = vmul.f32 %v6059_v12, %v4638_v23  ;;  %vm4645_vm13 = vweird.f32 %v6059_v12  ;;  %v4618_v40 = vmul.f32 %v4616_v43, %v4612_v6  ;;  %v4685_v35 = vrot.slane %v8335_v16, 6 }
0x3d3f   :  { %vm4646_vm7 = vmor %vm4644_vm14, %vm4645_vm13 }
0x3d40   :  { %v4641_v30 = vsub.f32 1.0, %v4640_v27 }
0x3d42   :  { %v4642_v51 = vmul.f32 %v6059_v12, %v4641_v30 }
0x3d44   :  { %v4643_v17 = vadd.f32 %v6059_v12, %v4642_v51 }
0x3d46   :  { %v4647_v37 = vsel %vm4646_vm7, %v6059_v12, %v4643_v17 }
0x3d47   :  { %v4652_v47 = vsel %vm4649_vm6, %v4651_v39, %v4647_v37 }
0x3d48   :  { %v4658_v41 = vmul.f32 %v4656_v2, %v4652_v47 }
0x3d83   :  { %v4621_v62 = vpop.permute.xlu2 %4620 }
0x3d84   :  { %v4623_v13 = vmul.f32 %v4621_v62, %v4612_v6 }
0x3d86   :  { %4625 = vrot.lane.b32.xlu1 %v4623_v13, %s6516_s1 }
0x3d9c   :  { %v4661_v19 = vpop.permute.xlu0 %4660 }
0x3d9d   :  { %v4663_v59 = vmul.f32 %v4661_v19, %v4652_v47 }
0x3d9f   :  { %4665 = vrot.lane.b32.xlu2 %v4663_v59, %s6516_s1 }
0x3df8   :  { %v4626_v52 = vpop.permute.xlu1 %4625 }
0x3df9   :  { %v4666_v45 = vpop.permute.xlu2 %4665  ;;  %v8318_v3 = vadd.f32 %v4626_v52, %v4618_v40 }
0x3dfa   :  { %v8320_v4 = vadd.f32 %v4666_v45, %v4658_v41 }
0x3dfb   :  { %6060 = vtanh.f32 %v8318_v3 }
0x3dfc   :  { %6062 = vtanh.f32 %v8320_v4 }
0x3e01   :  { %v6061_v42 = vpop.eup %6060 }
0x3e02   :  { %v6063_v53 = vpop.eup %6062  ;;  %4631 = vrot.lane.b32.xlu0 %v6061_v42, %s6515_s27  ;;  %v4794_v42 = vrot.slane %v8320_v4, 6 }
0x3e03   :  { %4671 = vrot.lane.b32.xlu1 %v6063_v53, %s6515_s27 }
0x3e74   :  { %v4632_v10 = vpop.permute.xlu0 %4631 }
0x3e75   :  { %v4672_v18 = vpop.permute.xlu1 %4671  ;;  %v4634_v44 = vmul.f32 %v4632_v10, %v4612_v6 }
0x3e76   :  { %v4674_v55 = vmul.f32 %v4672_v18, %v4652_v47 }
0x3e77   :  { %4676 = vrot.lane.b32.xlu2 %v4634_v44, %s6516_s1 }
0x3e78   :  { %4680 = vrot.lane.b32.xlu0 %v4674_v55, %s6515_s27  ;;  %v4754_v55 = vrot.slane %v8318_v3, 6 }
0x3ed1   :  { %v4677_v38 = vpop.permute.xlu2 %4676 }
0x3eea   :  { %v4681_v63 = vpop.permute.xlu0 %4680 }
0x3eeb   :  { %v4683_v60 = vsel %vm460_vm9, %v4677_v38, %v4681_v63 }
0x3eec   :  { %v4688_v31 = vrot.slane %v4683_v60, 6 }
0x3eee   :  { %5574 = vmatmul.msk.f32.vlgmr.msra.gmra.mxu0 %vm332_vm10, %v4688_v31  ;;  %5575 = vmatmul.msk.f32.vlgmr.msrb.gmra.mxu1 %vm332_vm10, %v4688_v31 }
0x3f6b   :  { %v4708_v33 = vpop.f32.mrf.mxu0  ;;  %v4728_v0 = vpop.f32.mrf.mxu1 }
0x3f6c   :  { %v4731_v23 = vadd.f32 %v4708_v33, %v8341_v56  ;;  %v4732_v25 = vadd.f32 %v4728_v0, %v4685_v35 }
0x3f6e   :  { %6064 = vtanh.f32 %v4731_v23  ;;  %v5577_v49 = vmul.f32 -1.442695, %v4732_v25  ;;  %v5576_v21 = vmul.f32 -1.442695, %v4731_v23 }
0x3f6f   :  { %6066 = vtanh.f32 %v4732_v25 }
0x3f70   :  { %6068 = vpow2.f32 %v5577_v49 }
0x3f74   :  { %v6065_v48 = vpop.eup %6064 }
0x3f75   :  { %v6067_v36 = vpop.eup %6066  ;;  %4758 = vrot.lane.b32.xlu1 %v6065_v48, %s6515_s27 }
0x3f76   :  { %4798 = vrot.lane.b32.xlu2 %v6067_v36, %s6515_s27  ;;  %v6069_v5 = vpop.eup %6068  ;;  %v4822_v36 = vrot.slane %v8335_v16, 2 }
0x3f77   :  { %v4776_v46 = vadd.f32 1.0, %v6069_v5 }
0x3f79   :  { %6070 = vrcp.f32 %v4776_v46  ;;  %v4788_v13 = vand.u32 2147483648, %v4776_v46  ;;  %vm4782_vm11 = vweird.f32 %v4776_v46  ;;  %v4786_v12 = vand.u32 2147483647, %v4776_v46 }
0x3f7a   :  { %6072 = vpow2.f32 %v5576_v21 }
0x3f7b   :  { %v4789_v30 = vor.u32 1.1754944e-38, %v4788_v13  ;;  %vm4787_vm15 = vcmp.eq.f32.partialorder %v4786_v12, 8.507059e+37 }
0x3f7f   :  { %v6071_v28 = vpop.eup %6070 }
0x3f80   :  { %v4778_v58 = vmul.f32 %v6071_v28, %v4776_v46  ;;  %v6073_v50 = vpop.eup %6072  ;;  %vm4783_vm8 = vweird.f32 %v6071_v28 }
0x3f81   :  { %v4736_v62 = vadd.f32 1.0, %v6073_v50  ;;  %vm4784_vm12 = vmor %vm4782_vm11, %vm4783_vm8 }
0x3f82   :  { %v4779_v15 = vsub.f32 1.0, %v4778_v58 }
0x3f83   :  { %6074 = vrcp.f32 %v4736_v62  ;;  %v4748_v59 = vand.u32 2147483648, %v4736_v62  ;;  %vm4742_vm1 = vweird.f32 %v4736_v62  ;;  %v4746_v43 = vand.u32 2147483647, %v4736_v62 }
0x3f84   :  { %v4780_v61 = vmul.f32 %v6071_v28, %v4779_v15 }
0x3f85   :  { %v4749_v40 = vor.u32 1.1754944e-38, %v4748_v59  ;;  %vm4747_vm3 = vcmp.eq.f32.partialorder %v4746_v43, 8.507059e+37 }
0x3f86   :  { %v4781_v6 = vadd.f32 %v6071_v28, %v4780_v61 }
0x3f88   :  { %v4785_v27 = vsel %vm4784_vm12, %v6071_v28, %v4781_v6 }
0x3f89   :  { %v4790_v17 = vsel %vm4787_vm15, %v4789_v30, %v4785_v27  ;;  %v6075_v57 = vpop.eup %6074 }
0x3f8a   :  { %v4738_v37 = vmul.f32 %v6075_v57, %v4736_v62  ;;  %vm4743_vm0 = vweird.f32 %v6075_v57  ;;  %v4796_v53 = vmul.f32 %v4794_v42, %v4790_v17 }
0x3f8b   :  { %vm4744_vm2 = vmor %vm4742_vm1, %vm4743_vm0 }
0x3f8c   :  { %v4739_v39 = vsub.f32 1.0, %v4738_v37 }
0x3f8e   :  { %v4740_v19 = vmul.f32 %v6075_v57, %v4739_v39 }
0x3f90   :  { %v4741_v47 = vadd.f32 %v6075_v57, %v4740_v19 }
0x3f92   :  { %v4745_v2 = vsel %vm4744_vm2, %v6075_v57, %v4741_v47 }
0x3f93   :  { %v4750_v52 = vsel %vm4747_vm3, %v4749_v40, %v4745_v2 }
0x3f94   :  { %v4756_v38 = vmul.f32 %v4754_v55, %v4750_v52 }
0x3fd0   :  { %v4799_v51 = vpop.permute.xlu2 %4798 }
0x3fd1   :  { %v4801_v24 = vmul.f32 %v4799_v51, %v4790_v17 }
0x3fd3   :  { %4803 = vrot.lane.b32.xlu1 %v4801_v24, %s6516_s1 }
0x3fe7   :  { %v4759_v41 = vpop.permute.xlu1 %4758 }
0x3fe8   :  { %v4761_v45 = vmul.f32 %v4759_v41, %v4750_v52 }
0x3fea   :  { %4763 = vrot.lane.b32.xlu0 %v4761_v45, %s6516_s1 }
0x4045   :  { %v4804_v10 = vpop.permute.xlu1 %4803 }
0x4046   :  { %v8352_v18 = vadd.f32 %v4804_v10, %v4796_v53 }
0x4048   :  { %6076 = vtanh.f32 %v8352_v18 }
0x404e   :  { %v6077_v44 = vpop.eup %6076 }
0x404f   :  { %4809 = vrot.lane.b32.xlu0 %v6077_v44, %s6515_s27 }
0x405c   :  { %v4764_v63 = vpop.permute.xlu0 %4763 }
0x405d   :  { %v8357_v60 = vadd.f32 %v4764_v63, %v4756_v38 }
0x405f   :  { %6078 = vtanh.f32 %v8357_v60  ;;  %v4896_v63 = vrot.slane %v8357_v60, 6 }
0x4065   :  { %v6079_v31 = vpop.eup %6078 }
0x4066   :  { %4769 = vrot.lane.b32.xlu2 %v6079_v31, %s6515_s27 }
0x40c0   :  { %v4770_v4 = vpop.permute.xlu2 %4769 }
0x40c1   :  { %v4810_v26 = vpop.permute.xlu0 %4809  ;;  %v4772_v9 = vmul.f32 %v4770_v4, %v4750_v52 }
0x40c2   :  { %v4812_v33 = vmul.f32 %v4810_v26, %v4790_v17 }
0x40c3   :  { %4814 = vrot.lane.b32.xlu1 %v4772_v9, %s6516_s1 }
0x40c4   :  { %4818 = vrot.lane.b32.xlu2 %v4812_v33, %s6515_s27  ;;  %v4936_v33 = vrot.slane %v8352_v18, 6 }
0x411e   :  { %v4819_v0 = vpop.permute.xlu2 %4818 }
0x4135   :  { %v4815_v23 = vpop.permute.xlu1 %4814 }
0x4136   :  { %v4821_v3 = vsel %vm460_vm9, %v4815_v23, %v4819_v0 }
0x4137   :  { %5578 = vmatmul.msk.f32.vlgmr.msrb.gmra.mxu2 %vm332_vm10, %v4821_v3  ;;  %5579 = vmatmul.msk.f32.vlgmr.msra.gmra.mxu3 %vm332_vm10, %v4821_v3 }
0x41ba   :  { %v4844_v25 = vpop.f32.mrf.mxu2  ;;  %v4864_v48 = vpop.f32.mrf.mxu3 }
0x41bb   :  { %v4869_v49 = vrot.slane %v4844_v25, 6  ;;  %v4870_v5 = vrot.slane %v4864_v48, 6 }
0x41bd   :  { %v4873_v46 = vadd.f32 %v4869_v49, %v8341_v56  ;;  %v4874_v28 = vadd.f32 %v4870_v5, %v4822_v36 }
0x41bf   :  { %6080 = vtanh.f32 %v4873_v46  ;;  %v5580_v15 = vmul.f32 -1.442695, %v4873_v46  ;;  %v5581_v50 = vmul.f32 -1.442695, %v4874_v28 }
0x41c0   :  { %6082 = vtanh.f32 %v4874_v28 }
0x41c1   :  { %6084 = vpow2.f32 %v5580_v15 }
0x41c2   :  { %6086 = vpow2.f32 %v5581_v50 }
0x41c5   :  { %v6081_v21 = vpop.eup %6080 }
0x41c6   :  { %v6083_v58 = vpop.eup %6082  ;;  %4900 = vrot.lane.b32.xlu0 %v6081_v21, %s6515_s27 }
0x41c7   :  { %4940 = vrot.lane.b32.xlu1 %v6083_v58, %s6515_s27  ;;  %v6085_v61 = vpop.eup %6084 }
0x41c8   :  { %v6087_v62 = vpop.eup %6086  ;;  %v4878_v6 = vadd.f32 1.0, %v6085_v61 }
0x41c9   :  { %v4918_v13 = vadd.f32 1.0, %v6087_v62 }
0x41ca   :  { %6088 = vrcp.f32 %v4878_v6  ;;  %v4890_v47 = vand.u32 2147483648, %v4878_v6  ;;  %vm4884_vm13 = vweird.f32 %v4878_v6  ;;  %v4888_v43 = vand.u32 2147483647, %v4878_v6 }
0x41cb   :  { %6090 = vrcp.f32 %v4918_v13  ;;  %v4930_v59 = vand.u32 2147483648, %v4918_v13  ;;  %vm4924_vm14 = vweird.f32 %v4918_v13  ;;  %v4928_v2 = vand.u32 2147483647, %v4918_v13 }
0x41cc   :  { %v4891_v52 = vor.u32 1.1754944e-38, %v4890_v47  ;;  %vm4889_vm8 = vcmp.eq.f32.partialorder %v4888_v43, 8.507059e+37 }
0x41cd   :  { %v4931_v45 = vor.u32 1.1754944e-38, %v4930_v59  ;;  %vm4929_vm11 = vcmp.eq.f32.partialorder %v4928_v2, 8.507059e+37 }
0x41d0   :  { %v6089_v12 = vpop.eup %6088 }
0x41d1   :  { %v6091_v27 = vpop.eup %6090  ;;  %v4880_v30 = vmul.f32 %v6089_v12, %v4878_v6  ;;  %vm4885_vm4 = vweird.f32 %v6089_v12 }
0x41d2   :  { %v4920_v51 = vmul.f32 %v6091_v27, %v4918_v13  ;;  %vm4925_vm5 = vweird.f32 %v6091_v27  ;;  %vm4886_vm7 = vmor %vm4884_vm13, %vm4885_vm4 }
0x41d3   :  { %v4881_v17 = vsub.f32 1.0, %v4880_v30  ;;  %vm4926_vm6 = vmor %vm4924_vm14, %vm4925_vm5 }
0x41d4   :  { %v4921_v57 = vsub.f32 1.0, %v4920_v51 }
0x41d5   :  { %v4882_v24 = vmul.f32 %v6089_v12, %v4881_v17 }
0x41d6   :  { %v4922_v37 = vmul.f32 %v6091_v27, %v4921_v57 }
0x41d7   :  { %v4883_v39 = vadd.f32 %v6089_v12, %v4882_v24 }
0x41d8   :  { %v4923_v19 = vadd.f32 %v6091_v27, %v4922_v37 }
0x41d9   :  { %v4887_v40 = vsel %vm4886_vm7, %v6089_v12, %v4883_v39 }
0x41da   :  { %v4927_v41 = vsel %vm4926_vm6, %v6091_v27, %v4923_v19  ;;  %v4892_v53 = vsel %vm4889_vm8, %v4891_v52, %v4887_v40 }
0x41db   :  { %v4932_v44 = vsel %vm4929_vm11, %v4931_v45, %v4927_v41  ;;  %v4898_v31 = vmul.f32 %v4896_v63, %v4892_v53 }
0x41dc   :  { %v4938_v0 = vmul.f32 %v4936_v33, %v4932_v44 }
0x4238   :  { %v4901_v42 = vpop.permute.xlu0 %4900 }
0x4239   :  { %v4941_v10 = vpop.permute.xlu1 %4940  ;;  %v4903_v55 = vmul.f32 %v4901_v42, %v4892_v53 }
0x423a   :  { %v4943_v38 = vmul.f32 %v4941_v10, %v4932_v44 }
0x423b   :  { %4905 = vrot.lane.b32.xlu2 %v4903_v55, %s6516_s1 }
0x423c   :  { %4945 = vrot.lane.b32.xlu0 %v4943_v38, %s6516_s1 }
0x4295   :  { %v4906_v4 = vpop.permute.xlu2 %4905 }
0x4296   :  { %v8375_v26 = vadd.f32 %v4906_v4, %v4898_v31 }
0x4298   :  { %6092 = vtanh.f32 %v8375_v26 }
0x429e   :  { %v6093_v9 = vpop.eup %6092 }
0x429f   :  { %4911 = vrot.lane.b32.xlu1 %v6093_v9, %s6515_s27 }
0x42ae   :  { %v4946_v23 = vpop.permute.xlu0 %4945 }
0x42af   :  { %v8380_v3 = vadd.f32 %v4946_v23, %v4938_v0  ;;  %v5037_v23 = vrot.slane %v8375_v26, 6 }
0x42b1   :  { %6094 = vtanh.f32 %v8380_v3 }
0x42b7   :  { %v6095_v25 = vpop.eup %6094 }
0x42b8   :  { %4951 = vrot.lane.b32.xlu2 %v6095_v25, %s6515_s27  ;;  %v5077_v25 = vrot.slane %v8380_v3, 6 }
0x4311   :  { %v4912_v60 = vpop.permute.xlu1 %4911 }
0x4312   :  { %v4952_v48 = vpop.permute.xlu2 %4951  ;;  %v4914_v49 = vmul.f32 %v4912_v60, %v4892_v53 }
0x4313   :  { %v4954_v5 = vmul.f32 %v4952_v48, %v4932_v44 }
0x4314   :  { %4956 = vrot.lane.b32.xlu0 %v4914_v49, %s6516_s1 }
0x4315   :  { %4960 = vrot.lane.b32.xlu1 %v4954_v5, %s6515_s27 }
0x4386   :  { %v4957_v46 = vpop.permute.xlu0 %4956 }
0x4387   :  { %v4961_v28 = vpop.permute.xlu1 %4960 }
0x4388   :  { %v4963_v18 = vsel %vm460_vm9, %v4957_v46, %v4961_v28 }
0x4389   :  { %v4965_v21 = vrot.slane %v4963_v18, 2  ;;  %v2648_v18 = vrot.slane %v7734_v8, 2 }
0x438b   :  { %5582 = vmatmul.msk.f32.vlgmr.msrb.gmra.mxu0 %vm332_vm10, %v4965_v21  ;;  %5583 = vmatmul.msk.f32.vlgmr.msra.gmra.mxu1 %vm332_vm10, %v4965_v21  ;;  %v2652_v21 = vadd.f32 %v2648_v18, %v7539_v14  ;;  %v2649_v14 = vrot.slane %v7736_v54, 2 }
0x4408   :  { %v4985_v58 = vpop.f32.mrf.mxu0  ;;  %v5005_v15 = vpop.f32.mrf.mxu1 }
0x4409   :  { %v5010_v50 = vrot.slane %v4985_v58, 4  ;;  %v5011_v61 = vrot.slane %v5005_v15, 4  ;;  %v5514_v15 = vmul.f32 -1.442695, %v2652_v21 }
0x440b   :  { %v5014_v62 = vadd.f32 %v5010_v50, %v8341_v56  ;;  %v5015_v6 = vadd.f32 %v5011_v61, %v4685_v35 }
0x440d   :  { %6096 = vtanh.f32 %v5014_v62  ;;  %v5584_v27 = vmul.f32 -1.442695, %v5014_v62  ;;  %v5585_v57 = vmul.f32 -1.442695, %v5015_v6 }
0x440e   :  { %6098 = vtanh.f32 %v5015_v6 }
0x440f   :  { %6100 = vpow2.f32 %v5584_v27  ;;  %v2653_v27 = vadd.f32 %v2649_v14, %v2319_v29 }
0x4413   :  { %v6097_v13 = vpop.eup %6096 }
0x4414   :  { %v6099_v12 = vpop.eup %6098  ;;  %5041 = vrot.lane.b32.xlu2 %v6097_v13, %s6515_s27 }
0x4415   :  { %5081 = vrot.lane.b32.xlu0 %v6099_v12, %s6515_s27  ;;  %v6101_v30 = vpop.eup %6100 }
0x4416   :  { %v5019_v51 = vadd.f32 1.0, %v6101_v30 }
0x4418   :  { %6102 = vrcp.f32 %v5019_v51  ;;  %v5031_v59 = vand.u32 2147483648, %v5019_v51  ;;  %vm5025_vm15 = vweird.f32 %v5019_v51  ;;  %v5029_v43 = vand.u32 2147483647, %v5019_v51 }
0x4419   :  { %6104 = vpow2.f32 %v5585_v57 }
0x441a   :  { %v5032_v40 = vor.u32 1.1754944e-38, %v5031_v59  ;;  %vm5030_vm1 = vcmp.eq.f32.partialorder %v5029_v43, 8.507059e+37 }
0x441e   :  { %v6103_v17 = vpop.eup %6102 }
0x441f   :  { %v5021_v24 = vmul.f32 %v6103_v17, %v5019_v51  ;;  %v6105_v35 = vpop.eup %6104  ;;  %vm5026_vm12 = vweird.f32 %v6103_v17 }
0x4420   :  { %v5059_v19 = vadd.f32 1.0, %v6105_v35  ;;  %vm5027_vm0 = vmor %vm5025_vm15, %vm5026_vm12 }
0x4421   :  { %v5022_v37 = vsub.f32 1.0, %v5021_v24 }
0x4422   :  { %6106 = vrcp.f32 %v5059_v19  ;;  %v5071_v38 = vand.u32 2147483648, %v5059_v19  ;;  %vm5065_vm3 = vweird.f32 %v5059_v19  ;;  %v5069_v63 = vand.u32 2147483647, %v5059_v19 }
0x4423   :  { %v5023_v39 = vmul.f32 %v6103_v17, %v5022_v37 }
0x4424   :  { %v5072_v4 = vor.u32 1.1754944e-38, %v5071_v38  ;;  %vm5070_vm5 = vcmp.eq.f32.partialorder %v5069_v63, 8.507059e+37 }
0x4425   :  { %v5024_v47 = vadd.f32 %v6103_v17, %v5023_v39 }
0x4427   :  { %v5028_v2 = vsel %vm5027_vm0, %v6103_v17, %v5024_v47  ;;  %v5515_v47 = vmul.f32 -1.442695, %v2653_v27 }
0x4428   :  { %v5033_v52 = vsel %vm5030_vm1, %v5032_v40, %v5028_v2  ;;  %v6107_v42 = vpop.eup %6106 }
0x4429   :  { %v5061_v53 = vmul.f32 %v6107_v42, %v5059_v19  ;;  %vm5066_vm2 = vweird.f32 %v6107_v42  ;;  %v5039_v60 = vmul.f32 %v5037_v23, %v5033_v52 }
0x442a   :  { %vm5067_vm4 = vmor %vm5065_vm3, %vm5066_vm2 }
0x442b   :  { %v5062_v10 = vsub.f32 1.0, %v5061_v53 }
0x442d   :  { %v5063_v44 = vmul.f32 %v6107_v42, %v5062_v10 }
0x442f   :  { %v5064_v55 = vadd.f32 %v6107_v42, %v5063_v44 }
0x4431   :  { %v5068_v31 = vsel %vm5067_vm4, %v6107_v42, %v5064_v55 }
0x4432   :  { %v5073_v33 = vsel %vm5070_vm5, %v5072_v4, %v5068_v31 }
0x4433   :  { %v5079_v48 = vmul.f32 %v5077_v25, %v5073_v33 }
0x446e   :  { %v5042_v41 = vpop.permute.xlu2 %5041 }
0x446f   :  { %v5044_v45 = vmul.f32 %v5042_v41, %v5033_v52 }
0x4471   :  { %5046 = vrot.lane.b32.xlu1 %v5044_v45, %s6516_s1 }
0x4487   :  { %v5082_v9 = vpop.permute.xlu0 %5081 }
0x4488   :  { %v5084_v0 = vmul.f32 %v5082_v9, %v5073_v33 }
0x448a   :  { %5086 = vrot.lane.b32.xlu2 %v5084_v0, %s6516_s1 }
0x44e3   :  { %v5047_v49 = vpop.permute.xlu1 %5046 }
0x44e4   :  { %v5087_v5 = vpop.permute.xlu2 %5086  ;;  %v8398_v46 = vadd.f32 %v5047_v49, %v5039_v60 }
0x44e5   :  { %v8400_v28 = vadd.f32 %v5087_v5, %v5079_v48 }
0x44e6   :  { %6108 = vtanh.f32 %v8398_v46 }
0x44e7   :  { %6110 = vtanh.f32 %v8400_v28 }
0x44e8   :  { %6112 = vtanh.f32 %v2652_v21 }
0x44e9   :  { %6114 = vpow2.f32 %v5514_v15 }
0x44ec   :  { %v6109_v58 = vpop.eup %6108 }
0x44ed   :  { %v6111_v26 = vpop.eup %6110  ;;  %5052 = vrot.lane.b32.xlu0 %v6109_v58, %s6515_s27 }
0x44ee   :  { %5092 = vrot.lane.b32.xlu1 %v6111_v26, %s6515_s27  ;;  %v6113_v3 = vpop.eup %6112 }
0x44ef   :  { %v6115_v50 = vpop.eup %6114 }
0x44f0   :  { %v2657_v61 = vadd.f32 1.0, %v6115_v50 }
0x44f2   :  { %6116 = vrcp.f32 %v2657_v61  ;;  %v2669_v24 = vand.u32 2147483648, %v2657_v61  ;;  %vm2663_vm14 = vweird.f32 %v2657_v61  ;;  %v2667_v37 = vand.u32 2147483647, %v2657_v61 }
0x44f3   :  { %6118 = vtanh.f32 %v2653_v27  ;;  %v2675_v27 = vrot.slane %v7595_v11, 6 }
0x44f4   :  { %v2670_v39 = vor.u32 1.1754944e-38, %v2669_v24  ;;  %vm2668_vm6 = vcmp.eq.f32.partialorder %v2667_v37, 8.507059e+37  ;;  %6120 = vpow2.f32 %v5515_v47  ;;  %v2715_v47 = vrot.slane %v7600_v32, 6 }
0x44f5   :  { %v5614_v32 = vpack.i.bf16 %v8049_v1, %v7218_v20 }
0x44f6   :  { %2679 = vrot.lane.b32.xlu1 %v6113_v3, %s6515_s27 }
0x44f8   :  { %v6117_v8 = vpop.eup %6116 }
0x44f9   :  { %v2659_v62 = vmul.f32 %v6117_v8, %v2657_v61  ;;  %vm2664_vm13 = vweird.f32 %v6117_v8  ;;  %v6119_v19 = vpop.eup %6118 }
0x44fa   :  { %vm2665_vm7 = vmor %vm2663_vm14, %vm2664_vm13  ;;  %v6121_v59 = vpop.eup %6120 }
0x44fb   :  { %v2660_v6 = vsub.f32 1.0, %v2659_v62  ;;  %v2697_v43 = vadd.f32 1.0, %v6121_v59 }
0x44fd   :  { %v2661_v13 = vmul.f32 %v6117_v8, %v2660_v6  ;;  %6122 = vrcp.f32 %v2697_v43  ;;  %v2709_v55 = vand.u32 2147483648, %v2697_v43  ;;  %vm2703_vm11 = vweird.f32 %v2697_v43 }
0x44fe   :  { %v2707_v38 = vand.u32 2147483647, %v2697_v43 }
0x44ff   :  { %v2662_v57 = vadd.f32 %v6117_v8, %v2661_v13  ;;  %v2710_v31 = vor.u32 1.1754944e-38, %v2709_v55 }
0x4500   :  { %vm2708_vm15 = vcmp.eq.f32.partialorder %v2707_v38, 8.507059e+37 }
0x4501   :  { %v2666_v54 = vsel %vm2665_vm7, %v6117_v8, %v2662_v57  ;;  %vm2747_vm7 = vcmask 785408  }
0x4502   :  { %v8414_v7 = vsel %vm2668_vm6, %v2670_v39, %v2666_v54  ;;  %vm5370_vm6 = vcmask 254976  }
0x4503   :  { %v6123_v2 = vpop.eup %6122  ;;  %v2677_v57 = vmul.f32 %v2675_v27, %v8414_v7 }
0x4504   :  { %v2699_v40 = vmul.f32 %v6123_v2, %v2697_v43  ;;  %vm2704_vm8 = vweird.f32 %v6123_v2 }
0x4505   :  { %vm2705_vm12 = vmor %vm2703_vm11, %vm2704_vm8 }
0x4506   :  { %v2700_v41 = vsub.f32 1.0, %v2699_v40 }
0x455f   :  { %v5053_v12 = vpop.permute.xlu0 %5052 }
0x4560   :  { %v5093_v30 = vpop.permute.xlu1 %5092  ;;  %v5055_v51 = vmul.f32 %v5053_v12, %v5033_v52  ;;  %v2701_v52 = vmul.f32 %v6123_v2, %v2700_v41 }
0x4561   :  { %v5095_v17 = vmul.f32 %v5093_v30, %v5073_v33 }
0x4562   :  { %5097 = vrot.lane.b32.xlu2 %v5055_v51, %s6516_s1  ;;  %v2702_v10 = vadd.f32 %v6123_v2, %v2701_v52 }
0x4563   :  { %5101 = vrot.lane.b32.xlu0 %v5095_v17, %s6515_s27 }
0x4564   :  { %v2706_v63 = vsel %vm2705_vm12, %v6123_v2, %v2702_v10 }
0x4565   :  { %v8422_v4 = vsel %vm2708_vm15, %v2710_v31, %v2706_v63 }
0x4566   :  { %v2717_v2 = vmul.f32 %v2715_v47, %v8422_v4  ;;  %v5338_v47 = vld [vmem:[%s8624_s16 + $0x20] sm:$0xff] }
0x4568   :  { %v2680_v35 = vpop.permute.xlu1 %2679 }
0x4569   :  { %v2682_v29 = vmul.f32 %v2680_v35, %v8414_v7 }
0x456b   :  { %2719 = vrot.lane.b32.xlu0 %v6119_v19, %s6515_s27  ;;  %2684 = vrot.lane.b32.xlu1 %v2682_v29, %s6516_s1 }
0x45bc   :  { %v5098_v45 = vpop.permute.xlu2 %5097 }
0x45d5   :  { %v5102_v42 = vpop.permute.xlu0 %5101 }
0x45d6   :  { %v5104_v53 = vsel %vm460_vm9, %v5098_v45, %v5102_v42 }
0x45d7   :  { %v5106_v44 = vrot.slane %v5104_v53, 4 }
0x45d9   :  { %5586 = vmatmul.msk.f32.vlgmr.msra.gmra.mxu2 %vm332_vm10, %v5106_v44  ;;  %5587 = vmatmul.msk.f32.vlgmr.msrb.gmra.mxu3 %vm332_vm10, %v5106_v44  ;;  %v5218_v44 = vrot.slane %v8400_v28, 6  ;;  %v5619_v28 = vpack.i.bf16 %v8036_v34, %v7221_v22  ;;  %v5281_v22 = vld [vmem:[%s8622_s14 + $0xf0] sm:$0xff]  ;;  %v5264_v34 = vld [vmem:[%s8622_s14 + $0x68] sm:$0xff] }
0x45dd   :  { %v2720_v9 = vpop.permute.xlu0 %2719  ;;  %v2685_v30 = vpop.permute.xlu1 %2684 }
0x45de   :  { %v2722_v33 = vmul.f32 %v2720_v9, %v8422_v4  ;;  %v2687_v37 = vadd.f32 %v2685_v30, %v2677_v57  ;;  %v5178_v9 = vrot.slane %v8398_v46, 6  ;;  %v5282_v46 = vld [vmem:[%s8622_s14 + $0xf8] sm:$0xff] }
0x45df   :  { %5313 = vmatpush.msrb.mxu1 %v5282_v46  ;;  %v5334_v46 = vld [vmem:[%s8624_s16] sm:$0xff] }
0x45e0   :  { %2724 = vrot.lane.b32.xlu1 %v2722_v33, %s6516_s1 }
0x45e1   :  { %5314 = vmatpush.msrb.mxu1 %v5281_v22  ;;  %v5374_v22 = vld [vmem:[%s8626_s18 + $0x10] sm:$0xff] }
0x4652   :  { %v2725_v59 = vpop.permute.xlu1 %2724 }
0x4653   :  { %v2727_v41 = vadd.f32 %v2725_v59, %v2717_v2 }
0x465c   :  { %v5126_v0 = vpop.f32.mrf.mxu2  ;;  %v5146_v25 = vpop.f32.mrf.mxu3 }
0x465d   :  { %v5151_v23 = vrot.slane %v5126_v0, 2  ;;  %v5152_v48 = vrot.slane %v5146_v25, 2  ;;  %v5265_v25 = vld [vmem:[%s8622_s14 + $0x70] sm:$0xff] }
0x465f   :  { %v5155_v60 = vadd.f32 %v5151_v23, %v8341_v56  ;;  %v5156_v49 = vadd.f32 %v5152_v48, %v4822_v36  ;;  %v5266_v23 = vld [vmem:[%s8622_s14 + $0x78] sm:$0xff]  ;;  %v5263_v48 = vld [vmem:[%s8622_s14 + $0x60] sm:$0xff] }
0x4660   :  { %5293 = vmatpush.msra.mxu0 %v5266_v23  ;;  %v5335_v23 = vld [vmem:[%s8624_s16 + $0x8] sm:$0xff] }
0x4661   :  { %6124 = vtanh.f32 %v5155_v60  ;;  %v5588_v21 = vmul.f32 -1.442695, %v5155_v60  ;;  %v5589_v58 = vmul.f32 -1.442695, %v5156_v49  ;;  %v5280_v60 = vld [vmem:[%s8622_s14 + $0xe8] sm:$0xff] }
0x4662   :  { %6126 = vtanh.f32 %v5156_v49  ;;  %5294 = vmatpush.msra.mxu0 %v5265_v25  ;;  %v5279_v49 = vld [vmem:[%s8622_s14 + $0xe0] sm:$0xff]  ;;  %5315 = vmatpush.msrb.mxu1 %v5280_v60  ;;  %v5375_v25 = vld [vmem:[%s8626_s18 + $0x18] sm:$0xff] }
0x4663   :  { %6128 = vpow2.f32 %v5588_v21  ;;  %v5261_v21 = vld [vmem:[%s8622_s14 + $0x50] sm:$0xff]  ;;  %5395 = vmatpush.msra.mxu3 %v5375_v25 }
0x4664   :  { %6130 = vpow2.f32 %v5589_v58  ;;  %5295 = vmatpush.msra.mxu0 %v5264_v34  ;;  %5316 = vmatpush.msrb.mxu1 %v5279_v49  ;;  %v5277_v58 = vld [vmem:[%s8622_s14 + $0xd0] sm:$0xff]  ;;  %v5629_v34 = vld [vmem:[#allocation19] ss:$0 sm:$0xff] }
0x4665   :  { %5396 = vmatpush.msra.mxu3 %v5374_v22 }
0x4666   :  { %5296 = vmatpush.msra.mxu0 %v5263_v48 }
0x4667   :  { %v6125_v5 = vpop.eup %6124 }
0x4668   :  { %5182 = vrot.lane.b32.xlu2 %v6125_v5, %s6515_s27  ;;  %v6127_v18 = vpop.eup %6126  ;;  %v5262_v5 = vld [vmem:[%s8622_s14 + $0x58] sm:$0xff] }
0x4669   :  { %v6129_v26 = vpop.eup %6128  ;;  %5297 = vmatpush.msra.mxu0 %v5262_v5 }
0x466a   :  { %v5160_v3 = vadd.f32 1.0, %v6129_v26  ;;  %v6131_v56 = vpop.eup %6130  ;;  %v5260_v26 = vld [vmem:[%s8622_s14 + $0x48] sm:$0xff] }
0x466b   :  { %v5200_v15 = vadd.f32 1.0, %v6131_v56  ;;  %5298 = vmatpush.msra.mxu0 %v5261_v21  ;;  %v5259_v56 = vld [vmem:[%s8622_s14 + $0x40] sm:$0xff]  ;;  %v5373_v21 = vld [vmem:[%s8626_s18 + $0x8] sm:$0xff] }
0x466c   :  { %6132 = vrcp.f32 %v5160_v3  ;;  %v5172_v13 = vand.u32 2147483648, %v5160_v3  ;;  %vm5166_vm1 = vweird.f32 %v5160_v3  ;;  %v5170_v12 = vand.u32 2147483647, %v5160_v3  ;;  %5397 = vmatpush.msra.mxu3 %v5373_v21 }
0x466d   :  { %6134 = vrcp.f32 %v5200_v15  ;;  %v5212_v19 = vand.u32 2147483648, %v5200_v15  ;;  %vm5206_vm5 = vweird.f32 %v5200_v15  ;;  %v5210_v11 = vand.u32 2147483647, %v5200_v15  ;;  %5299 = vmatpush.msra.mxu0 %v5260_v26  ;;  %v5630_v26 = vld [vmem:[#allocation20] ss:$0 sm:$0xff] }
0x466e   :  { %v5173_v24 = vor.u32 1.1754944e-38, %v5172_v13  ;;  %vm5171_vm3 = vcmp.eq.f32.partialorder %v5170_v12, 8.507059e+37  ;;  %6136 = vtanh.f32 %v2687_v37  ;;  %v5271_v13 = vld [vmem:[%s8622_s14 + $0xa0] sm:$0xff]  ;;  %v5252_v37 = vld [vmem:[%s8622_s14 + $0x8] sm:$0xff] }
0x466f   :  { %v5213_v40 = vor.u32 1.1754944e-38, %v5212_v19  ;;  %vm5211_vm14 = vcmp.eq.f32.partialorder %v5210_v11, 8.507059e+37  ;;  %6138 = vtanh.f32 %v2727_v41  ;;  %5300 = vmatpush.msra.mxu0 %v5259_v56  ;;  %v5340_v19 = vld [vmem:[%s8624_s16 + $0x30] sm:$0xff]  ;;  %v5339_v11 = vld [vmem:[%s8624_s16 + $0x28] sm:$0xff] }
0x4670   :  { %5222 = vrot.lane.b32.xlu2 %v6127_v18, %s6515_s27  ;;  %v5278_v18 = vld [vmem:[%s8622_s14 + $0xd8] sm:$0xff] }
0x4671   :  { %5317 = vmatpush.msrb.mxu1 %v5278_v18 }
0x4672   :  { %v6133_v50 = vpop.eup %6132 }
0x4673   :  { %v5162_v16 = vmul.f32 %v6133_v50, %v5160_v3  ;;  %v6135_v61 = vpop.eup %6134  ;;  %vm5167_vm0 = vweird.f32 %v6133_v50  ;;  %v5276_v3 = vld [vmem:[%s8622_s14 + $0xc8] sm:$0xff]  ;;  %5318 = vmatpush.msrb.mxu1 %v5277_v58  ;;  %v5372_v58 = vld [vmem:[%s8626_s18] sm:$0xff] }
0x4674   :  { %v5202_v62 = vmul.f32 %v6135_v61, %v5200_v15  ;;  %vm5168_vm2 = vmor %vm5166_vm1, %vm5167_vm0  ;;  %vm5207_vm4 = vweird.f32 %v6135_v61  ;;  %v6137_v53 = vpop.eup %6136  ;;  %v5275_v15 = vld [vmem:[%s8622_s14 + $0xc0] sm:$0xff]  ;;  %5398 = vmatpush.msra.mxu3 %v5372_v58 }
0x4675   :  { %v5163_v36 = vsub.f32 1.0, %v5162_v16  ;;  %vm5208_vm13 = vmor %vm5206_vm5, %vm5207_vm4  ;;  %v6139_v10 = vpop.eup %6138  ;;  %5319 = vmatpush.msrb.mxu1 %v5276_v3  ;;  %v5274_v16 = vld [vmem:[%s8622_s14 + $0xb8] sm:$0xff] }
0x4676   :  { %v5203_v14 = vsub.f32 1.0, %v5202_v62  ;;  %v5272_v62 = vld [vmem:[%s8622_s14 + $0xa8] sm:$0xff] }
0x4677   :  { %v5164_v8 = vmul.f32 %v6133_v50, %v5163_v36  ;;  %5320 = vmatpush.msrb.mxu1 %v5275_v15  ;;  %v5257_v36 = vld [vmem:[%s8622_s14 + $0x30] sm:$0xff] }
0x4678   :  { %v5204_v17 = vmul.f32 %v6135_v61, %v5203_v14  ;;  %v5255_v14 = vld [vmem:[%s8622_s14 + $0x20] sm:$0xff] }
0x4679   :  { %v5165_v6 = vadd.f32 %v6133_v50, %v5164_v8  ;;  %5321 = vmatpush.msrb.mxu1 %v5274_v16  ;;  %v5256_v8 = vld [vmem:[%s8622_s14 + $0x28] sm:$0xff] }
0x467a   :  { %v5205_v29 = vadd.f32 %v6135_v61, %v5204_v17  ;;  %v5270_v17 = vld [vmem:[%s8622_s14 + $0x98] sm:$0xff] }
0x467b   :  { %v5169_v51 = vsel %vm5168_vm2, %v6133_v50, %v5165_v6  ;;  %v5258_v50 = vld [vmem:[%s8622_s14 + $0x38] sm:$0xff] }
0x467c   :  { %v8433_v39 = vsel %vm5171_vm3, %v5173_v24, %v5169_v51  ;;  %v5209_v43 = vsel %vm5208_vm13, %v6135_v61, %v5205_v29  ;;  %v5273_v61 = vld [vmem:[%s8622_s14 + $0xb0] sm:$0xff]  ;;  %5301 = vmatpush.msra.mxu0 %v5258_v50  ;;  %v5254_v51 = vld [vmem:[%s8622_s14 + $0x18] sm:$0xff]  ;;  %v5631_v50 = vld [vmem:[%s8627_s19] ss:$0 sm:$0xff] }
0x467d   :  { %v8439_v52 = vsel %vm5211_vm14, %v5213_v40, %v5209_v43  ;;  %v5180_v33 = vmul.f32 %v5178_v9, %v8433_v39  ;;  %5322 = vmatpush.msrb.mxu1 %v5273_v61  ;;  %v5269_v24 = vld [vmem:[%s8622_s14 + $0x90] sm:$0xff]  ;;  %v5341_v29 = vld [vmem:[%s8624_s16 + $0x38] sm:$0xff] }
0x467e   :  { %v5220_v55 = vmul.f32 %v5218_v44, %v8439_v52  ;;  %5302 = vmatpush.msra.mxu0 %v5257_v36  ;;  %5357 = vmatpush.msrb.mxu2 %v5341_v29 }
0x467f   :  { %5323 = vmatpush.msrb.mxu1 %v5272_v62 }
0x4680   :  { %5303 = vmatpush.msra.mxu0 %v5256_v8  ;;  %5358 = vmatpush.msrb.mxu2 %v5340_v19 }
0x4681   :  { %5324 = vmatpush.msrb.mxu1 %v5271_v13 }
0x4682   :  { %5304 = vmatpush.msra.mxu0 %v5255_v14  ;;  %5359 = vmatpush.msrb.mxu2 %v5339_v11 }
0x4683   :  { %5325 = vmatpush.msrb.mxu1 %v5270_v17 }
0x4684   :  { %5305 = vmatpush.msra.mxu0 %v5254_v51  ;;  %5360 = vmatpush.msrb.mxu2 %v5338_v47 }
0x4685   :  { %5326 = vmatpush.msrb.mxu1 %v5269_v24 }
0x46c2   :  { %v5183_v54 = vpop.permute.xlu2 %5182 }
0x46c3   :  { %v5185_v35 = vmul.f32 %v5183_v54, %v8433_v39  ;;  %v5268_v54 = vld [vmem:[%s8622_s14 + $0x88] sm:$0xff] }
0x46c4   :  { %5327 = vmatpush.msrb.mxu1 %v5268_v54 }
0x46c5   :  { %5187 = vrot.lane.b32.xlu0 %v5185_v35, %s6516_s1  ;;  %v5267_v35 = vld [vmem:[%s8622_s14 + $0x80] sm:$0xff] }
0x46c6   :  { %5328 = vmatpush.msrb.mxu1 %v5267_v35 }
0x46ca   :  { %v5223_v45 = vpop.permute.xlu2 %5222 }
0x46cb   :  { %v5225_v42 = vmul.f32 %v5223_v45, %v8439_v52 }
0x46cd   :  { %5227 = vrot.lane.b32.xlu2 %v5225_v42, %s6516_s1  ;;  %2690 = vrot.lane.b32.xlu0 %v6137_v53, %s6515_s27 }
0x46d5   :  { %2730 = vrot.lane.b32.xlu2 %v6139_v10, %s6515_s27  ;;  %5615 = vrot.lane.b32.xlu0 %v5614_v32, %s6516_s1  ;;  %s6517_s1 = smov 96  }
0x4727   :  { %v5228_v38 = vpop.permute.xlu2 %5227 }
0x4728   :  { %v5230_v63 = vadd.f32 %v5228_v38, %v5220_v55 }
0x472a   :  { %6140 = vtanh.f32 %v5230_v63 }
0x472f   :  { %v2731_v43 = vpop.permute.xlu2 %2730 }
0x4730   :  { %v6141_v31 = vpop.eup %6140  ;;  %v2733_v55 = vmul.f32 %v2731_v43, %v8422_v4  ;;  %v5337_v4 = vld [vmem:[%s8624_s16 + $0x18] sm:$0xff] }
0x4731   :  { %5233 = vrot.lane.b32.xlu0 %v6141_v31, %s6515_s27  ;;  %5361 = vmatpush.msrb.mxu2 %v5337_v4 }
0x4737   :  { %v5188_v20 = vpop.permute.xlu0 %5187 }
0x4738   :  { %v5190_v1 = vadd.f32 %v5188_v20, %v5180_v33 }
0x473a   :  { %6142 = vtanh.f32 %v5190_v1 }
0x473f   :  { %v2691_v6 = vpop.permute.xlu0 %2690 }
0x4740   :  { %v6143_v0 = vpop.eup %6142  ;;  %v2693_v27 = vmul.f32 %v2691_v6, %v8414_v7  ;;  %v5253_v7 = vld [vmem:[%s8622_s14 + $0x10] sm:$0xff] }
0x4741   :  { %5193 = vrot.lane.b32.xlu1 %v6143_v0, %s6515_s27  ;;  %5306 = vmatpush.msra.mxu0 %v5253_v7 }
0x4743   :  { %5307 = vmatpush.msra.mxu0 %v5252_v37 }
0x4747   :  { %v5616_v59 = vpop.permute.xlu0 %5615 }
0x4748   :  { %v5618_v42 = vunpack.i.h.bf16 %v5616_v59  ;;  %v5617_v53 = vunpack.i.l.bf16 %v5616_v59 }
0x4749   :  { %5620 = vrot.lane.b32.xlu1 %v5619_v28, %s6515_s27 }
0x47a3   :  { %v5234_v45 = vpop.permute.xlu0 %5233 }
0x47a4   :  { %v5236_v38 = vmul.f32 %v5234_v45, %v8439_v52  ;;  %v5336_v52 = vld [vmem:[%s8624_s16 + $0x10] sm:$0xff] }
0x47a5   :  { %5362 = vmatpush.msrb.mxu2 %v5336_v52 }
0x47a7   :  { %5363 = vmatpush.msrb.mxu2 %v5335_v23 }
0x47a9   :  { %5364 = vmatpush.msrb.mxu2 %v5334_v46 }
0x47b3   :  { %v5194_v12 = vpop.permute.xlu1 %5193 }
0x47b4   :  { %v5196_v30 = vmul.f32 %v5194_v12, %v8433_v39  ;;  %v5251_v39 = vld [vmem:[%s8622_s14] sm:$0xff] }
0x47b5   :  { %5308 = vmatpush.msra.mxu0 %v5251_v39 }
0x47b6   :  { %v5624_v57 = vpack.i.bf16 %v5196_v30, %v2693_v27 }
0x47b8   :  { %5625 = vrot.lane.b32.xlu2 %v5624_v57, %s6517_s1 }
0x47bb   :  { %v5621_v2 = vpop.permute.xlu1 %5620 }
0x47bc   :  { %v5623_v40 = vunpack.i.h.bf16 %v5621_v2  ;;  %v5622_v41 = vunpack.i.l.bf16 %v5621_v2 }
0x47be   :  { %v2745_v63 = vsel %vm460_vm9, %v5617_v53, %v5622_v41  ;;  %v5248_v31 = vsel %vm460_vm9, %v5618_v42, %v5623_v40 }
0x4812   :  { %v5626_v32 = vpop.permute.xlu2 %5625 }
0x4813   :  { %v5628_v10 = vunpack.i.h.bf16 %v5626_v32  ;;  %v5627_v44 = vunpack.i.l.bf16 %v5626_v32 }
0x4815   :  { %v2746_v9 = vsel %vm332_vm10, %v2745_v63, %v5627_v44  ;;  %v5249_v33 = vsel %vm332_vm10, %v5248_v31, %v5628_v10 }
0x4816   :  { %v2748_v20 = vsel %vm2747_vm7, %v2746_v9, %v2733_v55  ;;  %v5250_v1 = vsel %vm2747_vm7, %v5249_v33, %v5236_v38 }
0x4817   :  { %v5289_v0 = vrot.slane %v2748_v20, 6  ;;  %v5290_v28 = vrot.slane %v5250_v1, 6 }
0x4819   :  { %5309 = vmatmul.f32.vlgmr.msra.gmra.mxu0 %v5289_v0  ;;  %5329 = vmatmul.f32.vlgmr.msrb.gmra.mxu1 %v5290_v28 }
0x4896   :  { %v5310_v60 = vpop.f32.mrf.mxu0  ;;  %v5330_v49 = vpop.f32.mrf.mxu1 }
0x4897   :  { %v5311_v48 = vadd.f32 %v5629_v34, %v5310_v60 }
0x4899   :  { %v5331_v5 = vadd.f32 %v5330_v49, %v5311_v48 }
0x489b   :  { %v5333_v18 = vmax.f32 %v5331_v5, 0.0 }
0x489d   :  { %5590 = vmatmul.msk.f32.vlgmr.msrb.gmra.mxu2 %vm332_vm10, %v5333_v18 }
0x4920   :  { %v5366_v3 = vpop.f32.mrf.mxu2 }
0x4921   :  { %v5367_v56 = vadd.f32 %v5630_v26, %v5366_v3 }
0x4923   :  { %v5369_v15 = vmax.f32 %v5367_v56, 0.0 }
0x4925   :  { %5591 = vmatmul.msk.f32.vlgmr.msra.gmra.mxu3 %vm460_vm9, %v5369_v15  ;;  %5371 = vst.msk [vmem:[#allocation22] sm:$0x3] %vm5370_vm6, %v5369_v15  ;;  %vm5403_vm9 = vcmask 58368  }
0x4926   :  { %5415 = dma.vmem_to_hbm [thread:$0]  %s5411_s7, 32, %s5413_s3, [#allocation4]  }
0x49a8   :  { %v5400_v16 = vpop.f32.mrf.mxu3 }
0x49a9   :  { %v5401_v36 = vadd.f32 %v5631_v50, %v5400_v16 }
0x49ab   :  { %5404 = vst.msk [vmem:[#allocation23] sm:$0x3] %vm5403_vm9, %v5401_v36 }
0x49ac   :  { %5426 = dma.vmem_to_hbm [thread:$0]  %s5422_s4, 32, %s5424_s25, [#allocation24]  }
0x49ad   :  { %6494 = dma.done.wait [#allocation4], 32  }
0x49ae   :  { %6495 = vsyncadd [#allocation4], 4294967264 }
0x49af   :  { %6496 = dma.done.wait [#allocation24], 32  }
0x49b0   :  { %6497 = vsyncadd [#allocation24], 4294967264 }
0x49b1   :  { %5435 = vsyncpa [#allocation3], 1 }
0x49b2   :  { %5436 = vsyncpa [#allocation6], 1 }
0x49b3   :  { %5437 = vsyncpa [#allocation9], 1 }
0x49b4   :  { %5438 = vsyncpa [#allocation12], 1 }
0x49b5   :  { %5439 = vsyncpa [#allocation15], 1 }
0x49b6   :  { %5440 = vsyncpa [#allocation18], 1 }
0x49b7   :  { %5441 = vsyncpa [#allocation21], 1 }
0x49b8   :  { %5442 = vsyncpa [#allocation4], 1 }
0x49b9   :  { %5443 = vsyncpa [#allocation24], 1 }

</bundles_post_ra>
